<compile_context>
chip_gen: v7x
topology: tpu7x:2x2x1
jax: 0.10.0
libtpu: 0.0.40
codegen_flags: <defaults>
</compile_context>

<pallas_src>
import functools

import jax
import jax.numpy as jnp
from jax.experimental import pallas as pl
from jax.experimental.pallas import tpu as pltpu

SUBLANE = 8  # batch padded up to this so per-step tiles are sublane-dense


def _vmem_limit(nbytes):
    """vmem_limit_bytes sized from the real footprint, with headroom."""
    return int(min(max(2 * nbytes + (2 << 20), 16 << 20), 96 << 20))


# ----------------------------------------------------------------------------
# Fused bidirectional LSTM layer kernel (one encoder layer, both directions).
#   x_ref  : (L*Bp, Din)  time-major flattened input
#   m_ref  : (L*Bp, 1)    1.0 = valid token, 0.0 = pad
#   wih_ref: (Din, 8H)    [W_ih_fwd | W_ih_rev]  (hoisted input projection)
#   whh_ref: (2H, 8H)     block_diag(W_hh_fwd, W_hh_rev)
#   b_ref  : (1, 8H)      [b_fwd | b_rev]
#   y_ref  : (L*Bp, 2H)   [fwd | rev] outputs (zero at pad positions)
#   hnf_ref: (Bp, H)      forward-direction final hidden (feeds h0_proj)
# ----------------------------------------------------------------------------
def _bilstm_layer_kernel(x_ref, m_ref, wih_ref, whh_ref, b_ref,
                         y_ref, hnf_ref, gin_ref, *, L, Bp, H):
    G = 4 * H
    # Hoisted fused input projection: one (L*Bp, Din) x (Din, 8H) matmul for
    # BOTH directions, off the serial dependency chain, into VMEM scratch.
    gin_ref[...] = (jnp.dot(x_ref[...], wih_ref[...],
                            preferred_element_type=jnp.float32) + b_ref[...])

    whh = whh_ref[...]                                # (2H, 8H) block-diagonal

    def cell(gates, c):
        # Full-tile activations (2 EUP passes), then slice the quarters.
        sg = jax.nn.sigmoid(gates)
        tg = jnp.tanh(gates)
        c_new = sg[:, H:2 * H] * c + sg[:, 0:H] * tg[:, 2 * H:3 * H]
        h_new = sg[:, 3 * H:4 * H] * jnp.tanh(c_new)
        return h_new, c_new

    zeros = jnp.zeros((Bp, H), jnp.float32)
    hf, cf = zeros, zeros
    hr, cr = zeros, zeros

    # Fully unrolled static time loop: fwd step t and rev step L-1-t share ONE
    # fused recurrent matmul (only this dot remains on the critical path).
    for t in range(L):
        tr = L - 1 - t
        h_cat = jnp.concatenate([hf, hr], axis=1)                   # (Bp, 2H)
        g_cat = jnp.dot(h_cat, whh, preferred_element_type=jnp.float32)

        # ---- forward direction, time t ----
        m_f = jnp.broadcast_to(m_ref[t * Bp:(t + 1) * Bp, :], (Bp, H)) > 0.0
        g_f = gin_ref[t * Bp:(t + 1) * Bp, 0:G] + g_cat[:, 0:G]
        h_new, c_new = cell(g_f, cf)
        y_ref[t * Bp:(t + 1) * Bp, 0:H] = jnp.where(m_f, h_new, 0.0)
        hf = jnp.where(m_f, h_new, hf)
        cf = jnp.where(m_f, c_new, cf)

        # ---- reverse direction, time L-1-t ----
        m_r = jnp.broadcast_to(m_ref[tr * Bp:(tr + 1) * Bp, :], (Bp, H)) > 0.0
        g_r = gin_ref[tr * Bp:(tr + 1) * Bp, G:2 * G] + g_cat[:, G:2 * G]
        h_newr, c_newr = cell(g_r, cr)
        y_ref[tr * Bp:(tr + 1) * Bp, H:2 * H] = jnp.where(m_r, h_newr, 0.0)
        hr = jnp.where(m_r, h_newr, hr)
        cr = jnp.where(m_r, c_newr, cr)

    hnf_ref[...] = hf


def bilstm_layer(x_seq, m_seq, wih, whh, b, *, L, Bp, H):
    Din = x_seq.shape[1]
    kernel = functools.partial(_bilstm_layer_kernel, L=L, Bp=Bp, H=H)
    vmem = pl.BlockSpec(memory_space=pltpu.MemorySpace.VMEM)
    nbytes = 4 * (L * Bp * (Din + 1 + 2 * H + 8 * H)    # x, m, y, gate scratch
                  + Din * 8 * H + 2 * H * 8 * H + 8 * H  # weights / bias
                  + Bp * H)                              # final hidden
    return pl.pallas_call(
        kernel,
        out_shape=(jax.ShapeDtypeStruct((L * Bp, 2 * H), jnp.float32),
                   jax.ShapeDtypeStruct((Bp, H), jnp.float32)),
        in_specs=[vmem] * 5,
        out_specs=(vmem, vmem),
        scratch_shapes=[pltpu.VMEM((L * Bp, 8 * H), jnp.float32)],
        compiler_params=pltpu.CompilerParams(
            vmem_limit_bytes=_vmem_limit(nbytes)),
    )(x_seq, m_seq, wih, whh, b)


# ----------------------------------------------------------------------------
# Fused 2-layer decoder LSTM kernel (+ h0_proj folded into the prologue).
#   x_ref   : (L*Bp, H)   decoder embedding (time-major flattened)
#   hsel_ref: (2*Bp, H)   [enc-layer0 fwd final ; enc-layer1 fwd final]
#   w1_ref  : (2H, 4H)    [W_ih1 ; W_hh1]  (layer-1 fused weight)
#   y_ref   : (L*Bp, H)   layer-1 outputs
# ----------------------------------------------------------------------------
def _declstm_kernel(x_ref, m_ref, hsel_ref, wp_ref, bp_ref,
                    wih0_ref, whh0_ref, b0_ref, w1_ref, b1_ref,
                    y_ref, gin0_ref, *, L, Bp, H):
    # h0_proj fold: project both layers' initial hidden states in one matmul.
    hproj = (jnp.dot(hsel_ref[...], wp_ref[...],
                     preferred_element_type=jnp.float32) + bp_ref[...])
    h0 = hproj[0:Bp, :]
    h1 = hproj[Bp:2 * Bp, :]
    c0 = jnp.zeros((Bp, H), jnp.float32)
    c1 = jnp.zeros((Bp, H), jnp.float32)

    # Hoisted layer-0 input projection.
    gin0_ref[...] = (jnp.dot(x_ref[...], wih0_ref[...],
                             preferred_element_type=jnp.float32) + b0_ref[...])

    whh0 = whh0_ref[...]
    w1 = w1_ref[...]                                  # (2H, 4H)
    b1 = b1_ref[...]

    def cell(gates, c):
        sg = jax.nn.sigmoid(gates)
        tg = jnp.tanh(gates)
        c_new = sg[:, H:2 * H] * c + sg[:, 0:H] * tg[:, 2 * H:3 * H]
        h_new = sg[:, 3 * H:4 * H] * jnp.tanh(c_new)
        return h_new, c_new

    for t in range(L):
        m_t = jnp.broadcast_to(m_ref[t * Bp:(t + 1) * Bp, :], (Bp, H)) > 0.0
        # ---- layer 0 ----
        g0 = (gin0_ref[t * Bp:(t + 1) * Bp, :]
              + jnp.dot(h0, whh0, preferred_element_type=jnp.float32))
        h0n, c0n = cell(g0, c0)
        out0 = jnp.where(m_t, h0n, 0.0)
        h0 = jnp.where(m_t, h0n, h0)
        c0 = jnp.where(m_t, c0n, c0)
        # ---- layer 1: input + recurrent matmul fused into one dot ----
        in1 = jnp.concatenate([out0, h1], axis=1)                   # (Bp, 2H)
        g1 = jnp.dot(in1, w1, preferred_element_type=jnp.float32) + b1
        h1n, c1n = cell(g1, c1)
        y_ref[t * Bp:(t + 1) * Bp, :] = jnp.where(m_t, h1n, 0.0)
        h1 = jnp.where(m_t, h1n, h1)
        c1 = jnp.where(m_t, c1n, c1)


def decoder_lstm(x_seq, m_seq, hsel, wp, bp, wih0, whh0, b0, w1, b1,
                 *, L, Bp, H):
    kernel = functools.partial(_declstm_kernel, L=L, Bp=Bp, H=H)
    vmem = pl.BlockSpec(memory_space=pltpu.MemorySpace.VMEM)
    nbytes = 4 * (L * Bp * (H + 1 + H + 4 * H)
                  + 2 * Bp * H + H * H + H
                  + H * 4 * H + H * 4 * H + 4 * H
                  + 2 * H * 4 * H + 4 * H)
    return pl.pallas_call(
        kernel,
        out_shape=jax.ShapeDtypeStruct((L * Bp, H), jnp.float32),
        in_specs=[vmem] * 10,
        out_specs=vmem,
        scratch_shapes=[pltpu.VMEM((L * Bp, 4 * H), jnp.float32)],
        compiler_params=pltpu.CompilerParams(
            vmem_limit_bytes=_vmem_limit(nbytes)),
    )(x_seq, m_seq, hsel, wp, bp, wih0, whh0, b0, w1, b1)


# ----------------------------------------------------------------------------
# Attention + combined/out projection kernel (grid over NB-row batch blocks).
#   simMat = y @ (yEnc @ Wa)^T ; masked softmax ; * decMask ; alpha = sim @ yEnc
#   out    = tanh(y @ Wc1 + alpha @ Wc2 + bc) @ Wo + bo
# ----------------------------------------------------------------------------
def _attn_out_kernel(y_ref, yenc_ref, encm_ref, decm_ref,
                     wa_ref, wc1_ref, wc2_ref, bc_ref, wo_ref, bo_ref, out_ref,
                     *, NB, Ld, Le, H, H2, V):
    y = y_ref[...]                        # (NB, Ld, H)
    yenc = yenc_ref[...]                  # (NB, Le, 2H)
    encm = encm_ref[...]                  # (NB, 1, Le)
    decm = decm_ref[...]                  # (NB, Ld, 1)

    # attenProj on a flattened (NB*Le, 2H) slab.
    yencp = jnp.dot(yenc.reshape(NB * Le, H2), wa_ref[...],
                    preferred_element_type=jnp.float32).reshape(NB, Le, H)
    sim = jnp.einsum('bqh,bkh->bqk', y, yencp,
                     preferred_element_type=jnp.float32)            # (NB,Ld,Le)
    encb = jnp.broadcast_to(encm, sim.shape) > 0.0
    sim = jnp.where(encb, sim, -1e30)
    sim = sim - jnp.max(sim, axis=2, keepdims=True)
    p = jnp.exp(sim)
    # approx=False for closer parity with a float32 reference softmax.
    sim = p * pl.reciprocal(jnp.sum(p, axis=2, keepdims=True), approx=False)
    sim = sim * decm
    alpha = jnp.einsum('bqk,bkh->bqh', sim, yenc,
                       preferred_element_type=jnp.float32)          # (NB,Ld,2H)

    # combinedProj + outProj on (NB*Ld, .) slabs => M = NB*Ld rows on the MXU.
    y2 = y.reshape(NB * Ld, H)
    a2 = alpha.reshape(NB * Ld, H2)
    comb = jnp.tanh(
        jnp.dot(y2, wc1_ref[...], preferred_element_type=jnp.float32)
        + jnp.dot(a2, wc2_ref[...], preferred_element_type=jnp.float32)
        + bc_ref[...])
    out = (jnp.dot(comb, wo_ref[...], preferred_element_type=jnp.float32)
           + bo_ref[...])
    out_ref[...] = out.reshape(NB, Ld, V)


def attn_output(ydec, yenc, encm, decm, wa, wc1, wc2, bc, wo, bo, *, NB):
    Bp, Ld, H = ydec.shape
    Le, H2 = yenc.shape[1], yenc.shape[2]
    V = wo.shape[1]
    assert Bp % NB == 0
    kernel = functools.partial(_attn_out_kernel, NB=NB, Ld=Ld, Le=Le,
                               H=H, H2=H2, V=V)
    blk = 4 * NB * (Ld * H + Le * H2 + Le + Ld + Ld * V)
    wts = 4 * (H2 * H + H * H + H2 * H + H + H * V + V)
    # TODO(synk): for a production vocabulary add a V-tile grid axis for wo/out
    #             (TILE_V a multiple of 128) to stay within VMEM on v7x.
    return pl.pallas_call(
        kernel,
        out_shape=jax.ShapeDtypeStruct((Bp, Ld, V), jnp.float32),
        grid=(Bp // NB,),
        in_specs=[
            pl.BlockSpec((NB, Ld, H), lambda b: (b, 0, 0)),
            pl.BlockSpec((NB, Le, H2), lambda b: (b, 0, 0)),
            pl.BlockSpec((NB, 1, Le), lambda b: (b, 0, 0)),
            pl.BlockSpec((NB, Ld, 1), lambda b: (b, 0, 0)),
            pl.BlockSpec((H2, H), lambda b: (0, 0)),
            pl.BlockSpec((H, H), lambda b: (0, 0)),
            pl.BlockSpec((H2, H), lambda b: (0, 0)),
            pl.BlockSpec((1, H), lambda b: (0, 0)),
            pl.BlockSpec((H, V), lambda b: (0, 0)),
            pl.BlockSpec((1, V), lambda b: (0, 0)),
        ],
        out_specs=pl.BlockSpec((NB, Ld, V), lambda b: (b, 0, 0)),
        compiler_params=pltpu.CompilerParams(
            dimension_semantics=("parallel",),
            vmem_limit_bytes=_vmem_limit(2 * blk + wts)),
    )(ydec, yenc, encm, decm, wa, wc1, wc2,
      bc.reshape(1, H), wo, bo.reshape(1, V))


# ----------------------------------------------------------------------------
# Weight fusion helpers (one-off, wrapper-level glue).
# ----------------------------------------------------------------------------
def _fuse_bidir(layer_params, H):
    wih_f, whh_f, b_f, wih_r, whh_r, b_r = layer_params
    wih = jnp.concatenate([wih_f, wih_r], axis=1)               # (Din, 8H)
    b = jnp.concatenate([b_f, b_r], axis=1)                     # (1, 8H)
    z = jnp.zeros((H, 4 * H), jnp.float32)
    whh = jnp.concatenate(
        [jnp.concatenate([whh_f, z], axis=1),
         jnp.concatenate([z, whh_r], axis=1)], axis=0)          # (2H, 8H)
    return wih, whh, b


# ----------------------------------------------------------------------------
# Full forward pass (teacher-forcing path of Seq2SeqwithAttention.forward)
# ----------------------------------------------------------------------------
def seq2seq_forward(params, x_tok, y_tok, H):
    B, Le = x_tok.shape
    Ld = y_tok.shape[1]
    Bp = ((B + SUBLANE - 1) // SUBLANE) * SUBLANE   # pad batch to sublane count

    if Bp > B:  # padded rows are all pad tokens (mask 0 => state frozen at 0)
        x_tok = jnp.pad(x_tok, ((0, Bp - B), (0, 0)))
        y_tok = jnp.pad(y_tok, ((0, Bp - B), (0, 0)))

    # ---------------- encoder ----------------
    enc_mask = (x_tok != 0).astype(jnp.float32)                    # (Bp, Le)
    emb = jax.nn.relu(jnp.take(params['emb_enc'], x_tok, axis=0))  # glue: gather
    # TODO(synk): keep a time-major layout end-to-end to drop these transposes.
    x_seq = jnp.transpose(emb, (1, 0, 2)).reshape(Le * Bp, H)      # time-major
    m_seq = jnp.transpose(enc_mask, (1, 0)).reshape(Le * Bp, 1)

    wih_e0, whh_e0, b_e0 = _fuse_bidir(params['enc_l0'], H)
    wih_e1, whh_e1, b_e1 = _fuse_bidir(params['enc_l1'], H)
    y0, h0f = bilstm_layer(x_seq, m_seq, wih_e0, whh_e0, b_e0, L=Le, Bp=Bp, H=H)
    y1, h1f = bilstm_layer(y0, m_seq, wih_e1, whh_e1, b_e1, L=Le, Bp=Bp, H=H)
    yEnc = jnp.transpose(y1.reshape(Le, Bp, 2 * H), (1, 0, 2))     # (Bp, Le, 2H)

    # ---------------- decoder (teacher forcing; tfThresh=0.0) ----------------
    dec_mask = (y_tok != 0).astype(jnp.float32)                    # (Bp, Ld)
    demb = jax.nn.relu(jnp.take(params['emb_dec'], y_tok, axis=0))
    d_seq = jnp.transpose(demb, (1, 0, 2)).reshape(Ld * Bp, H)
    dm_seq = jnp.transpose(dec_mask, (1, 0)).reshape(Ld * Bp, 1)

    hsel = jnp.concatenate([h0f, h1f], axis=0)                     # (2Bp, H)
    wih0, whh0, b0 = params['dec_l0']
    wih1, whh1, b1 = params['dec_l1']
    w1_cat = jnp.concatenate([wih1, whh1], axis=0)                 # (2H, 4H)
    yd = decoder_lstm(d_seq, dm_seq, hsel,
                      params['h0_proj_w'], params['h0_proj_b'].reshape(1, H),
                      wih0, whh0, b0, w1_cat, b1, L=Ld, Bp=Bp, H=H)
    ydec = jnp.transpose(yd.reshape(Ld, Bp, H), (1, 0, 2))         # (Bp, Ld, H)

    logits = attn_output(ydec, yEnc,
                         enc_mask[:, None, :],                     # (Bp, 1, Le)
                         dec_mask[:, :, None],                     # (Bp, Ld, 1)
                         params['atten_w'], params['comb_w1'], params['comb_w2'],
                         params['comb_b'], params['out_w'], params['out_b'],
                         NB=min(Bp, 8))
    return jnp.transpose(logits[:B], (0, 2, 1))                    # (B, Vabs, Ld)


# ----------------------------------------------------------------------------
# Deterministic parameter init (shapes implied by the PyTorch module __init__)
# ----------------------------------------------------------------------------
def init_params(key, vdesc, vabs, H):
    keys = iter(jax.random.split(key, 64))

    def rnd(shape, scale=0.1):
        return scale * jax.random.normal(next(keys), shape, dtype=jnp.float32)

    def lstm_dir(din):
        # (W_ih^T, W_hh^T, b_ih + b_hh)
        return (rnd((din, 4 * H)), rnd((H, 4 * H)), rnd((1, 4 * H)))

    p = {}
    p['emb_enc'] = rnd((vdesc, H)).at[0].set(0.0)   # padding_idx = 0
    p['emb_dec'] = rnd((vabs, H)).at[0].set(0.0)
    p['enc_l0'] = lstm_dir(H) + lstm_dir(H)         # fwd + reverse
    p['enc_l1'] = lstm_dir(2 * H) + lstm_dir(2 * H)
    p['h0_proj_w'] = rnd((H, H))
    p['h0_proj_b'] = rnd((H,))
    p['dec_l0'] = lstm_dir(H)
    p['dec_l1'] = lstm_dir(H)
    p['atten_w'] = rnd((2 * H, H))                  # attenProj (no bias)
    p['comb_w1'] = rnd((H, H))                      # combinedProj split: y part
    p['comb_w2'] = rnd((2 * H, H))                  #                    alpha part
    p['comb_b'] = rnd((H,))
    p['out_w'] = rnd((H, vabs))
    p['out_b'] = rnd((vabs,))
    return p


if __name__ == "__main__":
    H, B = 32, 2
    Lenc, Labs = 12, 8
    Vdesc, Vabs = 50, 40

    key = jax.random.PRNGKey(0)
    kp, kx, ky = jax.random.split(key, 3)
    params = init_params(kp, Vdesc, Vabs, H)

    x = jax.random.randint(kx, (B, Lenc), 1, Vdesc, dtype=jnp.int32)
    y = jax.random.randint(ky, (B, Labs), 1, Vabs, dtype=jnp.int32)
    # right-pad the second sequence with pad token 0 (first keeps full length,
    # so padded output length == input length as in the PyTorch pad_packed path)
    x = x.at[1, Lenc - 3:].set(0)
    y = y.at[1, Labs - 2:].set(0)

    fwd = jax.jit(seq2seq_forward, static_argnums=(3,))
    out = fwd(params, x, y, H)
    out = jax.block_until_ready(out)
    assert out.shape == (B, Vabs, Labs) and out.dtype == jnp.float32
    assert bool(jnp.all(jnp.isfinite(out)))
    print("KERNEL_OK")
</pallas_src>

<mosaic_0001>
module attributes {stable_mosaic.version = 11 : i64} {
  func.func @_bilstm_layer_kernel(%arg0: memref<96x32xf32, #tpu.memory_space<vmem>>, %arg1: memref<96x1xf32, #tpu.memory_space<vmem>>, %arg2: memref<32x256xf32, #tpu.memory_space<vmem>>, %arg3: memref<64x256xf32, #tpu.memory_space<vmem>>, %arg4: memref<1x256xf32, #tpu.memory_space<vmem>>, %arg5: memref<96x64xf32, #tpu.memory_space<vmem>>, %arg6: memref<8x32xf32, #tpu.memory_space<vmem>>, %arg7: memref<96x256xf32, #tpu.memory_space<vmem>>) attributes {dimension_semantics = [], scalar_prefetch = 0 : i64, scratch_operands = 1 : i64, tpu.core_type = #tpu.core_type<tc>} {
    %c0 = arith.constant 0 : index
    %c0_0 = arith.constant 0 : index
    %0 = vector.load %arg0[%c0, %c0_0] : memref<96x32xf32, #tpu.memory_space<vmem>>, vector<96x32xf32>
    %c0_1 = arith.constant 0 : index
    %c0_2 = arith.constant 0 : index
    %1 = vector.load %arg2[%c0_1, %c0_2] : memref<32x256xf32, #tpu.memory_space<vmem>>, vector<32x256xf32>
    %cst = arith.constant dense<0.000000e+00> : vector<96x256xf32>
    %2 = tpu.matmul %0, %1, %cst {dimension_numbers = #tpu.dot_dimension_numbers<[1], [0], [0], [1], [0, 0, 1, 1], [], []>} : vector<96x32xf32>, vector<32x256xf32>, vector<96x256xf32> -> vector<96x256xf32>
    %c0_3 = arith.constant 0 : index
    %c0_4 = arith.constant 0 : index
    %3 = vector.load %arg4[%c0_3, %c0_4] : memref<1x256xf32, #tpu.memory_space<vmem>>, vector<1x256xf32>
    %4 = vector.broadcast %3 : vector<1x256xf32> to vector<96x256xf32>
    %5 = arith.addf %2, %4 : vector<96x256xf32>
    %c0_5 = arith.constant 0 : index
    %c0_6 = arith.constant 0 : index
    %6 = vector.load %arg7[%c0_5, %c0_6] : memref<96x256xf32, #tpu.memory_space<vmem>>, vector<96x256xf32>
    tpu.vector_store %arg7[%c0_5, %c0_6], %5 {strides = array<i32>} : memref<96x256xf32, #tpu.memory_space<vmem>>, vector<96x256xf32>,
    %c0_7 = arith.constant 0 : index
    %c0_8 = arith.constant 0 : index
    %7 = vector.load %arg3[%c0_7, %c0_8] : memref<64x256xf32, #tpu.memory_space<vmem>>, vector<64x256xf32>
    %cst_9 = arith.constant 0.000000e+00 : f32
    %8 = vector.broadcast %cst_9 : f32 to vector<8x32xf32>
    %9 = tpu.concatenate %8, %8 in 1 : vector<8x32xf32>, vector<8x32xf32> -> vector<8x64xf32>
    %cst_10 = arith.constant dense<0.000000e+00> : vector<8x256xf32>
    %10 = tpu.matmul %9, %7, %cst_10 {dimension_numbers = #tpu.dot_dimension_numbers<[1], [0], [0], [1], [0, 0, 1, 1], [], []>} : vector<8x64xf32>, vector<64x256xf32>, vector<8x256xf32> -> vector<8x256xf32>
    %c0_11 = arith.constant 0 : index
    %c0_12 = arith.constant 0 : index
    %11 = vector.load %arg1[%c0_11, %c0_12] : memref<96x1xf32, #tpu.memory_space<vmem>>, vector<8x1xf32>
    %12 = vector.shape_cast %11 : vector<8x1xf32> to vector<8x1xf32>
    %13 = vector.broadcast %12 : vector<8x1xf32> to vector<8x32xf32>
    %cst_13 = arith.constant 0.000000e+00 : f32
    %14 = vector.broadcast %cst_13 : f32 to vector<8x32xf32>
    %15 = arith.cmpf ogt, %13, %14 : vector<8x32xf32>
    %c0_14 = arith.constant 0 : index
    %c0_15 = arith.constant 0 : index
    %16 = vector.load %arg7[%c0_14, %c0_15] : memref<96x256xf32, #tpu.memory_space<vmem>>, vector<8x128xf32>
    %17 = vector.extract_strided_slice %10 {offsets = [0, 0], sizes = [8, 128], strides = [1, 1]} : vector<8x256xf32> to vector<8x128xf32>
    %18 = arith.addf %16, %17 : vector<8x128xf32>
    %19 = arith.negf %18 : vector<8x128xf32>
    %20 = math.exp %19 : vector<8x128xf32>
    %cst_16 = arith.constant 1.000000e+00 : f32
    %21 = vector.broadcast %cst_16 : f32 to vector<8x128xf32>
    %22 = arith.addf %21, %20 : vector<8x128xf32>
    %23 = arith.divf %21, %22 : vector<8x128xf32>
    %24 = math.tanh %18 : vector<8x128xf32>
    %25 = vector.extract_strided_slice %23 {offsets = [0, 32], sizes = [8, 32], strides = [1, 1]} : vector<8x128xf32> to vector<8x32xf32>
    %26 = arith.mulf %25, %8 : vector<8x32xf32>
    %27 = vector.extract_strided_slice %23 {offsets = [0, 0], sizes = [8, 32], strides = [1, 1]} : vector<8x128xf32> to vector<8x32xf32>
    %28 = vector.extract_strided_slice %24 {offsets = [0, 64], sizes = [8, 32], strides = [1, 1]} : vector<8x128xf32> to vector<8x32xf32>
    %29 = arith.mulf %27, %28 : vector<8x32xf32>
    %30 = arith.addf %26, %29 : vector<8x32xf32>
    %31 = vector.extract_strided_slice %23 {offsets = [0, 96], sizes = [8, 32], strides = [1, 1]} : vector<8x128xf32> to vector<8x32xf32>
    %32 = math.tanh %30 : vector<8x32xf32>
    %33 = arith.mulf %31, %32 : vector<8x32xf32>
    %cst_17 = arith.constant 0.000000e+00 : f32
    %34 = vector.broadcast %cst_17 : f32 to vector<8x32xf32>
    %35 = arith.select %15, %33, %34 : vector<8x32xi1>, vector<8x32xf32>
    %c0_18 = arith.constant 0 : index
    %c0_19 = arith.constant 0 : index
    %36 = vector.load %arg5[%c0_18, %c0_19] : memref<96x64xf32, #tpu.memory_space<vmem>>, vector<8x32xf32>
    tpu.vector_store %arg5[%c0_18, %c0_19], %35 {strides = array<i32>} : memref<96x64xf32, #tpu.memory_space<vmem>>, vector<8x32xf32>,
    %37 = arith.select %15, %33, %8 : vector<8x32xi1>, vector<8x32xf32>
    %38 = arith.select %15, %30, %8 : vector<8x32xi1>, vector<8x32xf32>
    %c88 = arith.constant 88 : index
    %c0_20 = arith.constant 0 : index
    %39 = vector.load %arg1[%c88, %c0_20] : memref<96x1xf32, #tpu.memory_space<vmem>>, vector<8x1xf32>
    %40 = vector.shape_cast %39 : vector<8x1xf32> to vector<8x1xf32>
    %41 = vector.broadcast %40 : vector<8x1xf32> to vector<8x32xf32>
    %cst_21 = arith.constant 0.000000e+00 : f32
    %42 = vector.broadcast %cst_21 : f32 to vector<8x32xf32>
    %43 = arith.cmpf ogt, %41, %42 : vector<8x32xf32>
    %c88_22 = arith.constant 88 : index
    %c128 = arith.constant 128 : index
    %44 = vector.load %arg7[%c88_22, %c128] : memref<96x256xf32, #tpu.memory_space<vmem>>, vector<8x128xf32>
    %45 = vector.extract_strided_slice %10 {offsets = [0, 128], sizes = [8, 128], strides = [1, 1]} : vector<8x256xf32> to vector<8x128xf32>
    %46 = arith.addf %44, %45 : vector<8x128xf32>
    %47 = arith.negf %46 : vector<8x128xf32>
    %48 = math.exp %47 : vector<8x128xf32>
    %cst_23 = arith.constant 1.000000e+00 : f32
    %49 = vector.broadcast %cst_23 : f32 to vector<8x128xf32>
    %50 = arith.addf %49, %48 : vector<8x128xf32>
    %51 = arith.divf %49, %50 : vector<8x128xf32>
    %52 = math.tanh %46 : vector<8x128xf32>
    %53 = vector.extract_strided_slice %51 {offsets = [0, 32], sizes = [8, 32], strides = [1, 1]} : vector<8x128xf32> to vector<8x32xf32>
    %54 = arith.mulf %53, %8 : vector<8x32xf32>
    %55 = vector.extract_strided_slice %51 {offsets = [0, 0], sizes = [8, 32], strides = [1, 1]} : vector<8x128xf32> to vector<8x32xf32>
    %56 = vector.extract_strided_slice %52 {offsets = [0, 64], sizes = [8, 32], strides = [1, 1]} : vector<8x128xf32> to vector<8x32xf32>
    %57 = arith.mulf %55, %56 : vector<8x32xf32>
    %58 = arith.addf %54, %57 : vector<8x32xf32>
    %59 = vector.extract_strided_slice %51 {offsets = [0, 96], sizes = [8, 32], strides = [1, 1]} : vector<8x128xf32> to vector<8x32xf32>
    %60 = math.tanh %58 : vector<8x32xf32>
    %61 = arith.mulf %59, %60 : vector<8x32xf32>
    %cst_24 = arith.constant 0.000000e+00 : f32
    %62 = vector.broadcast %cst_24 : f32 to vector<8x32xf32>
    %63 = arith.select %43, %61, %62 : vector<8x32xi1>, vector<8x32xf32>
    %c88_25 = arith.constant 88 : index
    %c32 = arith.constant 32 : index
    %64 = vector.load %arg5[%c88_25, %c32] : memref<96x64xf32, #tpu.memory_space<vmem>>, vector<8x32xf32>
    tpu.vector_store %arg5[%c88_25, %c32], %63 {strides = array<i32>} : memref<96x64xf32, #tpu.memory_space<vmem>>, vector<8x32xf32>,
    %65 = arith.select %43, %61, %8 : vector<8x32xi1>, vector<8x32xf32>
    %66 = arith.select %43, %58, %8 : vector<8x32xi1>, vector<8x32xf32>
    %67 = tpu.concatenate %37, %65 in 1 : vector<8x32xf32>, vector<8x32xf32> -> vector<8x64xf32>
    %cst_26 = arith.constant dense<0.000000e+00> : vector<8x256xf32>
    %68 = tpu.matmul %67, %7, %cst_26 {dimension_numbers = #tpu.dot_dimension_numbers<[1], [0], [0], [1], [0, 0, 1, 1], [], []>} : vector<8x64xf32>, vector<64x256xf32>, vector<8x256xf32> -> vector<8x256xf32>
    %c8 = arith.constant 8 : index
    %c0_27 = arith.constant 0 : index
    %69 = vector.load %arg1[%c8, %c0_27] : memref<96x1xf32, #tpu.memory_space<vmem>>, vector<8x1xf32>
    %70 = vector.shape_cast %69 : vector<8x1xf32> to vector<8x1xf32>
    %71 = vector.broadcast %70 : vector<8x1xf32> to vector<8x32xf32>
    %cst_28 = arith.constant 0.000000e+00 : f32
    %72 = vector.broadcast %cst_28 : f32 to vector<8x32xf32>
    %73 = arith.cmpf ogt, %71, %72 : vector<8x32xf32>
    %c8_29 = arith.constant 8 : index
    %c0_30 = arith.constant 0 : index
    %74 = vector.load %arg7[%c8_29, %c0_30] : memref<96x256xf32, #tpu.memory_space<vmem>>, vector<8x128xf32>
    %75 = vector.extract_strided_slice %68 {offsets = [0, 0], sizes = [8, 128], strides = [1, 1]} : vector<8x256xf32> to vector<8x128xf32>
    %76 = arith.addf %74, %75 : vector<8x128xf32>
    %77 = arith.negf %76 : vector<8x128xf32>
    %78 = math.exp %77 : vector<8x128xf32>
    %cst_31 = arith.constant 1.000000e+00 : f32
    %79 = vector.broadcast %cst_31 : f32 to vector<8x128xf32>
    %80 = arith.addf %79, %78 : vector<8x128xf32>
    %81 = arith.divf %79, %80 : vector<8x128xf32>
    %82 = math.tanh %76 : vector<8x128xf32>
    %83 = vector.extract_strided_slice %81 {offsets = [0, 32], sizes = [8, 32], strides = [1, 1]} : vector<8x128xf32> to vector<8x32xf32>
    %84 = arith.mulf %83, %38 : vector<8x32xf32>
    %85 = vector.extract_strided_slice %81 {offsets = [0, 0], sizes = [8, 32], strides = [1, 1]} : vector<8x128xf32> to vector<8x32xf32>
    %86 = vector.extract_strided_slice %82 {offsets = [0, 64], sizes = [8, 32], strides = [1, 1]} : vector<8x128xf32> to vector<8x32xf32>
    %87 = arith.mulf %85, %86 : vector<8x32xf32>
    %88 = arith.addf %84, %87 : vector<8x32xf32>
    %89 = vector.extract_strided_slice %81 {offsets = [0, 96], sizes = [8, 32], strides = [1, 1]} : vector<8x128xf32> to vector<8x32xf32>
    %90 = math.tanh %88 : vector<8x32xf32>
    %91 = arith.mulf %89, %90 : vector<8x32xf32>
    %cst_32 = arith.constant 0.000000e+00 : f32
    %92 = vector.broadcast %cst_32 : f32 to vector<8x32xf32>
    %93 = arith.select %73, %91, %92 : vector<8x32xi1>, vector<8x32xf32>
    %c8_33 = arith.constant 8 : index
    %c0_34 = arith.constant 0 : index
    %94 = vector.load %arg5[%c8_33, %c0_34] : memref<96x64xf32, #tpu.memory_space<vmem>>, vector<8x32xf32>
    tpu.vector_store %arg5[%c8_33, %c0_34], %93 {strides = array<i32>} : memref<96x64xf32, #tpu.memory_space<vmem>>, vector<8x32xf32>,
    %95 = arith.select %73, %91, %37 : vector<8x32xi1>, vector<8x32xf32>
    %96 = arith.select %73, %88, %38 : vector<8x32xi1>, vector<8x32xf32>
    %c80 = arith.constant 80 : index
    %c0_35 = arith.constant 0 : index
    %97 = vector.load %arg1[%c80, %c0_35] : memref<96x1xf32, #tpu.memory_space<vmem>>, vector<8x1xf32>
    %98 = vector.shape_cast %97 : vector<8x1xf32> to vector<8x1xf32>
    %99 = vector.broadcast %98 : vector<8x1xf32> to vector<8x32xf32>
    %cst_36 = arith.constant 0.000000e+00 : f32
    %100 = vector.broadcast %cst_36 : f32 to vector<8x32xf32>
    %101 = arith.cmpf ogt, %99, %100 : vector<8x32xf32>
    %c80_37 = arith.constant 80 : index
    %c128_38 = arith.constant 128 : index
    %102 = vector.load %arg7[%c80_37, %c128_38] : memref<96x256xf32, #tpu.memory_space<vmem>>, vector<8x128xf32>
    %103 = vector.extract_strided_slice %68 {offsets = [0, 128], sizes = [8, 128], strides = [1, 1]} : vector<8x256xf32> to vector<8x128xf32>
    %104 = arith.addf %102, %103 : vector<8x128xf32>
    %105 = arith.negf %104 : vector<8x128xf32>
    %106 = math.exp %105 : vector<8x128xf32>
    %cst_39 = arith.constant 1.000000e+00 : f32
    %107 = vector.broadcast %cst_39 : f32 to vector<8x128xf32>
    %108 = arith.addf %107, %106 : vector<8x128xf32>
    %109 = arith.divf %107, %108 : vector<8x128xf32>
    %110 = math.tanh %104 : vector<8x128xf32>
    %111 = vector.extract_strided_slice %109 {offsets = [0, 32], sizes = [8, 32], strides = [1, 1]} : vector<8x128xf32> to vector<8x32xf32>
    %112 = arith.mulf %111, %66 : vector<8x32xf32>
    %113 = vector.extract_strided_slice %109 {offsets = [0, 0], sizes = [8, 32], strides = [1, 1]} : vector<8x128xf32> to vector<8x32xf32>
    %114 = vector.extract_strided_slice %110 {offsets = [0, 64], sizes = [8, 32], strides = [1, 1]} : vector<8x128xf32> to vector<8x32xf32>
    %115 = arith.mulf %113, %114 : vector<8x32xf32>
    %116 = arith.addf %112, %115 : vector<8x32xf32>
    %117 = vector.extract_strided_slice %109 {offsets = [0, 96], sizes = [8, 32], strides = [1, 1]} : vector<8x128xf32> to vector<8x32xf32>
    %118 = math.tanh %116 : vector<8x32xf32>
    %119 = arith.mulf %117, %118 : vector<8x32xf32>
    %cst_40 = arith.constant 0.000000e+00 : f32
    %120 = vector.broadcast %cst_40 : f32 to vector<8x32xf32>
    %121 = arith.select %101, %119, %120 : vector<8x32xi1>, vector<8x32xf32>
    %c80_41 = arith.constant 80 : index
    %c32_42 = arith.constant 32 : index
    %122 = vector.load %arg5[%c80_41, %c32_42] : memref<96x64xf32, #tpu.memory_space<vmem>>, vector<8x32xf32>
    tpu.vector_store %arg5[%c80_41, %c32_42], %121 {strides = array<i32>} : memref<96x64xf32, #tpu.memory_space<vmem>>, vector<8x32xf32>,
    %123 = arith.select %101, %119, %65 : vector<8x32xi1>, vector<8x32xf32>
    %124 = arith.select %101, %116, %66 : vector<8x32xi1>, vector<8x32xf32>
    %125 = tpu.concatenate %95, %123 in 1 : vector<8x32xf32>, vector<8x32xf32> -> vector<8x64xf32>
    %cst_43 = arith.constant dense<0.000000e+00> : vector<8x256xf32>
    %126 = tpu.matmul %125, %7, %cst_43 {dimension_numbers = #tpu.dot_dimension_numbers<[1], [0], [0], [1], [0, 0, 1, 1], [], []>} : vector<8x64xf32>, vector<64x256xf32>, vector<8x256xf32> -> vector<8x256xf32>
    %c16 = arith.constant 16 : index
    %c0_44 = arith.constant 0 : index
    %127 = vector.load %arg1[%c16, %c0_44] : memref<96x1xf32, #tpu.memory_space<vmem>>, vector<8x1xf32>
    %128 = vector.shape_cast %127 : vector<8x1xf32> to vector<8x1xf32>
    %129 = vector.broadcast %128 : vector<8x1xf32> to vector<8x32xf32>
    %cst_45 = arith.constant 0.000000e+00 : f32
    %130 = vector.broadcast %cst_45 : f32 to vector<8x32xf32>
    %131 = arith.cmpf ogt, %129, %130 : vector<8x32xf32>
    %c16_46 = arith.constant 16 : index
    %c0_47 = arith.constant 0 : index
    %132 = vector.load %arg7[%c16_46, %c0_47] : memref<96x256xf32, #tpu.memory_space<vmem>>, vector<8x128xf32>
    %133 = vector.extract_strided_slice %126 {offsets = [0, 0], sizes = [8, 128], strides = [1, 1]} : vector<8x256xf32> to vector<8x128xf32>
    %134 = arith.addf %132, %133 : vector<8x128xf32>
    %135 = arith.negf %134 : vector<8x128xf32>
    %136 = math.exp %135 : vector<8x128xf32>
    %cst_48 = arith.constant 1.000000e+00 : f32
    %137 = vector.broadcast %cst_48 : f32 to vector<8x128xf32>
    %138 = arith.addf %137, %136 : vector<8x128xf32>
    %139 = arith.divf %137, %138 : vector<8x128xf32>
    %140 = math.tanh %134 : vector<8x128xf32>
    %141 = vector.extract_strided_slice %139 {offsets = [0, 32], sizes = [8, 32], strides = [1, 1]} : vector<8x128xf32> to vector<8x32xf32>
    %142 = arith.mulf %141, %96 : vector<8x32xf32>
    %143 = vector.extract_strided_slice %139 {offsets = [0, 0], sizes = [8, 32], strides = [1, 1]} : vector<8x128xf32> to vector<8x32xf32>
    %144 = vector.extract_strided_slice %140 {offsets = [0, 64], sizes = [8, 32], strides = [1, 1]} : vector<8x128xf32> to vector<8x32xf32>
    %145 = arith.mulf %143, %144 : vector<8x32xf32>
    %146 = arith.addf %142, %145 : vector<8x32xf32>
    %147 = vector.extract_strided_slice %139 {offsets = [0, 96], sizes = [8, 32], strides = [1, 1]} : vector<8x128xf32> to vector<8x32xf32>
    %148 = math.tanh %146 : vector<8x32xf32>
    %149 = arith.mulf %147, %148 : vector<8x32xf32>
    %cst_49 = arith.constant 0.000000e+00 : f32
    %150 = vector.broadcast %cst_49 : f32 to vector<8x32xf32>
    %151 = arith.select %131, %149, %150 : vector<8x32xi1>, vector<8x32xf32>
    %c16_50 = arith.constant 16 : index
    %c0_51 = arith.constant 0 : index
    %152 = vector.load %arg5[%c16_50, %c0_51] : memref<96x64xf32, #tpu.memory_space<vmem>>, vector<8x32xf32>
    tpu.vector_store %arg5[%c16_50, %c0_51], %151 {strides = array<i32>} : memref<96x64xf32, #tpu.memory_space<vmem>>, vector<8x32xf32>,
    %153 = arith.select %131, %149, %95 : vector<8x32xi1>, vector<8x32xf32>
    %154 = arith.select %131, %146, %96 : vector<8x32xi1>, vector<8x32xf32>
    %c72 = arith.constant 72 : index
    %c0_52 = arith.constant 0 : index
    %155 = vector.load %arg1[%c72, %c0_52] : memref<96x1xf32, #tpu.memory_space<vmem>>, vector<8x1xf32>
    %156 = vector.shape_cast %155 : vector<8x1xf32> to vector<8x1xf32>
    %157 = vector.broadcast %156 : vector<8x1xf32> to vector<8x32xf32>
    %cst_53 = arith.constant 0.000000e+00 : f32
    %158 = vector.broadcast %cst_53 : f32 to vector<8x32xf32>
    %159 = arith.cmpf ogt, %157, %158 : vector<8x32xf32>
    %c72_54 = arith.constant 72 : index
    %c128_55 = arith.constant 128 : index
    %160 = vector.load %arg7[%c72_54, %c128_55] : memref<96x256xf32, #tpu.memory_space<vmem>>, vector<8x128xf32>
    %161 = vector.extract_strided_slice %126 {offsets = [0, 128], sizes = [8, 128], strides = [1, 1]} : vector<8x256xf32> to vector<8x128xf32>
    %162 = arith.addf %160, %161 : vector<8x128xf32>
    %163 = arith.negf %162 : vector<8x128xf32>
    %164 = math.exp %163 : vector<8x128xf32>
    %cst_56 = arith.constant 1.000000e+00 : f32
    %165 = vector.broadcast %cst_56 : f32 to vector<8x128xf32>
    %166 = arith.addf %165, %164 : vector<8x128xf32>
    %167 = arith.divf %165, %166 : vector<8x128xf32>
    %168 = math.tanh %162 : vector<8x128xf32>
    %169 = vector.extract_strided_slice %167 {offsets = [0, 32], sizes = [8, 32], strides = [1, 1]} : vector<8x128xf32> to vector<8x32xf32>
    %170 = arith.mulf %169, %124 : vector<8x32xf32>
    %171 = vector.extract_strided_slice %167 {offsets = [0, 0], sizes = [8, 32], strides = [1, 1]} : vector<8x128xf32> to vector<8x32xf32>
    %172 = vector.extract_strided_slice %168 {offsets = [0, 64], sizes = [8, 32], strides = [1, 1]} : vector<8x128xf32> to vector<8x32xf32>
    %173 = arith.mulf %171, %172 : vector<8x32xf32>
    %174 = arith.addf %170, %173 : vector<8x32xf32>
    %175 = vector.extract_strided_slice %167 {offsets = [0, 96], sizes = [8, 32], strides = [1, 1]} : vector<8x128xf32> to vector<8x32xf32>
    %176 = math.tanh %174 : vector<8x32xf32>
    %177 = arith.mulf %175, %176 : vector<8x32xf32>
    %cst_57 = arith.constant 0.000000e+00 : f32
    %178 = vector.broadcast %cst_57 : f32 to vector<8x32xf32>
    %179 = arith.select %159, %177, %178 : vector<8x32xi1>, vector<8x32xf32>
    %c72_58 = arith.constant 72 : index
    %c32_59 = arith.constant 32 : index
    %180 = vector.load %arg5[%c72_58, %c32_59] : memref<96x64xf32, #tpu.memory_space<vmem>>, vector<8x32xf32>
    tpu.vector_store %arg5[%c72_58, %c32_59], %179 {strides = array<i32>} : memref<96x64xf32, #tpu.memory_space<vmem>>, vector<8x32xf32>,
    %181 = arith.select %159, %177, %123 : vector<8x32xi1>, vector<8x32xf32>
    %182 = arith.select %159, %174, %124 : vector<8x32xi1>, vector<8x32xf32>
    %183 = tpu.concatenate %153, %181 in 1 : vector<8x32xf32>, vector<8x32xf32> -> vector<8x64xf32>
    %cst_60 = arith.constant dense<0.000000e+00> : vector<8x256xf32>
    %184 = tpu.matmul %183, %7, %cst_60 {dimension_numbers = #tpu.dot_dimension_numbers<[1], [0], [0], [1], [0, 0, 1, 1], [], []>} : vector<8x64xf32>, vector<64x256xf32>, vector<8x256xf32> -> vector<8x256xf32>
    %c24 = arith.constant 24 : index
    %c0_61 = arith.constant 0 : index
    %185 = vector.load %arg1[%c24, %c0_61] : memref<96x1xf32, #tpu.memory_space<vmem>>, vector<8x1xf32>
    %186 = vector.shape_cast %185 : vector<8x1xf32> to vector<8x1xf32>
    %187 = vector.broadcast %186 : vector<8x1xf32> to vector<8x32xf32>
    %cst_62 = arith.constant 0.000000e+00 : f32
    %188 = vector.broadcast %cst_62 : f32 to vector<8x32xf32>
    %189 = arith.cmpf ogt, %187, %188 : vector<8x32xf32>
    %c24_63 = arith.constant 24 : index
    %c0_64 = arith.constant 0 : index
    %190 = vector.load %arg7[%c24_63, %c0_64] : memref<96x256xf32, #tpu.memory_space<vmem>>, vector<8x128xf32>
    %191 = vector.extract_strided_slice %184 {offsets = [0, 0], sizes = [8, 128], strides = [1, 1]} : vector<8x256xf32> to vector<8x128xf32>
    %192 = arith.addf %190, %191 : vector<8x128xf32>
    %193 = arith.negf %192 : vector<8x128xf32>
    %194 = math.exp %193 : vector<8x128xf32>
    %cst_65 = arith.constant 1.000000e+00 : f32
    %195 = vector.broadcast %cst_65 : f32 to vector<8x128xf32>
    %196 = arith.addf %195, %194 : vector<8x128xf32>
    %197 = arith.divf %195, %196 : vector<8x128xf32>
    %198 = math.tanh %192 : vector<8x128xf32>
    %199 = vector.extract_strided_slice %197 {offsets = [0, 32], sizes = [8, 32], strides = [1, 1]} : vector<8x128xf32> to vector<8x32xf32>
    %200 = arith.mulf %199, %154 : vector<8x32xf32>
    %201 = vector.extract_strided_slice %197 {offsets = [0, 0], sizes = [8, 32], strides = [1, 1]} : vector<8x128xf32> to vector<8x32xf32>
    %202 = vector.extract_strided_slice %198 {offsets = [0, 64], sizes = [8, 32], strides = [1, 1]} : vector<8x128xf32> to vector<8x32xf32>
    %203 = arith.mulf %201, %202 : vector<8x32xf32>
    %204 = arith.addf %200, %203 : vector<8x32xf32>
    %205 = vector.extract_strided_slice %197 {offsets = [0, 96], sizes = [8, 32], strides = [1, 1]} : vector<8x128xf32> to vector<8x32xf32>
    %206 = math.tanh %204 : vector<8x32xf32>
    %207 = arith.mulf %205, %206 : vector<8x32xf32>
    %cst_66 = arith.constant 0.000000e+00 : f32
    %208 = vector.broadcast %cst_66 : f32 to vector<8x32xf32>
    %209 = arith.select %189, %207, %208 : vector<8x32xi1>, vector<8x32xf32>
    %c24_67 = arith.constant 24 : index
    %c0_68 = arith.constant 0 : index
    %210 = vector.load %arg5[%c24_67, %c0_68] : memref<96x64xf32, #tpu.memory_space<vmem>>, vector<8x32xf32>
    tpu.vector_store %arg5[%c24_67, %c0_68], %209 {strides = array<i32>} : memref<96x64xf32, #tpu.memory_space<vmem>>, vector<8x32xf32>,
    %211 = arith.select %189, %207, %153 : vector<8x32xi1>, vector<8x32xf32>
    %212 = arith.select %189, %204, %154 : vector<8x32xi1>, vector<8x32xf32>
    %c64 = arith.constant 64 : index
    %c0_69 = arith.constant 0 : index
    %213 = vector.load %arg1[%c64, %c0_69] : memref<96x1xf32, #tpu.memory_space<vmem>>, vector<8x1xf32>
    %214 = vector.shape_cast %213 : vector<8x1xf32> to vector<8x1xf32>
    %215 = vector.broadcast %214 : vector<8x1xf32> to vector<8x32xf32>
    %cst_70 = arith.constant 0.000000e+00 : f32
    %216 = vector.broadcast %cst_70 : f32 to vector<8x32xf32>
    %217 = arith.cmpf ogt, %215, %216 : vector<8x32xf32>
    %c64_71 = arith.constant 64 : index
    %c128_72 = arith.constant 128 : index
    %218 = vector.load %arg7[%c64_71, %c128_72] : memref<96x256xf32, #tpu.memory_space<vmem>>, vector<8x128xf32>
    %219 = vector.extract_strided_slice %184 {offsets = [0, 128], sizes = [8, 128], strides = [1, 1]} : vector<8x256xf32> to vector<8x128xf32>
    %220 = arith.addf %218, %219 : vector<8x128xf32>
    %221 = arith.negf %220 : vector<8x128xf32>
    %222 = math.exp %221 : vector<8x128xf32>
    %cst_73 = arith.constant 1.000000e+00 : f32
    %223 = vector.broadcast %cst_73 : f32 to vector<8x128xf32>
    %224 = arith.addf %223, %222 : vector<8x128xf32>
    %225 = arith.divf %223, %224 : vector<8x128xf32>
    %226 = math.tanh %220 : vector<8x128xf32>
    %227 = vector.extract_strided_slice %225 {offsets = [0, 32], sizes = [8, 32], strides = [1, 1]} : vector<8x128xf32> to vector<8x32xf32>
    %228 = arith.mulf %227, %182 : vector<8x32xf32>
    %229 = vector.extract_strided_slice %225 {offsets = [0, 0], sizes = [8, 32], strides = [1, 1]} : vector<8x128xf32> to vector<8x32xf32>
    %230 = vector.extract_strided_slice %226 {offsets = [0, 64], sizes = [8, 32], strides = [1, 1]} : vector<8x128xf32> to vector<8x32xf32>
    %231 = arith.mulf %229, %230 : vector<8x32xf32>
    %232 = arith.addf %228, %231 : vector<8x32xf32>
    %233 = vector.extract_strided_slice %225 {offsets = [0, 96], sizes = [8, 32], strides = [1, 1]} : vector<8x128xf32> to vector<8x32xf32>
    %234 = math.tanh %232 : vector<8x32xf32>
    %235 = arith.mulf %233, %234 : vector<8x32xf32>
    %cst_74 = arith.constant 0.000000e+00 : f32
    %236 = vector.broadcast %cst_74 : f32 to vector<8x32xf32>
    %237 = arith.select %217, %235, %236 : vector<8x32xi1>, vector<8x32xf32>
    %c64_75 = arith.constant 64 : index
    %c32_76 = arith.constant 32 : index
    %238 = vector.load %arg5[%c64_75, %c32_76] : memref<96x64xf32, #tpu.memory_space<vmem>>, vector<8x32xf32>
    tpu.vector_store %arg5[%c64_75, %c32_76], %237 {strides = array<i32>} : memref<96x64xf32, #tpu.memory_space<vmem>>, vector<8x32xf32>,
    %239 = arith.select %217, %235, %181 : vector<8x32xi1>, vector<8x32xf32>
    %240 = arith.select %217, %232, %182 : vector<8x32xi1>, vector<8x32xf32>
    %241 = tpu.concatenate %211, %239 in 1 : vector<8x32xf32>, vector<8x32xf32> -> vector<8x64xf32>
    %cst_77 = arith.constant dense<0.000000e+00> : vector<8x256xf32>
    %242 = tpu.matmul %241, %7, %cst_77 {dimension_numbers = #tpu.dot_dimension_numbers<[1], [0], [0], [1], [0, 0, 1, 1], [], []>} : vector<8x64xf32>, vector<64x256xf32>, vector<8x256xf32> -> vector<8x256xf32>
    %c32_78 = arith.constant 32 : index
    %c0_79 = arith.constant 0 : index
    %243 = vector.load %arg1[%c32_78, %c0_79] : memref<96x1xf32, #tpu.memory_space<vmem>>, vector<8x1xf32>
    %244 = vector.shape_cast %243 : vector<8x1xf32> to vector<8x1xf32>
    %245 = vector.broadcast %244 : vector<8x1xf32> to vector<8x32xf32>
    %cst_80 = arith.constant 0.000000e+00 : f32
    %246 = vector.broadcast %cst_80 : f32 to vector<8x32xf32>
    %247 = arith.cmpf ogt, %245, %246 : vector<8x32xf32>
    %c32_81 = arith.constant 32 : index
    %c0_82 = arith.constant 0 : index
    %248 = vector.load %arg7[%c32_81, %c0_82] : memref<96x256xf32, #tpu.memory_space<vmem>>, vector<8x128xf32>
    %249 = vector.extract_strided_slice %242 {offsets = [0, 0], sizes = [8, 128], strides = [1, 1]} : vector<8x256xf32> to vector<8x128xf32>
    %250 = arith.addf %248, %249 : vector<8x128xf32>
    %251 = arith.negf %250 : vector<8x128xf32>
    %252 = math.exp %251 : vector<8x128xf32>
    %cst_83 = arith.constant 1.000000e+00 : f32
    %253 = vector.broadcast %cst_83 : f32 to vector<8x128xf32>
    %254 = arith.addf %253, %252 : vector<8x128xf32>
    %255 = arith.divf %253, %254 : vector<8x128xf32>
    %256 = math.tanh %250 : vector<8x128xf32>
    %257 = vector.extract_strided_slice %255 {offsets = [0, 32], sizes = [8, 32], strides = [1, 1]} : vector<8x128xf32> to vector<8x32xf32>
    %258 = arith.mulf %257, %212 : vector<8x32xf32>
    %259 = vector.extract_strided_slice %255 {offsets = [0, 0], sizes = [8, 32], strides = [1, 1]} : vector<8x128xf32> to vector<8x32xf32>
    %260 = vector.extract_strided_slice %256 {offsets = [0, 64], sizes = [8, 32], strides = [1, 1]} : vector<8x128xf32> to vector<8x32xf32>
    %261 = arith.mulf %259, %260 : vector<8x32xf32>
    %262 = arith.addf %258, %261 : vector<8x32xf32>
    %263 = vector.extract_strided_slice %255 {offsets = [0, 96], sizes = [8, 32], strides = [1, 1]} : vector<8x128xf32> to vector<8x32xf32>
    %264 = math.tanh %262 : vector<8x32xf32>
    %265 = arith.mulf %263, %264 : vector<8x32xf32>
    %cst_84 = arith.constant 0.000000e+00 : f32
    %266 = vector.broadcast %cst_84 : f32 to vector<8x32xf32>
    %267 = arith.select %247, %265, %266 : vector<8x32xi1>, vector<8x32xf32>
    %c32_85 = arith.constant 32 : index
    %c0_86 = arith.constant 0 : index
    %268 = vector.load %arg5[%c32_85, %c0_86] : memref<96x64xf32, #tpu.memory_space<vmem>>, vector<8x32xf32>
    tpu.vector_store %arg5[%c32_85, %c0_86], %267 {strides = array<i32>} : memref<96x64xf32, #tpu.memory_space<vmem>>, vector<8x32xf32>,
    %269 = arith.select %247, %265, %211 : vector<8x32xi1>, vector<8x32xf32>
    %270 = arith.select %247, %262, %212 : vector<8x32xi1>, vector<8x32xf32>
    %c56 = arith.constant 56 : index
    %c0_87 = arith.constant 0 : index
    %271 = vector.load %arg1[%c56, %c0_87] : memref<96x1xf32, #tpu.memory_space<vmem>>, vector<8x1xf32>
    %272 = vector.shape_cast %271 : vector<8x1xf32> to vector<8x1xf32>
    %273 = vector.broadcast %272 : vector<8x1xf32> to vector<8x32xf32>
    %cst_88 = arith.constant 0.000000e+00 : f32
    %274 = vector.broadcast %cst_88 : f32 to vector<8x32xf32>
    %275 = arith.cmpf ogt, %273, %274 : vector<8x32xf32>
    %c56_89 = arith.constant 56 : index
    %c128_90 = arith.constant 128 : index
    %276 = vector.load %arg7[%c56_89, %c128_90] : memref<96x256xf32, #tpu.memory_space<vmem>>, vector<8x128xf32>
    %277 = vector.extract_strided_slice %242 {offsets = [0, 128], sizes = [8, 128], strides = [1, 1]} : vector<8x256xf32> to vector<8x128xf32>
    %278 = arith.addf %276, %277 : vector<8x128xf32>
    %279 = arith.negf %278 : vector<8x128xf32>
    %280 = math.exp %279 : vector<8x128xf32>
    %cst_91 = arith.constant 1.000000e+00 : f32
    %281 = vector.broadcast %cst_91 : f32 to vector<8x128xf32>
    %282 = arith.addf %281, %280 : vector<8x128xf32>
    %283 = arith.divf %281, %282 : vector<8x128xf32>
    %284 = math.tanh %278 : vector<8x128xf32>
    %285 = vector.extract_strided_slice %283 {offsets = [0, 32], sizes = [8, 32], strides = [1, 1]} : vector<8x128xf32> to vector<8x32xf32>
    %286 = arith.mulf %285, %240 : vector<8x32xf32>
    %287 = vector.extract_strided_slice %283 {offsets = [0, 0], sizes = [8, 32], strides = [1, 1]} : vector<8x128xf32> to vector<8x32xf32>
    %288 = vector.extract_strided_slice %284 {offsets = [0, 64], sizes = [8, 32], strides = [1, 1]} : vector<8x128xf32> to vector<8x32xf32>
    %289 = arith.mulf %287, %288 : vector<8x32xf32>
    %290 = arith.addf %286, %289 : vector<8x32xf32>
    %291 = vector.extract_strided_slice %283 {offsets = [0, 96], sizes = [8, 32], strides = [1, 1]} : vector<8x128xf32> to vector<8x32xf32>
    %292 = math.tanh %290 : vector<8x32xf32>
    %293 = arith.mulf %291, %292 : vector<8x32xf32>
    %cst_92 = arith.constant 0.000000e+00 : f32
    %294 = vector.broadcast %cst_92 : f32 to vector<8x32xf32>
    %295 = arith.select %275, %293, %294 : vector<8x32xi1>, vector<8x32xf32>
    %c56_93 = arith.constant 56 : index
    %c32_94 = arith.constant 32 : index
    %296 = vector.load %arg5[%c56_93, %c32_94] : memref<96x64xf32, #tpu.memory_space<vmem>>, vector<8x32xf32>
    tpu.vector_store %arg5[%c56_93, %c32_94], %295 {strides = array<i32>} : memref<96x64xf32, #tpu.memory_space<vmem>>, vector<8x32xf32>,
    %297 = arith.select %275, %293, %239 : vector<8x32xi1>, vector<8x32xf32>
    %298 = arith.select %275, %290, %240 : vector<8x32xi1>, vector<8x32xf32>
    %299 = tpu.concatenate %269, %297 in 1 : vector<8x32xf32>, vector<8x32xf32> -> vector<8x64xf32>
    %cst_95 = arith.constant dense<0.000000e+00> : vector<8x256xf32>
    %300 = tpu.matmul %299, %7, %cst_95 {dimension_numbers = #tpu.dot_dimension_numbers<[1], [0], [0], [1], [0, 0, 1, 1], [], []>} : vector<8x64xf32>, vector<64x256xf32>, vector<8x256xf32> -> vector<8x256xf32>
    %c40 = arith.constant 40 : index
    %c0_96 = arith.constant 0 : index
    %301 = vector.load %arg1[%c40, %c0_96] : memref<96x1xf32, #tpu.memory_space<vmem>>, vector<8x1xf32>
    %302 = vector.shape_cast %301 : vector<8x1xf32> to vector<8x1xf32>
    %303 = vector.broadcast %302 : vector<8x1xf32> to vector<8x32xf32>
    %cst_97 = arith.constant 0.000000e+00 : f32
    %304 = vector.broadcast %cst_97 : f32 to vector<8x32xf32>
    %305 = arith.cmpf ogt, %303, %304 : vector<8x32xf32>
    %c40_98 = arith.constant 40 : index
    %c0_99 = arith.constant 0 : index
    %306 = vector.load %arg7[%c40_98, %c0_99] : memref<96x256xf32, #tpu.memory_space<vmem>>, vector<8x128xf32>
    %307 = vector.extract_strided_slice %300 {offsets = [0, 0], sizes = [8, 128], strides = [1, 1]} : vector<8x256xf32> to vector<8x128xf32>
    %308 = arith.addf %306, %307 : vector<8x128xf32>
    %309 = arith.negf %308 : vector<8x128xf32>
    %310 = math.exp %309 : vector<8x128xf32>
    %cst_100 = arith.constant 1.000000e+00 : f32
    %311 = vector.broadcast %cst_100 : f32 to vector<8x128xf32>
    %312 = arith.addf %311, %310 : vector<8x128xf32>
    %313 = arith.divf %311, %312 : vector<8x128xf32>
    %314 = math.tanh %308 : vector<8x128xf32>
    %315 = vector.extract_strided_slice %313 {offsets = [0, 32], sizes = [8, 32], strides = [1, 1]} : vector<8x128xf32> to vector<8x32xf32>
    %316 = arith.mulf %315, %270 : vector<8x32xf32>
    %317 = vector.extract_strided_slice %313 {offsets = [0, 0], sizes = [8, 32], strides = [1, 1]} : vector<8x128xf32> to vector<8x32xf32>
    %318 = vector.extract_strided_slice %314 {offsets = [0, 64], sizes = [8, 32], strides = [1, 1]} : vector<8x128xf32> to vector<8x32xf32>
    %319 = arith.mulf %317, %318 : vector<8x32xf32>
    %320 = arith.addf %316, %319 : vector<8x32xf32>
    %321 = vector.extract_strided_slice %313 {offsets = [0, 96], sizes = [8, 32], strides = [1, 1]} : vector<8x128xf32> to vector<8x32xf32>
    %322 = math.tanh %320 : vector<8x32xf32>
    %323 = arith.mulf %321, %322 : vector<8x32xf32>
    %cst_101 = arith.constant 0.000000e+00 : f32
    %324 = vector.broadcast %cst_101 : f32 to vector<8x32xf32>
    %325 = arith.select %305, %323, %324 : vector<8x32xi1>, vector<8x32xf32>
    %c40_102 = arith.constant 40 : index
    %c0_103 = arith.constant 0 : index
    %326 = vector.load %arg5[%c40_102, %c0_103] : memref<96x64xf32, #tpu.memory_space<vmem>>, vector<8x32xf32>
    tpu.vector_store %arg5[%c40_102, %c0_103], %325 {strides = array<i32>} : memref<96x64xf32, #tpu.memory_space<vmem>>, vector<8x32xf32>,
    %327 = arith.select %305, %323, %269 : vector<8x32xi1>, vector<8x32xf32>
    %328 = arith.select %305, %320, %270 : vector<8x32xi1>, vector<8x32xf32>
    %c48 = arith.constant 48 : index
    %c0_104 = arith.constant 0 : index
    %329 = vector.load %arg1[%c48, %c0_104] : memref<96x1xf32, #tpu.memory_space<vmem>>, vector<8x1xf32>
    %330 = vector.shape_cast %329 : vector<8x1xf32> to vector<8x1xf32>
    %331 = vector.broadcast %330 : vector<8x1xf32> to vector<8x32xf32>
    %cst_105 = arith.constant 0.000000e+00 : f32
    %332 = vector.broadcast %cst_105 : f32 to vector<8x32xf32>
    %333 = arith.cmpf ogt, %331, %332 : vector<8x32xf32>
    %c48_106 = arith.constant 48 : index
    %c128_107 = arith.constant 128 : index
    %334 = vector.load %arg7[%c48_106, %c128_107] : memref<96x256xf32, #tpu.memory_space<vmem>>, vector<8x128xf32>
    %335 = vector.extract_strided_slice %300 {offsets = [0, 128], sizes = [8, 128], strides = [1, 1]} : vector<8x256xf32> to vector<8x128xf32>
    %336 = arith.addf %334, %335 : vector<8x128xf32>
    %337 = arith.negf %336 : vector<8x128xf32>
    %338 = math.exp %337 : vector<8x128xf32>
    %cst_108 = arith.constant 1.000000e+00 : f32
    %339 = vector.broadcast %cst_108 : f32 to vector<8x128xf32>
    %340 = arith.addf %339, %338 : vector<8x128xf32>
    %341 = arith.divf %339, %340 : vector<8x128xf32>
    %342 = math.tanh %336 : vector<8x128xf32>
    %343 = vector.extract_strided_slice %341 {offsets = [0, 32], sizes = [8, 32], strides = [1, 1]} : vector<8x128xf32> to vector<8x32xf32>
    %344 = arith.mulf %343, %298 : vector<8x32xf32>
    %345 = vector.extract_strided_slice %341 {offsets = [0, 0], sizes = [8, 32], strides = [1, 1]} : vector<8x128xf32> to vector<8x32xf32>
    %346 = vector.extract_strided_slice %342 {offsets = [0, 64], sizes = [8, 32], strides = [1, 1]} : vector<8x128xf32> to vector<8x32xf32>
    %347 = arith.mulf %345, %346 : vector<8x32xf32>
    %348 = arith.addf %344, %347 : vector<8x32xf32>
    %349 = vector.extract_strided_slice %341 {offsets = [0, 96], sizes = [8, 32], strides = [1, 1]} : vector<8x128xf32> to vector<8x32xf32>
    %350 = math.tanh %348 : vector<8x32xf32>
    %351 = arith.mulf %349, %350 : vector<8x32xf32>
    %cst_109 = arith.constant 0.000000e+00 : f32
    %352 = vector.broadcast %cst_109 : f32 to vector<8x32xf32>
    %353 = arith.select %333, %351, %352 : vector<8x32xi1>, vector<8x32xf32>
    %c48_110 = arith.constant 48 : index
    %c32_111 = arith.constant 32 : index
    %354 = vector.load %arg5[%c48_110, %c32_111] : memref<96x64xf32, #tpu.memory_space<vmem>>, vector<8x32xf32>
    tpu.vector_store %arg5[%c48_110, %c32_111], %353 {strides = array<i32>} : memref<96x64xf32, #tpu.memory_space<vmem>>, vector<8x32xf32>,
    %355 = arith.select %333, %351, %297 : vector<8x32xi1>, vector<8x32xf32>
    %356 = arith.select %333, %348, %298 : vector<8x32xi1>, vector<8x32xf32>
    %357 = tpu.concatenate %327, %355 in 1 : vector<8x32xf32>, vector<8x32xf32> -> vector<8x64xf32>
    %cst_112 = arith.constant dense<0.000000e+00> : vector<8x256xf32>
    %358 = tpu.matmul %357, %7, %cst_112 {dimension_numbers = #tpu.dot_dimension_numbers<[1], [0], [0], [1], [0, 0, 1, 1], [], []>} : vector<8x64xf32>, vector<64x256xf32>, vector<8x256xf32> -> vector<8x256xf32>
    %c48_113 = arith.constant 48 : index
    %c0_114 = arith.constant 0 : index
    %359 = vector.load %arg1[%c48_113, %c0_114] : memref<96x1xf32, #tpu.memory_space<vmem>>, vector<8x1xf32>
    %360 = vector.shape_cast %359 : vector<8x1xf32> to vector<8x1xf32>
    %361 = vector.broadcast %360 : vector<8x1xf32> to vector<8x32xf32>
    %cst_115 = arith.constant 0.000000e+00 : f32
    %362 = vector.broadcast %cst_115 : f32 to vector<8x32xf32>
    %363 = arith.cmpf ogt, %361, %362 : vector<8x32xf32>
    %c48_116 = arith.constant 48 : index
    %c0_117 = arith.constant 0 : index
    %364 = vector.load %arg7[%c48_116, %c0_117] : memref<96x256xf32, #tpu.memory_space<vmem>>, vector<8x128xf32>
    %365 = vector.extract_strided_slice %358 {offsets = [0, 0], sizes = [8, 128], strides = [1, 1]} : vector<8x256xf32> to vector<8x128xf32>
    %366 = arith.addf %364, %365 : vector<8x128xf32>
    %367 = arith.negf %366 : vector<8x128xf32>
    %368 = math.exp %367 : vector<8x128xf32>
    %cst_118 = arith.constant 1.000000e+00 : f32
    %369 = vector.broadcast %cst_118 : f32 to vector<8x128xf32>
    %370 = arith.addf %369, %368 : vector<8x128xf32>
    %371 = arith.divf %369, %370 : vector<8x128xf32>
    %372 = math.tanh %366 : vector<8x128xf32>
    %373 = vector.extract_strided_slice %371 {offsets = [0, 32], sizes = [8, 32], strides = [1, 1]} : vector<8x128xf32> to vector<8x32xf32>
    %374 = arith.mulf %373, %328 : vector<8x32xf32>
    %375 = vector.extract_strided_slice %371 {offsets = [0, 0], sizes = [8, 32], strides = [1, 1]} : vector<8x128xf32> to vector<8x32xf32>
    %376 = vector.extract_strided_slice %372 {offsets = [0, 64], sizes = [8, 32], strides = [1, 1]} : vector<8x128xf32> to vector<8x32xf32>
    %377 = arith.mulf %375, %376 : vector<8x32xf32>
    %378 = arith.addf %374, %377 : vector<8x32xf32>
    %379 = vector.extract_strided_slice %371 {offsets = [0, 96], sizes = [8, 32], strides = [1, 1]} : vector<8x128xf32> to vector<8x32xf32>
    %380 = math.tanh %378 : vector<8x32xf32>
    %381 = arith.mulf %379, %380 : vector<8x32xf32>
    %cst_119 = arith.constant 0.000000e+00 : f32
    %382 = vector.broadcast %cst_119 : f32 to vector<8x32xf32>
    %383 = arith.select %363, %381, %382 : vector<8x32xi1>, vector<8x32xf32>
    %c48_120 = arith.constant 48 : index
    %c0_121 = arith.constant 0 : index
    %384 = vector.load %arg5[%c48_120, %c0_121] : memref<96x64xf32, #tpu.memory_space<vmem>>, vector<8x32xf32>
    tpu.vector_store %arg5[%c48_120, %c0_121], %383 {strides = array<i32>} : memref<96x64xf32, #tpu.memory_space<vmem>>, vector<8x32xf32>,
    %385 = arith.select %363, %381, %327 : vector<8x32xi1>, vector<8x32xf32>
    %386 = arith.select %363, %378, %328 : vector<8x32xi1>, vector<8x32xf32>
    %c40_122 = arith.constant 40 : index
    %c0_123 = arith.constant 0 : index
    %387 = vector.load %arg1[%c40_122, %c0_123] : memref<96x1xf32, #tpu.memory_space<vmem>>, vector<8x1xf32>
    %388 = vector.shape_cast %387 : vector<8x1xf32> to vector<8x1xf32>
    %389 = vector.broadcast %388 : vector<8x1xf32> to vector<8x32xf32>
    %cst_124 = arith.constant 0.000000e+00 : f32
    %390 = vector.broadcast %cst_124 : f32 to vector<8x32xf32>
    %391 = arith.cmpf ogt, %389, %390 : vector<8x32xf32>
    %c40_125 = arith.constant 40 : index
    %c128_126 = arith.constant 128 : index
    %392 = vector.load %arg7[%c40_125, %c128_126] : memref<96x256xf32, #tpu.memory_space<vmem>>, vector<8x128xf32>
    %393 = vector.extract_strided_slice %358 {offsets = [0, 128], sizes = [8, 128], strides = [1, 1]} : vector<8x256xf32> to vector<8x128xf32>
    %394 = arith.addf %392, %393 : vector<8x128xf32>
    %395 = arith.negf %394 : vector<8x128xf32>
    %396 = math.exp %395 : vector<8x128xf32>
    %cst_127 = arith.constant 1.000000e+00 : f32
    %397 = vector.broadcast %cst_127 : f32 to vector<8x128xf32>
    %398 = arith.addf %397, %396 : vector<8x128xf32>
    %399 = arith.divf %397, %398 : vector<8x128xf32>
    %400 = math.tanh %394 : vector<8x128xf32>
    %401 = vector.extract_strided_slice %399 {offsets = [0, 32], sizes = [8, 32], strides = [1, 1]} : vector<8x128xf32> to vector<8x32xf32>
    %402 = arith.mulf %401, %356 : vector<8x32xf32>
    %403 = vector.extract_strided_slice %399 {offsets = [0, 0], sizes = [8, 32], strides = [1, 1]} : vector<8x128xf32> to vector<8x32xf32>
    %404 = vector.extract_strided_slice %400 {offsets = [0, 64], sizes = [8, 32], strides = [1, 1]} : vector<8x128xf32> to vector<8x32xf32>
    %405 = arith.mulf %403, %404 : vector<8x32xf32>
    %406 = arith.addf %402, %405 : vector<8x32xf32>
    %407 = vector.extract_strided_slice %399 {offsets = [0, 96], sizes = [8, 32], strides = [1, 1]} : vector<8x128xf32> to vector<8x32xf32>
    %408 = math.tanh %406 : vector<8x32xf32>
    %409 = arith.mulf %407, %408 : vector<8x32xf32>
    %cst_128 = arith.constant 0.000000e+00 : f32
    %410 = vector.broadcast %cst_128 : f32 to vector<8x32xf32>
    %411 = arith.select %391, %409, %410 : vector<8x32xi1>, vector<8x32xf32>
    %c40_129 = arith.constant 40 : index
    %c32_130 = arith.constant 32 : index
    %412 = vector.load %arg5[%c40_129, %c32_130] : memref<96x64xf32, #tpu.memory_space<vmem>>, vector<8x32xf32>
    tpu.vector_store %arg5[%c40_129, %c32_130], %411 {strides = array<i32>} : memref<96x64xf32, #tpu.memory_space<vmem>>, vector<8x32xf32>,
    %413 = arith.select %391, %409, %355 : vector<8x32xi1>, vector<8x32xf32>
    %414 = arith.select %391, %406, %356 : vector<8x32xi1>, vector<8x32xf32>
    %415 = tpu.concatenate %385, %413 in 1 : vector<8x32xf32>, vector<8x32xf32> -> vector<8x64xf32>
    %cst_131 = arith.constant dense<0.000000e+00> : vector<8x256xf32>
    %416 = tpu.matmul %415, %7, %cst_131 {dimension_numbers = #tpu.dot_dimension_numbers<[1], [0], [0], [1], [0, 0, 1, 1], [], []>} : vector<8x64xf32>, vector<64x256xf32>, vector<8x256xf32> -> vector<8x256xf32>
    %c56_132 = arith.constant 56 : index
    %c0_133 = arith.constant 0 : index
    %417 = vector.load %arg1[%c56_132, %c0_133] : memref<96x1xf32, #tpu.memory_space<vmem>>, vector<8x1xf32>
    %418 = vector.shape_cast %417 : vector<8x1xf32> to vector<8x1xf32>
    %419 = vector.broadcast %418 : vector<8x1xf32> to vector<8x32xf32>
    %cst_134 = arith.constant 0.000000e+00 : f32
    %420 = vector.broadcast %cst_134 : f32 to vector<8x32xf32>
    %421 = arith.cmpf ogt, %419, %420 : vector<8x32xf32>
    %c56_135 = arith.constant 56 : index
    %c0_136 = arith.constant 0 : index
    %422 = vector.load %arg7[%c56_135, %c0_136] : memref<96x256xf32, #tpu.memory_space<vmem>>, vector<8x128xf32>
    %423 = vector.extract_strided_slice %416 {offsets = [0, 0], sizes = [8, 128], strides = [1, 1]} : vector<8x256xf32> to vector<8x128xf32>
    %424 = arith.addf %422, %423 : vector<8x128xf32>
    %425 = arith.negf %424 : vector<8x128xf32>
    %426 = math.exp %425 : vector<8x128xf32>
    %cst_137 = arith.constant 1.000000e+00 : f32
    %427 = vector.broadcast %cst_137 : f32 to vector<8x128xf32>
    %428 = arith.addf %427, %426 : vector<8x128xf32>
    %429 = arith.divf %427, %428 : vector<8x128xf32>
    %430 = math.tanh %424 : vector<8x128xf32>
    %431 = vector.extract_strided_slice %429 {offsets = [0, 32], sizes = [8, 32], strides = [1, 1]} : vector<8x128xf32> to vector<8x32xf32>
    %432 = arith.mulf %431, %386 : vector<8x32xf32>
    %433 = vector.extract_strided_slice %429 {offsets = [0, 0], sizes = [8, 32], strides = [1, 1]} : vector<8x128xf32> to vector<8x32xf32>
    %434 = vector.extract_strided_slice %430 {offsets = [0, 64], sizes = [8, 32], strides = [1, 1]} : vector<8x128xf32> to vector<8x32xf32>
    %435 = arith.mulf %433, %434 : vector<8x32xf32>
    %436 = arith.addf %432, %435 : vector<8x32xf32>
    %437 = vector.extract_strided_slice %429 {offsets = [0, 96], sizes = [8, 32], strides = [1, 1]} : vector<8x128xf32> to vector<8x32xf32>
    %438 = math.tanh %436 : vector<8x32xf32>
    %439 = arith.mulf %437, %438 : vector<8x32xf32>
    %cst_138 = arith.constant 0.000000e+00 : f32
    %440 = vector.broadcast %cst_138 : f32 to vector<8x32xf32>
    %441 = arith.select %421, %439, %440 : vector<8x32xi1>, vector<8x32xf32>
    %c56_139 = arith.constant 56 : index
    %c0_140 = arith.constant 0 : index
    %442 = vector.load %arg5[%c56_139, %c0_140] : memref<96x64xf32, #tpu.memory_space<vmem>>, vector<8x32xf32>
    tpu.vector_store %arg5[%c56_139, %c0_140], %441 {strides = array<i32>} : memref<96x64xf32, #tpu.memory_space<vmem>>, vector<8x32xf32>,
    %443 = arith.select %421, %439, %385 : vector<8x32xi1>, vector<8x32xf32>
    %444 = arith.select %421, %436, %386 : vector<8x32xi1>, vector<8x32xf32>
    %c32_141 = arith.constant 32 : index
    %c0_142 = arith.constant 0 : index
    %445 = vector.load %arg1[%c32_141, %c0_142] : memref<96x1xf32, #tpu.memory_space<vmem>>, vector<8x1xf32>
    %446 = vector.shape_cast %445 : vector<8x1xf32> to vector<8x1xf32>
    %447 = vector.broadcast %446 : vector<8x1xf32> to vector<8x32xf32>
    %cst_143 = arith.constant 0.000000e+00 : f32
    %448 = vector.broadcast %cst_143 : f32 to vector<8x32xf32>
    %449 = arith.cmpf ogt, %447, %448 : vector<8x32xf32>
    %c32_144 = arith.constant 32 : index
    %c128_145 = arith.constant 128 : index
    %450 = vector.load %arg7[%c32_144, %c128_145] : memref<96x256xf32, #tpu.memory_space<vmem>>, vector<8x128xf32>
    %451 = vector.extract_strided_slice %416 {offsets = [0, 128], sizes = [8, 128], strides = [1, 1]} : vector<8x256xf32> to vector<8x128xf32>
    %452 = arith.addf %450, %451 : vector<8x128xf32>
    %453 = arith.negf %452 : vector<8x128xf32>
    %454 = math.exp %453 : vector<8x128xf32>
    %cst_146 = arith.constant 1.000000e+00 : f32
    %455 = vector.broadcast %cst_146 : f32 to vector<8x128xf32>
    %456 = arith.addf %455, %454 : vector<8x128xf32>
    %457 = arith.divf %455, %456 : vector<8x128xf32>
    %458 = math.tanh %452 : vector<8x128xf32>
    %459 = vector.extract_strided_slice %457 {offsets = [0, 32], sizes = [8, 32], strides = [1, 1]} : vector<8x128xf32> to vector<8x32xf32>
    %460 = arith.mulf %459, %414 : vector<8x32xf32>
    %461 = vector.extract_strided_slice %457 {offsets = [0, 0], sizes = [8, 32], strides = [1, 1]} : vector<8x128xf32> to vector<8x32xf32>
    %462 = vector.extract_strided_slice %458 {offsets = [0, 64], sizes = [8, 32], strides = [1, 1]} : vector<8x128xf32> to vector<8x32xf32>
    %463 = arith.mulf %461, %462 : vector<8x32xf32>
    %464 = arith.addf %460, %463 : vector<8x32xf32>
    %465 = vector.extract_strided_slice %457 {offsets = [0, 96], sizes = [8, 32], strides = [1, 1]} : vector<8x128xf32> to vector<8x32xf32>
    %466 = math.tanh %464 : vector<8x32xf32>
    %467 = arith.mulf %465, %466 : vector<8x32xf32>
    %cst_147 = arith.constant 0.000000e+00 : f32
    %468 = vector.broadcast %cst_147 : f32 to vector<8x32xf32>
    %469 = arith.select %449, %467, %468 : vector<8x32xi1>, vector<8x32xf32>
    %c32_148 = arith.constant 32 : index
    %c32_149 = arith.constant 32 : index
    %470 = vector.load %arg5[%c32_148, %c32_149] : memref<96x64xf32, #tpu.memory_space<vmem>>, vector<8x32xf32>
    tpu.vector_store %arg5[%c32_148, %c32_149], %469 {strides = array<i32>} : memref<96x64xf32, #tpu.memory_space<vmem>>, vector<8x32xf32>,
    %471 = arith.select %449, %467, %413 : vector<8x32xi1>, vector<8x32xf32>
    %472 = arith.select %449, %464, %414 : vector<8x32xi1>, vector<8x32xf32>
    %473 = tpu.concatenate %443, %471 in 1 : vector<8x32xf32>, vector<8x32xf32> -> vector<8x64xf32>
    %cst_150 = arith.constant dense<0.000000e+00> : vector<8x256xf32>
    %474 = tpu.matmul %473, %7, %cst_150 {dimension_numbers = #tpu.dot_dimension_numbers<[1], [0], [0], [1], [0, 0, 1, 1], [], []>} : vector<8x64xf32>, vector<64x256xf32>, vector<8x256xf32> -> vector<8x256xf32>
    %c64_151 = arith.constant 64 : index
    %c0_152 = arith.constant 0 : index
    %475 = vector.load %arg1[%c64_151, %c0_152] : memref<96x1xf32, #tpu.memory_space<vmem>>, vector<8x1xf32>
    %476 = vector.shape_cast %475 : vector<8x1xf32> to vector<8x1xf32>
    %477 = vector.broadcast %476 : vector<8x1xf32> to vector<8x32xf32>
    %cst_153 = arith.constant 0.000000e+00 : f32
    %478 = vector.broadcast %cst_153 : f32 to vector<8x32xf32>
    %479 = arith.cmpf ogt, %477, %478 : vector<8x32xf32>
    %c64_154 = arith.constant 64 : index
    %c0_155 = arith.constant 0 : index
    %480 = vector.load %arg7[%c64_154, %c0_155] : memref<96x256xf32, #tpu.memory_space<vmem>>, vector<8x128xf32>
    %481 = vector.extract_strided_slice %474 {offsets = [0, 0], sizes = [8, 128], strides = [1, 1]} : vector<8x256xf32> to vector<8x128xf32>
    %482 = arith.addf %480, %481 : vector<8x128xf32>
    %483 = arith.negf %482 : vector<8x128xf32>
    %484 = math.exp %483 : vector<8x128xf32>
    %cst_156 = arith.constant 1.000000e+00 : f32
    %485 = vector.broadcast %cst_156 : f32 to vector<8x128xf32>
    %486 = arith.addf %485, %484 : vector<8x128xf32>
    %487 = arith.divf %485, %486 : vector<8x128xf32>
    %488 = math.tanh %482 : vector<8x128xf32>
    %489 = vector.extract_strided_slice %487 {offsets = [0, 32], sizes = [8, 32], strides = [1, 1]} : vector<8x128xf32> to vector<8x32xf32>
    %490 = arith.mulf %489, %444 : vector<8x32xf32>
    %491 = vector.extract_strided_slice %487 {offsets = [0, 0], sizes = [8, 32], strides = [1, 1]} : vector<8x128xf32> to vector<8x32xf32>
    %492 = vector.extract_strided_slice %488 {offsets = [0, 64], sizes = [8, 32], strides = [1, 1]} : vector<8x128xf32> to vector<8x32xf32>
    %493 = arith.mulf %491, %492 : vector<8x32xf32>
    %494 = arith.addf %490, %493 : vector<8x32xf32>
    %495 = vector.extract_strided_slice %487 {offsets = [0, 96], sizes = [8, 32], strides = [1, 1]} : vector<8x128xf32> to vector<8x32xf32>
    %496 = math.tanh %494 : vector<8x32xf32>
    %497 = arith.mulf %495, %496 : vector<8x32xf32>
    %cst_157 = arith.constant 0.000000e+00 : f32
    %498 = vector.broadcast %cst_157 : f32 to vector<8x32xf32>
    %499 = arith.select %479, %497, %498 : vector<8x32xi1>, vector<8x32xf32>
    %c64_158 = arith.constant 64 : index
    %c0_159 = arith.constant 0 : index
    %500 = vector.load %arg5[%c64_158, %c0_159] : memref<96x64xf32, #tpu.memory_space<vmem>>, vector<8x32xf32>
    tpu.vector_store %arg5[%c64_158, %c0_159], %499 {strides = array<i32>} : memref<96x64xf32, #tpu.memory_space<vmem>>, vector<8x32xf32>,
    %501 = arith.select %479, %497, %443 : vector<8x32xi1>, vector<8x32xf32>
    %502 = arith.select %479, %494, %444 : vector<8x32xi1>, vector<8x32xf32>
    %c24_160 = arith.constant 24 : index
    %c0_161 = arith.constant 0 : index
    %503 = vector.load %arg1[%c24_160, %c0_161] : memref<96x1xf32, #tpu.memory_space<vmem>>, vector<8x1xf32>
    %504 = vector.shape_cast %503 : vector<8x1xf32> to vector<8x1xf32>
    %505 = vector.broadcast %504 : vector<8x1xf32> to vector<8x32xf32>
    %cst_162 = arith.constant 0.000000e+00 : f32
    %506 = vector.broadcast %cst_162 : f32 to vector<8x32xf32>
    %507 = arith.cmpf ogt, %505, %506 : vector<8x32xf32>
    %c24_163 = arith.constant 24 : index
    %c128_164 = arith.constant 128 : index
    %508 = vector.load %arg7[%c24_163, %c128_164] : memref<96x256xf32, #tpu.memory_space<vmem>>, vector<8x128xf32>
    %509 = vector.extract_strided_slice %474 {offsets = [0, 128], sizes = [8, 128], strides = [1, 1]} : vector<8x256xf32> to vector<8x128xf32>
    %510 = arith.addf %508, %509 : vector<8x128xf32>
    %511 = arith.negf %510 : vector<8x128xf32>
    %512 = math.exp %511 : vector<8x128xf32>
    %cst_165 = arith.constant 1.000000e+00 : f32
    %513 = vector.broadcast %cst_165 : f32 to vector<8x128xf32>
    %514 = arith.addf %513, %512 : vector<8x128xf32>
    %515 = arith.divf %513, %514 : vector<8x128xf32>
    %516 = math.tanh %510 : vector<8x128xf32>
    %517 = vector.extract_strided_slice %515 {offsets = [0, 32], sizes = [8, 32], strides = [1, 1]} : vector<8x128xf32> to vector<8x32xf32>
    %518 = arith.mulf %517, %472 : vector<8x32xf32>
    %519 = vector.extract_strided_slice %515 {offsets = [0, 0], sizes = [8, 32], strides = [1, 1]} : vector<8x128xf32> to vector<8x32xf32>
    %520 = vector.extract_strided_slice %516 {offsets = [0, 64], sizes = [8, 32], strides = [1, 1]} : vector<8x128xf32> to vector<8x32xf32>
    %521 = arith.mulf %519, %520 : vector<8x32xf32>
    %522 = arith.addf %518, %521 : vector<8x32xf32>
    %523 = vector.extract_strided_slice %515 {offsets = [0, 96], sizes = [8, 32], strides = [1, 1]} : vector<8x128xf32> to vector<8x32xf32>
    %524 = math.tanh %522 : vector<8x32xf32>
    %525 = arith.mulf %523, %524 : vector<8x32xf32>
    %cst_166 = arith.constant 0.000000e+00 : f32
    %526 = vector.broadcast %cst_166 : f32 to vector<8x32xf32>
    %527 = arith.select %507, %525, %526 : vector<8x32xi1>, vector<8x32xf32>
    %c24_167 = arith.constant 24 : index
    %c32_168 = arith.constant 32 : index
    %528 = vector.load %arg5[%c24_167, %c32_168] : memref<96x64xf32, #tpu.memory_space<vmem>>, vector<8x32xf32>
    tpu.vector_store %arg5[%c24_167, %c32_168], %527 {strides = array<i32>} : memref<96x64xf32, #tpu.memory_space<vmem>>, vector<8x32xf32>,
    %529 = arith.select %507, %525, %471 : vector<8x32xi1>, vector<8x32xf32>
    %530 = arith.select %507, %522, %472 : vector<8x32xi1>, vector<8x32xf32>
    %531 = tpu.concatenate %501, %529 in 1 : vector<8x32xf32>, vector<8x32xf32> -> vector<8x64xf32>
    %cst_169 = arith.constant dense<0.000000e+00> : vector<8x256xf32>
    %532 = tpu.matmul %531, %7, %cst_169 {dimension_numbers = #tpu.dot_dimension_numbers<[1], [0], [0], [1], [0, 0, 1, 1], [], []>} : vector<8x64xf32>, vector<64x256xf32>, vector<8x256xf32> -> vector<8x256xf32>
    %c72_170 = arith.constant 72 : index
    %c0_171 = arith.constant 0 : index
    %533 = vector.load %arg1[%c72_170, %c0_171] : memref<96x1xf32, #tpu.memory_space<vmem>>, vector<8x1xf32>
    %534 = vector.shape_cast %533 : vector<8x1xf32> to vector<8x1xf32>
    %535 = vector.broadcast %534 : vector<8x1xf32> to vector<8x32xf32>
    %cst_172 = arith.constant 0.000000e+00 : f32
    %536 = vector.broadcast %cst_172 : f32 to vector<8x32xf32>
    %537 = arith.cmpf ogt, %535, %536 : vector<8x32xf32>
    %c72_173 = arith.constant 72 : index
    %c0_174 = arith.constant 0 : index
    %538 = vector.load %arg7[%c72_173, %c0_174] : memref<96x256xf32, #tpu.memory_space<vmem>>, vector<8x128xf32>
    %539 = vector.extract_strided_slice %532 {offsets = [0, 0], sizes = [8, 128], strides = [1, 1]} : vector<8x256xf32> to vector<8x128xf32>
    %540 = arith.addf %538, %539 : vector<8x128xf32>
    %541 = arith.negf %540 : vector<8x128xf32>
    %542 = math.exp %541 : vector<8x128xf32>
    %cst_175 = arith.constant 1.000000e+00 : f32
    %543 = vector.broadcast %cst_175 : f32 to vector<8x128xf32>
    %544 = arith.addf %543, %542 : vector<8x128xf32>
    %545 = arith.divf %543, %544 : vector<8x128xf32>
    %546 = math.tanh %540 : vector<8x128xf32>
    %547 = vector.extract_strided_slice %545 {offsets = [0, 32], sizes = [8, 32], strides = [1, 1]} : vector<8x128xf32> to vector<8x32xf32>
    %548 = arith.mulf %547, %502 : vector<8x32xf32>
    %549 = vector.extract_strided_slice %545 {offsets = [0, 0], sizes = [8, 32], strides = [1, 1]} : vector<8x128xf32> to vector<8x32xf32>
    %550 = vector.extract_strided_slice %546 {offsets = [0, 64], sizes = [8, 32], strides = [1, 1]} : vector<8x128xf32> to vector<8x32xf32>
    %551 = arith.mulf %549, %550 : vector<8x32xf32>
    %552 = arith.addf %548, %551 : vector<8x32xf32>
    %553 = vector.extract_strided_slice %545 {offsets = [0, 96], sizes = [8, 32], strides = [1, 1]} : vector<8x128xf32> to vector<8x32xf32>
    %554 = math.tanh %552 : vector<8x32xf32>
    %555 = arith.mulf %553, %554 : vector<8x32xf32>
    %cst_176 = arith.constant 0.000000e+00 : f32
    %556 = vector.broadcast %cst_176 : f32 to vector<8x32xf32>
    %557 = arith.select %537, %555, %556 : vector<8x32xi1>, vector<8x32xf32>
    %c72_177 = arith.constant 72 : index
    %c0_178 = arith.constant 0 : index
    %558 = vector.load %arg5[%c72_177, %c0_178] : memref<96x64xf32, #tpu.memory_space<vmem>>, vector<8x32xf32>
    tpu.vector_store %arg5[%c72_177, %c0_178], %557 {strides = array<i32>} : memref<96x64xf32, #tpu.memory_space<vmem>>, vector<8x32xf32>,
    %559 = arith.select %537, %555, %501 : vector<8x32xi1>, vector<8x32xf32>
    %560 = arith.select %537, %552, %502 : vector<8x32xi1>, vector<8x32xf32>
    %c16_179 = arith.constant 16 : index
    %c0_180 = arith.constant 0 : index
    %561 = vector.load %arg1[%c16_179, %c0_180] : memref<96x1xf32, #tpu.memory_space<vmem>>, vector<8x1xf32>
    %562 = vector.shape_cast %561 : vector<8x1xf32> to vector<8x1xf32>
    %563 = vector.broadcast %562 : vector<8x1xf32> to vector<8x32xf32>
    %cst_181 = arith.constant 0.000000e+00 : f32
    %564 = vector.broadcast %cst_181 : f32 to vector<8x32xf32>
    %565 = arith.cmpf ogt, %563, %564 : vector<8x32xf32>
    %c16_182 = arith.constant 16 : index
    %c128_183 = arith.constant 128 : index
    %566 = vector.load %arg7[%c16_182, %c128_183] : memref<96x256xf32, #tpu.memory_space<vmem>>, vector<8x128xf32>
    %567 = vector.extract_strided_slice %532 {offsets = [0, 128], sizes = [8, 128], strides = [1, 1]} : vector<8x256xf32> to vector<8x128xf32>
    %568 = arith.addf %566, %567 : vector<8x128xf32>
    %569 = arith.negf %568 : vector<8x128xf32>
    %570 = math.exp %569 : vector<8x128xf32>
    %cst_184 = arith.constant 1.000000e+00 : f32
    %571 = vector.broadcast %cst_184 : f32 to vector<8x128xf32>
    %572 = arith.addf %571, %570 : vector<8x128xf32>
    %573 = arith.divf %571, %572 : vector<8x128xf32>
    %574 = math.tanh %568 : vector<8x128xf32>
    %575 = vector.extract_strided_slice %573 {offsets = [0, 32], sizes = [8, 32], strides = [1, 1]} : vector<8x128xf32> to vector<8x32xf32>
    %576 = arith.mulf %575, %530 : vector<8x32xf32>
    %577 = vector.extract_strided_slice %573 {offsets = [0, 0], sizes = [8, 32], strides = [1, 1]} : vector<8x128xf32> to vector<8x32xf32>
    %578 = vector.extract_strided_slice %574 {offsets = [0, 64], sizes = [8, 32], strides = [1, 1]} : vector<8x128xf32> to vector<8x32xf32>
    %579 = arith.mulf %577, %578 : vector<8x32xf32>
    %580 = arith.addf %576, %579 : vector<8x32xf32>
    %581 = vector.extract_strided_slice %573 {offsets = [0, 96], sizes = [8, 32], strides = [1, 1]} : vector<8x128xf32> to vector<8x32xf32>
    %582 = math.tanh %580 : vector<8x32xf32>
    %583 = arith.mulf %581, %582 : vector<8x32xf32>
    %cst_185 = arith.constant 0.000000e+00 : f32
    %584 = vector.broadcast %cst_185 : f32 to vector<8x32xf32>
    %585 = arith.select %565, %583, %584 : vector<8x32xi1>, vector<8x32xf32>
    %c16_186 = arith.constant 16 : index
    %c32_187 = arith.constant 32 : index
    %586 = vector.load %arg5[%c16_186, %c32_187] : memref<96x64xf32, #tpu.memory_space<vmem>>, vector<8x32xf32>
    tpu.vector_store %arg5[%c16_186, %c32_187], %585 {strides = array<i32>} : memref<96x64xf32, #tpu.memory_space<vmem>>, vector<8x32xf32>,
    %587 = arith.select %565, %583, %529 : vector<8x32xi1>, vector<8x32xf32>
    %588 = arith.select %565, %580, %530 : vector<8x32xi1>, vector<8x32xf32>
    %589 = tpu.concatenate %559, %587 in 1 : vector<8x32xf32>, vector<8x32xf32> -> vector<8x64xf32>
    %cst_188 = arith.constant dense<0.000000e+00> : vector<8x256xf32>
    %590 = tpu.matmul %589, %7, %cst_188 {dimension_numbers = #tpu.dot_dimension_numbers<[1], [0], [0], [1], [0, 0, 1, 1], [], []>} : vector<8x64xf32>, vector<64x256xf32>, vector<8x256xf32> -> vector<8x256xf32>
    %c80_189 = arith.constant 80 : index
    %c0_190 = arith.constant 0 : index
    %591 = vector.load %arg1[%c80_189, %c0_190] : memref<96x1xf32, #tpu.memory_space<vmem>>, vector<8x1xf32>
    %592 = vector.shape_cast %591 : vector<8x1xf32> to vector<8x1xf32>
    %593 = vector.broadcast %592 : vector<8x1xf32> to vector<8x32xf32>
    %cst_191 = arith.constant 0.000000e+00 : f32
    %594 = vector.broadcast %cst_191 : f32 to vector<8x32xf32>
    %595 = arith.cmpf ogt, %593, %594 : vector<8x32xf32>
    %c80_192 = arith.constant 80 : index
    %c0_193 = arith.constant 0 : index
    %596 = vector.load %arg7[%c80_192, %c0_193] : memref<96x256xf32, #tpu.memory_space<vmem>>, vector<8x128xf32>
    %597 = vector.extract_strided_slice %590 {offsets = [0, 0], sizes = [8, 128], strides = [1, 1]} : vector<8x256xf32> to vector<8x128xf32>
    %598 = arith.addf %596, %597 : vector<8x128xf32>
    %599 = arith.negf %598 : vector<8x128xf32>
    %600 = math.exp %599 : vector<8x128xf32>
    %cst_194 = arith.constant 1.000000e+00 : f32
    %601 = vector.broadcast %cst_194 : f32 to vector<8x128xf32>
    %602 = arith.addf %601, %600 : vector<8x128xf32>
    %603 = arith.divf %601, %602 : vector<8x128xf32>
    %604 = math.tanh %598 : vector<8x128xf32>
    %605 = vector.extract_strided_slice %603 {offsets = [0, 32], sizes = [8, 32], strides = [1, 1]} : vector<8x128xf32> to vector<8x32xf32>
    %606 = arith.mulf %605, %560 : vector<8x32xf32>
    %607 = vector.extract_strided_slice %603 {offsets = [0, 0], sizes = [8, 32], strides = [1, 1]} : vector<8x128xf32> to vector<8x32xf32>
    %608 = vector.extract_strided_slice %604 {offsets = [0, 64], sizes = [8, 32], strides = [1, 1]} : vector<8x128xf32> to vector<8x32xf32>
    %609 = arith.mulf %607, %608 : vector<8x32xf32>
    %610 = arith.addf %606, %609 : vector<8x32xf32>
    %611 = vector.extract_strided_slice %603 {offsets = [0, 96], sizes = [8, 32], strides = [1, 1]} : vector<8x128xf32> to vector<8x32xf32>
    %612 = math.tanh %610 : vector<8x32xf32>
    %613 = arith.mulf %611, %612 : vector<8x32xf32>
    %cst_195 = arith.constant 0.000000e+00 : f32
    %614 = vector.broadcast %cst_195 : f32 to vector<8x32xf32>
    %615 = arith.select %595, %613, %614 : vector<8x32xi1>, vector<8x32xf32>
    %c80_196 = arith.constant 80 : index
    %c0_197 = arith.constant 0 : index
    %616 = vector.load %arg5[%c80_196, %c0_197] : memref<96x64xf32, #tpu.memory_space<vmem>>, vector<8x32xf32>
    tpu.vector_store %arg5[%c80_196, %c0_197], %615 {strides = array<i32>} : memref<96x64xf32, #tpu.memory_space<vmem>>, vector<8x32xf32>,
    %617 = arith.select %595, %613, %559 : vector<8x32xi1>, vector<8x32xf32>
    %618 = arith.select %595, %610, %560 : vector<8x32xi1>, vector<8x32xf32>
    %c8_198 = arith.constant 8 : index
    %c0_199 = arith.constant 0 : index
    %619 = vector.load %arg1[%c8_198, %c0_199] : memref<96x1xf32, #tpu.memory_space<vmem>>, vector<8x1xf32>
    %620 = vector.shape_cast %619 : vector<8x1xf32> to vector<8x1xf32>
    %621 = vector.broadcast %620 : vector<8x1xf32> to vector<8x32xf32>
    %cst_200 = arith.constant 0.000000e+00 : f32
    %622 = vector.broadcast %cst_200 : f32 to vector<8x32xf32>
    %623 = arith.cmpf ogt, %621, %622 : vector<8x32xf32>
    %c8_201 = arith.constant 8 : index
    %c128_202 = arith.constant 128 : index
    %624 = vector.load %arg7[%c8_201, %c128_202] : memref<96x256xf32, #tpu.memory_space<vmem>>, vector<8x128xf32>
    %625 = vector.extract_strided_slice %590 {offsets = [0, 128], sizes = [8, 128], strides = [1, 1]} : vector<8x256xf32> to vector<8x128xf32>
    %626 = arith.addf %624, %625 : vector<8x128xf32>
    %627 = arith.negf %626 : vector<8x128xf32>
    %628 = math.exp %627 : vector<8x128xf32>
    %cst_203 = arith.constant 1.000000e+00 : f32
    %629 = vector.broadcast %cst_203 : f32 to vector<8x128xf32>
    %630 = arith.addf %629, %628 : vector<8x128xf32>
    %631 = arith.divf %629, %630 : vector<8x128xf32>
    %632 = math.tanh %626 : vector<8x128xf32>
    %633 = vector.extract_strided_slice %631 {offsets = [0, 32], sizes = [8, 32], strides = [1, 1]} : vector<8x128xf32> to vector<8x32xf32>
    %634 = arith.mulf %633, %588 : vector<8x32xf32>
    %635 = vector.extract_strided_slice %631 {offsets = [0, 0], sizes = [8, 32], strides = [1, 1]} : vector<8x128xf32> to vector<8x32xf32>
    %636 = vector.extract_strided_slice %632 {offsets = [0, 64], sizes = [8, 32], strides = [1, 1]} : vector<8x128xf32> to vector<8x32xf32>
    %637 = arith.mulf %635, %636 : vector<8x32xf32>
    %638 = arith.addf %634, %637 : vector<8x32xf32>
    %639 = vector.extract_strided_slice %631 {offsets = [0, 96], sizes = [8, 32], strides = [1, 1]} : vector<8x128xf32> to vector<8x32xf32>
    %640 = math.tanh %638 : vector<8x32xf32>
    %641 = arith.mulf %639, %640 : vector<8x32xf32>
    %cst_204 = arith.constant 0.000000e+00 : f32
    %642 = vector.broadcast %cst_204 : f32 to vector<8x32xf32>
    %643 = arith.select %623, %641, %642 : vector<8x32xi1>, vector<8x32xf32>
    %c8_205 = arith.constant 8 : index
    %c32_206 = arith.constant 32 : index
    %644 = vector.load %arg5[%c8_205, %c32_206] : memref<96x64xf32, #tpu.memory_space<vmem>>, vector<8x32xf32>
    tpu.vector_store %arg5[%c8_205, %c32_206], %643 {strides = array<i32>} : memref<96x64xf32, #tpu.memory_space<vmem>>, vector<8x32xf32>,
    %645 = arith.select %623, %641, %587 : vector<8x32xi1>, vector<8x32xf32>
    %646 = arith.select %623, %638, %588 : vector<8x32xi1>, vector<8x32xf32>
    %647 = tpu.concatenate %617, %645 in 1 : vector<8x32xf32>, vector<8x32xf32> -> vector<8x64xf32>
    %cst_207 = arith.constant dense<0.000000e+00> : vector<8x256xf32>
    %648 = tpu.matmul %647, %7, %cst_207 {dimension_numbers = #tpu.dot_dimension_numbers<[1], [0], [0], [1], [0, 0, 1, 1], [], []>} : vector<8x64xf32>, vector<64x256xf32>, vector<8x256xf32> -> vector<8x256xf32>
    %c88_208 = arith.constant 88 : index
    %c0_209 = arith.constant 0 : index
    %649 = vector.load %arg1[%c88_208, %c0_209] : memref<96x1xf32, #tpu.memory_space<vmem>>, vector<8x1xf32>
    %650 = vector.shape_cast %649 : vector<8x1xf32> to vector<8x1xf32>
    %651 = vector.broadcast %650 : vector<8x1xf32> to vector<8x32xf32>
    %cst_210 = arith.constant 0.000000e+00 : f32
    %652 = vector.broadcast %cst_210 : f32 to vector<8x32xf32>
    %653 = arith.cmpf ogt, %651, %652 : vector<8x32xf32>
    %c88_211 = arith.constant 88 : index
    %c0_212 = arith.constant 0 : index
    %654 = vector.load %arg7[%c88_211, %c0_212] : memref<96x256xf32, #tpu.memory_space<vmem>>, vector<8x128xf32>
    %655 = vector.extract_strided_slice %648 {offsets = [0, 0], sizes = [8, 128], strides = [1, 1]} : vector<8x256xf32> to vector<8x128xf32>
    %656 = arith.addf %654, %655 : vector<8x128xf32>
    %657 = arith.negf %656 : vector<8x128xf32>
    %658 = math.exp %657 : vector<8x128xf32>
    %cst_213 = arith.constant 1.000000e+00 : f32
    %659 = vector.broadcast %cst_213 : f32 to vector<8x128xf32>
    %660 = arith.addf %659, %658 : vector<8x128xf32>
    %661 = arith.divf %659, %660 : vector<8x128xf32>
    %662 = math.tanh %656 : vector<8x128xf32>
    %663 = vector.extract_strided_slice %661 {offsets = [0, 32], sizes = [8, 32], strides = [1, 1]} : vector<8x128xf32> to vector<8x32xf32>
    %664 = arith.mulf %663, %618 : vector<8x32xf32>
    %665 = vector.extract_strided_slice %661 {offsets = [0, 0], sizes = [8, 32], strides = [1, 1]} : vector<8x128xf32> to vector<8x32xf32>
    %666 = vector.extract_strided_slice %662 {offsets = [0, 64], sizes = [8, 32], strides = [1, 1]} : vector<8x128xf32> to vector<8x32xf32>
    %667 = arith.mulf %665, %666 : vector<8x32xf32>
    %668 = arith.addf %664, %667 : vector<8x32xf32>
    %669 = vector.extract_strided_slice %661 {offsets = [0, 96], sizes = [8, 32], strides = [1, 1]} : vector<8x128xf32> to vector<8x32xf32>
    %670 = math.tanh %668 : vector<8x32xf32>
    %671 = arith.mulf %669, %670 : vector<8x32xf32>
    %cst_214 = arith.constant 0.000000e+00 : f32
    %672 = vector.broadcast %cst_214 : f32 to vector<8x32xf32>
    %673 = arith.select %653, %671, %672 : vector<8x32xi1>, vector<8x32xf32>
    %c88_215 = arith.constant 88 : index
    %c0_216 = arith.constant 0 : index
    %674 = vector.load %arg5[%c88_215, %c0_216] : memref<96x64xf32, #tpu.memory_space<vmem>>, vector<8x32xf32>
    tpu.vector_store %arg5[%c88_215, %c0_216], %673 {strides = array<i32>} : memref<96x64xf32, #tpu.memory_space<vmem>>, vector<8x32xf32>,
    %675 = arith.select %653, %671, %617 : vector<8x32xi1>, vector<8x32xf32>
    %c0_217 = arith.constant 0 : index
    %c0_218 = arith.constant 0 : index
    %676 = vector.load %arg1[%c0_217, %c0_218] : memref<96x1xf32, #tpu.memory_space<vmem>>, vector<8x1xf32>
    %677 = vector.shape_cast %676 : vector<8x1xf32> to vector<8x1xf32>
    %678 = vector.broadcast %677 : vector<8x1xf32> to vector<8x32xf32>
    %cst_219 = arith.constant 0.000000e+00 : f32
    %679 = vector.broadcast %cst_219 : f32 to vector<8x32xf32>
    %680 = arith.cmpf ogt, %678, %679 : vector<8x32xf32>
    %c0_220 = arith.constant 0 : index
    %c128_221 = arith.constant 128 : index
    %681 = vector.load %arg7[%c0_220, %c128_221] : memref<96x256xf32, #tpu.memory_space<vmem>>, vector<8x128xf32>
    %682 = vector.extract_strided_slice %648 {offsets = [0, 128], sizes = [8, 128], strides = [1, 1]} : vector<8x256xf32> to vector<8x128xf32>
    %683 = arith.addf %681, %682 : vector<8x128xf32>
    %684 = arith.negf %683 : vector<8x128xf32>
    %685 = math.exp %684 : vector<8x128xf32>
    %cst_222 = arith.constant 1.000000e+00 : f32
    %686 = vector.broadcast %cst_222 : f32 to vector<8x128xf32>
    %687 = arith.addf %686, %685 : vector<8x128xf32>
    %688 = arith.divf %686, %687 : vector<8x128xf32>
    %689 = math.tanh %683 : vector<8x128xf32>
    %690 = vector.extract_strided_slice %688 {offsets = [0, 32], sizes = [8, 32], strides = [1, 1]} : vector<8x128xf32> to vector<8x32xf32>
    %691 = arith.mulf %690, %646 : vector<8x32xf32>
    %692 = vector.extract_strided_slice %688 {offsets = [0, 0], sizes = [8, 32], strides = [1, 1]} : vector<8x128xf32> to vector<8x32xf32>
    %693 = vector.extract_strided_slice %689 {offsets = [0, 64], sizes = [8, 32], strides = [1, 1]} : vector<8x128xf32> to vector<8x32xf32>
    %694 = arith.mulf %692, %693 : vector<8x32xf32>
    %695 = arith.addf %691, %694 : vector<8x32xf32>
    %696 = vector.extract_strided_slice %688 {offsets = [0, 96], sizes = [8, 32], strides = [1, 1]} : vector<8x128xf32> to vector<8x32xf32>
    %697 = math.tanh %695 : vector<8x32xf32>
    %698 = arith.mulf %696, %697 : vector<8x32xf32>
    %cst_223 = arith.constant 0.000000e+00 : f32
    %699 = vector.broadcast %cst_223 : f32 to vector<8x32xf32>
    %700 = arith.select %680, %698, %699 : vector<8x32xi1>, vector<8x32xf32>
    %c0_224 = arith.constant 0 : index
    %c32_225 = arith.constant 32 : index
    %701 = vector.load %arg5[%c0_224, %c32_225] : memref<96x64xf32, #tpu.memory_space<vmem>>, vector<8x32xf32>
    tpu.vector_store %arg5[%c0_224, %c32_225], %700 {strides = array<i32>} : memref<96x64xf32, #tpu.memory_space<vmem>>, vector<8x32xf32>,
    %c0_226 = arith.constant 0 : index
    %c0_227 = arith.constant 0 : index
    %702 = vector.load %arg6[%c0_226, %c0_227] : memref<8x32xf32, #tpu.memory_space<vmem>>, vector<8x32xf32>
    tpu.vector_store %arg6[%c0_226, %c0_227], %675 {strides = array<i32>} : memref<8x32xf32, #tpu.memory_space<vmem>>, vector<8x32xf32>,
    return
  }
}

module attributes {stable_mosaic.version = 11 : i64} {
  func.func @_bilstm_layer_kernel(%arg0: memref<96x64xf32, #tpu.memory_space<vmem>>, %arg1: memref<96x1xf32, #tpu.memory_space<vmem>>, %arg2: memref<64x256xf32, #tpu.memory_space<vmem>>, %arg3: memref<64x256xf32, #tpu.memory_space<vmem>>, %arg4: memref<1x256xf32, #tpu.memory_space<vmem>>, %arg5: memref<96x64xf32, #tpu.memory_space<vmem>>, %arg6: memref<8x32xf32, #tpu.memory_space<vmem>>, %arg7: memref<96x256xf32, #tpu.memory_space<vmem>>) attributes {dimension_semantics = [], scalar_prefetch = 0 : i64, scratch_operands = 1 : i64, tpu.core_type = #tpu.core_type<tc>} {
    %c0 = arith.constant 0 : index
    %c0_0 = arith.constant 0 : index
    %0 = vector.load %arg0[%c0, %c0_0] : memref<96x64xf32, #tpu.memory_space<vmem>>, vector<96x64xf32>
    %c0_1 = arith.constant 0 : index
    %c0_2 = arith.constant 0 : index
    %1 = vector.load %arg2[%c0_1, %c0_2] : memref<64x256xf32, #tpu.memory_space<vmem>>, vector<64x256xf32>
    %cst = arith.constant dense<0.000000e+00> : vector<96x256xf32>
    %2 = tpu.matmul %0, %1, %cst {dimension_numbers = #tpu.dot_dimension_numbers<[1], [0], [0], [1], [0, 0, 1, 1], [], []>} : vector<96x64xf32>, vector<64x256xf32>, vector<96x256xf32> -> vector<96x256xf32>
    %c0_3 = arith.constant 0 : index
    %c0_4 = arith.constant 0 : index
    %3 = vector.load %arg4[%c0_3, %c0_4] : memref<1x256xf32, #tpu.memory_space<vmem>>, vector<1x256xf32>
    %4 = vector.broadcast %3 : vector<1x256xf32> to vector<96x256xf32>
    %5 = arith.addf %2, %4 : vector<96x256xf32>
    %c0_5 = arith.constant 0 : index
    %c0_6 = arith.constant 0 : index
    %6 = vector.load %arg7[%c0_5, %c0_6] : memref<96x256xf32, #tpu.memory_space<vmem>>, vector<96x256xf32>
    tpu.vector_store %arg7[%c0_5, %c0_6], %5 {strides = array<i32>} : memref<96x256xf32, #tpu.memory_space<vmem>>, vector<96x256xf32>,
    %c0_7 = arith.constant 0 : index
    %c0_8 = arith.constant 0 : index
    %7 = vector.load %arg3[%c0_7, %c0_8] : memref<64x256xf32, #tpu.memory_space<vmem>>, vector<64x256xf32>
    %cst_9 = arith.constant 0.000000e+00 : f32
    %8 = vector.broadcast %cst_9 : f32 to vector<8x32xf32>
    %9 = tpu.concatenate %8, %8 in 1 : vector<8x32xf32>, vector<8x32xf32> -> vector<8x64xf32>
    %cst_10 = arith.constant dense<0.000000e+00> : vector<8x256xf32>
    %10 = tpu.matmul %9, %7, %cst_10 {dimension_numbers = #tpu.dot_dimension_numbers<[1], [0], [0], [1], [0, 0, 1, 1], [], []>} : vector<8x64xf32>, vector<64x256xf32>, vector<8x256xf32> -> vector<8x256xf32>
    %c0_11 = arith.constant 0 : index
    %c0_12 = arith.constant 0 : index
    %11 = vector.load %arg1[%c0_11, %c0_12] : memref<96x1xf32, #tpu.memory_space<vmem>>, vector<8x1xf32>
    %12 = vector.shape_cast %11 : vector<8x1xf32> to vector<8x1xf32>
    %13 = vector.broadcast %12 : vector<8x1xf32> to vector<8x32xf32>
    %cst_13 = arith.constant 0.000000e+00 : f32
    %14 = vector.broadcast %cst_13 : f32 to vector<8x32xf32>
    %15 = arith.cmpf ogt, %13, %14 : vector<8x32xf32>
    %c0_14 = arith.constant 0 : index
    %c0_15 = arith.constant 0 : index
    %16 = vector.load %arg7[%c0_14, %c0_15] : memref<96x256xf32, #tpu.memory_space<vmem>>, vector<8x128xf32>
    %17 = vector.extract_strided_slice %10 {offsets = [0, 0], sizes = [8, 128], strides = [1, 1]} : vector<8x256xf32> to vector<8x128xf32>
    %18 = arith.addf %16, %17 : vector<8x128xf32>
    %19 = arith.negf %18 : vector<8x128xf32>
    %20 = math.exp %19 : vector<8x128xf32>
    %cst_16 = arith.constant 1.000000e+00 : f32
    %21 = vector.broadcast %cst_16 : f32 to vector<8x128xf32>
    %22 = arith.addf %21, %20 : vector<8x128xf32>
    %23 = arith.divf %21, %22 : vector<8x128xf32>
    %24 = math.tanh %18 : vector<8x128xf32>
    %25 = vector.extract_strided_slice %23 {offsets = [0, 32], sizes = [8, 32], strides = [1, 1]} : vector<8x128xf32> to vector<8x32xf32>
    %26 = arith.mulf %25, %8 : vector<8x32xf32>
    %27 = vector.extract_strided_slice %23 {offsets = [0, 0], sizes = [8, 32], strides = [1, 1]} : vector<8x128xf32> to vector<8x32xf32>
    %28 = vector.extract_strided_slice %24 {offsets = [0, 64], sizes = [8, 32], strides = [1, 1]} : vector<8x128xf32> to vector<8x32xf32>
    %29 = arith.mulf %27, %28 : vector<8x32xf32>
    %30 = arith.addf %26, %29 : vector<8x32xf32>
    %31 = vector.extract_strided_slice %23 {offsets = [0, 96], sizes = [8, 32], strides = [1, 1]} : vector<8x128xf32> to vector<8x32xf32>
    %32 = math.tanh %30 : vector<8x32xf32>
    %33 = arith.mulf %31, %32 : vector<8x32xf32>
    %cst_17 = arith.constant 0.000000e+00 : f32
    %34 = vector.broadcast %cst_17 : f32 to vector<8x32xf32>
    %35 = arith.select %15, %33, %34 : vector<8x32xi1>, vector<8x32xf32>
    %c0_18 = arith.constant 0 : index
    %c0_19 = arith.constant 0 : index
    %36 = vector.load %arg5[%c0_18, %c0_19] : memref<96x64xf32, #tpu.memory_space<vmem>>, vector<8x32xf32>
    tpu.vector_store %arg5[%c0_18, %c0_19], %35 {strides = array<i32>} : memref<96x64xf32, #tpu.memory_space<vmem>>, vector<8x32xf32>,
    %37 = arith.select %15, %33, %8 : vector<8x32xi1>, vector<8x32xf32>
    %38 = arith.select %15, %30, %8 : vector<8x32xi1>, vector<8x32xf32>
    %c88 = arith.constant 88 : index
    %c0_20 = arith.constant 0 : index
    %39 = vector.load %arg1[%c88, %c0_20] : memref<96x1xf32, #tpu.memory_space<vmem>>, vector<8x1xf32>
    %40 = vector.shape_cast %39 : vector<8x1xf32> to vector<8x1xf32>
    %41 = vector.broadcast %40 : vector<8x1xf32> to vector<8x32xf32>
    %cst_21 = arith.constant 0.000000e+00 : f32
    %42 = vector.broadcast %cst_21 : f32 to vector<8x32xf32>
    %43 = arith.cmpf ogt, %41, %42 : vector<8x32xf32>
    %c88_22 = arith.constant 88 : index
    %c128 = arith.constant 128 : index
    %44 = vector.load %arg7[%c88_22, %c128] : memref<96x256xf32, #tpu.memory_space<vmem>>, vector<8x128xf32>
    %45 = vector.extract_strided_slice %10 {offsets = [0, 128], sizes = [8, 128], strides = [1, 1]} : vector<8x256xf32> to vector<8x128xf32>
    %46 = arith.addf %44, %45 : vector<8x128xf32>
    %47 = arith.negf %46 : vector<8x128xf32>
    %48 = math.exp %47 : vector<8x128xf32>
    %cst_23 = arith.constant 1.000000e+00 : f32
    %49 = vector.broadcast %cst_23 : f32 to vector<8x128xf32>
    %50 = arith.addf %49, %48 : vector<8x128xf32>
    %51 = arith.divf %49, %50 : vector<8x128xf32>
    %52 = math.tanh %46 : vector<8x128xf32>
    %53 = vector.extract_strided_slice %51 {offsets = [0, 32], sizes = [8, 32], strides = [1, 1]} : vector<8x128xf32> to vector<8x32xf32>
    %54 = arith.mulf %53, %8 : vector<8x32xf32>
    %55 = vector.extract_strided_slice %51 {offsets = [0, 0], sizes = [8, 32], strides = [1, 1]} : vector<8x128xf32> to vector<8x32xf32>
    %56 = vector.extract_strided_slice %52 {offsets = [0, 64], sizes = [8, 32], strides = [1, 1]} : vector<8x128xf32> to vector<8x32xf32>
    %57 = arith.mulf %55, %56 : vector<8x32xf32>
    %58 = arith.addf %54, %57 : vector<8x32xf32>
    %59 = vector.extract_strided_slice %51 {offsets = [0, 96], sizes = [8, 32], strides = [1, 1]} : vector<8x128xf32> to vector<8x32xf32>
    %60 = math.tanh %58 : vector<8x32xf32>
    %61 = arith.mulf %59, %60 : vector<8x32xf32>
    %cst_24 = arith.constant 0.000000e+00 : f32
    %62 = vector.broadcast %cst_24 : f32 to vector<8x32xf32>
    %63 = arith.select %43, %61, %62 : vector<8x32xi1>, vector<8x32xf32>
    %c88_25 = arith.constant 88 : index
    %c32 = arith.constant 32 : index
    %64 = vector.load %arg5[%c88_25, %c32] : memref<96x64xf32, #tpu.memory_space<vmem>>, vector<8x32xf32>
    tpu.vector_store %arg5[%c88_25, %c32], %63 {strides = array<i32>} : memref<96x64xf32, #tpu.memory_space<vmem>>, vector<8x32xf32>,
    %65 = arith.select %43, %61, %8 : vector<8x32xi1>, vector<8x32xf32>
    %66 = arith.select %43, %58, %8 : vector<8x32xi1>, vector<8x32xf32>
    %67 = tpu.concatenate %37, %65 in 1 : vector<8x32xf32>, vector<8x32xf32> -> vector<8x64xf32>
    %cst_26 = arith.constant dense<0.000000e+00> : vector<8x256xf32>
    %68 = tpu.matmul %67, %7, %cst_26 {dimension_numbers = #tpu.dot_dimension_numbers<[1], [0], [0], [1], [0, 0, 1, 1], [], []>} : vector<8x64xf32>, vector<64x256xf32>, vector<8x256xf32> -> vector<8x256xf32>
    %c8 = arith.constant 8 : index
    %c0_27 = arith.constant 0 : index
    %69 = vector.load %arg1[%c8, %c0_27] : memref<96x1xf32, #tpu.memory_space<vmem>>, vector<8x1xf32>
    %70 = vector.shape_cast %69 : vector<8x1xf32> to vector<8x1xf32>
    %71 = vector.broadcast %70 : vector<8x1xf32> to vector<8x32xf32>
    %cst_28 = arith.constant 0.000000e+00 : f32
    %72 = vector.broadcast %cst_28 : f32 to vector<8x32xf32>
    %73 = arith.cmpf ogt, %71, %72 : vector<8x32xf32>
    %c8_29 = arith.constant 8 : index
    %c0_30 = arith.constant 0 : index
    %74 = vector.load %arg7[%c8_29, %c0_30] : memref<96x256xf32, #tpu.memory_space<vmem>>, vector<8x128xf32>
    %75 = vector.extract_strided_slice %68 {offsets = [0, 0], sizes = [8, 128], strides = [1, 1]} : vector<8x256xf32> to vector<8x128xf32>
    %76 = arith.addf %74, %75 : vector<8x128xf32>
    %77 = arith.negf %76 : vector<8x128xf32>
    %78 = math.exp %77 : vector<8x128xf32>
    %cst_31 = arith.constant 1.000000e+00 : f32
    %79 = vector.broadcast %cst_31 : f32 to vector<8x128xf32>
    %80 = arith.addf %79, %78 : vector<8x128xf32>
    %81 = arith.divf %79, %80 : vector<8x128xf32>
    %82 = math.tanh %76 : vector<8x128xf32>
    %83 = vector.extract_strided_slice %81 {offsets = [0, 32], sizes = [8, 32], strides = [1, 1]} : vector<8x128xf32> to vector<8x32xf32>
    %84 = arith.mulf %83, %38 : vector<8x32xf32>
    %85 = vector.extract_strided_slice %81 {offsets = [0, 0], sizes = [8, 32], strides = [1, 1]} : vector<8x128xf32> to vector<8x32xf32>
    %86 = vector.extract_strided_slice %82 {offsets = [0, 64], sizes = [8, 32], strides = [1, 1]} : vector<8x128xf32> to vector<8x32xf32>
    %87 = arith.mulf %85, %86 : vector<8x32xf32>
    %88 = arith.addf %84, %87 : vector<8x32xf32>
    %89 = vector.extract_strided_slice %81 {offsets = [0, 96], sizes = [8, 32], strides = [1, 1]} : vector<8x128xf32> to vector<8x32xf32>
    %90 = math.tanh %88 : vector<8x32xf32>
    %91 = arith.mulf %89, %90 : vector<8x32xf32>
    %cst_32 = arith.constant 0.000000e+00 : f32
    %92 = vector.broadcast %cst_32 : f32 to vector<8x32xf32>
    %93 = arith.select %73, %91, %92 : vector<8x32xi1>, vector<8x32xf32>
    %c8_33 = arith.constant 8 : index
    %c0_34 = arith.constant 0 : index
    %94 = vector.load %arg5[%c8_33, %c0_34] : memref<96x64xf32, #tpu.memory_space<vmem>>, vector<8x32xf32>
    tpu.vector_store %arg5[%c8_33, %c0_34], %93 {strides = array<i32>} : memref<96x64xf32, #tpu.memory_space<vmem>>, vector<8x32xf32>,
    %95 = arith.select %73, %91, %37 : vector<8x32xi1>, vector<8x32xf32>
    %96 = arith.select %73, %88, %38 : vector<8x32xi1>, vector<8x32xf32>
    %c80 = arith.constant 80 : index
    %c0_35 = arith.constant 0 : index
    %97 = vector.load %arg1[%c80, %c0_35] : memref<96x1xf32, #tpu.memory_space<vmem>>, vector<8x1xf32>
    %98 = vector.shape_cast %97 : vector<8x1xf32> to vector<8x1xf32>
    %99 = vector.broadcast %98 : vector<8x1xf32> to vector<8x32xf32>
    %cst_36 = arith.constant 0.000000e+00 : f32
    %100 = vector.broadcast %cst_36 : f32 to vector<8x32xf32>
    %101 = arith.cmpf ogt, %99, %100 : vector<8x32xf32>
    %c80_37 = arith.constant 80 : index
    %c128_38 = arith.constant 128 : index
    %102 = vector.load %arg7[%c80_37, %c128_38] : memref<96x256xf32, #tpu.memory_space<vmem>>, vector<8x128xf32>
    %103 = vector.extract_strided_slice %68 {offsets = [0, 128], sizes = [8, 128], strides = [1, 1]} : vector<8x256xf32> to vector<8x128xf32>
    %104 = arith.addf %102, %103 : vector<8x128xf32>
    %105 = arith.negf %104 : vector<8x128xf32>
    %106 = math.exp %105 : vector<8x128xf32>
    %cst_39 = arith.constant 1.000000e+00 : f32
    %107 = vector.broadcast %cst_39 : f32 to vector<8x128xf32>
    %108 = arith.addf %107, %106 : vector<8x128xf32>
    %109 = arith.divf %107, %108 : vector<8x128xf32>
    %110 = math.tanh %104 : vector<8x128xf32>
    %111 = vector.extract_strided_slice %109 {offsets = [0, 32], sizes = [8, 32], strides = [1, 1]} : vector<8x128xf32> to vector<8x32xf32>
    %112 = arith.mulf %111, %66 : vector<8x32xf32>
    %113 = vector.extract_strided_slice %109 {offsets = [0, 0], sizes = [8, 32], strides = [1, 1]} : vector<8x128xf32> to vector<8x32xf32>
    %114 = vector.extract_strided_slice %110 {offsets = [0, 64], sizes = [8, 32], strides = [1, 1]} : vector<8x128xf32> to vector<8x32xf32>
    %115 = arith.mulf %113, %114 : vector<8x32xf32>
    %116 = arith.addf %112, %115 : vector<8x32xf32>
    %117 = vector.extract_strided_slice %109 {offsets = [0, 96], sizes = [8, 32], strides = [1, 1]} : vector<8x128xf32> to vector<8x32xf32>
    %118 = math.tanh %116 : vector<8x32xf32>
    %119 = arith.mulf %117, %118 : vector<8x32xf32>
    %cst_40 = arith.constant 0.000000e+00 : f32
    %120 = vector.broadcast %cst_40 : f32 to vector<8x32xf32>
    %121 = arith.select %101, %119, %120 : vector<8x32xi1>, vector<8x32xf32>
    %c80_41 = arith.constant 80 : index
    %c32_42 = arith.constant 32 : index
    %122 = vector.load %arg5[%c80_41, %c32_42] : memref<96x64xf32, #tpu.memory_space<vmem>>, vector<8x32xf32>
    tpu.vector_store %arg5[%c80_41, %c32_42], %121 {strides = array<i32>} : memref<96x64xf32, #tpu.memory_space<vmem>>, vector<8x32xf32>,
    %123 = arith.select %101, %119, %65 : vector<8x32xi1>, vector<8x32xf32>
    %124 = arith.select %101, %116, %66 : vector<8x32xi1>, vector<8x32xf32>
    %125 = tpu.concatenate %95, %123 in 1 : vector<8x32xf32>, vector<8x32xf32> -> vector<8x64xf32>
    %cst_43 = arith.constant dense<0.000000e+00> : vector<8x256xf32>
    %126 = tpu.matmul %125, %7, %cst_43 {dimension_numbers = #tpu.dot_dimension_numbers<[1], [0], [0], [1], [0, 0, 1, 1], [], []>} : vector<8x64xf32>, vector<64x256xf32>, vector<8x256xf32> -> vector<8x256xf32>
    %c16 = arith.constant 16 : index
    %c0_44 = arith.constant 0 : index
    %127 = vector.load %arg1[%c16, %c0_44] : memref<96x1xf32, #tpu.memory_space<vmem>>, vector<8x1xf32>
    %128 = vector.shape_cast %127 : vector<8x1xf32> to vector<8x1xf32>
    %129 = vector.broadcast %128 : vector<8x1xf32> to vector<8x32xf32>
    %cst_45 = arith.constant 0.000000e+00 : f32
    %130 = vector.broadcast %cst_45 : f32 to vector<8x32xf32>
    %131 = arith.cmpf ogt, %129, %130 : vector<8x32xf32>
    %c16_46 = arith.constant 16 : index
    %c0_47 = arith.constant 0 : index
    %132 = vector.load %arg7[%c16_46, %c0_47] : memref<96x256xf32, #tpu.memory_space<vmem>>, vector<8x128xf32>
    %133 = vector.extract_strided_slice %126 {offsets = [0, 0], sizes = [8, 128], strides = [1, 1]} : vector<8x256xf32> to vector<8x128xf32>
    %134 = arith.addf %132, %133 : vector<8x128xf32>
    %135 = arith.negf %134 : vector<8x128xf32>
    %136 = math.exp %135 : vector<8x128xf32>
    %cst_48 = arith.constant 1.000000e+00 : f32
    %137 = vector.broadcast %cst_48 : f32 to vector<8x128xf32>
    %138 = arith.addf %137, %136 : vector<8x128xf32>
    %139 = arith.divf %137, %138 : vector<8x128xf32>
    %140 = math.tanh %134 : vector<8x128xf32>
    %141 = vector.extract_strided_slice %139 {offsets = [0, 32], sizes = [8, 32], strides = [1, 1]} : vector<8x128xf32> to vector<8x32xf32>
    %142 = arith.mulf %141, %96 : vector<8x32xf32>
    %143 = vector.extract_strided_slice %139 {offsets = [0, 0], sizes = [8, 32], strides = [1, 1]} : vector<8x128xf32> to vector<8x32xf32>
    %144 = vector.extract_strided_slice %140 {offsets = [0, 64], sizes = [8, 32], strides = [1, 1]} : vector<8x128xf32> to vector<8x32xf32>
    %145 = arith.mulf %143, %144 : vector<8x32xf32>
    %146 = arith.addf %142, %145 : vector<8x32xf32>
    %147 = vector.extract_strided_slice %139 {offsets = [0, 96], sizes = [8, 32], strides = [1, 1]} : vector<8x128xf32> to vector<8x32xf32>
    %148 = math.tanh %146 : vector<8x32xf32>
    %149 = arith.mulf %147, %148 : vector<8x32xf32>
    %cst_49 = arith.constant 0.000000e+00 : f32
    %150 = vector.broadcast %cst_49 : f32 to vector<8x32xf32>
    %151 = arith.select %131, %149, %150 : vector<8x32xi1>, vector<8x32xf32>
    %c16_50 = arith.constant 16 : index
    %c0_51 = arith.constant 0 : index
    %152 = vector.load %arg5[%c16_50, %c0_51] : memref<96x64xf32, #tpu.memory_space<vmem>>, vector<8x32xf32>
    tpu.vector_store %arg5[%c16_50, %c0_51], %151 {strides = array<i32>} : memref<96x64xf32, #tpu.memory_space<vmem>>, vector<8x32xf32>,
    %153 = arith.select %131, %149, %95 : vector<8x32xi1>, vector<8x32xf32>
    %154 = arith.select %131, %146, %96 : vector<8x32xi1>, vector<8x32xf32>
    %c72 = arith.constant 72 : index
    %c0_52 = arith.constant 0 : index
    %155 = vector.load %arg1[%c72, %c0_52] : memref<96x1xf32, #tpu.memory_space<vmem>>, vector<8x1xf32>
    %156 = vector.shape_cast %155 : vector<8x1xf32> to vector<8x1xf32>
    %157 = vector.broadcast %156 : vector<8x1xf32> to vector<8x32xf32>
    %cst_53 = arith.constant 0.000000e+00 : f32
    %158 = vector.broadcast %cst_53 : f32 to vector<8x32xf32>
    %159 = arith.cmpf ogt, %157, %158 : vector<8x32xf32>
    %c72_54 = arith.constant 72 : index
    %c128_55 = arith.constant 128 : index
    %160 = vector.load %arg7[%c72_54, %c128_55] : memref<96x256xf32, #tpu.memory_space<vmem>>, vector<8x128xf32>
    %161 = vector.extract_strided_slice %126 {offsets = [0, 128], sizes = [8, 128], strides = [1, 1]} : vector<8x256xf32> to vector<8x128xf32>
    %162 = arith.addf %160, %161 : vector<8x128xf32>
    %163 = arith.negf %162 : vector<8x128xf32>
    %164 = math.exp %163 : vector<8x128xf32>
    %cst_56 = arith.constant 1.000000e+00 : f32
    %165 = vector.broadcast %cst_56 : f32 to vector<8x128xf32>
    %166 = arith.addf %165, %164 : vector<8x128xf32>
    %167 = arith.divf %165, %166 : vector<8x128xf32>
    %168 = math.tanh %162 : vector<8x128xf32>
    %169 = vector.extract_strided_slice %167 {offsets = [0, 32], sizes = [8, 32], strides = [1, 1]} : vector<8x128xf32> to vector<8x32xf32>
    %170 = arith.mulf %169, %124 : vector<8x32xf32>
    %171 = vector.extract_strided_slice %167 {offsets = [0, 0], sizes = [8, 32], strides = [1, 1]} : vector<8x128xf32> to vector<8x32xf32>
    %172 = vector.extract_strided_slice %168 {offsets = [0, 64], sizes = [8, 32], strides = [1, 1]} : vector<8x128xf32> to vector<8x32xf32>
    %173 = arith.mulf %171, %172 : vector<8x32xf32>
    %174 = arith.addf %170, %173 : vector<8x32xf32>
    %175 = vector.extract_strided_slice %167 {offsets = [0, 96], sizes = [8, 32], strides = [1, 1]} : vector<8x128xf32> to vector<8x32xf32>
    %176 = math.tanh %174 : vector<8x32xf32>
    %177 = arith.mulf %175, %176 : vector<8x32xf32>
    %cst_57 = arith.constant 0.000000e+00 : f32
    %178 = vector.broadcast %cst_57 : f32 to vector<8x32xf32>
    %179 = arith.select %159, %177, %178 : vector<8x32xi1>, vector<8x32xf32>
    %c72_58 = arith.constant 72 : index
    %c32_59 = arith.constant 32 : index
    %180 = vector.load %arg5[%c72_58, %c32_59] : memref<96x64xf32, #tpu.memory_space<vmem>>, vector<8x32xf32>
    tpu.vector_store %arg5[%c72_58, %c32_59], %179 {strides = array<i32>} : memref<96x64xf32, #tpu.memory_space<vmem>>, vector<8x32xf32>,
    %181 = arith.select %159, %177, %123 : vector<8x32xi1>, vector<8x32xf32>
    %182 = arith.select %159, %174, %124 : vector<8x32xi1>, vector<8x32xf32>
    %183 = tpu.concatenate %153, %181 in 1 : vector<8x32xf32>, vector<8x32xf32> -> vector<8x64xf32>
    %cst_60 = arith.constant dense<0.000000e+00> : vector<8x256xf32>
    %184 = tpu.matmul %183, %7, %cst_60 {dimension_numbers = #tpu.dot_dimension_numbers<[1], [0], [0], [1], [0, 0, 1, 1], [], []>} : vector<8x64xf32>, vector<64x256xf32>, vector<8x256xf32> -> vector<8x256xf32>
    %c24 = arith.constant 24 : index
    %c0_61 = arith.constant 0 : index
    %185 = vector.load %arg1[%c24, %c0_61] : memref<96x1xf32, #tpu.memory_space<vmem>>, vector<8x1xf32>
    %186 = vector.shape_cast %185 : vector<8x1xf32> to vector<8x1xf32>
    %187 = vector.broadcast %186 : vector<8x1xf32> to vector<8x32xf32>
    %cst_62 = arith.constant 0.000000e+00 : f32
    %188 = vector.broadcast %cst_62 : f32 to vector<8x32xf32>
    %189 = arith.cmpf ogt, %187, %188 : vector<8x32xf32>
    %c24_63 = arith.constant 24 : index
    %c0_64 = arith.constant 0 : index
    %190 = vector.load %arg7[%c24_63, %c0_64] : memref<96x256xf32, #tpu.memory_space<vmem>>, vector<8x128xf32>
    %191 = vector.extract_strided_slice %184 {offsets = [0, 0], sizes = [8, 128], strides = [1, 1]} : vector<8x256xf32> to vector<8x128xf32>
    %192 = arith.addf %190, %191 : vector<8x128xf32>
    %193 = arith.negf %192 : vector<8x128xf32>
    %194 = math.exp %193 : vector<8x128xf32>
    %cst_65 = arith.constant 1.000000e+00 : f32
    %195 = vector.broadcast %cst_65 : f32 to vector<8x128xf32>
    %196 = arith.addf %195, %194 : vector<8x128xf32>
    %197 = arith.divf %195, %196 : vector<8x128xf32>
    %198 = math.tanh %192 : vector<8x128xf32>
    %199 = vector.extract_strided_slice %197 {offsets = [0, 32], sizes = [8, 32], strides = [1, 1]} : vector<8x128xf32> to vector<8x32xf32>
    %200 = arith.mulf %199, %154 : vector<8x32xf32>
    %201 = vector.extract_strided_slice %197 {offsets = [0, 0], sizes = [8, 32], strides = [1, 1]} : vector<8x128xf32> to vector<8x32xf32>
    %202 = vector.extract_strided_slice %198 {offsets = [0, 64], sizes = [8, 32], strides = [1, 1]} : vector<8x128xf32> to vector<8x32xf32>
    %203 = arith.mulf %201, %202 : vector<8x32xf32>
    %204 = arith.addf %200, %203 : vector<8x32xf32>
    %205 = vector.extract_strided_slice %197 {offsets = [0, 96], sizes = [8, 32], strides = [1, 1]} : vector<8x128xf32> to vector<8x32xf32>
    %206 = math.tanh %204 : vector<8x32xf32>
    %207 = arith.mulf %205, %206 : vector<8x32xf32>
    %cst_66 = arith.constant 0.000000e+00 : f32
    %208 = vector.broadcast %cst_66 : f32 to vector<8x32xf32>
    %209 = arith.select %189, %207, %208 : vector<8x32xi1>, vector<8x32xf32>
    %c24_67 = arith.constant 24 : index
    %c0_68 = arith.constant 0 : index
    %210 = vector.load %arg5[%c24_67, %c0_68] : memref<96x64xf32, #tpu.memory_space<vmem>>, vector<8x32xf32>
    tpu.vector_store %arg5[%c24_67, %c0_68], %209 {strides = array<i32>} : memref<96x64xf32, #tpu.memory_space<vmem>>, vector<8x32xf32>,
    %211 = arith.select %189, %207, %153 : vector<8x32xi1>, vector<8x32xf32>
    %212 = arith.select %189, %204, %154 : vector<8x32xi1>, vector<8x32xf32>
    %c64 = arith.constant 64 : index
    %c0_69 = arith.constant 0 : index
    %213 = vector.load %arg1[%c64, %c0_69] : memref<96x1xf32, #tpu.memory_space<vmem>>, vector<8x1xf32>
    %214 = vector.shape_cast %213 : vector<8x1xf32> to vector<8x1xf32>
    %215 = vector.broadcast %214 : vector<8x1xf32> to vector<8x32xf32>
    %cst_70 = arith.constant 0.000000e+00 : f32
    %216 = vector.broadcast %cst_70 : f32 to vector<8x32xf32>
    %217 = arith.cmpf ogt, %215, %216 : vector<8x32xf32>
    %c64_71 = arith.constant 64 : index
    %c128_72 = arith.constant 128 : index
    %218 = vector.load %arg7[%c64_71, %c128_72] : memref<96x256xf32, #tpu.memory_space<vmem>>, vector<8x128xf32>
    %219 = vector.extract_strided_slice %184 {offsets = [0, 128], sizes = [8, 128], strides = [1, 1]} : vector<8x256xf32> to vector<8x128xf32>
    %220 = arith.addf %218, %219 : vector<8x128xf32>
    %221 = arith.negf %220 : vector<8x128xf32>
    %222 = math.exp %221 : vector<8x128xf32>
    %cst_73 = arith.constant 1.000000e+00 : f32
    %223 = vector.broadcast %cst_73 : f32 to vector<8x128xf32>
    %224 = arith.addf %223, %222 : vector<8x128xf32>
    %225 = arith.divf %223, %224 : vector<8x128xf32>
    %226 = math.tanh %220 : vector<8x128xf32>
    %227 = vector.extract_strided_slice %225 {offsets = [0, 32], sizes = [8, 32], strides = [1, 1]} : vector<8x128xf32> to vector<8x32xf32>
    %228 = arith.mulf %227, %182 : vector<8x32xf32>
    %229 = vector.extract_strided_slice %225 {offsets = [0, 0], sizes = [8, 32], strides = [1, 1]} : vector<8x128xf32> to vector<8x32xf32>
    %230 = vector.extract_strided_slice %226 {offsets = [0, 64], sizes = [8, 32], strides = [1, 1]} : vector<8x128xf32> to vector<8x32xf32>
    %231 = arith.mulf %229, %230 : vector<8x32xf32>
    %232 = arith.addf %228, %231 : vector<8x32xf32>
    %233 = vector.extract_strided_slice %225 {offsets = [0, 96], sizes = [8, 32], strides = [1, 1]} : vector<8x128xf32> to vector<8x32xf32>
    %234 = math.tanh %232 : vector<8x32xf32>
    %235 = arith.mulf %233, %234 : vector<8x32xf32>
    %cst_74 = arith.constant 0.000000e+00 : f32
    %236 = vector.broadcast %cst_74 : f32 to vector<8x32xf32>
    %237 = arith.select %217, %235, %236 : vector<8x32xi1>, vector<8x32xf32>
    %c64_75 = arith.constant 64 : index
    %c32_76 = arith.constant 32 : index
    %238 = vector.load %arg5[%c64_75, %c32_76] : memref<96x64xf32, #tpu.memory_space<vmem>>, vector<8x32xf32>
    tpu.vector_store %arg5[%c64_75, %c32_76], %237 {strides = array<i32>} : memref<96x64xf32, #tpu.memory_space<vmem>>, vector<8x32xf32>,
    %239 = arith.select %217, %235, %181 : vector<8x32xi1>, vector<8x32xf32>
    %240 = arith.select %217, %232, %182 : vector<8x32xi1>, vector<8x32xf32>
    %241 = tpu.concatenate %211, %239 in 1 : vector<8x32xf32>, vector<8x32xf32> -> vector<8x64xf32>
    %cst_77 = arith.constant dense<0.000000e+00> : vector<8x256xf32>
    %242 = tpu.matmul %241, %7, %cst_77 {dimension_numbers = #tpu.dot_dimension_numbers<[1], [0], [0], [1], [0, 0, 1, 1], [], []>} : vector<8x64xf32>, vector<64x256xf32>, vector<8x256xf32> -> vector<8x256xf32>
    %c32_78 = arith.constant 32 : index
    %c0_79 = arith.constant 0 : index
    %243 = vector.load %arg1[%c32_78, %c0_79] : memref<96x1xf32, #tpu.memory_space<vmem>>, vector<8x1xf32>
    %244 = vector.shape_cast %243 : vector<8x1xf32> to vector<8x1xf32>
    %245 = vector.broadcast %244 : vector<8x1xf32> to vector<8x32xf32>
    %cst_80 = arith.constant 0.000000e+00 : f32
    %246 = vector.broadcast %cst_80 : f32 to vector<8x32xf32>
    %247 = arith.cmpf ogt, %245, %246 : vector<8x32xf32>
    %c32_81 = arith.constant 32 : index
    %c0_82 = arith.constant 0 : index
    %248 = vector.load %arg7[%c32_81, %c0_82] : memref<96x256xf32, #tpu.memory_space<vmem>>, vector<8x128xf32>
    %249 = vector.extract_strided_slice %242 {offsets = [0, 0], sizes = [8, 128], strides = [1, 1]} : vector<8x256xf32> to vector<8x128xf32>
    %250 = arith.addf %248, %249 : vector<8x128xf32>
    %251 = arith.negf %250 : vector<8x128xf32>
    %252 = math.exp %251 : vector<8x128xf32>
    %cst_83 = arith.constant 1.000000e+00 : f32
    %253 = vector.broadcast %cst_83 : f32 to vector<8x128xf32>
    %254 = arith.addf %253, %252 : vector<8x128xf32>
    %255 = arith.divf %253, %254 : vector<8x128xf32>
    %256 = math.tanh %250 : vector<8x128xf32>
    %257 = vector.extract_strided_slice %255 {offsets = [0, 32], sizes = [8, 32], strides = [1, 1]} : vector<8x128xf32> to vector<8x32xf32>
    %258 = arith.mulf %257, %212 : vector<8x32xf32>
    %259 = vector.extract_strided_slice %255 {offsets = [0, 0], sizes = [8, 32], strides = [1, 1]} : vector<8x128xf32> to vector<8x32xf32>
    %260 = vector.extract_strided_slice %256 {offsets = [0, 64], sizes = [8, 32], strides = [1, 1]} : vector<8x128xf32> to vector<8x32xf32>
    %261 = arith.mulf %259, %260 : vector<8x32xf32>
    %262 = arith.addf %258, %261 : vector<8x32xf32>
    %263 = vector.extract_strided_slice %255 {offsets = [0, 96], sizes = [8, 32], strides = [1, 1]} : vector<8x128xf32> to vector<8x32xf32>
    %264 = math.tanh %262 : vector<8x32xf32>
    %265 = arith.mulf %263, %264 : vector<8x32xf32>
    %cst_84 = arith.constant 0.000000e+00 : f32
    %266 = vector.broadcast %cst_84 : f32 to vector<8x32xf32>
    %267 = arith.select %247, %265, %266 : vector<8x32xi1>, vector<8x32xf32>
    %c32_85 = arith.constant 32 : index
    %c0_86 = arith.constant 0 : index
    %268 = vector.load %arg5[%c32_85, %c0_86] : memref<96x64xf32, #tpu.memory_space<vmem>>, vector<8x32xf32>
    tpu.vector_store %arg5[%c32_85, %c0_86], %267 {strides = array<i32>} : memref<96x64xf32, #tpu.memory_space<vmem>>, vector<8x32xf32>,
    %269 = arith.select %247, %265, %211 : vector<8x32xi1>, vector<8x32xf32>
    %270 = arith.select %247, %262, %212 : vector<8x32xi1>, vector<8x32xf32>
    %c56 = arith.constant 56 : index
    %c0_87 = arith.constant 0 : index
    %271 = vector.load %arg1[%c56, %c0_87] : memref<96x1xf32, #tpu.memory_space<vmem>>, vector<8x1xf32>
    %272 = vector.shape_cast %271 : vector<8x1xf32> to vector<8x1xf32>
    %273 = vector.broadcast %272 : vector<8x1xf32> to vector<8x32xf32>
    %cst_88 = arith.constant 0.000000e+00 : f32
    %274 = vector.broadcast %cst_88 : f32 to vector<8x32xf32>
    %275 = arith.cmpf ogt, %273, %274 : vector<8x32xf32>
    %c56_89 = arith.constant 56 : index
    %c128_90 = arith.constant 128 : index
    %276 = vector.load %arg7[%c56_89, %c128_90] : memref<96x256xf32, #tpu.memory_space<vmem>>, vector<8x128xf32>
    %277 = vector.extract_strided_slice %242 {offsets = [0, 128], sizes = [8, 128], strides = [1, 1]} : vector<8x256xf32> to vector<8x128xf32>
    %278 = arith.addf %276, %277 : vector<8x128xf32>
    %279 = arith.negf %278 : vector<8x128xf32>
    %280 = math.exp %279 : vector<8x128xf32>
    %cst_91 = arith.constant 1.000000e+00 : f32
    %281 = vector.broadcast %cst_91 : f32 to vector<8x128xf32>
    %282 = arith.addf %281, %280 : vector<8x128xf32>
    %283 = arith.divf %281, %282 : vector<8x128xf32>
    %284 = math.tanh %278 : vector<8x128xf32>
    %285 = vector.extract_strided_slice %283 {offsets = [0, 32], sizes = [8, 32], strides = [1, 1]} : vector<8x128xf32> to vector<8x32xf32>
    %286 = arith.mulf %285, %240 : vector<8x32xf32>
    %287 = vector.extract_strided_slice %283 {offsets = [0, 0], sizes = [8, 32], strides = [1, 1]} : vector<8x128xf32> to vector<8x32xf32>
    %288 = vector.extract_strided_slice %284 {offsets = [0, 64], sizes = [8, 32], strides = [1, 1]} : vector<8x128xf32> to vector<8x32xf32>
    %289 = arith.mulf %287, %288 : vector<8x32xf32>
    %290 = arith.addf %286, %289 : vector<8x32xf32>
    %291 = vector.extract_strided_slice %283 {offsets = [0, 96], sizes = [8, 32], strides = [1, 1]} : vector<8x128xf32> to vector<8x32xf32>
    %292 = math.tanh %290 : vector<8x32xf32>
    %293 = arith.mulf %291, %292 : vector<8x32xf32>
    %cst_92 = arith.constant 0.000000e+00 : f32
    %294 = vector.broadcast %cst_92 : f32 to vector<8x32xf32>
    %295 = arith.select %275, %293, %294 : vector<8x32xi1>, vector<8x32xf32>
    %c56_93 = arith.constant 56 : index
    %c32_94 = arith.constant 32 : index
    %296 = vector.load %arg5[%c56_93, %c32_94] : memref<96x64xf32, #tpu.memory_space<vmem>>, vector<8x32xf32>
    tpu.vector_store %arg5[%c56_93, %c32_94], %295 {strides = array<i32>} : memref<96x64xf32, #tpu.memory_space<vmem>>, vector<8x32xf32>,
    %297 = arith.select %275, %293, %239 : vector<8x32xi1>, vector<8x32xf32>
    %298 = arith.select %275, %290, %240 : vector<8x32xi1>, vector<8x32xf32>
    %299 = tpu.concatenate %269, %297 in 1 : vector<8x32xf32>, vector<8x32xf32> -> vector<8x64xf32>
    %cst_95 = arith.constant dense<0.000000e+00> : vector<8x256xf32>
    %300 = tpu.matmul %299, %7, %cst_95 {dimension_numbers = #tpu.dot_dimension_numbers<[1], [0], [0], [1], [0, 0, 1, 1], [], []>} : vector<8x64xf32>, vector<64x256xf32>, vector<8x256xf32> -> vector<8x256xf32>
    %c40 = arith.constant 40 : index
    %c0_96 = arith.constant 0 : index
    %301 = vector.load %arg1[%c40, %c0_96] : memref<96x1xf32, #tpu.memory_space<vmem>>, vector<8x1xf32>
    %302 = vector.shape_cast %301 : vector<8x1xf32> to vector<8x1xf32>
    %303 = vector.broadcast %302 : vector<8x1xf32> to vector<8x32xf32>
    %cst_97 = arith.constant 0.000000e+00 : f32
    %304 = vector.broadcast %cst_97 : f32 to vector<8x32xf32>
    %305 = arith.cmpf ogt, %303, %304 : vector<8x32xf32>
    %c40_98 = arith.constant 40 : index
    %c0_99 = arith.constant 0 : index
    %306 = vector.load %arg7[%c40_98, %c0_99] : memref<96x256xf32, #tpu.memory_space<vmem>>, vector<8x128xf32>
    %307 = vector.extract_strided_slice %300 {offsets = [0, 0], sizes = [8, 128], strides = [1, 1]} : vector<8x256xf32> to vector<8x128xf32>
    %308 = arith.addf %306, %307 : vector<8x128xf32>
    %309 = arith.negf %308 : vector<8x128xf32>
    %310 = math.exp %309 : vector<8x128xf32>
    %cst_100 = arith.constant 1.000000e+00 : f32
    %311 = vector.broadcast %cst_100 : f32 to vector<8x128xf32>
    %312 = arith.addf %311, %310 : vector<8x128xf32>
    %313 = arith.divf %311, %312 : vector<8x128xf32>
    %314 = math.tanh %308 : vector<8x128xf32>
    %315 = vector.extract_strided_slice %313 {offsets = [0, 32], sizes = [8, 32], strides = [1, 1]} : vector<8x128xf32> to vector<8x32xf32>
    %316 = arith.mulf %315, %270 : vector<8x32xf32>
    %317 = vector.extract_strided_slice %313 {offsets = [0, 0], sizes = [8, 32], strides = [1, 1]} : vector<8x128xf32> to vector<8x32xf32>
    %318 = vector.extract_strided_slice %314 {offsets = [0, 64], sizes = [8, 32], strides = [1, 1]} : vector<8x128xf32> to vector<8x32xf32>
    %319 = arith.mulf %317, %318 : vector<8x32xf32>
    %320 = arith.addf %316, %319 : vector<8x32xf32>
    %321 = vector.extract_strided_slice %313 {offsets = [0, 96], sizes = [8, 32], strides = [1, 1]} : vector<8x128xf32> to vector<8x32xf32>
    %322 = math.tanh %320 : vector<8x32xf32>
    %323 = arith.mulf %321, %322 : vector<8x32xf32>
    %cst_101 = arith.constant 0.000000e+00 : f32
    %324 = vector.broadcast %cst_101 : f32 to vector<8x32xf32>
    %325 = arith.select %305, %323, %324 : vector<8x32xi1>, vector<8x32xf32>
    %c40_102 = arith.constant 40 : index
    %c0_103 = arith.constant 0 : index
    %326 = vector.load %arg5[%c40_102, %c0_103] : memref<96x64xf32, #tpu.memory_space<vmem>>, vector<8x32xf32>
    tpu.vector_store %arg5[%c40_102, %c0_103], %325 {strides = array<i32>} : memref<96x64xf32, #tpu.memory_space<vmem>>, vector<8x32xf32>,
    %327 = arith.select %305, %323, %269 : vector<8x32xi1>, vector<8x32xf32>
    %328 = arith.select %305, %320, %270 : vector<8x32xi1>, vector<8x32xf32>
    %c48 = arith.constant 48 : index
    %c0_104 = arith.constant 0 : index
    %329 = vector.load %arg1[%c48, %c0_104] : memref<96x1xf32, #tpu.memory_space<vmem>>, vector<8x1xf32>
    %330 = vector.shape_cast %329 : vector<8x1xf32> to vector<8x1xf32>
    %331 = vector.broadcast %330 : vector<8x1xf32> to vector<8x32xf32>
    %cst_105 = arith.constant 0.000000e+00 : f32
    %332 = vector.broadcast %cst_105 : f32 to vector<8x32xf32>
    %333 = arith.cmpf ogt, %331, %332 : vector<8x32xf32>
    %c48_106 = arith.constant 48 : index
    %c128_107 = arith.constant 128 : index
    %334 = vector.load %arg7[%c48_106, %c128_107] : memref<96x256xf32, #tpu.memory_space<vmem>>, vector<8x128xf32>
    %335 = vector.extract_strided_slice %300 {offsets = [0, 128], sizes = [8, 128], strides = [1, 1]} : vector<8x256xf32> to vector<8x128xf32>
    %336 = arith.addf %334, %335 : vector<8x128xf32>
    %337 = arith.negf %336 : vector<8x128xf32>
    %338 = math.exp %337 : vector<8x128xf32>
    %cst_108 = arith.constant 1.000000e+00 : f32
    %339 = vector.broadcast %cst_108 : f32 to vector<8x128xf32>
    %340 = arith.addf %339, %338 : vector<8x128xf32>
    %341 = arith.divf %339, %340 : vector<8x128xf32>
    %342 = math.tanh %336 : vector<8x128xf32>
    %343 = vector.extract_strided_slice %341 {offsets = [0, 32], sizes = [8, 32], strides = [1, 1]} : vector<8x128xf32> to vector<8x32xf32>
    %344 = arith.mulf %343, %298 : vector<8x32xf32>
    %345 = vector.extract_strided_slice %341 {offsets = [0, 0], sizes = [8, 32], strides = [1, 1]} : vector<8x128xf32> to vector<8x32xf32>
    %346 = vector.extract_strided_slice %342 {offsets = [0, 64], sizes = [8, 32], strides = [1, 1]} : vector<8x128xf32> to vector<8x32xf32>
    %347 = arith.mulf %345, %346 : vector<8x32xf32>
    %348 = arith.addf %344, %347 : vector<8x32xf32>
    %349 = vector.extract_strided_slice %341 {offsets = [0, 96], sizes = [8, 32], strides = [1, 1]} : vector<8x128xf32> to vector<8x32xf32>
    %350 = math.tanh %348 : vector<8x32xf32>
    %351 = arith.mulf %349, %350 : vector<8x32xf32>
    %cst_109 = arith.constant 0.000000e+00 : f32
    %352 = vector.broadcast %cst_109 : f32 to vector<8x32xf32>
    %353 = arith.select %333, %351, %352 : vector<8x32xi1>, vector<8x32xf32>
    %c48_110 = arith.constant 48 : index
    %c32_111 = arith.constant 32 : index
    %354 = vector.load %arg5[%c48_110, %c32_111] : memref<96x64xf32, #tpu.memory_space<vmem>>, vector<8x32xf32>
    tpu.vector_store %arg5[%c48_110, %c32_111], %353 {strides = array<i32>} : memref<96x64xf32, #tpu.memory_space<vmem>>, vector<8x32xf32>,
    %355 = arith.select %333, %351, %297 : vector<8x32xi1>, vector<8x32xf32>
    %356 = arith.select %333, %348, %298 : vector<8x32xi1>, vector<8x32xf32>
    %357 = tpu.concatenate %327, %355 in 1 : vector<8x32xf32>, vector<8x32xf32> -> vector<8x64xf32>
    %cst_112 = arith.constant dense<0.000000e+00> : vector<8x256xf32>
    %358 = tpu.matmul %357, %7, %cst_112 {dimension_numbers = #tpu.dot_dimension_numbers<[1], [0], [0], [1], [0, 0, 1, 1], [], []>} : vector<8x64xf32>, vector<64x256xf32>, vector<8x256xf32> -> vector<8x256xf32>
    %c48_113 = arith.constant 48 : index
    %c0_114 = arith.constant 0 : index
    %359 = vector.load %arg1[%c48_113, %c0_114] : memref<96x1xf32, #tpu.memory_space<vmem>>, vector<8x1xf32>
    %360 = vector.shape_cast %359 : vector<8x1xf32> to vector<8x1xf32>
    %361 = vector.broadcast %360 : vector<8x1xf32> to vector<8x32xf32>
    %cst_115 = arith.constant 0.000000e+00 : f32
    %362 = vector.broadcast %cst_115 : f32 to vector<8x32xf32>
    %363 = arith.cmpf ogt, %361, %362 : vector<8x32xf32>
    %c48_116 = arith.constant 48 : index
    %c0_117 = arith.constant 0 : index
    %364 = vector.load %arg7[%c48_116, %c0_117] : memref<96x256xf32, #tpu.memory_space<vmem>>, vector<8x128xf32>
    %365 = vector.extract_strided_slice %358 {offsets = [0, 0], sizes = [8, 128], strides = [1, 1]} : vector<8x256xf32> to vector<8x128xf32>
    %366 = arith.addf %364, %365 : vector<8x128xf32>
    %367 = arith.negf %366 : vector<8x128xf32>
    %368 = math.exp %367 : vector<8x128xf32>
    %cst_118 = arith.constant 1.000000e+00 : f32
    %369 = vector.broadcast %cst_118 : f32 to vector<8x128xf32>
    %370 = arith.addf %369, %368 : vector<8x128xf32>
    %371 = arith.divf %369, %370 : vector<8x128xf32>
    %372 = math.tanh %366 : vector<8x128xf32>
    %373 = vector.extract_strided_slice %371 {offsets = [0, 32], sizes = [8, 32], strides = [1, 1]} : vector<8x128xf32> to vector<8x32xf32>
    %374 = arith.mulf %373, %328 : vector<8x32xf32>
    %375 = vector.extract_strided_slice %371 {offsets = [0, 0], sizes = [8, 32], strides = [1, 1]} : vector<8x128xf32> to vector<8x32xf32>
    %376 = vector.extract_strided_slice %372 {offsets = [0, 64], sizes = [8, 32], strides = [1, 1]} : vector<8x128xf32> to vector<8x32xf32>
    %377 = arith.mulf %375, %376 : vector<8x32xf32>
    %378 = arith.addf %374, %377 : vector<8x32xf32>
    %379 = vector.extract_strided_slice %371 {offsets = [0, 96], sizes = [8, 32], strides = [1, 1]} : vector<8x128xf32> to vector<8x32xf32>
    %380 = math.tanh %378 : vector<8x32xf32>
    %381 = arith.mulf %379, %380 : vector<8x32xf32>
    %cst_119 = arith.constant 0.000000e+00 : f32
    %382 = vector.broadcast %cst_119 : f32 to vector<8x32xf32>
    %383 = arith.select %363, %381, %382 : vector<8x32xi1>, vector<8x32xf32>
    %c48_120 = arith.constant 48 : index
    %c0_121 = arith.constant 0 : index
    %384 = vector.load %arg5[%c48_120, %c0_121] : memref<96x64xf32, #tpu.memory_space<vmem>>, vector<8x32xf32>
    tpu.vector_store %arg5[%c48_120, %c0_121], %383 {strides = array<i32>} : memref<96x64xf32, #tpu.memory_space<vmem>>, vector<8x32xf32>,
    %385 = arith.select %363, %381, %327 : vector<8x32xi1>, vector<8x32xf32>
    %386 = arith.select %363, %378, %328 : vector<8x32xi1>, vector<8x32xf32>
    %c40_122 = arith.constant 40 : index
    %c0_123 = arith.constant 0 : index
    %387 = vector.load %arg1[%c40_122, %c0_123] : memref<96x1xf32, #tpu.memory_space<vmem>>, vector<8x1xf32>
    %388 = vector.shape_cast %387 : vector<8x1xf32> to vector<8x1xf32>
    %389 = vector.broadcast %388 : vector<8x1xf32> to vector<8x32xf32>
    %cst_124 = arith.constant 0.000000e+00 : f32
    %390 = vector.broadcast %cst_124 : f32 to vector<8x32xf32>
    %391 = arith.cmpf ogt, %389, %390 : vector<8x32xf32>
    %c40_125 = arith.constant 40 : index
    %c128_126 = arith.constant 128 : index
    %392 = vector.load %arg7[%c40_125, %c128_126] : memref<96x256xf32, #tpu.memory_space<vmem>>, vector<8x128xf32>
    %393 = vector.extract_strided_slice %358 {offsets = [0, 128], sizes = [8, 128], strides = [1, 1]} : vector<8x256xf32> to vector<8x128xf32>
    %394 = arith.addf %392, %393 : vector<8x128xf32>
    %395 = arith.negf %394 : vector<8x128xf32>
    %396 = math.exp %395 : vector<8x128xf32>
    %cst_127 = arith.constant 1.000000e+00 : f32
    %397 = vector.broadcast %cst_127 : f32 to vector<8x128xf32>
    %398 = arith.addf %397, %396 : vector<8x128xf32>
    %399 = arith.divf %397, %398 : vector<8x128xf32>
    %400 = math.tanh %394 : vector<8x128xf32>
    %401 = vector.extract_strided_slice %399 {offsets = [0, 32], sizes = [8, 32], strides = [1, 1]} : vector<8x128xf32> to vector<8x32xf32>
    %402 = arith.mulf %401, %356 : vector<8x32xf32>
    %403 = vector.extract_strided_slice %399 {offsets = [0, 0], sizes = [8, 32], strides = [1, 1]} : vector<8x128xf32> to vector<8x32xf32>
    %404 = vector.extract_strided_slice %400 {offsets = [0, 64], sizes = [8, 32], strides = [1, 1]} : vector<8x128xf32> to vector<8x32xf32>
    %405 = arith.mulf %403, %404 : vector<8x32xf32>
    %406 = arith.addf %402, %405 : vector<8x32xf32>
    %407 = vector.extract_strided_slice %399 {offsets = [0, 96], sizes = [8, 32], strides = [1, 1]} : vector<8x128xf32> to vector<8x32xf32>
    %408 = math.tanh %406 : vector<8x32xf32>
    %409 = arith.mulf %407, %408 : vector<8x32xf32>
    %cst_128 = arith.constant 0.000000e+00 : f32
    %410 = vector.broadcast %cst_128 : f32 to vector<8x32xf32>
    %411 = arith.select %391, %409, %410 : vector<8x32xi1>, vector<8x32xf32>
    %c40_129 = arith.constant 40 : index
    %c32_130 = arith.constant 32 : index
    %412 = vector.load %arg5[%c40_129, %c32_130] : memref<96x64xf32, #tpu.memory_space<vmem>>, vector<8x32xf32>
    tpu.vector_store %arg5[%c40_129, %c32_130], %411 {strides = array<i32>} : memref<96x64xf32, #tpu.memory_space<vmem>>, vector<8x32xf32>,
    %413 = arith.select %391, %409, %355 : vector<8x32xi1>, vector<8x32xf32>
    %414 = arith.select %391, %406, %356 : vector<8x32xi1>, vector<8x32xf32>
    %415 = tpu.concatenate %385, %413 in 1 : vector<8x32xf32>, vector<8x32xf32> -> vector<8x64xf32>
    %cst_131 = arith.constant dense<0.000000e+00> : vector<8x256xf32>
    %416 = tpu.matmul %415, %7, %cst_131 {dimension_numbers = #tpu.dot_dimension_numbers<[1], [0], [0], [1], [0, 0, 1, 1], [], []>} : vector<8x64xf32>, vector<64x256xf32>, vector<8x256xf32> -> vector<8x256xf32>
    %c56_132 = arith.constant 56 : index
    %c0_133 = arith.constant 0 : index
    %417 = vector.load %arg1[%c56_132, %c0_133] : memref<96x1xf32, #tpu.memory_space<vmem>>, vector<8x1xf32>
    %418 = vector.shape_cast %417 : vector<8x1xf32> to vector<8x1xf32>
    %419 = vector.broadcast %418 : vector<8x1xf32> to vector<8x32xf32>
    %cst_134 = arith.constant 0.000000e+00 : f32
    %420 = vector.broadcast %cst_134 : f32 to vector<8x32xf32>
    %421 = arith.cmpf ogt, %419, %420 : vector<8x32xf32>
    %c56_135 = arith.constant 56 : index
    %c0_136 = arith.constant 0 : index
    %422 = vector.load %arg7[%c56_135, %c0_136] : memref<96x256xf32, #tpu.memory_space<vmem>>, vector<8x128xf32>
    %423 = vector.extract_strided_slice %416 {offsets = [0, 0], sizes = [8, 128], strides = [1, 1]} : vector<8x256xf32> to vector<8x128xf32>
    %424 = arith.addf %422, %423 : vector<8x128xf32>
    %425 = arith.negf %424 : vector<8x128xf32>
    %426 = math.exp %425 : vector<8x128xf32>
    %cst_137 = arith.constant 1.000000e+00 : f32
    %427 = vector.broadcast %cst_137 : f32 to vector<8x128xf32>
    %428 = arith.addf %427, %426 : vector<8x128xf32>
    %429 = arith.divf %427, %428 : vector<8x128xf32>
    %430 = math.tanh %424 : vector<8x128xf32>
    %431 = vector.extract_strided_slice %429 {offsets = [0, 32], sizes = [8, 32], strides = [1, 1]} : vector<8x128xf32> to vector<8x32xf32>
    %432 = arith.mulf %431, %386 : vector<8x32xf32>
    %433 = vector.extract_strided_slice %429 {offsets = [0, 0], sizes = [8, 32], strides = [1, 1]} : vector<8x128xf32> to vector<8x32xf32>
    %434 = vector.extract_strided_slice %430 {offsets = [0, 64], sizes = [8, 32], strides = [1, 1]} : vector<8x128xf32> to vector<8x32xf32>
    %435 = arith.mulf %433, %434 : vector<8x32xf32>
    %436 = arith.addf %432, %435 : vector<8x32xf32>
    %437 = vector.extract_strided_slice %429 {offsets = [0, 96], sizes = [8, 32], strides = [1, 1]} : vector<8x128xf32> to vector<8x32xf32>
    %438 = math.tanh %436 : vector<8x32xf32>
    %439 = arith.mulf %437, %438 : vector<8x32xf32>
    %cst_138 = arith.constant 0.000000e+00 : f32
    %440 = vector.broadcast %cst_138 : f32 to vector<8x32xf32>
    %441 = arith.select %421, %439, %440 : vector<8x32xi1>, vector<8x32xf32>
    %c56_139 = arith.constant 56 : index
    %c0_140 = arith.constant 0 : index
    %442 = vector.load %arg5[%c56_139, %c0_140] : memref<96x64xf32, #tpu.memory_space<vmem>>, vector<8x32xf32>
    tpu.vector_store %arg5[%c56_139, %c0_140], %441 {strides = array<i32>} : memref<96x64xf32, #tpu.memory_space<vmem>>, vector<8x32xf32>,
    %443 = arith.select %421, %439, %385 : vector<8x32xi1>, vector<8x32xf32>
    %444 = arith.select %421, %436, %386 : vector<8x32xi1>, vector<8x32xf32>
    %c32_141 = arith.constant 32 : index
    %c0_142 = arith.constant 0 : index
    %445 = vector.load %arg1[%c32_141, %c0_142] : memref<96x1xf32, #tpu.memory_space<vmem>>, vector<8x1xf32>
    %446 = vector.shape_cast %445 : vector<8x1xf32> to vector<8x1xf32>
    %447 = vector.broadcast %446 : vector<8x1xf32> to vector<8x32xf32>
    %cst_143 = arith.constant 0.000000e+00 : f32
    %448 = vector.broadcast %cst_143 : f32 to vector<8x32xf32>
    %449 = arith.cmpf ogt, %447, %448 : vector<8x32xf32>
    %c32_144 = arith.constant 32 : index
    %c128_145 = arith.constant 128 : index
    %450 = vector.load %arg7[%c32_144, %c128_145] : memref<96x256xf32, #tpu.memory_space<vmem>>, vector<8x128xf32>
    %451 = vector.extract_strided_slice %416 {offsets = [0, 128], sizes = [8, 128], strides = [1, 1]} : vector<8x256xf32> to vector<8x128xf32>
    %452 = arith.addf %450, %451 : vector<8x128xf32>
    %453 = arith.negf %452 : vector<8x128xf32>
    %454 = math.exp %453 : vector<8x128xf32>
    %cst_146 = arith.constant 1.000000e+00 : f32
    %455 = vector.broadcast %cst_146 : f32 to vector<8x128xf32>
    %456 = arith.addf %455, %454 : vector<8x128xf32>
    %457 = arith.divf %455, %456 : vector<8x128xf32>
    %458 = math.tanh %452 : vector<8x128xf32>
    %459 = vector.extract_strided_slice %457 {offsets = [0, 32], sizes = [8, 32], strides = [1, 1]} : vector<8x128xf32> to vector<8x32xf32>
    %460 = arith.mulf %459, %414 : vector<8x32xf32>
    %461 = vector.extract_strided_slice %457 {offsets = [0, 0], sizes = [8, 32], strides = [1, 1]} : vector<8x128xf32> to vector<8x32xf32>
    %462 = vector.extract_strided_slice %458 {offsets = [0, 64], sizes = [8, 32], strides = [1, 1]} : vector<8x128xf32> to vector<8x32xf32>
    %463 = arith.mulf %461, %462 : vector<8x32xf32>
    %464 = arith.addf %460, %463 : vector<8x32xf32>
    %465 = vector.extract_strided_slice %457 {offsets = [0, 96], sizes = [8, 32], strides = [1, 1]} : vector<8x128xf32> to vector<8x32xf32>
    %466 = math.tanh %464 : vector<8x32xf32>
    %467 = arith.mulf %465, %466 : vector<8x32xf32>
    %cst_147 = arith.constant 0.000000e+00 : f32
    %468 = vector.broadcast %cst_147 : f32 to vector<8x32xf32>
    %469 = arith.select %449, %467, %468 : vector<8x32xi1>, vector<8x32xf32>
    %c32_148 = arith.constant 32 : index
    %c32_149 = arith.constant 32 : index
    %470 = vector.load %arg5[%c32_148, %c32_149] : memref<96x64xf32, #tpu.memory_space<vmem>>, vector<8x32xf32>
    tpu.vector_store %arg5[%c32_148, %c32_149], %469 {strides = array<i32>} : memref<96x64xf32, #tpu.memory_space<vmem>>, vector<8x32xf32>,
    %471 = arith.select %449, %467, %413 : vector<8x32xi1>, vector<8x32xf32>
    %472 = arith.select %449, %464, %414 : vector<8x32xi1>, vector<8x32xf32>
    %473 = tpu.concatenate %443, %471 in 1 : vector<8x32xf32>, vector<8x32xf32> -> vector<8x64xf32>
    %cst_150 = arith.constant dense<0.000000e+00> : vector<8x256xf32>
    %474 = tpu.matmul %473, %7, %cst_150 {dimension_numbers = #tpu.dot_dimension_numbers<[1], [0], [0], [1], [0, 0, 1, 1], [], []>} : vector<8x64xf32>, vector<64x256xf32>, vector<8x256xf32> -> vector<8x256xf32>
    %c64_151 = arith.constant 64 : index
    %c0_152 = arith.constant 0 : index
    %475 = vector.load %arg1[%c64_151, %c0_152] : memref<96x1xf32, #tpu.memory_space<vmem>>, vector<8x1xf32>
    %476 = vector.shape_cast %475 : vector<8x1xf32> to vector<8x1xf32>
    %477 = vector.broadcast %476 : vector<8x1xf32> to vector<8x32xf32>
    %cst_153 = arith.constant 0.000000e+00 : f32
    %478 = vector.broadcast %cst_153 : f32 to vector<8x32xf32>
    %479 = arith.cmpf ogt, %477, %478 : vector<8x32xf32>
    %c64_154 = arith.constant 64 : index
    %c0_155 = arith.constant 0 : index
    %480 = vector.load %arg7[%c64_154, %c0_155] : memref<96x256xf32, #tpu.memory_space<vmem>>, vector<8x128xf32>
    %481 = vector.extract_strided_slice %474 {offsets = [0, 0], sizes = [8, 128], strides = [1, 1]} : vector<8x256xf32> to vector<8x128xf32>
    %482 = arith.addf %480, %481 : vector<8x128xf32>
    %483 = arith.negf %482 : vector<8x128xf32>
    %484 = math.exp %483 : vector<8x128xf32>
    %cst_156 = arith.constant 1.000000e+00 : f32
    %485 = vector.broadcast %cst_156 : f32 to vector<8x128xf32>
    %486 = arith.addf %485, %484 : vector<8x128xf32>
    %487 = arith.divf %485, %486 : vector<8x128xf32>
    %488 = math.tanh %482 : vector<8x128xf32>
    %489 = vector.extract_strided_slice %487 {offsets = [0, 32], sizes = [8, 32], strides = [1, 1]} : vector<8x128xf32> to vector<8x32xf32>
    %490 = arith.mulf %489, %444 : vector<8x32xf32>
    %491 = vector.extract_strided_slice %487 {offsets = [0, 0], sizes = [8, 32], strides = [1, 1]} : vector<8x128xf32> to vector<8x32xf32>
    %492 = vector.extract_strided_slice %488 {offsets = [0, 64], sizes = [8, 32], strides = [1, 1]} : vector<8x128xf32> to vector<8x32xf32>
    %493 = arith.mulf %491, %492 : vector<8x32xf32>
    %494 = arith.addf %490, %493 : vector<8x32xf32>
    %495 = vector.extract_strided_slice %487 {offsets = [0, 96], sizes = [8, 32], strides = [1, 1]} : vector<8x128xf32> to vector<8x32xf32>
    %496 = math.tanh %494 : vector<8x32xf32>
    %497 = arith.mulf %495, %496 : vector<8x32xf32>
    %cst_157 = arith.constant 0.000000e+00 : f32
    %498 = vector.broadcast %cst_157 : f32 to vector<8x32xf32>
    %499 = arith.select %479, %497, %498 : vector<8x32xi1>, vector<8x32xf32>
    %c64_158 = arith.constant 64 : index
    %c0_159 = arith.constant 0 : index
    %500 = vector.load %arg5[%c64_158, %c0_159] : memref<96x64xf32, #tpu.memory_space<vmem>>, vector<8x32xf32>
    tpu.vector_store %arg5[%c64_158, %c0_159], %499 {strides = array<i32>} : memref<96x64xf32, #tpu.memory_space<vmem>>, vector<8x32xf32>,
    %501 = arith.select %479, %497, %443 : vector<8x32xi1>, vector<8x32xf32>
    %502 = arith.select %479, %494, %444 : vector<8x32xi1>, vector<8x32xf32>
    %c24_160 = arith.constant 24 : index
    %c0_161 = arith.constant 0 : index
    %503 = vector.load %arg1[%c24_160, %c0_161] : memref<96x1xf32, #tpu.memory_space<vmem>>, vector<8x1xf32>
    %504 = vector.shape_cast %503 : vector<8x1xf32> to vector<8x1xf32>
    %505 = vector.broadcast %504 : vector<8x1xf32> to vector<8x32xf32>
    %cst_162 = arith.constant 0.000000e+00 : f32
    %506 = vector.broadcast %cst_162 : f32 to vector<8x32xf32>
    %507 = arith.cmpf ogt, %505, %506 : vector<8x32xf32>
    %c24_163 = arith.constant 24 : index
    %c128_164 = arith.constant 128 : index
    %508 = vector.load %arg7[%c24_163, %c128_164] : memref<96x256xf32, #tpu.memory_space<vmem>>, vector<8x128xf32>
    %509 = vector.extract_strided_slice %474 {offsets = [0, 128], sizes = [8, 128], strides = [1, 1]} : vector<8x256xf32> to vector<8x128xf32>
    %510 = arith.addf %508, %509 : vector<8x128xf32>
    %511 = arith.negf %510 : vector<8x128xf32>
    %512 = math.exp %511 : vector<8x128xf32>
    %cst_165 = arith.constant 1.000000e+00 : f32
    %513 = vector.broadcast %cst_165 : f32 to vector<8x128xf32>
    %514 = arith.addf %513, %512 : vector<8x128xf32>
    %515 = arith.divf %513, %514 : vector<8x128xf32>
    %516 = math.tanh %510 : vector<8x128xf32>
    %517 = vector.extract_strided_slice %515 {offsets = [0, 32], sizes = [8, 32], strides = [1, 1]} : vector<8x128xf32> to vector<8x32xf32>
    %518 = arith.mulf %517, %472 : vector<8x32xf32>
    %519 = vector.extract_strided_slice %515 {offsets = [0, 0], sizes = [8, 32], strides = [1, 1]} : vector<8x128xf32> to vector<8x32xf32>
    %520 = vector.extract_strided_slice %516 {offsets = [0, 64], sizes = [8, 32], strides = [1, 1]} : vector<8x128xf32> to vector<8x32xf32>
    %521 = arith.mulf %519, %520 : vector<8x32xf32>
    %522 = arith.addf %518, %521 : vector<8x32xf32>
    %523 = vector.extract_strided_slice %515 {offsets = [0, 96], sizes = [8, 32], strides = [1, 1]} : vector<8x128xf32> to vector<8x32xf32>
    %524 = math.tanh %522 : vector<8x32xf32>
    %525 = arith.mulf %523, %524 : vector<8x32xf32>
    %cst_166 = arith.constant 0.000000e+00 : f32
    %526 = vector.broadcast %cst_166 : f32 to vector<8x32xf32>
    %527 = arith.select %507, %525, %526 : vector<8x32xi1>, vector<8x32xf32>
    %c24_167 = arith.constant 24 : index
    %c32_168 = arith.constant 32 : index
    %528 = vector.load %arg5[%c24_167, %c32_168] : memref<96x64xf32, #tpu.memory_space<vmem>>, vector<8x32xf32>
    tpu.vector_store %arg5[%c24_167, %c32_168], %527 {strides = array<i32>} : memref<96x64xf32, #tpu.memory_space<vmem>>, vector<8x32xf32>,
    %529 = arith.select %507, %525, %471 : vector<8x32xi1>, vector<8x32xf32>
    %530 = arith.select %507, %522, %472 : vector<8x32xi1>, vector<8x32xf32>
    %531 = tpu.concatenate %501, %529 in 1 : vector<8x32xf32>, vector<8x32xf32> -> vector<8x64xf32>
    %cst_169 = arith.constant dense<0.000000e+00> : vector<8x256xf32>
    %532 = tpu.matmul %531, %7, %cst_169 {dimension_numbers = #tpu.dot_dimension_numbers<[1], [0], [0], [1], [0, 0, 1, 1], [], []>} : vector<8x64xf32>, vector<64x256xf32>, vector<8x256xf32> -> vector<8x256xf32>
    %c72_170 = arith.constant 72 : index
    %c0_171 = arith.constant 0 : index
    %533 = vector.load %arg1[%c72_170, %c0_171] : memref<96x1xf32, #tpu.memory_space<vmem>>, vector<8x1xf32>
    %534 = vector.shape_cast %533 : vector<8x1xf32> to vector<8x1xf32>
    %535 = vector.broadcast %534 : vector<8x1xf32> to vector<8x32xf32>
    %cst_172 = arith.constant 0.000000e+00 : f32
    %536 = vector.broadcast %cst_172 : f32 to vector<8x32xf32>
    %537 = arith.cmpf ogt, %535, %536 : vector<8x32xf32>
    %c72_173 = arith.constant 72 : index
    %c0_174 = arith.constant 0 : index
    %538 = vector.load %arg7[%c72_173, %c0_174] : memref<96x256xf32, #tpu.memory_space<vmem>>, vector<8x128xf32>
    %539 = vector.extract_strided_slice %532 {offsets = [0, 0], sizes = [8, 128], strides = [1, 1]} : vector<8x256xf32> to vector<8x128xf32>
    %540 = arith.addf %538, %539 : vector<8x128xf32>
    %541 = arith.negf %540 : vector<8x128xf32>
    %542 = math.exp %541 : vector<8x128xf32>
    %cst_175 = arith.constant 1.000000e+00 : f32
    %543 = vector.broadcast %cst_175 : f32 to vector<8x128xf32>
    %544 = arith.addf %543, %542 : vector<8x128xf32>
    %545 = arith.divf %543, %544 : vector<8x128xf32>
    %546 = math.tanh %540 : vector<8x128xf32>
    %547 = vector.extract_strided_slice %545 {offsets = [0, 32], sizes = [8, 32], strides = [1, 1]} : vector<8x128xf32> to vector<8x32xf32>
    %548 = arith.mulf %547, %502 : vector<8x32xf32>
    %549 = vector.extract_strided_slice %545 {offsets = [0, 0], sizes = [8, 32], strides = [1, 1]} : vector<8x128xf32> to vector<8x32xf32>
    %550 = vector.extract_strided_slice %546 {offsets = [0, 64], sizes = [8, 32], strides = [1, 1]} : vector<8x128xf32> to vector<8x32xf32>
    %551 = arith.mulf %549, %550 : vector<8x32xf32>
    %552 = arith.addf %548, %551 : vector<8x32xf32>
    %553 = vector.extract_strided_slice %545 {offsets = [0, 96], sizes = [8, 32], strides = [1, 1]} : vector<8x128xf32> to vector<8x32xf32>
    %554 = math.tanh %552 : vector<8x32xf32>
    %555 = arith.mulf %553, %554 : vector<8x32xf32>
    %cst_176 = arith.constant 0.000000e+00 : f32
    %556 = vector.broadcast %cst_176 : f32 to vector<8x32xf32>
    %557 = arith.select %537, %555, %556 : vector<8x32xi1>, vector<8x32xf32>
    %c72_177 = arith.constant 72 : index
    %c0_178 = arith.constant 0 : index
    %558 = vector.load %arg5[%c72_177, %c0_178] : memref<96x64xf32, #tpu.memory_space<vmem>>, vector<8x32xf32>
    tpu.vector_store %arg5[%c72_177, %c0_178], %557 {strides = array<i32>} : memref<96x64xf32, #tpu.memory_space<vmem>>, vector<8x32xf32>,
    %559 = arith.select %537, %555, %501 : vector<8x32xi1>, vector<8x32xf32>
    %560 = arith.select %537, %552, %502 : vector<8x32xi1>, vector<8x32xf32>
    %c16_179 = arith.constant 16 : index
    %c0_180 = arith.constant 0 : index
    %561 = vector.load %arg1[%c16_179, %c0_180] : memref<96x1xf32, #tpu.memory_space<vmem>>, vector<8x1xf32>
    %562 = vector.shape_cast %561 : vector<8x1xf32> to vector<8x1xf32>
    %563 = vector.broadcast %562 : vector<8x1xf32> to vector<8x32xf32>
    %cst_181 = arith.constant 0.000000e+00 : f32
    %564 = vector.broadcast %cst_181 : f32 to vector<8x32xf32>
    %565 = arith.cmpf ogt, %563, %564 : vector<8x32xf32>
    %c16_182 = arith.constant 16 : index
    %c128_183 = arith.constant 128 : index
    %566 = vector.load %arg7[%c16_182, %c128_183] : memref<96x256xf32, #tpu.memory_space<vmem>>, vector<8x128xf32>
    %567 = vector.extract_strided_slice %532 {offsets = [0, 128], sizes = [8, 128], strides = [1, 1]} : vector<8x256xf32> to vector<8x128xf32>
    %568 = arith.addf %566, %567 : vector<8x128xf32>
    %569 = arith.negf %568 : vector<8x128xf32>
    %570 = math.exp %569 : vector<8x128xf32>
    %cst_184 = arith.constant 1.000000e+00 : f32
    %571 = vector.broadcast %cst_184 : f32 to vector<8x128xf32>
    %572 = arith.addf %571, %570 : vector<8x128xf32>
    %573 = arith.divf %571, %572 : vector<8x128xf32>
    %574 = math.tanh %568 : vector<8x128xf32>
    %575 = vector.extract_strided_slice %573 {offsets = [0, 32], sizes = [8, 32], strides = [1, 1]} : vector<8x128xf32> to vector<8x32xf32>
    %576 = arith.mulf %575, %530 : vector<8x32xf32>
    %577 = vector.extract_strided_slice %573 {offsets = [0, 0], sizes = [8, 32], strides = [1, 1]} : vector<8x128xf32> to vector<8x32xf32>
    %578 = vector.extract_strided_slice %574 {offsets = [0, 64], sizes = [8, 32], strides = [1, 1]} : vector<8x128xf32> to vector<8x32xf32>
    %579 = arith.mulf %577, %578 : vector<8x32xf32>
    %580 = arith.addf %576, %579 : vector<8x32xf32>
    %581 = vector.extract_strided_slice %573 {offsets = [0, 96], sizes = [8, 32], strides = [1, 1]} : vector<8x128xf32> to vector<8x32xf32>
    %582 = math.tanh %580 : vector<8x32xf32>
    %583 = arith.mulf %581, %582 : vector<8x32xf32>
    %cst_185 = arith.constant 0.000000e+00 : f32
    %584 = vector.broadcast %cst_185 : f32 to vector<8x32xf32>
    %585 = arith.select %565, %583, %584 : vector<8x32xi1>, vector<8x32xf32>
    %c16_186 = arith.constant 16 : index
    %c32_187 = arith.constant 32 : index
    %586 = vector.load %arg5[%c16_186, %c32_187] : memref<96x64xf32, #tpu.memory_space<vmem>>, vector<8x32xf32>
    tpu.vector_store %arg5[%c16_186, %c32_187], %585 {strides = array<i32>} : memref<96x64xf32, #tpu.memory_space<vmem>>, vector<8x32xf32>,
    %587 = arith.select %565, %583, %529 : vector<8x32xi1>, vector<8x32xf32>
    %588 = arith.select %565, %580, %530 : vector<8x32xi1>, vector<8x32xf32>
    %589 = tpu.concatenate %559, %587 in 1 : vector<8x32xf32>, vector<8x32xf32> -> vector<8x64xf32>
    %cst_188 = arith.constant dense<0.000000e+00> : vector<8x256xf32>
    %590 = tpu.matmul %589, %7, %cst_188 {dimension_numbers = #tpu.dot_dimension_numbers<[1], [0], [0], [1], [0, 0, 1, 1], [], []>} : vector<8x64xf32>, vector<64x256xf32>, vector<8x256xf32> -> vector<8x256xf32>
    %c80_189 = arith.constant 80 : index
    %c0_190 = arith.constant 0 : index
    %591 = vector.load %arg1[%c80_189, %c0_190] : memref<96x1xf32, #tpu.memory_space<vmem>>, vector<8x1xf32>
    %592 = vector.shape_cast %591 : vector<8x1xf32> to vector<8x1xf32>
    %593 = vector.broadcast %592 : vector<8x1xf32> to vector<8x32xf32>
    %cst_191 = arith.constant 0.000000e+00 : f32
    %594 = vector.broadcast %cst_191 : f32 to vector<8x32xf32>
    %595 = arith.cmpf ogt, %593, %594 : vector<8x32xf32>
    %c80_192 = arith.constant 80 : index
    %c0_193 = arith.constant 0 : index
    %596 = vector.load %arg7[%c80_192, %c0_193] : memref<96x256xf32, #tpu.memory_space<vmem>>, vector<8x128xf32>
    %597 = vector.extract_strided_slice %590 {offsets = [0, 0], sizes = [8, 128], strides = [1, 1]} : vector<8x256xf32> to vector<8x128xf32>
    %598 = arith.addf %596, %597 : vector<8x128xf32>
    %599 = arith.negf %598 : vector<8x128xf32>
    %600 = math.exp %599 : vector<8x128xf32>
    %cst_194 = arith.constant 1.000000e+00 : f32
    %601 = vector.broadcast %cst_194 : f32 to vector<8x128xf32>
    %602 = arith.addf %601, %600 : vector<8x128xf32>
    %603 = arith.divf %601, %602 : vector<8x128xf32>
    %604 = math.tanh %598 : vector<8x128xf32>
    %605 = vector.extract_strided_slice %603 {offsets = [0, 32], sizes = [8, 32], strides = [1, 1]} : vector<8x128xf32> to vector<8x32xf32>
    %606 = arith.mulf %605, %560 : vector<8x32xf32>
    %607 = vector.extract_strided_slice %603 {offsets = [0, 0], sizes = [8, 32], strides = [1, 1]} : vector<8x128xf32> to vector<8x32xf32>
    %608 = vector.extract_strided_slice %604 {offsets = [0, 64], sizes = [8, 32], strides = [1, 1]} : vector<8x128xf32> to vector<8x32xf32>
    %609 = arith.mulf %607, %608 : vector<8x32xf32>
    %610 = arith.addf %606, %609 : vector<8x32xf32>
    %611 = vector.extract_strided_slice %603 {offsets = [0, 96], sizes = [8, 32], strides = [1, 1]} : vector<8x128xf32> to vector<8x32xf32>
    %612 = math.tanh %610 : vector<8x32xf32>
    %613 = arith.mulf %611, %612 : vector<8x32xf32>
    %cst_195 = arith.constant 0.000000e+00 : f32
    %614 = vector.broadcast %cst_195 : f32 to vector<8x32xf32>
    %615 = arith.select %595, %613, %614 : vector<8x32xi1>, vector<8x32xf32>
    %c80_196 = arith.constant 80 : index
    %c0_197 = arith.constant 0 : index
    %616 = vector.load %arg5[%c80_196, %c0_197] : memref<96x64xf32, #tpu.memory_space<vmem>>, vector<8x32xf32>
    tpu.vector_store %arg5[%c80_196, %c0_197], %615 {strides = array<i32>} : memref<96x64xf32, #tpu.memory_space<vmem>>, vector<8x32xf32>,
    %617 = arith.select %595, %613, %559 : vector<8x32xi1>, vector<8x32xf32>
    %618 = arith.select %595, %610, %560 : vector<8x32xi1>, vector<8x32xf32>
    %c8_198 = arith.constant 8 : index
    %c0_199 = arith.constant 0 : index
    %619 = vector.load %arg1[%c8_198, %c0_199] : memref<96x1xf32, #tpu.memory_space<vmem>>, vector<8x1xf32>
    %620 = vector.shape_cast %619 : vector<8x1xf32> to vector<8x1xf32>
    %621 = vector.broadcast %620 : vector<8x1xf32> to vector<8x32xf32>
    %cst_200 = arith.constant 0.000000e+00 : f32
    %622 = vector.broadcast %cst_200 : f32 to vector<8x32xf32>
    %623 = arith.cmpf ogt, %621, %622 : vector<8x32xf32>
    %c8_201 = arith.constant 8 : index
    %c128_202 = arith.constant 128 : index
    %624 = vector.load %arg7[%c8_201, %c128_202] : memref<96x256xf32, #tpu.memory_space<vmem>>, vector<8x128xf32>
    %625 = vector.extract_strided_slice %590 {offsets = [0, 128], sizes = [8, 128], strides = [1, 1]} : vector<8x256xf32> to vector<8x128xf32>
    %626 = arith.addf %624, %625 : vector<8x128xf32>
    %627 = arith.negf %626 : vector<8x128xf32>
    %628 = math.exp %627 : vector<8x128xf32>
    %cst_203 = arith.constant 1.000000e+00 : f32
    %629 = vector.broadcast %cst_203 : f32 to vector<8x128xf32>
    %630 = arith.addf %629, %628 : vector<8x128xf32>
    %631 = arith.divf %629, %630 : vector<8x128xf32>
    %632 = math.tanh %626 : vector<8x128xf32>
    %633 = vector.extract_strided_slice %631 {offsets = [0, 32], sizes = [8, 32], strides = [1, 1]} : vector<8x128xf32> to vector<8x32xf32>
    %634 = arith.mulf %633, %588 : vector<8x32xf32>
    %635 = vector.extract_strided_slice %631 {offsets = [0, 0], sizes = [8, 32], strides = [1, 1]} : vector<8x128xf32> to vector<8x32xf32>
    %636 = vector.extract_strided_slice %632 {offsets = [0, 64], sizes = [8, 32], strides = [1, 1]} : vector<8x128xf32> to vector<8x32xf32>
    %637 = arith.mulf %635, %636 : vector<8x32xf32>
    %638 = arith.addf %634, %637 : vector<8x32xf32>
    %639 = vector.extract_strided_slice %631 {offsets = [0, 96], sizes = [8, 32], strides = [1, 1]} : vector<8x128xf32> to vector<8x32xf32>
    %640 = math.tanh %638 : vector<8x32xf32>
    %641 = arith.mulf %639, %640 : vector<8x32xf32>
    %cst_204 = arith.constant 0.000000e+00 : f32
    %642 = vector.broadcast %cst_204 : f32 to vector<8x32xf32>
    %643 = arith.select %623, %641, %642 : vector<8x32xi1>, vector<8x32xf32>
    %c8_205 = arith.constant 8 : index
    %c32_206 = arith.constant 32 : index
    %644 = vector.load %arg5[%c8_205, %c32_206] : memref<96x64xf32, #tpu.memory_space<vmem>>, vector<8x32xf32>
    tpu.vector_store %arg5[%c8_205, %c32_206], %643 {strides = array<i32>} : memref<96x64xf32, #tpu.memory_space<vmem>>, vector<8x32xf32>,
    %645 = arith.select %623, %641, %587 : vector<8x32xi1>, vector<8x32xf32>
    %646 = arith.select %623, %638, %588 : vector<8x32xi1>, vector<8x32xf32>
    %647 = tpu.concatenate %617, %645 in 1 : vector<8x32xf32>, vector<8x32xf32> -> vector<8x64xf32>
    %cst_207 = arith.constant dense<0.000000e+00> : vector<8x256xf32>
    %648 = tpu.matmul %647, %7, %cst_207 {dimension_numbers = #tpu.dot_dimension_numbers<[1], [0], [0], [1], [0, 0, 1, 1], [], []>} : vector<8x64xf32>, vector<64x256xf32>, vector<8x256xf32> -> vector<8x256xf32>
    %c88_208 = arith.constant 88 : index
    %c0_209 = arith.constant 0 : index
    %649 = vector.load %arg1[%c88_208, %c0_209] : memref<96x1xf32, #tpu.memory_space<vmem>>, vector<8x1xf32>
    %650 = vector.shape_cast %649 : vector<8x1xf32> to vector<8x1xf32>
    %651 = vector.broadcast %650 : vector<8x1xf32> to vector<8x32xf32>
    %cst_210 = arith.constant 0.000000e+00 : f32
    %652 = vector.broadcast %cst_210 : f32 to vector<8x32xf32>
    %653 = arith.cmpf ogt, %651, %652 : vector<8x32xf32>
    %c88_211 = arith.constant 88 : index
    %c0_212 = arith.constant 0 : index
    %654 = vector.load %arg7[%c88_211, %c0_212] : memref<96x256xf32, #tpu.memory_space<vmem>>, vector<8x128xf32>
    %655 = vector.extract_strided_slice %648 {offsets = [0, 0], sizes = [8, 128], strides = [1, 1]} : vector<8x256xf32> to vector<8x128xf32>
    %656 = arith.addf %654, %655 : vector<8x128xf32>
    %657 = arith.negf %656 : vector<8x128xf32>
    %658 = math.exp %657 : vector<8x128xf32>
    %cst_213 = arith.constant 1.000000e+00 : f32
    %659 = vector.broadcast %cst_213 : f32 to vector<8x128xf32>
    %660 = arith.addf %659, %658 : vector<8x128xf32>
    %661 = arith.divf %659, %660 : vector<8x128xf32>
    %662 = math.tanh %656 : vector<8x128xf32>
    %663 = vector.extract_strided_slice %661 {offsets = [0, 32], sizes = [8, 32], strides = [1, 1]} : vector<8x128xf32> to vector<8x32xf32>
    %664 = arith.mulf %663, %618 : vector<8x32xf32>
    %665 = vector.extract_strided_slice %661 {offsets = [0, 0], sizes = [8, 32], strides = [1, 1]} : vector<8x128xf32> to vector<8x32xf32>
    %666 = vector.extract_strided_slice %662 {offsets = [0, 64], sizes = [8, 32], strides = [1, 1]} : vector<8x128xf32> to vector<8x32xf32>
    %667 = arith.mulf %665, %666 : vector<8x32xf32>
    %668 = arith.addf %664, %667 : vector<8x32xf32>
    %669 = vector.extract_strided_slice %661 {offsets = [0, 96], sizes = [8, 32], strides = [1, 1]} : vector<8x128xf32> to vector<8x32xf32>
    %670 = math.tanh %668 : vector<8x32xf32>
    %671 = arith.mulf %669, %670 : vector<8x32xf32>
    %cst_214 = arith.constant 0.000000e+00 : f32
    %672 = vector.broadcast %cst_214 : f32 to vector<8x32xf32>
    %673 = arith.select %653, %671, %672 : vector<8x32xi1>, vector<8x32xf32>
    %c88_215 = arith.constant 88 : index
    %c0_216 = arith.constant 0 : index
    %674 = vector.load %arg5[%c88_215, %c0_216] : memref<96x64xf32, #tpu.memory_space<vmem>>, vector<8x32xf32>
    tpu.vector_store %arg5[%c88_215, %c0_216], %673 {strides = array<i32>} : memref<96x64xf32, #tpu.memory_space<vmem>>, vector<8x32xf32>,
    %675 = arith.select %653, %671, %617 : vector<8x32xi1>, vector<8x32xf32>
    %c0_217 = arith.constant 0 : index
    %c0_218 = arith.constant 0 : index
    %676 = vector.load %arg1[%c0_217, %c0_218] : memref<96x1xf32, #tpu.memory_space<vmem>>, vector<8x1xf32>
    %677 = vector.shape_cast %676 : vector<8x1xf32> to vector<8x1xf32>
    %678 = vector.broadcast %677 : vector<8x1xf32> to vector<8x32xf32>
    %cst_219 = arith.constant 0.000000e+00 : f32
    %679 = vector.broadcast %cst_219 : f32 to vector<8x32xf32>
    %680 = arith.cmpf ogt, %678, %679 : vector<8x32xf32>
    %c0_220 = arith.constant 0 : index
    %c128_221 = arith.constant 128 : index
    %681 = vector.load %arg7[%c0_220, %c128_221] : memref<96x256xf32, #tpu.memory_space<vmem>>, vector<8x128xf32>
    %682 = vector.extract_strided_slice %648 {offsets = [0, 128], sizes = [8, 128], strides = [1, 1]} : vector<8x256xf32> to vector<8x128xf32>
    %683 = arith.addf %681, %682 : vector<8x128xf32>
    %684 = arith.negf %683 : vector<8x128xf32>
    %685 = math.exp %684 : vector<8x128xf32>
    %cst_222 = arith.constant 1.000000e+00 : f32
    %686 = vector.broadcast %cst_222 : f32 to vector<8x128xf32>
    %687 = arith.addf %686, %685 : vector<8x128xf32>
    %688 = arith.divf %686, %687 : vector<8x128xf32>
    %689 = math.tanh %683 : vector<8x128xf32>
    %690 = vector.extract_strided_slice %688 {offsets = [0, 32], sizes = [8, 32], strides = [1, 1]} : vector<8x128xf32> to vector<8x32xf32>
    %691 = arith.mulf %690, %646 : vector<8x32xf32>
    %692 = vector.extract_strided_slice %688 {offsets = [0, 0], sizes = [8, 32], strides = [1, 1]} : vector<8x128xf32> to vector<8x32xf32>
    %693 = vector.extract_strided_slice %689 {offsets = [0, 64], sizes = [8, 32], strides = [1, 1]} : vector<8x128xf32> to vector<8x32xf32>
    %694 = arith.mulf %692, %693 : vector<8x32xf32>
    %695 = arith.addf %691, %694 : vector<8x32xf32>
    %696 = vector.extract_strided_slice %688 {offsets = [0, 96], sizes = [8, 32], strides = [1, 1]} : vector<8x128xf32> to vector<8x32xf32>
    %697 = math.tanh %695 : vector<8x32xf32>
    %698 = arith.mulf %696, %697 : vector<8x32xf32>
    %cst_223 = arith.constant 0.000000e+00 : f32
    %699 = vector.broadcast %cst_223 : f32 to vector<8x32xf32>
    %700 = arith.select %680, %698, %699 : vector<8x32xi1>, vector<8x32xf32>
    %c0_224 = arith.constant 0 : index
    %c32_225 = arith.constant 32 : index
    %701 = vector.load %arg5[%c0_224, %c32_225] : memref<96x64xf32, #tpu.memory_space<vmem>>, vector<8x32xf32>
    tpu.vector_store %arg5[%c0_224, %c32_225], %700 {strides = array<i32>} : memref<96x64xf32, #tpu.memory_space<vmem>>, vector<8x32xf32>,
    %c0_226 = arith.constant 0 : index
    %c0_227 = arith.constant 0 : index
    %702 = vector.load %arg6[%c0_226, %c0_227] : memref<8x32xf32, #tpu.memory_space<vmem>>, vector<8x32xf32>
    tpu.vector_store %arg6[%c0_226, %c0_227], %675 {strides = array<i32>} : memref<8x32xf32, #tpu.memory_space<vmem>>, vector<8x32xf32>,
    return
  }
}

module attributes {stable_mosaic.version = 11 : i64} {
  func.func @_declstm_kernel(%arg0: memref<64x32xf32, #tpu.memory_space<vmem>>, %arg1: memref<64x1xf32, #tpu.memory_space<vmem>>, %arg2: memref<16x32xf32, #tpu.memory_space<vmem>>, %arg3: memref<32x32xf32, #tpu.memory_space<vmem>>, %arg4: memref<1x32xf32, #tpu.memory_space<vmem>>, %arg5: memref<32x128xf32, #tpu.memory_space<vmem>>, %arg6: memref<32x128xf32, #tpu.memory_space<vmem>>, %arg7: memref<1x128xf32, #tpu.memory_space<vmem>>, %arg8: memref<64x128xf32, #tpu.memory_space<vmem>>, %arg9: memref<1x128xf32, #tpu.memory_space<vmem>>, %arg10: memref<64x32xf32, #tpu.memory_space<vmem>>, %arg11: memref<64x128xf32, #tpu.memory_space<vmem>>) attributes {dimension_semantics = [], scalar_prefetch = 0 : i64, scratch_operands = 1 : i64, tpu.core_type = #tpu.core_type<tc>} {
    %c0 = arith.constant 0 : index
    %c0_0 = arith.constant 0 : index
    %0 = vector.load %arg2[%c0, %c0_0] : memref<16x32xf32, #tpu.memory_space<vmem>>, vector<16x32xf32>
    %c0_1 = arith.constant 0 : index
    %c0_2 = arith.constant 0 : index
    %1 = vector.load %arg3[%c0_1, %c0_2] : memref<32x32xf32, #tpu.memory_space<vmem>>, vector<32x32xf32>
    %cst = arith.constant dense<0.000000e+00> : vector<16x32xf32>
    %2 = tpu.matmul %0, %1, %cst {dimension_numbers = #tpu.dot_dimension_numbers<[1], [0], [0], [1], [0, 0, 1, 1], [], []>} : vector<16x32xf32>, vector<32x32xf32>, vector<16x32xf32> -> vector<16x32xf32>
    %c0_3 = arith.constant 0 : index
    %c0_4 = arith.constant 0 : index
    %3 = vector.load %arg4[%c0_3, %c0_4] : memref<1x32xf32, #tpu.memory_space<vmem>>, vector<1x32xf32>
    %4 = vector.broadcast %3 : vector<1x32xf32> to vector<16x32xf32>
    %5 = arith.addf %2, %4 : vector<16x32xf32>
    %6 = vector.extract_strided_slice %5 {offsets = [0, 0], sizes = [8, 32], strides = [1, 1]} : vector<16x32xf32> to vector<8x32xf32>
    %7 = vector.extract_strided_slice %5 {offsets = [8, 0], sizes = [8, 32], strides = [1, 1]} : vector<16x32xf32> to vector<8x32xf32>
    %cst_5 = arith.constant 0.000000e+00 : f32
    %8 = vector.broadcast %cst_5 : f32 to vector<8x32xf32>
    %cst_6 = arith.constant 0.000000e+00 : f32
    %9 = vector.broadcast %cst_6 : f32 to vector<8x32xf32>
    %c0_7 = arith.constant 0 : index
    %c0_8 = arith.constant 0 : index
    %10 = vector.load %arg0[%c0_7, %c0_8] : memref<64x32xf32, #tpu.memory_space<vmem>>, vector<64x32xf32>
    %c0_9 = arith.constant 0 : index
    %c0_10 = arith.constant 0 : index
    %11 = vector.load %arg5[%c0_9, %c0_10] : memref<32x128xf32, #tpu.memory_space<vmem>>, vector<32x128xf32>
    %cst_11 = arith.constant dense<0.000000e+00> : vector<64x128xf32>
    %12 = tpu.matmul %10, %11, %cst_11 {dimension_numbers = #tpu.dot_dimension_numbers<[1], [0], [0], [1], [0, 0, 1, 1], [], []>} : vector<64x32xf32>, vector<32x128xf32>, vector<64x128xf32> -> vector<64x128xf32>
    %c0_12 = arith.constant 0 : index
    %c0_13 = arith.constant 0 : index
    %13 = vector.load %arg7[%c0_12, %c0_13] : memref<1x128xf32, #tpu.memory_space<vmem>>, vector<1x128xf32>
    %14 = vector.broadcast %13 : vector<1x128xf32> to vector<64x128xf32>
    %15 = arith.addf %12, %14 : vector<64x128xf32>
    %c0_14 = arith.constant 0 : index
    %c0_15 = arith.constant 0 : index
    %16 = vector.load %arg11[%c0_14, %c0_15] : memref<64x128xf32, #tpu.memory_space<vmem>>, vector<64x128xf32>
    tpu.vector_store %arg11[%c0_14, %c0_15], %15 {strides = array<i32>} : memref<64x128xf32, #tpu.memory_space<vmem>>, vector<64x128xf32>,
    %c0_16 = arith.constant 0 : index
    %c0_17 = arith.constant 0 : index
    %17 = vector.load %arg6[%c0_16, %c0_17] : memref<32x128xf32, #tpu.memory_space<vmem>>, vector<32x128xf32>
    %c0_18 = arith.constant 0 : index
    %c0_19 = arith.constant 0 : index
    %18 = vector.load %arg8[%c0_18, %c0_19] : memref<64x128xf32, #tpu.memory_space<vmem>>, vector<64x128xf32>
    %c0_20 = arith.constant 0 : index
    %c0_21 = arith.constant 0 : index
    %19 = vector.load %arg9[%c0_20, %c0_21] : memref<1x128xf32, #tpu.memory_space<vmem>>, vector<1x128xf32>
    %c0_22 = arith.constant 0 : index
    %c0_23 = arith.constant 0 : index
    %20 = vector.load %arg1[%c0_22, %c0_23] : memref<64x1xf32, #tpu.memory_space<vmem>>, vector<8x1xf32>
    %21 = vector.shape_cast %20 : vector<8x1xf32> to vector<8x1xf32>
    %22 = vector.broadcast %21 : vector<8x1xf32> to vector<8x32xf32>
    %cst_24 = arith.constant 0.000000e+00 : f32
    %23 = vector.broadcast %cst_24 : f32 to vector<8x32xf32>
    %24 = arith.cmpf ogt, %22, %23 : vector<8x32xf32>
    %c0_25 = arith.constant 0 : index
    %c0_26 = arith.constant 0 : index
    %25 = vector.load %arg11[%c0_25, %c0_26] : memref<64x128xf32, #tpu.memory_space<vmem>>, vector<8x128xf32>
    %cst_27 = arith.constant dense<0.000000e+00> : vector<8x128xf32>
    %26 = tpu.matmul %6, %17, %cst_27 {dimension_numbers = #tpu.dot_dimension_numbers<[1], [0], [0], [1], [0, 0, 1, 1], [], []>} : vector<8x32xf32>, vector<32x128xf32>, vector<8x128xf32> -> vector<8x128xf32>
    %27 = arith.addf %25, %26 : vector<8x128xf32>
    %28 = arith.negf %27 : vector<8x128xf32>
    %29 = math.exp %28 : vector<8x128xf32>
    %cst_28 = arith.constant 1.000000e+00 : f32
    %30 = vector.broadcast %cst_28 : f32 to vector<8x128xf32>
    %31 = arith.addf %30, %29 : vector<8x128xf32>
    %32 = arith.divf %30, %31 : vector<8x128xf32>
    %33 = math.tanh %27 : vector<8x128xf32>
    %34 = vector.extract_strided_slice %32 {offsets = [0, 32], sizes = [8, 32], strides = [1, 1]} : vector<8x128xf32> to vector<8x32xf32>
    %35 = arith.mulf %34, %8 : vector<8x32xf32>
    %36 = vector.extract_strided_slice %32 {offsets = [0, 0], sizes = [8, 32], strides = [1, 1]} : vector<8x128xf32> to vector<8x32xf32>
    %37 = vector.extract_strided_slice %33 {offsets = [0, 64], sizes = [8, 32], strides = [1, 1]} : vector<8x128xf32> to vector<8x32xf32>
    %38 = arith.mulf %36, %37 : vector<8x32xf32>
    %39 = arith.addf %35, %38 : vector<8x32xf32>
    %40 = vector.extract_strided_slice %32 {offsets = [0, 96], sizes = [8, 32], strides = [1, 1]} : vector<8x128xf32> to vector<8x32xf32>
    %41 = math.tanh %39 : vector<8x32xf32>
    %42 = arith.mulf %40, %41 : vector<8x32xf32>
    %cst_29 = arith.constant 0.000000e+00 : f32
    %43 = vector.broadcast %cst_29 : f32 to vector<8x32xf32>
    %44 = arith.select %24, %42, %43 : vector<8x32xi1>, vector<8x32xf32>
    %45 = arith.select %24, %42, %6 : vector<8x32xi1>, vector<8x32xf32>
    %46 = arith.select %24, %39, %8 : vector<8x32xi1>, vector<8x32xf32>
    %47 = tpu.concatenate %44, %7 in 1 : vector<8x32xf32>, vector<8x32xf32> -> vector<8x64xf32>
    %cst_30 = arith.constant dense<0.000000e+00> : vector<8x128xf32>
    %48 = tpu.matmul %47, %18, %cst_30 {dimension_numbers = #tpu.dot_dimension_numbers<[1], [0], [0], [1], [0, 0, 1, 1], [], []>} : vector<8x64xf32>, vector<64x128xf32>, vector<8x128xf32> -> vector<8x128xf32>
    %49 = vector.broadcast %19 : vector<1x128xf32> to vector<8x128xf32>
    %50 = arith.addf %48, %49 : vector<8x128xf32>
    %51 = arith.negf %50 : vector<8x128xf32>
    %52 = math.exp %51 : vector<8x128xf32>
    %cst_31 = arith.constant 1.000000e+00 : f32
    %53 = vector.broadcast %cst_31 : f32 to vector<8x128xf32>
    %54 = arith.addf %53, %52 : vector<8x128xf32>
    %55 = arith.divf %53, %54 : vector<8x128xf32>
    %56 = math.tanh %50 : vector<8x128xf32>
    %57 = vector.extract_strided_slice %55 {offsets = [0, 32], sizes = [8, 32], strides = [1, 1]} : vector<8x128xf32> to vector<8x32xf32>
    %58 = arith.mulf %57, %9 : vector<8x32xf32>
    %59 = vector.extract_strided_slice %55 {offsets = [0, 0], sizes = [8, 32], strides = [1, 1]} : vector<8x128xf32> to vector<8x32xf32>
    %60 = vector.extract_strided_slice %56 {offsets = [0, 64], sizes = [8, 32], strides = [1, 1]} : vector<8x128xf32> to vector<8x32xf32>
    %61 = arith.mulf %59, %60 : vector<8x32xf32>
    %62 = arith.addf %58, %61 : vector<8x32xf32>
    %63 = vector.extract_strided_slice %55 {offsets = [0, 96], sizes = [8, 32], strides = [1, 1]} : vector<8x128xf32> to vector<8x32xf32>
    %64 = math.tanh %62 : vector<8x32xf32>
    %65 = arith.mulf %63, %64 : vector<8x32xf32>
    %cst_32 = arith.constant 0.000000e+00 : f32
    %66 = vector.broadcast %cst_32 : f32 to vector<8x32xf32>
    %67 = arith.select %24, %65, %66 : vector<8x32xi1>, vector<8x32xf32>
    %c0_33 = arith.constant 0 : index
    %c0_34 = arith.constant 0 : index
    %68 = vector.load %arg10[%c0_33, %c0_34] : memref<64x32xf32, #tpu.memory_space<vmem>>, vector<8x32xf32>
    tpu.vector_store %arg10[%c0_33, %c0_34], %67 {strides = array<i32>} : memref<64x32xf32, #tpu.memory_space<vmem>>, vector<8x32xf32>,
    %69 = arith.select %24, %65, %7 : vector<8x32xi1>, vector<8x32xf32>
    %70 = arith.select %24, %62, %9 : vector<8x32xi1>, vector<8x32xf32>
    %c8 = arith.constant 8 : index
    %c0_35 = arith.constant 0 : index
    %71 = vector.load %arg1[%c8, %c0_35] : memref<64x1xf32, #tpu.memory_space<vmem>>, vector<8x1xf32>
    %72 = vector.shape_cast %71 : vector<8x1xf32> to vector<8x1xf32>
    %73 = vector.broadcast %72 : vector<8x1xf32> to vector<8x32xf32>
    %cst_36 = arith.constant 0.000000e+00 : f32
    %74 = vector.broadcast %cst_36 : f32 to vector<8x32xf32>
    %75 = arith.cmpf ogt, %73, %74 : vector<8x32xf32>
    %c8_37 = arith.constant 8 : index
    %c0_38 = arith.constant 0 : index
    %76 = vector.load %arg11[%c8_37, %c0_38] : memref<64x128xf32, #tpu.memory_space<vmem>>, vector<8x128xf32>
    %cst_39 = arith.constant dense<0.000000e+00> : vector<8x128xf32>
    %77 = tpu.matmul %45, %17, %cst_39 {dimension_numbers = #tpu.dot_dimension_numbers<[1], [0], [0], [1], [0, 0, 1, 1], [], []>} : vector<8x32xf32>, vector<32x128xf32>, vector<8x128xf32> -> vector<8x128xf32>
    %78 = arith.addf %76, %77 : vector<8x128xf32>
    %79 = arith.negf %78 : vector<8x128xf32>
    %80 = math.exp %79 : vector<8x128xf32>
    %cst_40 = arith.constant 1.000000e+00 : f32
    %81 = vector.broadcast %cst_40 : f32 to vector<8x128xf32>
    %82 = arith.addf %81, %80 : vector<8x128xf32>
    %83 = arith.divf %81, %82 : vector<8x128xf32>
    %84 = math.tanh %78 : vector<8x128xf32>
    %85 = vector.extract_strided_slice %83 {offsets = [0, 32], sizes = [8, 32], strides = [1, 1]} : vector<8x128xf32> to vector<8x32xf32>
    %86 = arith.mulf %85, %46 : vector<8x32xf32>
    %87 = vector.extract_strided_slice %83 {offsets = [0, 0], sizes = [8, 32], strides = [1, 1]} : vector<8x128xf32> to vector<8x32xf32>
    %88 = vector.extract_strided_slice %84 {offsets = [0, 64], sizes = [8, 32], strides = [1, 1]} : vector<8x128xf32> to vector<8x32xf32>
    %89 = arith.mulf %87, %88 : vector<8x32xf32>
    %90 = arith.addf %86, %89 : vector<8x32xf32>
    %91 = vector.extract_strided_slice %83 {offsets = [0, 96], sizes = [8, 32], strides = [1, 1]} : vector<8x128xf32> to vector<8x32xf32>
    %92 = math.tanh %90 : vector<8x32xf32>
    %93 = arith.mulf %91, %92 : vector<8x32xf32>
    %cst_41 = arith.constant 0.000000e+00 : f32
    %94 = vector.broadcast %cst_41 : f32 to vector<8x32xf32>
    %95 = arith.select %75, %93, %94 : vector<8x32xi1>, vector<8x32xf32>
    %96 = arith.select %75, %93, %45 : vector<8x32xi1>, vector<8x32xf32>
    %97 = arith.select %75, %90, %46 : vector<8x32xi1>, vector<8x32xf32>
    %98 = tpu.concatenate %95, %69 in 1 : vector<8x32xf32>, vector<8x32xf32> -> vector<8x64xf32>
    %cst_42 = arith.constant dense<0.000000e+00> : vector<8x128xf32>
    %99 = tpu.matmul %98, %18, %cst_42 {dimension_numbers = #tpu.dot_dimension_numbers<[1], [0], [0], [1], [0, 0, 1, 1], [], []>} : vector<8x64xf32>, vector<64x128xf32>, vector<8x128xf32> -> vector<8x128xf32>
    %100 = vector.broadcast %19 : vector<1x128xf32> to vector<8x128xf32>
    %101 = arith.addf %99, %100 : vector<8x128xf32>
    %102 = arith.negf %101 : vector<8x128xf32>
    %103 = math.exp %102 : vector<8x128xf32>
    %cst_43 = arith.constant 1.000000e+00 : f32
    %104 = vector.broadcast %cst_43 : f32 to vector<8x128xf32>
    %105 = arith.addf %104, %103 : vector<8x128xf32>
    %106 = arith.divf %104, %105 : vector<8x128xf32>
    %107 = math.tanh %101 : vector<8x128xf32>
    %108 = vector.extract_strided_slice %106 {offsets = [0, 32], sizes = [8, 32], strides = [1, 1]} : vector<8x128xf32> to vector<8x32xf32>
    %109 = arith.mulf %108, %70 : vector<8x32xf32>
    %110 = vector.extract_strided_slice %106 {offsets = [0, 0], sizes = [8, 32], strides = [1, 1]} : vector<8x128xf32> to vector<8x32xf32>
    %111 = vector.extract_strided_slice %107 {offsets = [0, 64], sizes = [8, 32], strides = [1, 1]} : vector<8x128xf32> to vector<8x32xf32>
    %112 = arith.mulf %110, %111 : vector<8x32xf32>
    %113 = arith.addf %109, %112 : vector<8x32xf32>
    %114 = vector.extract_strided_slice %106 {offsets = [0, 96], sizes = [8, 32], strides = [1, 1]} : vector<8x128xf32> to vector<8x32xf32>
    %115 = math.tanh %113 : vector<8x32xf32>
    %116 = arith.mulf %114, %115 : vector<8x32xf32>
    %cst_44 = arith.constant 0.000000e+00 : f32
    %117 = vector.broadcast %cst_44 : f32 to vector<8x32xf32>
    %118 = arith.select %75, %116, %117 : vector<8x32xi1>, vector<8x32xf32>
    %c8_45 = arith.constant 8 : index
    %c0_46 = arith.constant 0 : index
    %119 = vector.load %arg10[%c8_45, %c0_46] : memref<64x32xf32, #tpu.memory_space<vmem>>, vector<8x32xf32>
    tpu.vector_store %arg10[%c8_45, %c0_46], %118 {strides = array<i32>} : memref<64x32xf32, #tpu.memory_space<vmem>>, vector<8x32xf32>,
    %120 = arith.select %75, %116, %69 : vector<8x32xi1>, vector<8x32xf32>
    %121 = arith.select %75, %113, %70 : vector<8x32xi1>, vector<8x32xf32>
    %c16 = arith.constant 16 : index
    %c0_47 = arith.constant 0 : index
    %122 = vector.load %arg1[%c16, %c0_47] : memref<64x1xf32, #tpu.memory_space<vmem>>, vector<8x1xf32>
    %123 = vector.shape_cast %122 : vector<8x1xf32> to vector<8x1xf32>
    %124 = vector.broadcast %123 : vector<8x1xf32> to vector<8x32xf32>
    %cst_48 = arith.constant 0.000000e+00 : f32
    %125 = vector.broadcast %cst_48 : f32 to vector<8x32xf32>
    %126 = arith.cmpf ogt, %124, %125 : vector<8x32xf32>
    %c16_49 = arith.constant 16 : index
    %c0_50 = arith.constant 0 : index
    %127 = vector.load %arg11[%c16_49, %c0_50] : memref<64x128xf32, #tpu.memory_space<vmem>>, vector<8x128xf32>
    %cst_51 = arith.constant dense<0.000000e+00> : vector<8x128xf32>
    %128 = tpu.matmul %96, %17, %cst_51 {dimension_numbers = #tpu.dot_dimension_numbers<[1], [0], [0], [1], [0, 0, 1, 1], [], []>} : vector<8x32xf32>, vector<32x128xf32>, vector<8x128xf32> -> vector<8x128xf32>
    %129 = arith.addf %127, %128 : vector<8x128xf32>
    %130 = arith.negf %129 : vector<8x128xf32>
    %131 = math.exp %130 : vector<8x128xf32>
    %cst_52 = arith.constant 1.000000e+00 : f32
    %132 = vector.broadcast %cst_52 : f32 to vector<8x128xf32>
    %133 = arith.addf %132, %131 : vector<8x128xf32>
    %134 = arith.divf %132, %133 : vector<8x128xf32>
    %135 = math.tanh %129 : vector<8x128xf32>
    %136 = vector.extract_strided_slice %134 {offsets = [0, 32], sizes = [8, 32], strides = [1, 1]} : vector<8x128xf32> to vector<8x32xf32>
    %137 = arith.mulf %136, %97 : vector<8x32xf32>
    %138 = vector.extract_strided_slice %134 {offsets = [0, 0], sizes = [8, 32], strides = [1, 1]} : vector<8x128xf32> to vector<8x32xf32>
    %139 = vector.extract_strided_slice %135 {offsets = [0, 64], sizes = [8, 32], strides = [1, 1]} : vector<8x128xf32> to vector<8x32xf32>
    %140 = arith.mulf %138, %139 : vector<8x32xf32>
    %141 = arith.addf %137, %140 : vector<8x32xf32>
    %142 = vector.extract_strided_slice %134 {offsets = [0, 96], sizes = [8, 32], strides = [1, 1]} : vector<8x128xf32> to vector<8x32xf32>
    %143 = math.tanh %141 : vector<8x32xf32>
    %144 = arith.mulf %142, %143 : vector<8x32xf32>
    %cst_53 = arith.constant 0.000000e+00 : f32
    %145 = vector.broadcast %cst_53 : f32 to vector<8x32xf32>
    %146 = arith.select %126, %144, %145 : vector<8x32xi1>, vector<8x32xf32>
    %147 = arith.select %126, %144, %96 : vector<8x32xi1>, vector<8x32xf32>
    %148 = arith.select %126, %141, %97 : vector<8x32xi1>, vector<8x32xf32>
    %149 = tpu.concatenate %146, %120 in 1 : vector<8x32xf32>, vector<8x32xf32> -> vector<8x64xf32>
    %cst_54 = arith.constant dense<0.000000e+00> : vector<8x128xf32>
    %150 = tpu.matmul %149, %18, %cst_54 {dimension_numbers = #tpu.dot_dimension_numbers<[1], [0], [0], [1], [0, 0, 1, 1], [], []>} : vector<8x64xf32>, vector<64x128xf32>, vector<8x128xf32> -> vector<8x128xf32>
    %151 = vector.broadcast %19 : vector<1x128xf32> to vector<8x128xf32>
    %152 = arith.addf %150, %151 : vector<8x128xf32>
    %153 = arith.negf %152 : vector<8x128xf32>
    %154 = math.exp %153 : vector<8x128xf32>
    %cst_55 = arith.constant 1.000000e+00 : f32
    %155 = vector.broadcast %cst_55 : f32 to vector<8x128xf32>
    %156 = arith.addf %155, %154 : vector<8x128xf32>
    %157 = arith.divf %155, %156 : vector<8x128xf32>
    %158 = math.tanh %152 : vector<8x128xf32>
    %159 = vector.extract_strided_slice %157 {offsets = [0, 32], sizes = [8, 32], strides = [1, 1]} : vector<8x128xf32> to vector<8x32xf32>
    %160 = arith.mulf %159, %121 : vector<8x32xf32>
    %161 = vector.extract_strided_slice %157 {offsets = [0, 0], sizes = [8, 32], strides = [1, 1]} : vector<8x128xf32> to vector<8x32xf32>
    %162 = vector.extract_strided_slice %158 {offsets = [0, 64], sizes = [8, 32], strides = [1, 1]} : vector<8x128xf32> to vector<8x32xf32>
    %163 = arith.mulf %161, %162 : vector<8x32xf32>
    %164 = arith.addf %160, %163 : vector<8x32xf32>
    %165 = vector.extract_strided_slice %157 {offsets = [0, 96], sizes = [8, 32], strides = [1, 1]} : vector<8x128xf32> to vector<8x32xf32>
    %166 = math.tanh %164 : vector<8x32xf32>
    %167 = arith.mulf %165, %166 : vector<8x32xf32>
    %cst_56 = arith.constant 0.000000e+00 : f32
    %168 = vector.broadcast %cst_56 : f32 to vector<8x32xf32>
    %169 = arith.select %126, %167, %168 : vector<8x32xi1>, vector<8x32xf32>
    %c16_57 = arith.constant 16 : index
    %c0_58 = arith.constant 0 : index
    %170 = vector.load %arg10[%c16_57, %c0_58] : memref<64x32xf32, #tpu.memory_space<vmem>>, vector<8x32xf32>
    tpu.vector_store %arg10[%c16_57, %c0_58], %169 {strides = array<i32>} : memref<64x32xf32, #tpu.memory_space<vmem>>, vector<8x32xf32>,
    %171 = arith.select %126, %167, %120 : vector<8x32xi1>, vector<8x32xf32>
    %172 = arith.select %126, %164, %121 : vector<8x32xi1>, vector<8x32xf32>
    %c24 = arith.constant 24 : index
    %c0_59 = arith.constant 0 : index
    %173 = vector.load %arg1[%c24, %c0_59] : memref<64x1xf32, #tpu.memory_space<vmem>>, vector<8x1xf32>
    %174 = vector.shape_cast %173 : vector<8x1xf32> to vector<8x1xf32>
    %175 = vector.broadcast %174 : vector<8x1xf32> to vector<8x32xf32>
    %cst_60 = arith.constant 0.000000e+00 : f32
    %176 = vector.broadcast %cst_60 : f32 to vector<8x32xf32>
    %177 = arith.cmpf ogt, %175, %176 : vector<8x32xf32>
    %c24_61 = arith.constant 24 : index
    %c0_62 = arith.constant 0 : index
    %178 = vector.load %arg11[%c24_61, %c0_62] : memref<64x128xf32, #tpu.memory_space<vmem>>, vector<8x128xf32>
    %cst_63 = arith.constant dense<0.000000e+00> : vector<8x128xf32>
    %179 = tpu.matmul %147, %17, %cst_63 {dimension_numbers = #tpu.dot_dimension_numbers<[1], [0], [0], [1], [0, 0, 1, 1], [], []>} : vector<8x32xf32>, vector<32x128xf32>, vector<8x128xf32> -> vector<8x128xf32>
    %180 = arith.addf %178, %179 : vector<8x128xf32>
    %181 = arith.negf %180 : vector<8x128xf32>
    %182 = math.exp %181 : vector<8x128xf32>
    %cst_64 = arith.constant 1.000000e+00 : f32
    %183 = vector.broadcast %cst_64 : f32 to vector<8x128xf32>
    %184 = arith.addf %183, %182 : vector<8x128xf32>
    %185 = arith.divf %183, %184 : vector<8x128xf32>
    %186 = math.tanh %180 : vector<8x128xf32>
    %187 = vector.extract_strided_slice %185 {offsets = [0, 32], sizes = [8, 32], strides = [1, 1]} : vector<8x128xf32> to vector<8x32xf32>
    %188 = arith.mulf %187, %148 : vector<8x32xf32>
    %189 = vector.extract_strided_slice %185 {offsets = [0, 0], sizes = [8, 32], strides = [1, 1]} : vector<8x128xf32> to vector<8x32xf32>
    %190 = vector.extract_strided_slice %186 {offsets = [0, 64], sizes = [8, 32], strides = [1, 1]} : vector<8x128xf32> to vector<8x32xf32>
    %191 = arith.mulf %189, %190 : vector<8x32xf32>
    %192 = arith.addf %188, %191 : vector<8x32xf32>
    %193 = vector.extract_strided_slice %185 {offsets = [0, 96], sizes = [8, 32], strides = [1, 1]} : vector<8x128xf32> to vector<8x32xf32>
    %194 = math.tanh %192 : vector<8x32xf32>
    %195 = arith.mulf %193, %194 : vector<8x32xf32>
    %cst_65 = arith.constant 0.000000e+00 : f32
    %196 = vector.broadcast %cst_65 : f32 to vector<8x32xf32>
    %197 = arith.select %177, %195, %196 : vector<8x32xi1>, vector<8x32xf32>
    %198 = arith.select %177, %195, %147 : vector<8x32xi1>, vector<8x32xf32>
    %199 = arith.select %177, %192, %148 : vector<8x32xi1>, vector<8x32xf32>
    %200 = tpu.concatenate %197, %171 in 1 : vector<8x32xf32>, vector<8x32xf32> -> vector<8x64xf32>
    %cst_66 = arith.constant dense<0.000000e+00> : vector<8x128xf32>
    %201 = tpu.matmul %200, %18, %cst_66 {dimension_numbers = #tpu.dot_dimension_numbers<[1], [0], [0], [1], [0, 0, 1, 1], [], []>} : vector<8x64xf32>, vector<64x128xf32>, vector<8x128xf32> -> vector<8x128xf32>
    %202 = vector.broadcast %19 : vector<1x128xf32> to vector<8x128xf32>
    %203 = arith.addf %201, %202 : vector<8x128xf32>
    %204 = arith.negf %203 : vector<8x128xf32>
    %205 = math.exp %204 : vector<8x128xf32>
    %cst_67 = arith.constant 1.000000e+00 : f32
    %206 = vector.broadcast %cst_67 : f32 to vector<8x128xf32>
    %207 = arith.addf %206, %205 : vector<8x128xf32>
    %208 = arith.divf %206, %207 : vector<8x128xf32>
    %209 = math.tanh %203 : vector<8x128xf32>
    %210 = vector.extract_strided_slice %208 {offsets = [0, 32], sizes = [8, 32], strides = [1, 1]} : vector<8x128xf32> to vector<8x32xf32>
    %211 = arith.mulf %210, %172 : vector<8x32xf32>
    %212 = vector.extract_strided_slice %208 {offsets = [0, 0], sizes = [8, 32], strides = [1, 1]} : vector<8x128xf32> to vector<8x32xf32>
    %213 = vector.extract_strided_slice %209 {offsets = [0, 64], sizes = [8, 32], strides = [1, 1]} : vector<8x128xf32> to vector<8x32xf32>
    %214 = arith.mulf %212, %213 : vector<8x32xf32>
    %215 = arith.addf %211, %214 : vector<8x32xf32>
    %216 = vector.extract_strided_slice %208 {offsets = [0, 96], sizes = [8, 32], strides = [1, 1]} : vector<8x128xf32> to vector<8x32xf32>
    %217 = math.tanh %215 : vector<8x32xf32>
    %218 = arith.mulf %216, %217 : vector<8x32xf32>
    %cst_68 = arith.constant 0.000000e+00 : f32
    %219 = vector.broadcast %cst_68 : f32 to vector<8x32xf32>
    %220 = arith.select %177, %218, %219 : vector<8x32xi1>, vector<8x32xf32>
    %c24_69 = arith.constant 24 : index
    %c0_70 = arith.constant 0 : index
    %221 = vector.load %arg10[%c24_69, %c0_70] : memref<64x32xf32, #tpu.memory_space<vmem>>, vector<8x32xf32>
    tpu.vector_store %arg10[%c24_69, %c0_70], %220 {strides = array<i32>} : memref<64x32xf32, #tpu.memory_space<vmem>>, vector<8x32xf32>,
    %222 = arith.select %177, %218, %171 : vector<8x32xi1>, vector<8x32xf32>
    %223 = arith.select %177, %215, %172 : vector<8x32xi1>, vector<8x32xf32>
    %c32 = arith.constant 32 : index
    %c0_71 = arith.constant 0 : index
    %224 = vector.load %arg1[%c32, %c0_71] : memref<64x1xf32, #tpu.memory_space<vmem>>, vector<8x1xf32>
    %225 = vector.shape_cast %224 : vector<8x1xf32> to vector<8x1xf32>
    %226 = vector.broadcast %225 : vector<8x1xf32> to vector<8x32xf32>
    %cst_72 = arith.constant 0.000000e+00 : f32
    %227 = vector.broadcast %cst_72 : f32 to vector<8x32xf32>
    %228 = arith.cmpf ogt, %226, %227 : vector<8x32xf32>
    %c32_73 = arith.constant 32 : index
    %c0_74 = arith.constant 0 : index
    %229 = vector.load %arg11[%c32_73, %c0_74] : memref<64x128xf32, #tpu.memory_space<vmem>>, vector<8x128xf32>
    %cst_75 = arith.constant dense<0.000000e+00> : vector<8x128xf32>
    %230 = tpu.matmul %198, %17, %cst_75 {dimension_numbers = #tpu.dot_dimension_numbers<[1], [0], [0], [1], [0, 0, 1, 1], [], []>} : vector<8x32xf32>, vector<32x128xf32>, vector<8x128xf32> -> vector<8x128xf32>
    %231 = arith.addf %229, %230 : vector<8x128xf32>
    %232 = arith.negf %231 : vector<8x128xf32>
    %233 = math.exp %232 : vector<8x128xf32>
    %cst_76 = arith.constant 1.000000e+00 : f32
    %234 = vector.broadcast %cst_76 : f32 to vector<8x128xf32>
    %235 = arith.addf %234, %233 : vector<8x128xf32>
    %236 = arith.divf %234, %235 : vector<8x128xf32>
    %237 = math.tanh %231 : vector<8x128xf32>
    %238 = vector.extract_strided_slice %236 {offsets = [0, 32], sizes = [8, 32], strides = [1, 1]} : vector<8x128xf32> to vector<8x32xf32>
    %239 = arith.mulf %238, %199 : vector<8x32xf32>
    %240 = vector.extract_strided_slice %236 {offsets = [0, 0], sizes = [8, 32], strides = [1, 1]} : vector<8x128xf32> to vector<8x32xf32>
    %241 = vector.extract_strided_slice %237 {offsets = [0, 64], sizes = [8, 32], strides = [1, 1]} : vector<8x128xf32> to vector<8x32xf32>
    %242 = arith.mulf %240, %241 : vector<8x32xf32>
    %243 = arith.addf %239, %242 : vector<8x32xf32>
    %244 = vector.extract_strided_slice %236 {offsets = [0, 96], sizes = [8, 32], strides = [1, 1]} : vector<8x128xf32> to vector<8x32xf32>
    %245 = math.tanh %243 : vector<8x32xf32>
    %246 = arith.mulf %244, %245 : vector<8x32xf32>
    %cst_77 = arith.constant 0.000000e+00 : f32
    %247 = vector.broadcast %cst_77 : f32 to vector<8x32xf32>
    %248 = arith.select %228, %246, %247 : vector<8x32xi1>, vector<8x32xf32>
    %249 = arith.select %228, %246, %198 : vector<8x32xi1>, vector<8x32xf32>
    %250 = arith.select %228, %243, %199 : vector<8x32xi1>, vector<8x32xf32>
    %251 = tpu.concatenate %248, %222 in 1 : vector<8x32xf32>, vector<8x32xf32> -> vector<8x64xf32>
    %cst_78 = arith.constant dense<0.000000e+00> : vector<8x128xf32>
    %252 = tpu.matmul %251, %18, %cst_78 {dimension_numbers = #tpu.dot_dimension_numbers<[1], [0], [0], [1], [0, 0, 1, 1], [], []>} : vector<8x64xf32>, vector<64x128xf32>, vector<8x128xf32> -> vector<8x128xf32>
    %253 = vector.broadcast %19 : vector<1x128xf32> to vector<8x128xf32>
    %254 = arith.addf %252, %253 : vector<8x128xf32>
    %255 = arith.negf %254 : vector<8x128xf32>
    %256 = math.exp %255 : vector<8x128xf32>
    %cst_79 = arith.constant 1.000000e+00 : f32
    %257 = vector.broadcast %cst_79 : f32 to vector<8x128xf32>
    %258 = arith.addf %257, %256 : vector<8x128xf32>
    %259 = arith.divf %257, %258 : vector<8x128xf32>
    %260 = math.tanh %254 : vector<8x128xf32>
    %261 = vector.extract_strided_slice %259 {offsets = [0, 32], sizes = [8, 32], strides = [1, 1]} : vector<8x128xf32> to vector<8x32xf32>
    %262 = arith.mulf %261, %223 : vector<8x32xf32>
    %263 = vector.extract_strided_slice %259 {offsets = [0, 0], sizes = [8, 32], strides = [1, 1]} : vector<8x128xf32> to vector<8x32xf32>
    %264 = vector.extract_strided_slice %260 {offsets = [0, 64], sizes = [8, 32], strides = [1, 1]} : vector<8x128xf32> to vector<8x32xf32>
    %265 = arith.mulf %263, %264 : vector<8x32xf32>
    %266 = arith.addf %262, %265 : vector<8x32xf32>
    %267 = vector.extract_strided_slice %259 {offsets = [0, 96], sizes = [8, 32], strides = [1, 1]} : vector<8x128xf32> to vector<8x32xf32>
    %268 = math.tanh %266 : vector<8x32xf32>
    %269 = arith.mulf %267, %268 : vector<8x32xf32>
    %cst_80 = arith.constant 0.000000e+00 : f32
    %270 = vector.broadcast %cst_80 : f32 to vector<8x32xf32>
    %271 = arith.select %228, %269, %270 : vector<8x32xi1>, vector<8x32xf32>
    %c32_81 = arith.constant 32 : index
    %c0_82 = arith.constant 0 : index
    %272 = vector.load %arg10[%c32_81, %c0_82] : memref<64x32xf32, #tpu.memory_space<vmem>>, vector<8x32xf32>
    tpu.vector_store %arg10[%c32_81, %c0_82], %271 {strides = array<i32>} : memref<64x32xf32, #tpu.memory_space<vmem>>, vector<8x32xf32>,
    %273 = arith.select %228, %269, %222 : vector<8x32xi1>, vector<8x32xf32>
    %274 = arith.select %228, %266, %223 : vector<8x32xi1>, vector<8x32xf32>
    %c40 = arith.constant 40 : index
    %c0_83 = arith.constant 0 : index
    %275 = vector.load %arg1[%c40, %c0_83] : memref<64x1xf32, #tpu.memory_space<vmem>>, vector<8x1xf32>
    %276 = vector.shape_cast %275 : vector<8x1xf32> to vector<8x1xf32>
    %277 = vector.broadcast %276 : vector<8x1xf32> to vector<8x32xf32>
    %cst_84 = arith.constant 0.000000e+00 : f32
    %278 = vector.broadcast %cst_84 : f32 to vector<8x32xf32>
    %279 = arith.cmpf ogt, %277, %278 : vector<8x32xf32>
    %c40_85 = arith.constant 40 : index
    %c0_86 = arith.constant 0 : index
    %280 = vector.load %arg11[%c40_85, %c0_86] : memref<64x128xf32, #tpu.memory_space<vmem>>, vector<8x128xf32>
    %cst_87 = arith.constant dense<0.000000e+00> : vector<8x128xf32>
    %281 = tpu.matmul %249, %17, %cst_87 {dimension_numbers = #tpu.dot_dimension_numbers<[1], [0], [0], [1], [0, 0, 1, 1], [], []>} : vector<8x32xf32>, vector<32x128xf32>, vector<8x128xf32> -> vector<8x128xf32>
    %282 = arith.addf %280, %281 : vector<8x128xf32>
    %283 = arith.negf %282 : vector<8x128xf32>
    %284 = math.exp %283 : vector<8x128xf32>
    %cst_88 = arith.constant 1.000000e+00 : f32
    %285 = vector.broadcast %cst_88 : f32 to vector<8x128xf32>
    %286 = arith.addf %285, %284 : vector<8x128xf32>
    %287 = arith.divf %285, %286 : vector<8x128xf32>
    %288 = math.tanh %282 : vector<8x128xf32>
    %289 = vector.extract_strided_slice %287 {offsets = [0, 32], sizes = [8, 32], strides = [1, 1]} : vector<8x128xf32> to vector<8x32xf32>
    %290 = arith.mulf %289, %250 : vector<8x32xf32>
    %291 = vector.extract_strided_slice %287 {offsets = [0, 0], sizes = [8, 32], strides = [1, 1]} : vector<8x128xf32> to vector<8x32xf32>
    %292 = vector.extract_strided_slice %288 {offsets = [0, 64], sizes = [8, 32], strides = [1, 1]} : vector<8x128xf32> to vector<8x32xf32>
    %293 = arith.mulf %291, %292 : vector<8x32xf32>
    %294 = arith.addf %290, %293 : vector<8x32xf32>
    %295 = vector.extract_strided_slice %287 {offsets = [0, 96], sizes = [8, 32], strides = [1, 1]} : vector<8x128xf32> to vector<8x32xf32>
    %296 = math.tanh %294 : vector<8x32xf32>
    %297 = arith.mulf %295, %296 : vector<8x32xf32>
    %cst_89 = arith.constant 0.000000e+00 : f32
    %298 = vector.broadcast %cst_89 : f32 to vector<8x32xf32>
    %299 = arith.select %279, %297, %298 : vector<8x32xi1>, vector<8x32xf32>
    %300 = arith.select %279, %297, %249 : vector<8x32xi1>, vector<8x32xf32>
    %301 = arith.select %279, %294, %250 : vector<8x32xi1>, vector<8x32xf32>
    %302 = tpu.concatenate %299, %273 in 1 : vector<8x32xf32>, vector<8x32xf32> -> vector<8x64xf32>
    %cst_90 = arith.constant dense<0.000000e+00> : vector<8x128xf32>
    %303 = tpu.matmul %302, %18, %cst_90 {dimension_numbers = #tpu.dot_dimension_numbers<[1], [0], [0], [1], [0, 0, 1, 1], [], []>} : vector<8x64xf32>, vector<64x128xf32>, vector<8x128xf32> -> vector<8x128xf32>
    %304 = vector.broadcast %19 : vector<1x128xf32> to vector<8x128xf32>
    %305 = arith.addf %303, %304 : vector<8x128xf32>
    %306 = arith.negf %305 : vector<8x128xf32>
    %307 = math.exp %306 : vector<8x128xf32>
    %cst_91 = arith.constant 1.000000e+00 : f32
    %308 = vector.broadcast %cst_91 : f32 to vector<8x128xf32>
    %309 = arith.addf %308, %307 : vector<8x128xf32>
    %310 = arith.divf %308, %309 : vector<8x128xf32>
    %311 = math.tanh %305 : vector<8x128xf32>
    %312 = vector.extract_strided_slice %310 {offsets = [0, 32], sizes = [8, 32], strides = [1, 1]} : vector<8x128xf32> to vector<8x32xf32>
    %313 = arith.mulf %312, %274 : vector<8x32xf32>
    %314 = vector.extract_strided_slice %310 {offsets = [0, 0], sizes = [8, 32], strides = [1, 1]} : vector<8x128xf32> to vector<8x32xf32>
    %315 = vector.extract_strided_slice %311 {offsets = [0, 64], sizes = [8, 32], strides = [1, 1]} : vector<8x128xf32> to vector<8x32xf32>
    %316 = arith.mulf %314, %315 : vector<8x32xf32>
    %317 = arith.addf %313, %316 : vector<8x32xf32>
    %318 = vector.extract_strided_slice %310 {offsets = [0, 96], sizes = [8, 32], strides = [1, 1]} : vector<8x128xf32> to vector<8x32xf32>
    %319 = math.tanh %317 : vector<8x32xf32>
    %320 = arith.mulf %318, %319 : vector<8x32xf32>
    %cst_92 = arith.constant 0.000000e+00 : f32
    %321 = vector.broadcast %cst_92 : f32 to vector<8x32xf32>
    %322 = arith.select %279, %320, %321 : vector<8x32xi1>, vector<8x32xf32>
    %c40_93 = arith.constant 40 : index
    %c0_94 = arith.constant 0 : index
    %323 = vector.load %arg10[%c40_93, %c0_94] : memref<64x32xf32, #tpu.memory_space<vmem>>, vector<8x32xf32>
    tpu.vector_store %arg10[%c40_93, %c0_94], %322 {strides = array<i32>} : memref<64x32xf32, #tpu.memory_space<vmem>>, vector<8x32xf32>,
    %324 = arith.select %279, %320, %273 : vector<8x32xi1>, vector<8x32xf32>
    %325 = arith.select %279, %317, %274 : vector<8x32xi1>, vector<8x32xf32>
    %c48 = arith.constant 48 : index
    %c0_95 = arith.constant 0 : index
    %326 = vector.load %arg1[%c48, %c0_95] : memref<64x1xf32, #tpu.memory_space<vmem>>, vector<8x1xf32>
    %327 = vector.shape_cast %326 : vector<8x1xf32> to vector<8x1xf32>
    %328 = vector.broadcast %327 : vector<8x1xf32> to vector<8x32xf32>
    %cst_96 = arith.constant 0.000000e+00 : f32
    %329 = vector.broadcast %cst_96 : f32 to vector<8x32xf32>
    %330 = arith.cmpf ogt, %328, %329 : vector<8x32xf32>
    %c48_97 = arith.constant 48 : index
    %c0_98 = arith.constant 0 : index
    %331 = vector.load %arg11[%c48_97, %c0_98] : memref<64x128xf32, #tpu.memory_space<vmem>>, vector<8x128xf32>
    %cst_99 = arith.constant dense<0.000000e+00> : vector<8x128xf32>
    %332 = tpu.matmul %300, %17, %cst_99 {dimension_numbers = #tpu.dot_dimension_numbers<[1], [0], [0], [1], [0, 0, 1, 1], [], []>} : vector<8x32xf32>, vector<32x128xf32>, vector<8x128xf32> -> vector<8x128xf32>
    %333 = arith.addf %331, %332 : vector<8x128xf32>
    %334 = arith.negf %333 : vector<8x128xf32>
    %335 = math.exp %334 : vector<8x128xf32>
    %cst_100 = arith.constant 1.000000e+00 : f32
    %336 = vector.broadcast %cst_100 : f32 to vector<8x128xf32>
    %337 = arith.addf %336, %335 : vector<8x128xf32>
    %338 = arith.divf %336, %337 : vector<8x128xf32>
    %339 = math.tanh %333 : vector<8x128xf32>
    %340 = vector.extract_strided_slice %338 {offsets = [0, 32], sizes = [8, 32], strides = [1, 1]} : vector<8x128xf32> to vector<8x32xf32>
    %341 = arith.mulf %340, %301 : vector<8x32xf32>
    %342 = vector.extract_strided_slice %338 {offsets = [0, 0], sizes = [8, 32], strides = [1, 1]} : vector<8x128xf32> to vector<8x32xf32>
    %343 = vector.extract_strided_slice %339 {offsets = [0, 64], sizes = [8, 32], strides = [1, 1]} : vector<8x128xf32> to vector<8x32xf32>
    %344 = arith.mulf %342, %343 : vector<8x32xf32>
    %345 = arith.addf %341, %344 : vector<8x32xf32>
    %346 = vector.extract_strided_slice %338 {offsets = [0, 96], sizes = [8, 32], strides = [1, 1]} : vector<8x128xf32> to vector<8x32xf32>
    %347 = math.tanh %345 : vector<8x32xf32>
    %348 = arith.mulf %346, %347 : vector<8x32xf32>
    %cst_101 = arith.constant 0.000000e+00 : f32
    %349 = vector.broadcast %cst_101 : f32 to vector<8x32xf32>
    %350 = arith.select %330, %348, %349 : vector<8x32xi1>, vector<8x32xf32>
    %351 = arith.select %330, %348, %300 : vector<8x32xi1>, vector<8x32xf32>
    %352 = arith.select %330, %345, %301 : vector<8x32xi1>, vector<8x32xf32>
    %353 = tpu.concatenate %350, %324 in 1 : vector<8x32xf32>, vector<8x32xf32> -> vector<8x64xf32>
    %cst_102 = arith.constant dense<0.000000e+00> : vector<8x128xf32>
    %354 = tpu.matmul %353, %18, %cst_102 {dimension_numbers = #tpu.dot_dimension_numbers<[1], [0], [0], [1], [0, 0, 1, 1], [], []>} : vector<8x64xf32>, vector<64x128xf32>, vector<8x128xf32> -> vector<8x128xf32>
    %355 = vector.broadcast %19 : vector<1x128xf32> to vector<8x128xf32>
    %356 = arith.addf %354, %355 : vector<8x128xf32>
    %357 = arith.negf %356 : vector<8x128xf32>
    %358 = math.exp %357 : vector<8x128xf32>
    %cst_103 = arith.constant 1.000000e+00 : f32
    %359 = vector.broadcast %cst_103 : f32 to vector<8x128xf32>
    %360 = arith.addf %359, %358 : vector<8x128xf32>
    %361 = arith.divf %359, %360 : vector<8x128xf32>
    %362 = math.tanh %356 : vector<8x128xf32>
    %363 = vector.extract_strided_slice %361 {offsets = [0, 32], sizes = [8, 32], strides = [1, 1]} : vector<8x128xf32> to vector<8x32xf32>
    %364 = arith.mulf %363, %325 : vector<8x32xf32>
    %365 = vector.extract_strided_slice %361 {offsets = [0, 0], sizes = [8, 32], strides = [1, 1]} : vector<8x128xf32> to vector<8x32xf32>
    %366 = vector.extract_strided_slice %362 {offsets = [0, 64], sizes = [8, 32], strides = [1, 1]} : vector<8x128xf32> to vector<8x32xf32>
    %367 = arith.mulf %365, %366 : vector<8x32xf32>
    %368 = arith.addf %364, %367 : vector<8x32xf32>
    %369 = vector.extract_strided_slice %361 {offsets = [0, 96], sizes = [8, 32], strides = [1, 1]} : vector<8x128xf32> to vector<8x32xf32>
    %370 = math.tanh %368 : vector<8x32xf32>
    %371 = arith.mulf %369, %370 : vector<8x32xf32>
    %cst_104 = arith.constant 0.000000e+00 : f32
    %372 = vector.broadcast %cst_104 : f32 to vector<8x32xf32>
    %373 = arith.select %330, %371, %372 : vector<8x32xi1>, vector<8x32xf32>
    %c48_105 = arith.constant 48 : index
    %c0_106 = arith.constant 0 : index
    %374 = vector.load %arg10[%c48_105, %c0_106] : memref<64x32xf32, #tpu.memory_space<vmem>>, vector<8x32xf32>
    tpu.vector_store %arg10[%c48_105, %c0_106], %373 {strides = array<i32>} : memref<64x32xf32, #tpu.memory_space<vmem>>, vector<8x32xf32>,
    %375 = arith.select %330, %371, %324 : vector<8x32xi1>, vector<8x32xf32>
    %376 = arith.select %330, %368, %325 : vector<8x32xi1>, vector<8x32xf32>
    %c56 = arith.constant 56 : index
    %c0_107 = arith.constant 0 : index
    %377 = vector.load %arg1[%c56, %c0_107] : memref<64x1xf32, #tpu.memory_space<vmem>>, vector<8x1xf32>
    %378 = vector.shape_cast %377 : vector<8x1xf32> to vector<8x1xf32>
    %379 = vector.broadcast %378 : vector<8x1xf32> to vector<8x32xf32>
    %cst_108 = arith.constant 0.000000e+00 : f32
    %380 = vector.broadcast %cst_108 : f32 to vector<8x32xf32>
    %381 = arith.cmpf ogt, %379, %380 : vector<8x32xf32>
    %c56_109 = arith.constant 56 : index
    %c0_110 = arith.constant 0 : index
    %382 = vector.load %arg11[%c56_109, %c0_110] : memref<64x128xf32, #tpu.memory_space<vmem>>, vector<8x128xf32>
    %cst_111 = arith.constant dense<0.000000e+00> : vector<8x128xf32>
    %383 = tpu.matmul %351, %17, %cst_111 {dimension_numbers = #tpu.dot_dimension_numbers<[1], [0], [0], [1], [0, 0, 1, 1], [], []>} : vector<8x32xf32>, vector<32x128xf32>, vector<8x128xf32> -> vector<8x128xf32>
    %384 = arith.addf %382, %383 : vector<8x128xf32>
    %385 = arith.negf %384 : vector<8x128xf32>
    %386 = math.exp %385 : vector<8x128xf32>
    %cst_112 = arith.constant 1.000000e+00 : f32
    %387 = vector.broadcast %cst_112 : f32 to vector<8x128xf32>
    %388 = arith.addf %387, %386 : vector<8x128xf32>
    %389 = arith.divf %387, %388 : vector<8x128xf32>
    %390 = math.tanh %384 : vector<8x128xf32>
    %391 = vector.extract_strided_slice %389 {offsets = [0, 32], sizes = [8, 32], strides = [1, 1]} : vector<8x128xf32> to vector<8x32xf32>
    %392 = arith.mulf %391, %352 : vector<8x32xf32>
    %393 = vector.extract_strided_slice %389 {offsets = [0, 0], sizes = [8, 32], strides = [1, 1]} : vector<8x128xf32> to vector<8x32xf32>
    %394 = vector.extract_strided_slice %390 {offsets = [0, 64], sizes = [8, 32], strides = [1, 1]} : vector<8x128xf32> to vector<8x32xf32>
    %395 = arith.mulf %393, %394 : vector<8x32xf32>
    %396 = arith.addf %392, %395 : vector<8x32xf32>
    %397 = vector.extract_strided_slice %389 {offsets = [0, 96], sizes = [8, 32], strides = [1, 1]} : vector<8x128xf32> to vector<8x32xf32>
    %398 = math.tanh %396 : vector<8x32xf32>
    %399 = arith.mulf %397, %398 : vector<8x32xf32>
    %cst_113 = arith.constant 0.000000e+00 : f32
    %400 = vector.broadcast %cst_113 : f32 to vector<8x32xf32>
    %401 = arith.select %381, %399, %400 : vector<8x32xi1>, vector<8x32xf32>
    %402 = tpu.concatenate %401, %375 in 1 : vector<8x32xf32>, vector<8x32xf32> -> vector<8x64xf32>
    %cst_114 = arith.constant dense<0.000000e+00> : vector<8x128xf32>
    %403 = tpu.matmul %402, %18, %cst_114 {dimension_numbers = #tpu.dot_dimension_numbers<[1], [0], [0], [1], [0, 0, 1, 1], [], []>} : vector<8x64xf32>, vector<64x128xf32>, vector<8x128xf32> -> vector<8x128xf32>
    %404 = vector.broadcast %19 : vector<1x128xf32> to vector<8x128xf32>
    %405 = arith.addf %403, %404 : vector<8x128xf32>
    %406 = arith.negf %405 : vector<8x128xf32>
    %407 = math.exp %406 : vector<8x128xf32>
    %cst_115 = arith.constant 1.000000e+00 : f32
    %408 = vector.broadcast %cst_115 : f32 to vector<8x128xf32>
    %409 = arith.addf %408, %407 : vector<8x128xf32>
    %410 = arith.divf %408, %409 : vector<8x128xf32>
    %411 = math.tanh %405 : vector<8x128xf32>
    %412 = vector.extract_strided_slice %410 {offsets = [0, 32], sizes = [8, 32], strides = [1, 1]} : vector<8x128xf32> to vector<8x32xf32>
    %413 = arith.mulf %412, %376 : vector<8x32xf32>
    %414 = vector.extract_strided_slice %410 {offsets = [0, 0], sizes = [8, 32], strides = [1, 1]} : vector<8x128xf32> to vector<8x32xf32>
    %415 = vector.extract_strided_slice %411 {offsets = [0, 64], sizes = [8, 32], strides = [1, 1]} : vector<8x128xf32> to vector<8x32xf32>
    %416 = arith.mulf %414, %415 : vector<8x32xf32>
    %417 = arith.addf %413, %416 : vector<8x32xf32>
    %418 = vector.extract_strided_slice %410 {offsets = [0, 96], sizes = [8, 32], strides = [1, 1]} : vector<8x128xf32> to vector<8x32xf32>
    %419 = math.tanh %417 : vector<8x32xf32>
    %420 = arith.mulf %418, %419 : vector<8x32xf32>
    %cst_116 = arith.constant 0.000000e+00 : f32
    %421 = vector.broadcast %cst_116 : f32 to vector<8x32xf32>
    %422 = arith.select %381, %420, %421 : vector<8x32xi1>, vector<8x32xf32>
    %c56_117 = arith.constant 56 : index
    %c0_118 = arith.constant 0 : index
    %423 = vector.load %arg10[%c56_117, %c0_118] : memref<64x32xf32, #tpu.memory_space<vmem>>, vector<8x32xf32>
    tpu.vector_store %arg10[%c56_117, %c0_118], %422 {strides = array<i32>} : memref<64x32xf32, #tpu.memory_space<vmem>>, vector<8x32xf32>,
    return
  }
}

module attributes {stable_mosaic.version = 11 : i64} {
  func.func @_attn_out_kernel(%arg0: i32, %arg1: memref<8x8x32xf32, #tpu.memory_space<vmem>>, %arg2: memref<8x12x64xf32, #tpu.memory_space<vmem>>, %arg3: memref<8x1x12xf32, #tpu.memory_space<vmem>>, %arg4: memref<8x8x1xf32, #tpu.memory_space<vmem>>, %arg5: memref<64x32xf32, #tpu.memory_space<vmem>>, %arg6: memref<32x32xf32, #tpu.memory_space<vmem>>, %arg7: memref<64x32xf32, #tpu.memory_space<vmem>>, %arg8: memref<1x32xf32, #tpu.memory_space<vmem>>, %arg9: memref<32x40xf32, #tpu.memory_space<vmem>>, %arg10: memref<1x40xf32, #tpu.memory_space<vmem>>, %arg11: memref<8x8x40xf32, #tpu.memory_space<vmem>>) attributes {dimension_semantics = [#tpu.dimension_semantics<parallel>], iteration_bounds = array<i64: 1>, scalar_prefetch = 0 : i64, scratch_operands = 0 : i64, tpu.core_type = #tpu.core_type<tc>, window_params = [{transform_indices = @transform_0, window_bounds = array<i64: 8, 8, 32>}, {transform_indices = @transform_1, window_bounds = array<i64: 8, 12, 64>}, {transform_indices = @transform_2, window_bounds = array<i64: 8, 1, 12>}, {transform_indices = @transform_3, window_bounds = array<i64: 8, 8, 1>}, {pipeline_mode = #tpu.pipeline_mode<synchronous>, transform_indices = @transform_4, window_bounds = array<i64: 64, 32>}, {pipeline_mode = #tpu.pipeline_mode<synchronous>, transform_indices = @transform_5, window_bounds = array<i64: 32, 32>}, {pipeline_mode = #tpu.pipeline_mode<synchronous>, transform_indices = @transform_6, window_bounds = array<i64: 64, 32>}, {pipeline_mode = #tpu.pipeline_mode<synchronous>, transform_indices = @transform_7, window_bounds = array<i64: 1, 32>}, {pipeline_mode = #tpu.pipeline_mode<synchronous>, transform_indices = @transform_8, window_bounds = array<i64: 32, 40>}, {pipeline_mode = #tpu.pipeline_mode<synchronous>, transform_indices = @transform_9, window_bounds = array<i64: 1, 40>}, {transform_indices = @transform_10, window_bounds = array<i64: 8, 8, 40>}]} {
    %c0 = arith.constant 0 : index
    %c0_0 = arith.constant 0 : index
    %c0_1 = arith.constant 0 : index
    %0 = vector.load %arg1[%c0, %c0_0, %c0_1] : memref<8x8x32xf32, #tpu.memory_space<vmem>>, vector<8x8x32xf32>
    %c0_2 = arith.constant 0 : index
    %c0_3 = arith.constant 0 : index
    %c0_4 = arith.constant 0 : index
    %1 = vector.load %arg2[%c0_2, %c0_3, %c0_4] : memref<8x12x64xf32, #tpu.memory_space<vmem>>, vector<8x12x64xf32>
    %c0_5 = arith.constant 0 : index
    %c0_6 = arith.constant 0 : index
    %c0_7 = arith.constant 0 : index
    %2 = vector.load %arg3[%c0_5, %c0_6, %c0_7] : memref<8x1x12xf32, #tpu.memory_space<vmem>>, vector<8x1x12xf32>
    %c0_8 = arith.constant 0 : index
    %c0_9 = arith.constant 0 : index
    %c0_10 = arith.constant 0 : index
    %3 = vector.load %arg4[%c0_8, %c0_9, %c0_10] : memref<8x8x1xf32, #tpu.memory_space<vmem>>, vector<8x8x1xf32>
    %4 = vector.shape_cast %1 : vector<8x12x64xf32> to vector<96x64xf32>
    %c0_11 = arith.constant 0 : index
    %c0_12 = arith.constant 0 : index
    %5 = vector.load %arg5[%c0_11, %c0_12] : memref<64x32xf32, #tpu.memory_space<vmem>>, vector<64x32xf32>
    %cst = arith.constant dense<0.000000e+00> : vector<96x32xf32>
    %6 = tpu.matmul %4, %5, %cst {dimension_numbers = #tpu.dot_dimension_numbers<[1], [0], [0], [1], [0, 0, 1, 1], [], []>} : vector<96x64xf32>, vector<64x32xf32>, vector<96x32xf32> -> vector<96x32xf32>
    %7 = vector.shape_cast %6 : vector<96x32xf32> to vector<8x12x32xf32>
    "tpu.trace_start"() <{level = 10 : i32, message = "bqh,bkh->bqk"}> : () -> ()
    %cst_13 = arith.constant dense<0.000000e+00> : vector<8x8x12xf32>
    %8 = tpu.matmul %0, %7, %cst_13 {dimension_numbers = #tpu.dot_dimension_numbers<[2], [2], [1], [1], [0, 0, 0, 1, 1, 1], [0], [0]>} : vector<8x8x32xf32>, vector<8x12x32xf32>, vector<8x8x12xf32> -> vector<8x8x12xf32>
    "tpu.trace_stop"() : () -> ()
    %9 = vector.shape_cast %2 : vector<8x1x12xf32> to vector<8x1x12xf32>
    %10 = vector.broadcast %9 : vector<8x1x12xf32> to vector<8x8x12xf32>
    %cst_14 = arith.constant 0.000000e+00 : f32
    %11 = vector.broadcast %cst_14 : f32 to vector<8x8x12xf32>
    %12 = arith.cmpf ogt, %10, %11 : vector<8x8x12xf32>
    %cst_15 = arith.constant -1.000000e+30 : f32
    %13 = vector.broadcast %cst_15 : f32 to vector<8x8x12xf32>
    %14 = arith.select %12, %8, %13 : vector<8x8x12xi1>, vector<8x8x12xf32>
    %cst_16 = arith.constant dense<0xFF800000> : vector<8x8xf32>
    %15 = vector.multi_reduction <maximumf>, %14, %cst_16 [2] : vector<8x8x12xf32> to vector<8x8xf32>
    %16 = vector.shape_cast %15 : vector<8x8xf32> to vector<8x8x1xf32>
    %17 = vector.broadcast %16 : vector<8x8x1xf32> to vector<8x8x12xf32>
    %18 = arith.subf %14, %17 : vector<8x8x12xf32>
    %19 = math.exp %18 : vector<8x8x12xf32>
    %cst_17 = arith.constant dense<0.000000e+00> : vector<8x8xf32>
    %20 = vector.multi_reduction <add>, %19, %cst_17 [2] : vector<8x8x12xf32> to vector<8x8xf32>
    %21 = vector.shape_cast %20 : vector<8x8xf32> to vector<8x8x1xf32>
    %22 = tpu.reciprocal %21 : vector<8x8x1xf32> -> vector<8x8x1xf32>
    %23 = vector.broadcast %22 : vector<8x8x1xf32> to vector<8x8x12xf32>
    %24 = arith.mulf %19, %23 : vector<8x8x12xf32>
    %25 = vector.broadcast %3 : vector<8x8x1xf32> to vector<8x8x12xf32>
    %26 = arith.mulf %24, %25 : vector<8x8x12xf32>
    "tpu.trace_start"() <{level = 10 : i32, message = "bqk,bkh->bqh"}> : () -> ()
    %cst_18 = arith.constant dense<0.000000e+00> : vector<8x8x64xf32>
    %27 = tpu.matmul %26, %1, %cst_18 {dimension_numbers = #tpu.dot_dimension_numbers<[2], [1], [1], [2], [0, 0, 0, 1, 1, 2], [0], [0]>} : vector<8x8x12xf32>, vector<8x12x64xf32>, vector<8x8x64xf32> -> vector<8x8x64xf32>
    "tpu.trace_stop"() : () -> ()
    %28 = vector.shape_cast %0 : vector<8x8x32xf32> to vector<64x32xf32>
    %29 = vector.shape_cast %27 : vector<8x8x64xf32> to vector<64x64xf32>
    %c0_19 = arith.constant 0 : index
    %c0_20 = arith.constant 0 : index
    %30 = vector.load %arg6[%c0_19, %c0_20] : memref<32x32xf32, #tpu.memory_space<vmem>>, vector<32x32xf32>
    %cst_21 = arith.constant dense<0.000000e+00> : vector<64x32xf32>
    %31 = tpu.matmul %28, %30, %cst_21 {dimension_numbers = #tpu.dot_dimension_numbers<[1], [0], [0], [1], [0, 0, 1, 1], [], []>} : vector<64x32xf32>, vector<32x32xf32>, vector<64x32xf32> -> vector<64x32xf32>
    %c0_22 = arith.constant 0 : index
    %c0_23 = arith.constant 0 : index
    %32 = vector.load %arg7[%c0_22, %c0_23] : memref<64x32xf32, #tpu.memory_space<vmem>>, vector<64x32xf32>
    %cst_24 = arith.constant dense<0.000000e+00> : vector<64x32xf32>
    %33 = tpu.matmul %29, %32, %cst_24 {dimension_numbers = #tpu.dot_dimension_numbers<[1], [0], [0], [1], [0, 0, 1, 1], [], []>} : vector<64x64xf32>, vector<64x32xf32>, vector<64x32xf32> -> vector<64x32xf32>
    %34 = arith.addf %31, %33 : vector<64x32xf32>
    %c0_25 = arith.constant 0 : index
    %c0_26 = arith.constant 0 : index
    %35 = vector.load %arg8[%c0_25, %c0_26] : memref<1x32xf32, #tpu.memory_space<vmem>>, vector<1x32xf32>
    %36 = vector.broadcast %35 : vector<1x32xf32> to vector<64x32xf32>
    %37 = arith.addf %34, %36 : vector<64x32xf32>
    %38 = math.tanh %37 : vector<64x32xf32>
    %c0_27 = arith.constant 0 : index
    %c0_28 = arith.constant 0 : index
    %39 = vector.load %arg9[%c0_27, %c0_28] : memref<32x40xf32, #tpu.memory_space<vmem>>, vector<32x40xf32>
    %cst_29 = arith.constant dense<0.000000e+00> : vector<64x40xf32>
    %40 = tpu.matmul %38, %39, %cst_29 {dimension_numbers = #tpu.dot_dimension_numbers<[1], [0], [0], [1], [0, 0, 1, 1], [], []>} : vector<64x32xf32>, vector<32x40xf32>, vector<64x40xf32> -> vector<64x40xf32>
    %c0_30 = arith.constant 0 : index
    %c0_31 = arith.constant 0 : index
    %41 = vector.load %arg10[%c0_30, %c0_31] : memref<1x40xf32, #tpu.memory_space<vmem>>, vector<1x40xf32>
    %42 = vector.broadcast %41 : vector<1x40xf32> to vector<64x40xf32>
    %43 = arith.addf %40, %42 : vector<64x40xf32>
    %44 = vector.shape_cast %43 : vector<64x40xf32> to vector<8x8x40xf32>
    %c0_32 = arith.constant 0 : index
    %c0_33 = arith.constant 0 : index
    %c0_34 = arith.constant 0 : index
    %45 = vector.load %arg11[%c0_32, %c0_33, %c0_34] : memref<8x8x40xf32, #tpu.memory_space<vmem>>, vector<8x8x40xf32>
    tpu.vector_store %arg11[%c0_32, %c0_33, %c0_34], %44 {strides = array<i32>} : memref<8x8x40xf32, #tpu.memory_space<vmem>>, vector<8x8x40xf32>,
    return
  }
  func.func @transform_0(%arg0: i32) -> (i32, i32, i32) {
    %c0_i32 = arith.constant 0 : i32
    %c0_i32_0 = arith.constant 0 : i32
    %c0_i32_1 = arith.constant 0 : i32
    return %arg0, %c0_i32, %c0_i32_0 : i32, i32, i32
  }
  func.func @transform_1(%arg0: i32) -> (i32, i32, i32) {
    %c0_i32 = arith.constant 0 : i32
    %c0_i32_0 = arith.constant 0 : i32
    %c0_i32_1 = arith.constant 0 : i32
    return %arg0, %c0_i32, %c0_i32_0 : i32, i32, i32
  }
  func.func @transform_2(%arg0: i32) -> (i32, i32, i32) {
    %c0_i32 = arith.constant 0 : i32
    %c0_i32_0 = arith.constant 0 : i32
    %c0_i32_1 = arith.constant 0 : i32
    return %arg0, %c0_i32, %c0_i32_0 : i32, i32, i32
  }
  func.func @transform_3(%arg0: i32) -> (i32, i32, i32) {
    %c0_i32 = arith.constant 0 : i32
    %c0_i32_0 = arith.constant 0 : i32
    %c0_i32_1 = arith.constant 0 : i32
    return %arg0, %c0_i32, %c0_i32_0 : i32, i32, i32
  }
  func.func @transform_4(%arg0: i32) -> (i32, i32) {
    %c0_i32 = arith.constant 0 : i32
    %c0_i32_0 = arith.constant 0 : i32
    %c0_i32_1 = arith.constant 0 : i32
    return %c0_i32, %c0_i32_0 : i32, i32
  }
  func.func @transform_5(%arg0: i32) -> (i32, i32) {
    %c0_i32 = arith.constant 0 : i32
    %c0_i32_0 = arith.constant 0 : i32
    %c0_i32_1 = arith.constant 0 : i32
    return %c0_i32, %c0_i32_0 : i32, i32
  }
  func.func @transform_6(%arg0: i32) -> (i32, i32) {
    %c0_i32 = arith.constant 0 : i32
    %c0_i32_0 = arith.constant 0 : i32
    %c0_i32_1 = arith.constant 0 : i32
    return %c0_i32, %c0_i32_0 : i32, i32
  }
  func.func @transform_7(%arg0: i32) -> (i32, i32) {
    %c0_i32 = arith.constant 0 : i32
    %c0_i32_0 = arith.constant 0 : i32
    %c0_i32_1 = arith.constant 0 : i32
    return %c0_i32, %c0_i32_0 : i32, i32
  }
  func.func @transform_8(%arg0: i32) -> (i32, i32) {
    %c0_i32 = arith.constant 0 : i32
    %c0_i32_0 = arith.constant 0 : i32
    %c0_i32_1 = arith.constant 0 : i32
    return %c0_i32, %c0_i32_0 : i32, i32
  }
  func.func @transform_9(%arg0: i32) -> (i32, i32) {
    %c0_i32 = arith.constant 0 : i32
    %c0_i32_0 = arith.constant 0 : i32
    %c0_i32_1 = arith.constant 0 : i32
    return %c0_i32, %c0_i32_0 : i32, i32
  }
  func.func @transform_10(%arg0: i32) -> (i32, i32, i32) {
    %c0_i32 = arith.constant 0 : i32
    %c0_i32_0 = arith.constant 0 : i32
    %c0_i32_1 = arith.constant 0 : i32
    return %arg0, %c0_i32, %c0_i32_0 : i32, i32, i32
  }
}

</mosaic_0001>

<bundles_post_ra>
// kernel: seq2seq_forward.6
= control target key start
LH: loop header
LB: loop body
LE: loop exit
PB: predicated region body
PF: predicated region fallthrough
CT: control target
= control target key end

     0   :  { %vm48_vm0 = vcmask 261120   ;;  %v2855_v3 = vmov 0.0|0.0   ;;  %vm2856_vm1 = vmmov 0   ;;  %v2857_v23 = vmov 0.0   ;;  %s2859_s26 = smov 64   ;;  %s2860_s27 = smov 32   ;;  %s3656_s3 = inlined_call_operand.vmem [shape: f32[32,32], index: 3, kind: input, shape index: {}]   ;;  %s3657_s2 = inlined_call_operand.vmem [shape: f32[16,32], index: 2, kind: input, shape index: {}]   ;;  %s3658_s5 = inlined_call_operand.vmem [shape: f32[32,128], index: 5, kind: input, shape index: {}]   ;;  %s3659_s6 = inlined_call_operand.vmem [shape: f32[32,128], index: 6, kind: input, shape index: {}]   ;;  %s3660_s0 = inlined_call_operand.vmem [shape: f32[64,32], index: 0, kind: input, shape index: {}]   ;;  %s3661_s4 = inlined_call_operand.vmem [shape: f32[1,32], index: 4, kind: input, shape index: {}]   ;;  %s3662_s1 = inlined_call_operand.vmem [shape: f32[64,1], index: 1, kind: input, shape index: {}]   ;;  %s3663_s7 = inlined_call_operand.vmem [shape: f32[1,128], index: 7, kind: input, shape index: {}]   ;;  %s3664_s8 = inlined_call_operand.vmem [shape: f32[64,128], index: 8, kind: input, shape index: {}]   ;;  %s3665_s9 = inlined_call_operand.vmem [shape: f32[1,128], index: 9, kind: input, shape index: {}]   ;;  %s3666_s10 = inlined_call_operand.vmem [shape: f32[64,32], index: 10, kind: output, shape index: {}]  }
   0x1   :  { %v37_v0 = vld [vmem:[%s3656_s3] sm:$0xff]  ;;  %v38_v1 = vld [vmem:[%s3656_s3 + $0x8] sm:$0xff]  ;;  %v39_v2 = vld [vmem:[%s3656_s3 + $0x10] sm:$0xff]  ;;  %2572 = vmatprep.subr.bf16.mxu0 %v2855_v3  ;;  %2324 = vmatprep.mubr.msk.f32.mxu0 %vm2856_vm1, %v2857_v23  ;;  %v2858_v31 = vmov 0   ;;  %s2861_s28 = smov 96   ;;  %vm426_vm3 = vcmask 523264  }
   0x2   :  { %v2556_v4 = vpack.c.bf16 %v38_v1, %v37_v0  ;;  %v40_v5 = vld [vmem:[%s3656_s3 + $0x18] sm:$0xff]  ;;  %v35_v6 = vld [vmem:[%s3657_s2] sm:$0xff]  ;;  %v139_v9 = vld [vmem:[%s3658_s5 + $0x8] sm:$0xff]  ;;  %2723 = vset.pattern.permute.xlu1 %v2858_v31  ;;  %2724 = vset.pattern.permute.xlu0 %v2858_v31 }
   0x3   :  { %v2560_v7 = vpack.c.bf16 %v40_v5, %v39_v2  ;;  %2293 = vmatprep.mubr.msk.f32.mxu1 %vm48_vm0, %v35_v6  ;;  %v138_v8 = vld [vmem:[%s3658_s5] sm:$0xff]  ;;  %v287_v11 = vld [vmem:[%s3659_s6 + $0x8] sm:$0xff]  ;;  %v140_v14 = vld [vmem:[%s3658_s5 + $0x10] sm:$0xff] }
   0x4   :  { %2557 = vmatprep.subr.bf16.mxu1 %v2556_v4  ;;  %v286_v10 = vld [vmem:[%s3659_s6] sm:$0xff]  ;;  %v2564_v13 = vpack.c.bf16 %v139_v9, %v138_v8  ;;  %v141_v15 = vld [vmem:[%s3658_s5 + $0x18] sm:$0xff]  ;;  %v36_v16 = vld [vmem:[%s3657_s2 + $0x8] sm:$0xff] }
   0x5   :  { %2559 = vmatpush3.bf16.msra.mxu1 %v2556_v4  ;;  %v2946_v12 = vpack.c.bf16 %v287_v11, %v286_v10  ;;  %v2568_v17 = vpack.c.bf16 %v141_v15, %v140_v14  ;;  %v130_v18 = vld [vmem:[%s3660_s0] sm:$0xff]  ;;  %v288_v19 = vld [vmem:[%s3659_s6 + $0x10] sm:$0xff]  ;;  %v289_v20 = vld [vmem:[%s3659_s6 + $0x18] sm:$0xff] }
   0x6   :  { %2561 = vmatprep.subr.bf16.mxu1 %v2560_v7  ;;  %v131_v21 = vld [vmem:[%s3660_s0 + $0x8] sm:$0xff]  ;;  %v2974_v22 = vpack.c.bf16 %v289_v20, %v288_v19  ;;  %v2110_v24 = vld [vmem:[%s3661_s4] ss:$0 sm:$0xff]  ;;  %v132_v48 = vld [vmem:[%s3660_s0 + $0x10] sm:$0xff] }
   0x7   :  { %2574 = vmatpush3.bf16.msra.mxu0 %v2946_v12  ;;  %v299_v32 = vld [vmem:[%s3662_s1] sm:$0xff]  ;;  %v133_v49 = vld [vmem:[%s3660_s0 + $0x18] sm:$0xff]  ;;  %v291_v52 = vld [vmem:[%s3664_s8 + $0x8] sm:$0xff] }
   0x8   :  { %2575 = vmatprep.subr.bf16.mxu0 %v2855_v3  ;;  %302 = vperm.xlu1 %2723, %v299_v32   ;;  %v3001_v33 = vld [vmem:[%s3663_s7] ss:$0 sm:$0xff]  ;;  %v292_v53 = vld [vmem:[%s3664_s8 + $0x10] sm:$0xff]  ;;  %v293_v55 = vld [vmem:[%s3664_s8 + $0x18] sm:$0xff] }
   0x9   :  { %2563 = vmatpush3.bf16.msra.mxu1 %v2560_v7  ;;  %v134_v50 = vld [vmem:[%s3660_s0 + $0x20] sm:$0xff]  ;;  %v135_v56 = vld [vmem:[%s3660_s0 + $0x28] sm:$0xff]  ;;  %v3042_v57 = vpack.c.bf16 %v293_v55, %v292_v53  ;;  %v136_v58 = vld [vmem:[%s3660_s0 + $0x30] sm:$0xff] }
   0xa   :  { %2565 = vmatprep.subr.bf16.mxu1 %v2564_v13  ;;  %v290_v51 = vld [vmem:[%s3664_s8] sm:$0xff]  ;;  %v295_v61 = vld [vmem:[%s3664_s8 + $0x28] sm:$0xff]  ;;  %v137_v62 = vld [vmem:[%s3660_s0 + $0x38] sm:$0xff] }
   0xb   :  { %2577 = vmatpush3.bf16.msra.mxu0 %v2974_v22  ;;  %v3031_v54 = vpack.c.bf16 %v291_v52, %v290_v51  ;;  %v294_v60 = vld [vmem:[%s3664_s8 + $0x20] sm:$0xff]  ;;  %v296_v0 = vld [vmem:[%s3664_s8 + $0x30] sm:$0xff]  ;;  %v297_v1 = vld [vmem:[%s3664_s8 + $0x38] sm:$0xff] }
   0xc   :  { %2294 = vmatmul.mubr.msk.f32.vlgmr.msra.gmra.mrb[0].mxu1 %vm48_vm0, %v36_v16  ;;  %2590 = vmatprep.subr.bf16.mxu0 %v2855_v3  ;;  %v3061_v63 = vpack.c.bf16 %v295_v61, %v294_v60  ;;  %v3074_v2 = vpack.c.bf16 %v297_v1, %v296_v0 }
   0xd   :  { %2567 = vmatpush3.bf16.msra.mxu1 %v2564_v13  ;;  %2304 = vmatprep.mubr.msk.f32.mxu1 %vm48_vm0, %v130_v18 }
   0xe   :  { %2569 = vmatprep.subr.bf16.mxu1 %v2568_v17 }
  0x11   :  { %2571 = vmatpush3.bf16.msra.mxu1 %v2568_v17 }
  0x12   :  { %2578 = vmatprep.subr.bf16.mxu1 %v2855_v3 }
  0x14   :  { %2305 = vmatmul.mubr.msk.f32.vlgmr.msra.gmra.mrb[2].mxu1 %vm48_vm0, %v131_v21  ;;  %v3125_v21 = vld [vmem:[%s3665_s9] ss:$0 sm:$0xff] }
  0x15   :  { %2307 = vmatprep.mubr.msk.f32.mxu1 %vm48_vm0, %v132_v48  ;;  %2580 = vmatpush3.bf16.msra.mxu1 %v3031_v54  ;;  %v535_v48 = vld [vmem:[%s3662_s1 + $0x8] sm:$0xff] }
  0x16   :  { %2581 = vmatprep.subr.bf16.mxu1 %v2855_v3 }
  0x18   :  { %2308 = vmatmul.mubr.msk.f32.gmra.mrb[4].mxu1 %vm48_vm0, %v133_v49 }
  0x19   :  { %2310 = vmatprep.mubr.msk.f32.mxu1 %vm48_vm0, %v134_v50  ;;  %2583 = vmatpush3.bf16.msra.mxu1 %v3042_v57 }
  0x1a   :  { %2584 = vmatprep.subr.bf16.mxu1 %v2855_v3 }
  0x1c   :  { %2311 = vmatmul.mubr.msk.f32.gmra.mrb[6].mxu1 %vm48_vm0, %v135_v56 }
  0x1d   :  { %2313 = vmatprep.mubr.msk.f32.mxu1 %vm48_vm0, %v136_v58  ;;  %2586 = vmatpush3.bf16.msra.mxu1 %v3061_v63 }
  0x1e   :  { %2587 = vmatprep.subr.bf16.mxu1 %v2855_v3 }
  0x20   :  { %2314 = vmatmul.mubr.msk.f32.gmra.mrb[8].mxu1 %vm48_vm0, %v137_v62 }
  0x21   :  { %2343 = vmatprep.mubr.msk.f32.mxu1 %vm2856_vm1, %v2857_v23  ;;  %2589 = vmatpush3.bf16.msra.mxu1 %v3074_v2 }
  0x22   :  { %2608 = vmatprep.subr.bf16.mxu1 %v2855_v3 }
  0x87   :  { %v3079_v4 = vpop.permute.xlu1 %302 }
  0x88   :  { %vm305_vm2 = vcmp.gt.f32.partialorder %v3079_v4, 0.0 }
  0xdf   :  { %v2295_v25 = vpop.f32.mrb[0].mxu1 }
  0xe0   :  { %v2984_v26 = vadd.f32 %v2295_v25, %v2110_v24  ;;  %v121_v27 = vpop.f32.mrb[1].mxu1 }
  0xe1   :  { %v122_v28 = vadd.f32 %v2110_v24, %v121_v27 }
  0xe3   :  { %2325 = vmatmul.mubr.msk.f32.vlgmr.msra.gmra.mrb[0].mxu0 %vm48_vm0, %v122_v28 }
  0xe4   :  { %2592 = vmatpush3.bf16.msra.mxu0 %v2946_v12  ;;  %2354 = vmatprep.mubr.msk.f32.mxu0 %vm2856_vm1, %v2857_v23 }
  0xe5   :  { %2593 = vmatprep.subr.bf16.mxu0 %v2855_v3 }
  0xe7   :  { %v2993_v29 = vpop.f32.mrb[2].mxu1 }
  0xe8   :  { %2595 = vmatpush3.bf16.msra.mxu0 %v2974_v22  ;;  %v239_v30 = vpop.f32.mrb[3].mxu1 }
  0xe9   :  { %2596 = vmatprep.subr.bf16.mxu0 %v2855_v3  ;;  %v240_v34 = vadd.f32 %v3001_v33, %v239_v30 }
  0xeb   :  { %v3091_v10 = vpop.f32.mrb[4].mxu1 }
  0xec   :  { %v3093_v11 = vpop.f32.mrb[5].mxu1 }
  0xef   :  { %v3095_v13 = vpop.f32.mrb[6].mxu1 }
  0xf0   :  { %v3097_v14 = vpop.f32.mrb[7].mxu1 }
  0xf3   :  { %v3099_v15 = vpop.f32.mrb[8].mxu1 }
  0xf4   :  { %v3101_v16 = vpop.f32.mrb[9].mxu1 }
 0x1b6   :  { %v376_v35 = vpop.f32.mrb[0].mxu0 }
 0x1b7   :  { %v380_v36 = vadd.f32 %v376_v35, %v240_v34  ;;  %v2326_v37 = vpop.f32.mrb[1].mxu0 }
 0x1b9   :  { %2725 = vtanh.f32 %v380_v36  ;;  %v2123_v39 = vmul.f32 -1.442695, %v380_v36 }
 0x1bb   :  { %2727 = vpow2.f32 %v2123_v39 }
 0x1c3   :  { %v2726_v38 = vpop.eup %2725 }
 0x1c4   :  { %390 = vrot.lane.b32.xlu0 %v2726_v38, %s2859_s26 }
 0x1c5   :  { %v2728_v40 = vpop.eup %2727 }
 0x1c6   :  { %v384_v41 = vadd.f32 1.0, %v2728_v40 }
 0x1c8   :  { %2729 = vrcp.f32 %v384_v41 }
 0x1d2   :  { %v2730_v42 = vpop.eup %2729 }
 0x1d3   :  { %v388_v45 = vmul.f32 0.0, %v2730_v42 }
 0x236   :  { %v391_v43 = vpop.permute.xlu0 %390 }
 0x237   :  { %v393_v44 = vmul.f32 %v2730_v42, %v391_v43 }
 0x239   :  { %395 = vrot.lane.b32.xlu0 %v393_v44, %s2860_s27 }
 0x23d   :  { %406 = vrot.lane.b32.xlu0 %v122_v28, %s2861_s28  ;;  %v245_v28 = vadd.f32 %v2993_v29, %v3001_v33 }
 0x241   :  { %416 = vrot.lane.b32.xlu0 %v2984_v26, %s2860_s27 }
 0x2ab   :  { %v396_v46 = vpop.permute.xlu0 %395 }
 0x2ac   :  { %v3009_v47 = vadd.f32 %v396_v46, %v388_v45 }
 0x2ae   :  { %2731 = vtanh.f32 %v3009_v47  ;;  %v3144_v52 = vsel %vm305_vm2, %v3009_v47, 0.0 }
 0x2af   :  { %v407_v8 = vpop.permute.xlu0 %406 }
 0x2b3   :  { %v417_v17 = vpop.permute.xlu0 %416 }
 0x2b8   :  { %v2732_v59 = vpop.eup %2731 }
 0x2b9   :  { %401 = vrot.lane.b32.xlu1 %v2732_v59, %s2859_s26 }
 0x32b   :  { %v402_v5 = vpop.permute.xlu1 %401 }
 0x32c   :  { %v404_v6 = vmul.f32 %v2730_v42, %v402_v5 }
 0x32e   :  { %v405_v7 = vsel %vm305_vm2, %v404_v6, 0.0  ;;  %v3087_v9 = vsel %vm305_vm2, %v404_v6, %v407_v8 }
 0x32f   :  { %412 = vrot.lane.b32.xlu1 %v405_v7, %s2860_s27 }
 0x333   :  { %544 = vrot.lane.b32.xlu1 %v3087_v9, %s2860_s27 }
 0x3a1   :  { %v413_v18 = vpop.permute.xlu1 %412 }
 0x3a2   :  { %v419_v19 = vsel %vm48_vm0, %v413_v18, %v417_v17 }
 0x3a3   :  { %2344 = vmatmul.mubr.msk.f32.vlgmr.msra.gmra.mrb[10].mxu1 %vm426_vm3, %v419_v19 }
 0x3a4   :  { %2610 = vmatpush3.bf16.msra.mxu1 %v2946_v12  ;;  %2384 = vmatprep.mubr.msk.f32.mxu1 %vm2856_vm1, %v2857_v23 }
 0x3a5   :  { %v545_v20 = vpop.permute.xlu1 %544  ;;  %2611 = vmatprep.subr.bf16.mxu1 %v2855_v3 }
 0x3a6   :  { %2355 = vmatmul.mubr.msk.f32.vlgmr.msra.gmra.mrb[2].mxu0 %vm48_vm0, %v545_v20 }
 0x3a7   :  { %2598 = vmatpush3.bf16.msra.mxu0 %v3031_v54  ;;  %2373 = vmatprep.mubr.msk.f32.mxu0 %vm2856_vm1, %v2857_v23 }
 0x3a8   :  { %2599 = vmatprep.subr.bf16.mxu0 %v2855_v3  ;;  %2613 = vmatpush3.bf16.msra.mxu1 %v2974_v22 }
 0x3a9   :  { %2614 = vmatprep.subr.bf16.mxu1 %v2855_v3 }
 0x3ab   :  { %2601 = vmatpush3.bf16.msra.mxu0 %v3042_v57 }
 0x3ac   :  { %2602 = vmatprep.subr.bf16.mxu0 %v2855_v3 }
 0x3af   :  { %2604 = vmatpush3.bf16.msra.mxu0 %v3061_v63 }
 0x3b0   :  { %2605 = vmatprep.subr.bf16.mxu0 %v2855_v3 }
 0x3b3   :  { %2607 = vmatpush3.bf16.msra.mxu0 %v3074_v2 }
 0x3b4   :  { %2626 = vmatprep.subr.bf16.mxu0 %v2855_v3 }
 0x476   :  { %v496_v24 = vpop.f32.mrb[10].mxu1 }
 0x477   :  { %v497_v25 = vadd.f32 %v3125_v21, %v496_v24  ;;  %v2345_v27 = vpop.f32.mrb[11].mxu1  ;;  %v250_v24 = vadd.f32 %v3001_v33, %v3093_v11 }
 0x479   :  { %2733 = vtanh.f32 %v497_v25  ;;  %v614_v30 = vpop.f32.mrb[2].mxu0  ;;  %v2126_v36 = vmul.f32 -1.442695, %v497_v25 }
 0x47a   :  { %v618_v31 = vadd.f32 %v614_v30, %v245_v28  ;;  %v2356_v32 = vpop.f32.mrb[3].mxu0 }
 0x47c   :  { %2735 = vtanh.f32 %v618_v31  ;;  %v2128_v37 = vmul.f32 -1.442695, %v618_v31 }
 0x47d   :  { %2737 = vpow2.f32 %v2126_v36 }
 0x47e   :  { %2739 = vpow2.f32 %v2128_v37 }
 0x483   :  { %v2734_v34 = vpop.eup %2733 }
 0x484   :  { %509 = vrot.lane.b32.xlu0 %v2734_v34, %s2859_s26 }
 0x486   :  { %v2736_v35 = vpop.eup %2735 }
 0x487   :  { %628 = vrot.lane.b32.xlu1 %v2736_v35, %s2859_s26  ;;  %v2738_v38 = vpop.eup %2737 }
 0x488   :  { %v2740_v39 = vpop.eup %2739  ;;  %v503_v40 = vadd.f32 1.0, %v2738_v38 }
 0x489   :  { %v622_v41 = vadd.f32 1.0, %v2740_v39 }
 0x48a   :  { %2741 = vrcp.f32 %v503_v40 }
 0x48b   :  { %2743 = vrcp.f32 %v622_v41 }
 0x494   :  { %v2742_v29 = vpop.eup %2741 }
 0x495   :  { %v2744_v44 = vpop.eup %2743  ;;  %v507_v49 = vmul.f32 0.0, %v2742_v29 }
 0x496   :  { %v626_v53 = vmul.f32 %v2744_v44, %v3144_v52 }
 0x4f6   :  { %v510_v42 = vpop.permute.xlu0 %509 }
 0x4f7   :  { %v512_v43 = vmul.f32 %v2742_v29, %v510_v42 }
 0x4f9   :  { %514 = vrot.lane.b32.xlu0 %v512_v43, %s2860_s27  ;;  %v629_v45 = vpop.permute.xlu1 %628  ;;  %v760_v43 = vld [vmem:[%s3662_s1 + $0x10] sm:$0xff] }
 0x4fa   :  { %v631_v46 = vmul.f32 %v2744_v44, %v629_v45 }
 0x4fc   :  { %633 = vrot.lane.b32.xlu1 %v631_v46, %s2860_s27 }
 0x4fd   :  { %538 = vperm.xlu0 %2724, %v535_v48  }
 0x501   :  { %530 = vrot.lane.b32.xlu0 %v2984_v26, %s2861_s28 }
 0x56b   :  { %v515_v50 = vpop.permute.xlu0 %514 }
 0x56c   :  { %v3139_v51 = vadd.f32 %v515_v50, %v507_v49 }
 0x56e   :  { %2745 = vtanh.f32 %v3139_v51  ;;  %v634_v55 = vpop.permute.xlu1 %633 }
 0x56f   :  { %v3148_v56 = vadd.f32 %v634_v55, %v626_v53 }
 0x571   :  { %2747 = vtanh.f32 %v3148_v56 }
 0x578   :  { %v2746_v58 = vpop.eup %2745 }
 0x579   :  { %520 = vrot.lane.b32.xlu1 %v2746_v58, %s2859_s26 }
 0x57b   :  { %v2748_v26 = vpop.eup %2747 }
 0x57c   :  { %v3153_v59 = vpop.permute.xlu0 %538 }
 0x57d   :  { %639 = vrot.lane.b32.xlu1 %v2748_v26, %s2859_s26  ;;  %vm541_vm4 = vcmp.gt.f32.partialorder %v3153_v59, 0.0 }
 0x57e   :  { %v3216_v49 = vsel %vm541_vm4, %v3148_v56, %v3144_v52 }
 0x580   :  { %v531_v61 = vpop.permute.xlu0 %530 }
 0x5eb   :  { %v521_v60 = vpop.permute.xlu1 %520 }
 0x5ec   :  { %v3155_v47 = vmul.f32 %v2742_v29, %v521_v60 }
 0x5ee   :  { %v3160_v62 = vsel %vm305_vm2, %v3155_v47, %v531_v61 }
 0x5ef   :  { %651 = vrot.lane.b32.xlu0 %v3160_v62, %s2859_s26  ;;  %v640_v0 = vpop.permute.xlu1 %639 }
 0x5f0   :  { %v642_v1 = vmul.f32 %v2744_v44, %v640_v0  ;;  %v3207_v44 = vsel %vm305_vm2, %v3139_v51, 0.0 }
 0x5f2   :  { %v643_v5 = vsel %vm541_vm4, %v642_v1, 0.0  ;;  %v3171_v6 = vsel %vm541_vm4, %v642_v1, %v3087_v9 }
 0x5f3   :  { %647 = vrot.lane.b32.xlu1 %v643_v5, %s2860_s27 }
 0x5f7   :  { %769 = vrot.lane.b32.xlu1 %v3171_v6, %s2860_s27 }
 0x661   :  { %v652_v7 = vpop.permute.xlu0 %651 }
 0x665   :  { %v648_v8 = vpop.permute.xlu1 %647 }
 0x666   :  { %v654_v17 = vsel %vm48_vm0, %v648_v8, %v652_v7 }
 0x667   :  { %2374 = vmatmul.mubr.msk.f32.vlgmr.msra.gmra.mrb[4].mxu0 %vm426_vm3, %v654_v17 }
 0x668   :  { %2628 = vmatpush3.bf16.msra.mxu0 %v2946_v12  ;;  %2414 = vmatprep.mubr.msk.f32.mxu0 %vm2856_vm1, %v2857_v23 }
 0x669   :  { %v770_v18 = vpop.permute.xlu1 %769  ;;  %2629 = vmatprep.subr.bf16.mxu0 %v2855_v3 }
 0x66a   :  { %2385 = vmatmul.mubr.msk.f32.vlgmr.msra.gmra.mrb[12].mxu1 %vm48_vm0, %v770_v18 }
 0x66b   :  { %2616 = vmatpush3.bf16.msra.mxu1 %v3031_v54  ;;  %2403 = vmatprep.mubr.msk.f32.mxu1 %vm2856_vm1, %v2857_v23 }
 0x66c   :  { %2617 = vmatprep.subr.bf16.mxu1 %v2855_v3  ;;  %2631 = vmatpush3.bf16.msra.mxu0 %v2974_v22 }
 0x66d   :  { %2632 = vmatprep.subr.bf16.mxu0 %v2855_v3 }
 0x66f   :  { %2619 = vmatpush3.bf16.msra.mxu1 %v3042_v57 }
 0x670   :  { %2620 = vmatprep.subr.bf16.mxu1 %v2855_v3 }
 0x673   :  { %2622 = vmatpush3.bf16.msra.mxu1 %v3061_v63 }
 0x674   :  { %2623 = vmatprep.subr.bf16.mxu1 %v2855_v3 }
 0x677   :  { %2625 = vmatpush3.bf16.msra.mxu1 %v3074_v2 }
 0x678   :  { %2644 = vmatprep.subr.bf16.mxu1 %v2855_v3 }
 0x73a   :  { %v724_v9 = vpop.f32.mrb[4].mxu0 }
 0x73b   :  { %v725_v19 = vadd.f32 %v3125_v21, %v724_v9  ;;  %v2375_v20 = vpop.f32.mrb[5].mxu0 }
 0x73d   :  { %2749 = vtanh.f32 %v725_v19  ;;  %v839_v25 = vpop.f32.mrb[12].mxu1  ;;  %v2130_v32 = vmul.f32 -1.442695, %v725_v19  ;;  %v255_v19 = vadd.f32 %v3091_v10, %v3001_v33 }
 0x73e   :  { %v843_v27 = vadd.f32 %v839_v25, %v250_v24  ;;  %v2386_v28 = vpop.f32.mrb[13].mxu1 }
 0x740   :  { %2751 = vtanh.f32 %v843_v27  ;;  %v2132_v34 = vmul.f32 -1.442695, %v843_v27 }
 0x741   :  { %2753 = vpow2.f32 %v2130_v32 }
 0x742   :  { %2755 = vpow2.f32 %v2132_v34 }
 0x747   :  { %v2750_v30 = vpop.eup %2749 }
 0x748   :  { %737 = vrot.lane.b32.xlu0 %v2750_v30, %s2859_s26 }
 0x74a   :  { %v2752_v31 = vpop.eup %2751 }
 0x74b   :  { %853 = vrot.lane.b32.xlu1 %v2752_v31, %s2859_s26  ;;  %v2754_v35 = vpop.eup %2753 }
 0x74c   :  { %v2756_v36 = vpop.eup %2755  ;;  %v731_v37 = vadd.f32 1.0, %v2754_v35 }
 0x74d   :  { %v847_v38 = vadd.f32 1.0, %v2756_v36 }
 0x74e   :  { %2757 = vrcp.f32 %v731_v37 }
 0x74f   :  { %2759 = vrcp.f32 %v847_v38 }
 0x758   :  { %v2758_v11 = vpop.eup %2757 }
 0x759   :  { %v2760_v41 = vpop.eup %2759  ;;  %v735_v45 = vmul.f32 %v2758_v11, %v3207_v44 }
 0x75a   :  { %v851_v50 = vmul.f32 %v2760_v41, %v3216_v49 }
 0x7ba   :  { %v738_v39 = vpop.permute.xlu0 %737 }
 0x7bb   :  { %v740_v40 = vmul.f32 %v2758_v11, %v738_v39 }
 0x7bd   :  { %v854_v29 = vpop.permute.xlu1 %853  ;;  %742 = vrot.lane.b32.xlu0 %v740_v40, %s2860_s27 }
 0x7be   :  { %v856_v42 = vmul.f32 %v2760_v41, %v854_v29 }
 0x7c0   :  { %858 = vrot.lane.b32.xlu1 %v856_v42, %s2860_s27 }
 0x7c1   :  { %763 = vperm.xlu0 %2724, %v760_v43  }
 0x82f   :  { %v743_v46 = vpop.permute.xlu0 %742 }
 0x830   :  { %v3210_v48 = vadd.f32 %v743_v46, %v735_v45 }
 0x832   :  { %2761 = vtanh.f32 %v3210_v48  ;;  %v859_v53 = vpop.permute.xlu1 %858  ;;  %v3281_v29 = vsel %vm541_vm4, %v3210_v48, %v3207_v44 }
 0x833   :  { %v3220_v55 = vadd.f32 %v859_v53, %v851_v50 }
 0x835   :  { %2763 = vtanh.f32 %v3220_v55 }
 0x83c   :  { %v2762_v51 = vpop.eup %2761 }
 0x83d   :  { %748 = vrot.lane.b32.xlu1 %v2762_v51, %s2859_s26 }
 0x83f   :  { %v2764_v58 = vpop.eup %2763 }
 0x840   :  { %864 = vrot.lane.b32.xlu0 %v2764_v58, %s2859_s26  ;;  %v3225_v26 = vpop.permute.xlu0 %763 }
 0x841   :  { %vm766_vm5 = vcmp.gt.f32.partialorder %v3225_v26, 0.0 }
 0x842   :  { %v3290_v46 = vsel %vm766_vm5, %v3220_v55, %v3216_v49 }
 0x8af   :  { %v749_v60 = vpop.permute.xlu1 %748 }
 0x8b0   :  { %v3227_v52 = vmul.f32 %v2758_v11, %v749_v60 }
 0x8b2   :  { %v865_v56 = vpop.permute.xlu0 %864  ;;  %v3233_v61 = vsel %vm541_vm4, %v3227_v52, %v3160_v62 }
 0x8b3   :  { %v867_v0 = vmul.f32 %v2760_v41, %v865_v56  ;;  %876 = vrot.lane.b32.xlu0 %v3233_v61, %s2859_s26  ;;  %v985_v41 = vld [vmem:[%s3662_s1 + $0x18] sm:$0xff] }
 0x8b5   :  { %v868_v1 = vsel %vm766_vm5, %v867_v0, 0.0  ;;  %v3244_v5 = vsel %vm766_vm5, %v867_v0, %v3171_v6 }
 0x8b6   :  { %872 = vrot.lane.b32.xlu1 %v868_v1, %s2860_s27 }
 0x8ba   :  { %994 = vrot.lane.b32.xlu1 %v3244_v5, %s2860_s27 }
 0x925   :  { %v877_v62 = vpop.permute.xlu0 %876 }
 0x928   :  { %v873_v7 = vpop.permute.xlu1 %872 }
 0x929   :  { %v879_v8 = vsel %vm48_vm0, %v873_v7, %v877_v62 }
 0x92a   :  { %2404 = vmatmul.mubr.msk.f32.vlgmr.msra.gmra.mrb[14].mxu1 %vm426_vm3, %v879_v8 }
 0x92b   :  { %2646 = vmatpush3.bf16.msra.mxu1 %v2946_v12  ;;  %2444 = vmatprep.mubr.msk.f32.mxu1 %vm2856_vm1, %v2857_v23 }
 0x92c   :  { %v995_v17 = vpop.permute.xlu1 %994  ;;  %2647 = vmatprep.subr.bf16.mxu1 %v2855_v3 }
 0x92d   :  { %2415 = vmatmul.mubr.msk.f32.vlgmr.msra.gmra.mrb[6].mxu0 %vm48_vm0, %v995_v17 }
 0x92e   :  { %2634 = vmatpush3.bf16.msra.mxu0 %v3031_v54  ;;  %2433 = vmatprep.mubr.msk.f32.mxu0 %vm2856_vm1, %v2857_v23 }
 0x92f   :  { %2635 = vmatprep.subr.bf16.mxu0 %v2855_v3  ;;  %2649 = vmatpush3.bf16.msra.mxu1 %v2974_v22 }
 0x930   :  { %2650 = vmatprep.subr.bf16.mxu1 %v2855_v3 }
 0x932   :  { %2637 = vmatpush3.bf16.msra.mxu0 %v3042_v57 }
 0x933   :  { %2638 = vmatprep.subr.bf16.mxu0 %v2855_v3 }
 0x936   :  { %2640 = vmatpush3.bf16.msra.mxu0 %v3061_v63 }
 0x937   :  { %2641 = vmatprep.subr.bf16.mxu0 %v2855_v3 }
 0x93a   :  { %2643 = vmatpush3.bf16.msra.mxu0 %v3074_v2 }
 0x93b   :  { %2662 = vmatprep.subr.bf16.mxu0 %v2855_v3 }
 0x9fd   :  { %v949_v6 = vpop.f32.mrb[14].mxu1 }
 0x9fe   :  { %v950_v18 = vadd.f32 %v3125_v21, %v949_v6  ;;  %v2405_v9 = vpop.f32.mrb[15].mxu1 }
 0x9ff   :  { %v260_v9 = vadd.f32 %v3001_v33, %v3097_v14 }
 0xa00   :  { %2765 = vtanh.f32 %v950_v18  ;;  %v1064_v20 = vpop.f32.mrb[6].mxu0  ;;  %v2134_v30 = vmul.f32 -1.442695, %v950_v18 }
 0xa01   :  { %v1068_v24 = vadd.f32 %v1064_v20, %v255_v19  ;;  %v2416_v25 = vpop.f32.mrb[7].mxu0 }
 0xa03   :  { %2767 = vtanh.f32 %v1068_v24  ;;  %v2136_v31 = vmul.f32 -1.442695, %v1068_v24 }
 0xa04   :  { %2769 = vpow2.f32 %v2134_v30 }
 0xa05   :  { %2771 = vpow2.f32 %v2136_v31 }
 0xa0a   :  { %v2766_v27 = vpop.eup %2765 }
 0xa0b   :  { %962 = vrot.lane.b32.xlu0 %v2766_v27, %s2859_s26 }
 0xa0d   :  { %v2768_v28 = vpop.eup %2767 }
 0xa0e   :  { %1078 = vrot.lane.b32.xlu1 %v2768_v28, %s2859_s26  ;;  %v2770_v32 = vpop.eup %2769 }
 0xa0f   :  { %v2772_v34 = vpop.eup %2771  ;;  %v956_v35 = vadd.f32 1.0, %v2770_v32 }
 0xa10   :  { %v1072_v36 = vadd.f32 1.0, %v2772_v34 }
 0xa11   :  { %2773 = vrcp.f32 %v956_v35 }
 0xa12   :  { %2775 = vrcp.f32 %v1072_v36 }
 0xa1b   :  { %v2774_v10 = vpop.eup %2773 }
 0xa1c   :  { %v2776_v11 = vpop.eup %2775  ;;  %v960_v42 = vmul.f32 %v2774_v10, %v3281_v29 }
 0xa1d   :  { %v1076_v50 = vmul.f32 %v2776_v11, %v3290_v46 }
 0xa7d   :  { %v963_v37 = vpop.permute.xlu0 %962 }
 0xa7e   :  { %v965_v38 = vmul.f32 %v2774_v10, %v963_v37 }
 0xa80   :  { %967 = vrot.lane.b32.xlu0 %v965_v38, %s2860_s27  ;;  %v1079_v39 = vpop.permute.xlu1 %1078 }
 0xa81   :  { %v1081_v40 = vmul.f32 %v2776_v11, %v1079_v39  ;;  %v1210_v39 = vld [vmem:[%s3662_s1 + $0x20] sm:$0xff] }
 0xa83   :  { %1083 = vrot.lane.b32.xlu1 %v1081_v40, %s2860_s27 }
 0xa84   :  { %988 = vperm.xlu0 %2724, %v985_v41  }
 0xaf2   :  { %v968_v43 = vpop.permute.xlu0 %967 }
 0xaf3   :  { %v3284_v45 = vadd.f32 %v968_v43, %v960_v42 }
 0xaf5   :  { %2777 = vtanh.f32 %v3284_v45  ;;  %v1084_v53 = vpop.permute.xlu1 %1083  ;;  %v3355_v40 = vsel %vm766_vm5, %v3284_v45, %v3281_v29 }
 0xaf6   :  { %v3294_v51 = vadd.f32 %v1084_v53, %v1076_v50 }
 0xaf8   :  { %2779 = vtanh.f32 %v3294_v51 }
 0xaff   :  { %v2778_v44 = vpop.eup %2777 }
 0xb00   :  { %973 = vrot.lane.b32.xlu1 %v2778_v44, %s2859_s26 }
 0xb02   :  { %v2780_v48 = vpop.eup %2779 }
 0xb03   :  { %1089 = vrot.lane.b32.xlu0 %v2780_v48, %s2859_s26  ;;  %v3299_v58 = vpop.permute.xlu0 %988 }
 0xb04   :  { %vm991_vm6 = vcmp.gt.f32.partialorder %v3299_v58, 0.0 }
 0xb05   :  { %v3364_v50 = vsel %vm991_vm6, %v3294_v51, %v3290_v46 }
 0xb72   :  { %v974_v60 = vpop.permute.xlu1 %973 }
 0xb73   :  { %v3301_v49 = vmul.f32 %v2774_v10, %v974_v60 }
 0xb75   :  { %v1090_v55 = vpop.permute.xlu0 %1089  ;;  %v3307_v56 = vsel %vm766_vm5, %v3301_v49, %v3233_v61 }
 0xb76   :  { %v1092_v0 = vmul.f32 %v2776_v11, %v1090_v55  ;;  %1101 = vrot.lane.b32.xlu0 %v3307_v56, %s2859_s26 }
 0xb78   :  { %v1093_v1 = vsel %vm991_vm6, %v1092_v0, 0.0  ;;  %v3318_v62 = vsel %vm991_vm6, %v1092_v0, %v3244_v5 }
 0xb79   :  { %1097 = vrot.lane.b32.xlu1 %v1093_v1, %s2860_s27 }
 0xb7d   :  { %1219 = vrot.lane.b32.xlu1 %v3318_v62, %s2860_s27 }
 0xbe8   :  { %v1102_v61 = vpop.permute.xlu0 %1101 }
 0xbeb   :  { %v1098_v7 = vpop.permute.xlu1 %1097 }
 0xbec   :  { %v1104_v8 = vsel %vm48_vm0, %v1098_v7, %v1102_v61 }
 0xbed   :  { %2434 = vmatmul.mubr.msk.f32.vlgmr.msra.gmra.mrb[8].mxu0 %vm426_vm3, %v1104_v8 }
 0xbee   :  { %2664 = vmatpush3.bf16.msra.mxu0 %v2946_v12  ;;  %2474 = vmatprep.mubr.msk.f32.mxu0 %vm2856_vm1, %v2857_v23 }
 0xbef   :  { %v1220_v17 = vpop.permute.xlu1 %1219  ;;  %2665 = vmatprep.subr.bf16.mxu0 %v2855_v3 }
 0xbf0   :  { %2445 = vmatmul.mubr.msk.f32.vlgmr.msra.gmra.mrb[16].mxu1 %vm48_vm0, %v1220_v17 }
 0xbf1   :  { %2652 = vmatpush3.bf16.msra.mxu1 %v3031_v54  ;;  %2463 = vmatprep.mubr.msk.f32.mxu1 %vm2856_vm1, %v2857_v23 }
 0xbf2   :  { %2653 = vmatprep.subr.bf16.mxu1 %v2855_v3  ;;  %2667 = vmatpush3.bf16.msra.mxu0 %v2974_v22 }
 0xbf3   :  { %2668 = vmatprep.subr.bf16.mxu0 %v2855_v3 }
 0xbf5   :  { %2655 = vmatpush3.bf16.msra.mxu1 %v3042_v57 }
 0xbf6   :  { %2656 = vmatprep.subr.bf16.mxu1 %v2855_v3 }
 0xbf9   :  { %2658 = vmatpush3.bf16.msra.mxu1 %v3061_v63 }
 0xbfa   :  { %2659 = vmatprep.subr.bf16.mxu1 %v2855_v3 }
 0xbfd   :  { %2661 = vmatpush3.bf16.msra.mxu1 %v3074_v2 }
 0xbfe   :  { %2680 = vmatprep.subr.bf16.mxu1 %v2855_v3 }
 0xcc0   :  { %v1174_v5 = vpop.f32.mrb[8].mxu0 }
 0xcc1   :  { %v1175_v6 = vadd.f32 %v3125_v21, %v1174_v5  ;;  %v2435_v18 = vpop.f32.mrb[9].mxu0 }
 0xcc3   :  { %2781 = vtanh.f32 %v1175_v6  ;;  %v1289_v19 = vpop.f32.mrb[16].mxu1  ;;  %v2138_v28 = vmul.f32 -1.442695, %v1175_v6 }
 0xcc4   :  { %v1293_v20 = vadd.f32 %v1289_v19, %v260_v9  ;;  %v2446_v24 = vpop.f32.mrb[17].mxu1  ;;  %v265_v9 = vadd.f32 %v3095_v13, %v3001_v33 }
 0xcc6   :  { %2783 = vtanh.f32 %v1293_v20  ;;  %v2140_v30 = vmul.f32 -1.442695, %v1293_v20 }
 0xcc7   :  { %2785 = vpow2.f32 %v2138_v28 }
 0xcc8   :  { %2787 = vpow2.f32 %v2140_v30 }
 0xccd   :  { %v2782_v25 = vpop.eup %2781 }
 0xcce   :  { %1187 = vrot.lane.b32.xlu0 %v2782_v25, %s2859_s26 }
 0xcd0   :  { %v2784_v27 = vpop.eup %2783 }
 0xcd1   :  { %1303 = vrot.lane.b32.xlu1 %v2784_v27, %s2859_s26  ;;  %v2786_v31 = vpop.eup %2785 }
 0xcd2   :  { %v2788_v32 = vpop.eup %2787  ;;  %v1181_v34 = vadd.f32 1.0, %v2786_v31 }
 0xcd3   :  { %v1297_v35 = vadd.f32 1.0, %v2788_v32 }
 0xcd4   :  { %2789 = vrcp.f32 %v1181_v34 }
 0xcd5   :  { %2791 = vrcp.f32 %v1297_v35 }
 0xcde   :  { %v2790_v14 = vpop.eup %2789 }
 0xcdf   :  { %v2792_v37 = vpop.eup %2791  ;;  %v1185_v41 = vmul.f32 %v2790_v14, %v3355_v40 }
 0xce0   :  { %v1301_v53 = vmul.f32 %v2792_v37, %v3364_v50 }
 0xd40   :  { %v1188_v36 = vpop.permute.xlu0 %1187 }
 0xd41   :  { %v1190_v10 = vmul.f32 %v2790_v14, %v1188_v36 }
 0xd43   :  { %v1304_v38 = vpop.permute.xlu1 %1303  ;;  %1192 = vrot.lane.b32.xlu0 %v1190_v10, %s2860_s27 }
 0xd44   :  { %v1306_v11 = vmul.f32 %v2792_v37, %v1304_v38 }
 0xd46   :  { %1308 = vrot.lane.b32.xlu1 %v1306_v11, %s2860_s27  ;;  %v1435_v11 = vld [vmem:[%s3662_s1 + $0x28] sm:$0xff] }
 0xd47   :  { %1213 = vperm.xlu0 %2724, %v1210_v39  }
 0xdb5   :  { %v1193_v42 = vpop.permute.xlu0 %1192 }
 0xdb6   :  { %v3358_v43 = vadd.f32 %v1193_v42, %v1185_v41 }
 0xdb8   :  { %2793 = vtanh.f32 %v3358_v43  ;;  %v1309_v44 = vpop.permute.xlu1 %1308  ;;  %v3429_v39 = vsel %vm991_vm6, %v3358_v43, %v3355_v40 }
 0xdb9   :  { %v3368_v48 = vadd.f32 %v1309_v44, %v1301_v53 }
 0xdbb   :  { %2795 = vtanh.f32 %v3368_v48 }
 0xdc2   :  { %v2794_v29 = vpop.eup %2793 }
 0xdc3   :  { %1198 = vrot.lane.b32.xlu1 %v2794_v29, %s2859_s26 }
 0xdc5   :  { %v2796_v45 = vpop.eup %2795 }
 0xdc6   :  { %1314 = vrot.lane.b32.xlu0 %v2796_v45, %s2859_s26  ;;  %v3373_v60 = vpop.permute.xlu0 %1213 }
 0xdc7   :  { %vm1216_vm7 = vcmp.gt.f32.partialorder %v3373_v60, 0.0 }
 0xdc8   :  { %v3438_v44 = vsel %vm1216_vm7, %v3368_v48, %v3364_v50 }
 0xe35   :  { %v1199_v55 = vpop.permute.xlu1 %1198 }
 0xe36   :  { %v3375_v46 = vmul.f32 %v2790_v14, %v1199_v55 }
 0xe38   :  { %v1315_v51 = vpop.permute.xlu0 %1314  ;;  %v3381_v0 = vsel %vm991_vm6, %v3375_v46, %v3307_v56 }
 0xe39   :  { %v1317_v1 = vmul.f32 %v2792_v37, %v1315_v51  ;;  %1326 = vrot.lane.b32.xlu0 %v3381_v0, %s2859_s26 }
 0xe3b   :  { %v1318_v61 = vsel %vm1216_vm7, %v1317_v1, 0.0  ;;  %v3392_v7 = vsel %vm1216_vm7, %v1317_v1, %v3318_v62 }
 0xe3c   :  { %1322 = vrot.lane.b32.xlu1 %v1318_v61, %s2860_s27 }
 0xe40   :  { %1444 = vrot.lane.b32.xlu1 %v3392_v7, %s2860_s27 }
 0xeab   :  { %v1327_v56 = vpop.permute.xlu0 %1326 }
 0xeae   :  { %v1323_v8 = vpop.permute.xlu1 %1322 }
 0xeaf   :  { %v1329_v17 = vsel %vm48_vm0, %v1323_v8, %v1327_v56 }
 0xeb0   :  { %2464 = vmatmul.mubr.msk.f32.vlgmr.msra.gmra.mrb[18].mxu1 %vm426_vm3, %v1329_v17 }
 0xeb1   :  { %2682 = vmatpush3.bf16.msra.mxu1 %v2946_v12  ;;  %2504 = vmatprep.mubr.msk.f32.mxu1 %vm2856_vm1, %v2857_v23 }
 0xeb2   :  { %v1445_v5 = vpop.permute.xlu1 %1444  ;;  %2683 = vmatprep.subr.bf16.mxu1 %v2855_v3 }
 0xeb3   :  { %2475 = vmatmul.mubr.msk.f32.vlgmr.msra.gmra.mrb[10].mxu0 %vm48_vm0, %v1445_v5 }
 0xeb4   :  { %2670 = vmatpush3.bf16.msra.mxu0 %v3031_v54  ;;  %2493 = vmatprep.mubr.msk.f32.mxu0 %vm2856_vm1, %v2857_v23 }
 0xeb5   :  { %2671 = vmatprep.subr.bf16.mxu0 %v2855_v3  ;;  %2685 = vmatpush3.bf16.msra.mxu1 %v2974_v22 }
 0xeb6   :  { %2686 = vmatprep.subr.bf16.mxu1 %v2855_v3 }
 0xeb8   :  { %2673 = vmatpush3.bf16.msra.mxu0 %v3042_v57 }
 0xeb9   :  { %2674 = vmatprep.subr.bf16.mxu0 %v2855_v3 }
 0xebc   :  { %2676 = vmatpush3.bf16.msra.mxu0 %v3061_v63 }
 0xebd   :  { %2677 = vmatprep.subr.bf16.mxu0 %v2855_v3 }
 0xec0   :  { %2679 = vmatpush3.bf16.msra.mxu0 %v3074_v2 }
 0xec1   :  { %2698 = vmatprep.subr.bf16.mxu0 %v2855_v3 }
 0xf83   :  { %v1399_v62 = vpop.f32.mrb[18].mxu1 }
 0xf84   :  { %v1400_v6 = vadd.f32 %v3125_v21, %v1399_v62  ;;  %v2465_v18 = vpop.f32.mrb[19].mxu1 }
 0xf86   :  { %2797 = vtanh.f32 %v1400_v6  ;;  %v1514_v19 = vpop.f32.mrb[10].mxu0  ;;  %v2142_v28 = vmul.f32 -1.442695, %v1400_v6 }
 0xf87   :  { %v1518_v20 = vadd.f32 %v1514_v19, %v265_v9  ;;  %v2476_v24 = vpop.f32.mrb[11].mxu0  ;;  %v270_v9 = vadd.f32 %v3001_v33, %v3101_v16 }
 0xf89   :  { %2799 = vtanh.f32 %v1518_v20  ;;  %v2144_v30 = vmul.f32 -1.442695, %v1518_v20 }
 0xf8a   :  { %2801 = vpow2.f32 %v2142_v28 }
 0xf8b   :  { %2803 = vpow2.f32 %v2144_v30 }
 0xf90   :  { %v2798_v25 = vpop.eup %2797 }
 0xf91   :  { %1412 = vrot.lane.b32.xlu0 %v2798_v25, %s2859_s26 }
 0xf93   :  { %v2800_v27 = vpop.eup %2799 }
 0xf94   :  { %1528 = vrot.lane.b32.xlu1 %v2800_v27, %s2859_s26  ;;  %v2802_v31 = vpop.eup %2801 }
 0xf95   :  { %v2804_v32 = vpop.eup %2803  ;;  %v1406_v34 = vadd.f32 1.0, %v2802_v31 }
 0xf96   :  { %v1522_v35 = vadd.f32 1.0, %v2804_v32 }
 0xf97   :  { %2805 = vrcp.f32 %v1406_v34 }
 0xf98   :  { %2807 = vrcp.f32 %v1522_v35 }
 0xfa1   :  { %v2806_v13 = vpop.eup %2805 }
 0xfa2   :  { %v2808_v10 = vpop.eup %2807  ;;  %v1410_v41 = vmul.f32 %v2806_v13, %v3429_v39 }
 0xfa3   :  { %v1526_v29 = vmul.f32 %v2808_v10, %v3438_v44 }
0x1003   :  { %v1413_v14 = vpop.permute.xlu0 %1412 }
0x1004   :  { %v1415_v36 = vmul.f32 %v2806_v13, %v1413_v14 }
0x1006   :  { %1417 = vrot.lane.b32.xlu0 %v1415_v36, %s2860_s27  ;;  %v1529_v37 = vpop.permute.xlu1 %1528 }
0x1007   :  { %v1531_v38 = vmul.f32 %v2808_v10, %v1529_v37 }
0x1009   :  { %1533 = vrot.lane.b32.xlu1 %v1531_v38, %s2860_s27 }
0x100a   :  { %1438 = vperm.xlu0 %2724, %v1435_v11  }
0x1078   :  { %v1418_v42 = vpop.permute.xlu0 %1417 }
0x1079   :  { %v3432_v53 = vadd.f32 %v1418_v42, %v1410_v41 }
0x107b   :  { %2809 = vtanh.f32 %v3432_v53  ;;  %v1534_v45 = vpop.permute.xlu1 %1533  ;;  %v3502_v37 = vsel %vm1216_vm7, %v3432_v53, %v3429_v39 }
0x107c   :  { %v3442_v55 = vadd.f32 %v1534_v45, %v1526_v29 }
0x107e   :  { %2811 = vtanh.f32 %v3442_v55 }
0x1085   :  { %v2810_v40 = vpop.eup %2809 }
0x1086   :  { %1423 = vrot.lane.b32.xlu1 %v2810_v40, %s2859_s26 }
0x1088   :  { %v2812_v43 = vpop.eup %2811 }
0x1089   :  { %1539 = vrot.lane.b32.xlu0 %v2812_v43, %s2859_s26  ;;  %v3447_v51 = vpop.permute.xlu0 %1438 }
0x108a   :  { %vm1441_vm8 = vcmp.gt.f32.partialorder %v3447_v51, 0.0 }
0x108b   :  { %v3511_v42 = vsel %vm1441_vm8, %v3442_v55, %v3438_v44 }
0x10f8   :  { %v1424_v1 = vpop.permute.xlu1 %1423 }
0x10f9   :  { %v3449_v50 = vmul.f32 %v2806_v13, %v1424_v1 }
0x10fb   :  { %v1540_v48 = vpop.permute.xlu0 %1539  ;;  %v3455_v61 = vsel %vm1216_vm7, %v3449_v50, %v3381_v0 }
0x10fc   :  { %v1542_v56 = vmul.f32 %v2808_v10, %v1540_v48  ;;  %1551 = vrot.lane.b32.xlu0 %v3455_v61, %s2859_s26  ;;  %v1660_v10 = vld [vmem:[%s3662_s1 + $0x30] sm:$0xff] }
0x10fe   :  { %v1543_v8 = vsel %vm1441_vm8, %v1542_v56, 0.0  ;;  %v3466_v17 = vsel %vm1441_vm8, %v1542_v56, %v3392_v7 }
0x10ff   :  { %1547 = vrot.lane.b32.xlu1 %v1543_v8, %s2860_s27 }
0x1103   :  { %1669 = vrot.lane.b32.xlu1 %v3466_v17, %s2860_s27 }
0x116e   :  { %v1552_v0 = vpop.permute.xlu0 %1551 }
0x1171   :  { %v1548_v5 = vpop.permute.xlu1 %1547 }
0x1172   :  { %v1554_v62 = vsel %vm48_vm0, %v1548_v5, %v1552_v0 }
0x1173   :  { %2494 = vmatmul.mubr.msk.f32.vlgmr.msra.gmra.mrb[12].mxu0 %vm426_vm3, %v1554_v62 }
0x1174   :  { %2700 = vmatpush3.bf16.msra.mxu0 %v2946_v12  ;;  %2534 = vmatprep.mubr.msk.f32.mxu0 %vm2856_vm1, %v2857_v23 }
0x1175   :  { %v1670_v6 = vpop.permute.xlu1 %1669  ;;  %2701 = vmatprep.subr.bf16.mxu0 %v2855_v3 }
0x1176   :  { %2505 = vmatmul.mubr.msk.f32.vlgmr.msra.gmra.mrb[20].mxu1 %vm48_vm0, %v1670_v6 }
0x1177   :  { %2688 = vmatpush3.bf16.msra.mxu1 %v3031_v54  ;;  %2523 = vmatprep.mubr.msk.f32.mxu1 %vm2856_vm1, %v2857_v23 }
0x1178   :  { %2689 = vmatprep.subr.bf16.mxu1 %v2855_v3  ;;  %2703 = vmatpush3.bf16.msra.mxu0 %v2974_v22 }
0x1179   :  { %2704 = vmatprep.subr.bf16.mxu0 %v2855_v3 }
0x117b   :  { %2691 = vmatpush3.bf16.msra.mxu1 %v3042_v57 }
0x117c   :  { %2692 = vmatprep.subr.bf16.mxu1 %v2855_v3 }
0x117f   :  { %2694 = vmatpush3.bf16.msra.mxu1 %v3061_v63 }
0x1180   :  { %2695 = vmatprep.subr.bf16.mxu1 %v2855_v3 }
0x1183   :  { %2697 = vmatpush3.bf16.msra.mxu1 %v3074_v2 }
0x1246   :  { %v1624_v12 = vpop.f32.mrb[12].mxu0 }
0x1247   :  { %v1625_v7 = vadd.f32 %v3125_v21, %v1624_v12  ;;  %v2495_v18 = vpop.f32.mrb[13].mxu0 }
0x1249   :  { %2813 = vtanh.f32 %v1625_v7  ;;  %v1739_v22 = vpop.f32.mrb[20].mxu1  ;;  %v2146_v27 = vmul.f32 -1.442695, %v1625_v7 }
0x124a   :  { %v1743_v19 = vadd.f32 %v1739_v22, %v270_v9  ;;  %v2506_v20 = vpop.f32.mrb[21].mxu1 }
0x124c   :  { %2815 = vtanh.f32 %v1743_v19  ;;  %v2148_v28 = vmul.f32 -1.442695, %v1743_v19 }
0x124d   :  { %2817 = vpow2.f32 %v2146_v27 }
0x124e   :  { %2819 = vpow2.f32 %v2148_v28 }
0x1253   :  { %v2814_v24 = vpop.eup %2813 }
0x1254   :  { %1637 = vrot.lane.b32.xlu0 %v2814_v24, %s2859_s26 }
0x1256   :  { %v2816_v25 = vpop.eup %2815 }
0x1257   :  { %1753 = vrot.lane.b32.xlu1 %v2816_v25, %s2859_s26  ;;  %v2818_v30 = vpop.eup %2817 }
0x1258   :  { %v2820_v31 = vpop.eup %2819  ;;  %v1631_v32 = vadd.f32 1.0, %v2818_v30 }
0x1259   :  { %v1747_v34 = vadd.f32 1.0, %v2820_v31 }
0x125a   :  { %2821 = vrcp.f32 %v1631_v32  ;;  %v1885_v32 = vld [vmem:[%s3662_s1 + $0x38] sm:$0xff] }
0x125b   :  { %2823 = vrcp.f32 %v1747_v34 }
0x1264   :  { %v2822_v33 = vpop.eup %2821 }
0x1265   :  { %v2824_v13 = vpop.eup %2823  ;;  %v1635_v38 = vmul.f32 %v2822_v33, %v3502_v37 }
0x1266   :  { %v1751_v29 = vmul.f32 %v2824_v13, %v3511_v42 }
0x12c6   :  { %v1638_v16 = vpop.permute.xlu0 %1637 }
0x12c7   :  { %v1640_v35 = vmul.f32 %v2822_v33, %v1638_v16 }
0x12c9   :  { %v1754_v14 = vpop.permute.xlu1 %1753  ;;  %1642 = vrot.lane.b32.xlu0 %v1640_v35, %s2860_s27 }
0x12ca   :  { %v1756_v36 = vmul.f32 %v2824_v13, %v1754_v14 }
0x12cc   :  { %1758 = vrot.lane.b32.xlu1 %v1756_v36, %s2860_s27 }
0x12cd   :  { %1663 = vperm.xlu0 %2724, %v1660_v10  }
0x133b   :  { %v1643_v11 = vpop.permute.xlu0 %1642 }
0x133c   :  { %v3505_v41 = vadd.f32 %v1643_v11, %v1635_v38 }
0x133e   :  { %2825 = vtanh.f32 %v3505_v41  ;;  %v1759_v45 = vpop.permute.xlu1 %1758  ;;  %v1659_v34 = vsel %vm1441_vm8, %v3505_v41, %v3502_v37 }
0x133f   :  { %v3515_v40 = vadd.f32 %v1759_v45, %v1751_v29 }
0x1341   :  { %2827 = vtanh.f32 %v3515_v40 }
0x1348   :  { %v2826_v39 = vpop.eup %2825 }
0x1349   :  { %1648 = vrot.lane.b32.xlu1 %v2826_v39, %s2859_s26 }
0x134b   :  { %v2828_v53 = vpop.eup %2827 }
0x134c   :  { %1764 = vrot.lane.b32.xlu0 %v2828_v53, %s2859_s26  ;;  %v3520_v43 = vpop.permute.xlu0 %1663 }
0x134d   :  { %vm1666_vm9 = vcmp.gt.f32.partialorder %v3520_v43, 0.0 }
0x13bb   :  { %v1649_v1 = vpop.permute.xlu1 %1648 }
0x13bc   :  { %v3522_v44 = vmul.f32 %v2822_v33, %v1649_v1 }
0x13be   :  { %v1765_v55 = vpop.permute.xlu0 %1764  ;;  %v3528_v48 = vsel %vm1441_vm8, %v3522_v44, %v3455_v61 }
0x13bf   :  { %v1767_v56 = vmul.f32 %v2824_v13, %v1765_v55  ;;  %1776 = vrot.lane.b32.xlu0 %v3528_v48, %s2859_s26  ;;  %v1770_v13 = vsel %vm1666_vm9, %v3515_v40, %v3511_v42 }
0x13c1   :  { %v1768_v8 = vsel %vm1666_vm9, %v1767_v56, 0.0  ;;  %v1769_v0 = vsel %vm1666_vm9, %v1767_v56, %v3466_v17 }
0x13c2   :  { %1772 = vrot.lane.b32.xlu1 %v1768_v8, %s2860_s27 }
0x13c6   :  { %1894 = vrot.lane.b32.xlu1 %v1769_v0, %s2860_s27 }
0x1431   :  { %v1777_v5 = vpop.permute.xlu0 %1776 }
0x1434   :  { %v1773_v61 = vpop.permute.xlu1 %1772 }
0x1435   :  { %v1779_v62 = vsel %vm48_vm0, %v1773_v61, %v1777_v5 }
0x1436   :  { %2524 = vmatmul.mubr.msk.f32.vlgmr.msra.gmra.mrb[22].mxu1 %vm426_vm3, %v1779_v62 }
0x1438   :  { %v1895_v6 = vpop.permute.xlu1 %1894 }
0x1439   :  { %2535 = vmatmul.mubr.msk.f32.vlgmr.msra.gmra.mrb[14].mxu0 %vm48_vm0, %v1895_v6 }
0x143a   :  { %2706 = vmatpush3.bf16.msra.mxu0 %v3031_v54  ;;  %2553 = vmatprep.mubr.msk.f32.mxu0 %vm2856_vm1, %v2857_v23  ;;  %v2853_v23 = vld [vmem:[%s3663_s7] ss:$0 sm:$0xff] }
0x143b   :  { %2707 = vmatprep.subr.bf16.mxu0 %v2855_v3  ;;  %v275_v54 = vadd.f32 %v2853_v23, %v3099_v15  ;;  %v524_v23 = vsel %vm305_vm2, %v3155_v47, 0.0 }
0x143e   :  { %2709 = vmatpush3.bf16.msra.mxu0 %v3042_v57 }
0x143f   :  { %2710 = vmatprep.subr.bf16.mxu0 %v2855_v3 }
0x1442   :  { %2712 = vmatpush3.bf16.msra.mxu0 %v3061_v63 }
0x1443   :  { %2713 = vmatprep.subr.bf16.mxu0 %v2855_v3 }
0x1446   :  { %2715 = vmatpush3.bf16.msra.mxu0 %v3074_v2 }
0x1509   :  { %v1849_v17 = vpop.f32.mrb[22].mxu1 }
0x150a   :  { %v1850_v12 = vadd.f32 %v3125_v21, %v1849_v17  ;;  %v2525_v7 = vpop.f32.mrb[23].mxu1 }
0x150c   :  { %2829 = vtanh.f32 %v1850_v12  ;;  %v1964_v57 = vpop.f32.mrb[14].mxu0  ;;  %v2150_v2 = vmul.f32 -1.442695, %v1850_v12 }
0x150d   :  { %v1968_v18 = vadd.f32 %v1964_v57, %v275_v54  ;;  %v2536_v9 = vpop.f32.mrb[15].mxu0  ;;  %v977_v54 = vsel %vm766_vm5, %v3301_v49, 0.0  ;;  %v1427_v57 = vsel %vm1216_vm7, %v3449_v50, 0.0 }
0x150f   :  { %2831 = vtanh.f32 %v1968_v18  ;;  %v2152_v21 = vmul.f32 -1.442695, %v1968_v18 }
0x1510   :  { %2833 = vpow2.f32 %v2150_v2  ;;  %v1202_v2 = vsel %vm991_vm6, %v3375_v46, 0.0 }
0x1511   :  { %2835 = vpow2.f32 %v2152_v21  ;;  %v1652_v21 = vsel %vm1441_vm8, %v3522_v44, 0.0 }
0x1516   :  { %v2830_v63 = vpop.eup %2829 }
0x1517   :  { %1862 = vrot.lane.b32.xlu0 %v2830_v63, %s2859_s26 }
0x1519   :  { %v2832_v3 = vpop.eup %2831 }
0x151a   :  { %1978 = vrot.lane.b32.xlu1 %v2832_v3, %s2859_s26  ;;  %v2834_v22 = vpop.eup %2833  ;;  %v752_v3 = vsel %vm541_vm4, %v3227_v52, 0.0 }
0x151b   :  { %v2836_v19 = vpop.eup %2835  ;;  %v1856_v20 = vadd.f32 1.0, %v2834_v22 }
0x151c   :  { %v1972_v24 = vadd.f32 1.0, %v2836_v19 }
0x151d   :  { %2837 = vrcp.f32 %v1856_v20 }
0x151e   :  { %2839 = vrcp.f32 %v1972_v24 }
0x1527   :  { %v2838_v15 = vpop.eup %2837 }
0x1528   :  { %v2840_v28 = vpop.eup %2839  ;;  %v1860_v33 = vmul.f32 %v2838_v15, %v1659_v34 }
0x1529   :  { %v1976_v14 = vmul.f32 %v2840_v28, %v1770_v13 }
0x1589   :  { %v1863_v25 = vpop.permute.xlu0 %1862 }
0x158a   :  { %v1865_v27 = vmul.f32 %v2838_v15, %v1863_v25 }
0x158c   :  { %1867 = vrot.lane.b32.xlu0 %v1865_v27, %s2860_s27  ;;  %v1979_v30 = vpop.permute.xlu1 %1978 }
0x158d   :  { %v1981_v31 = vmul.f32 %v2840_v28, %v1979_v30 }
0x158f   :  { %1983 = vrot.lane.b32.xlu1 %v1981_v31, %s2860_s27 }
0x1590   :  { %1888 = vperm.xlu0 %2724, %v1885_v32  }
0x15fe   :  { %v1868_v16 = vpop.permute.xlu0 %1867 }
0x15ff   :  { %v1870_v35 = vadd.f32 %v1868_v16, %v1860_v33 }
0x1601   :  { %2841 = vtanh.f32 %v1870_v35  ;;  %v1984_v36 = vpop.permute.xlu1 %1983  ;;  %v1884_v4 = vsel %vm1666_vm9, %v1870_v35, %v1659_v34 }
0x1602   :  { %v1986_v10 = vadd.f32 %v1984_v36, %v1976_v14 }
0x1604   :  { %2843 = vtanh.f32 %v1986_v10 }
0x160b   :  { %v2842_v38 = vpop.eup %2841 }
0x160c   :  { %1873 = vrot.lane.b32.xlu1 %v2842_v38, %s2859_s26 }
0x160e   :  { %v2844_v11 = vpop.eup %2843 }
0x160f   :  { %1989 = vrot.lane.b32.xlu0 %v2844_v11, %s2859_s26  ;;  %v3574_v37 = vpop.permute.xlu0 %1888 }
0x1610   :  { %vm1891_vm10 = vcmp.gt.f32.partialorder %v3574_v37, 0.0 }
0x167e   :  { %v1874_v41 = vpop.permute.xlu1 %1873 }
0x167f   :  { %v1876_v29 = vmul.f32 %v2838_v15, %v1874_v41 }
0x1681   :  { %v1990_v45 = vpop.permute.xlu0 %1989  ;;  %v1883_v42 = vsel %vm1666_vm9, %v1876_v29, %v3528_v48  ;;  %v2854_v48 = vld [vmem:[%s3665_s9] ss:$0 sm:$0xff]  ;;  %v1877_v18 = vsel %vm1666_vm9, %v1876_v29, 0.0 }
0x1682   :  { %v1992_v40 = vmul.f32 %v2840_v28, %v1990_v45  ;;  %1999 = vrot.lane.b32.xlu0 %v1883_v42, %s2859_s26 }
0x1684   :  { %v1993_v39 = vsel %vm1891_vm10, %v1992_v40, 0.0 }
0x1685   :  { %1995 = vrot.lane.b32.xlu1 %v1993_v39, %s2860_s27 }
0x16f4   :  { %v2000_v53 = vpop.permute.xlu0 %1999 }
0x16f7   :  { %v1996_v1 = vpop.permute.xlu1 %1995 }
0x16f8   :  { %v2002_v55 = vsel %vm48_vm0, %v1996_v1, %v2000_v53 }
0x16f9   :  { %2554 = vmatmul.mubr.msk.f32.vlgmr.msra.gmra.mrb[16].mxu0 %vm426_vm3, %v2002_v55 }
0x17cc   :  { %v2072_v56 = vpop.f32.mrb[16].mxu0 }
0x17cd   :  { %v2073_v8 = vadd.f32 %v2854_v48, %v2072_v56  ;;  %v2555_v0 = vpop.f32.mrb[17].mxu0 }
0x17cf   :  { %2845 = vtanh.f32 %v2073_v8  ;;  %v2154_v61 = vmul.f32 -1.442695, %v2073_v8 }
0x17d1   :  { %2847 = vpow2.f32 %v2154_v61 }
0x17d9   :  { %v2846_v5 = vpop.eup %2845 }
0x17da   :  { %2085 = vrot.lane.b32.xlu1 %v2846_v5, %s2859_s26 }
0x17db   :  { %v2848_v62 = vpop.eup %2847 }
0x17dc   :  { %v2079_v6 = vadd.f32 1.0, %v2848_v62 }
0x17de   :  { %2849 = vrcp.f32 %v2079_v6 }
0x17e8   :  { %v2850_v17 = vpop.eup %2849 }
0x17e9   :  { %v2083_v47 = vmul.f32 %v2850_v17, %v1884_v4 }
0x184c   :  { %v2086_v12 = vpop.permute.xlu1 %2085 }
0x184d   :  { %v2088_v7 = vmul.f32 %v2850_v17, %v2086_v12 }
0x184f   :  { %2090 = vrot.lane.b32.xlu0 %v2088_v7, %s2860_s27 }
0x1853   :  { %526 = vrot.lane.b32.xlu0 %v524_v23, %s2860_s27 }
0x1857   :  { %979 = vrot.lane.b32.xlu0 %v977_v54, %s2860_s27 }
0x185b   :  { %1429 = vrot.lane.b32.xlu0 %v1427_v57, %s2860_s27 }
0x185f   :  { %1879 = vrot.lane.b32.xlu0 %v1877_v18, %s2860_s27 }
0x18c1   :  { %v2091_v9 = vpop.permute.xlu0 %2090 }
0x18c2   :  { %v2093_v26 = vadd.f32 %v2091_v9, %v2083_v47 }
0x18c4   :  { %2851 = vtanh.f32 %v2093_v26 }
0x18c5   :  { %v527_v49 = vpop.permute.xlu0 %526 }
0x18c6   :  { %529 = vst.msk [vmem:[%s3666_s10] sm:$0xff] %vm48_vm0, %v527_v49 }
0x18c9   :  { %v980_v60 = vpop.permute.xlu0 %979 }
0x18ca   :  { %982 = vst.msk [vmem:[%s3666_s10 + $0x10] sm:$0xff] %vm48_vm0, %v980_v60 }
0x18cd   :  { %v1430_v50 = vpop.permute.xlu0 %1429 }
0x18ce   :  { %v2852_v63 = vpop.eup %2851  ;;  %1432 = vst.msk [vmem:[%s3666_s10 + $0x20] sm:$0xff] %vm48_vm0, %v1430_v50 }
0x18cf   :  { %2096 = vrot.lane.b32.xlu1 %v2852_v63, %s2859_s26 }
0x18d1   :  { %v1880_v43 = vpop.permute.xlu0 %1879 }
0x18d2   :  { %1882 = vst.msk [vmem:[%s3666_s10 + $0x30] sm:$0xff] %vm48_vm0, %v1880_v43 }
0x18d3   :  { %754 = vrot.lane.b32.xlu1 %v752_v3, %s2860_s27 }
0x18d7   :  { %1204 = vrot.lane.b32.xlu1 %v1202_v2, %s2860_s27 }
0x18db   :  { %1654 = vrot.lane.b32.xlu1 %v1652_v21, %s2860_s27 }
0x1941   :  { %v2097_v22 = vpop.permute.xlu1 %2096 }
0x1942   :  { %v2099_v19 = vmul.f32 %v2850_v17, %v2097_v22 }
0x1944   :  { %v2100_v59 = vsel %vm1891_vm10, %v2099_v19, 0.0 }
0x1945   :  { %2102 = vrot.lane.b32.xlu1 %v2100_v59, %s2860_s27  ;;  %v755_v52 = vpop.permute.xlu1 %754 }
0x1946   :  { %757 = vst.msk [vmem:[%s3666_s10 + $0x8] sm:$0xff] %vm48_vm0, %v755_v52 }
0x1949   :  { %v1205_v58 = vpop.permute.xlu1 %1204 }
0x194a   :  { %1207 = vst.msk [vmem:[%s3666_s10 + $0x18] sm:$0xff] %vm48_vm0, %v1205_v58 }
0x194d   :  { %v1655_v46 = vpop.permute.xlu1 %1654 }
0x194e   :  { %1657 = vst.msk [vmem:[%s3666_s10 + $0x28] sm:$0xff] %vm48_vm0, %v1655_v46 }
0x19b7   :  { %v2103_v51 = vpop.permute.xlu1 %2102 }
0x19b8   :  { %2105 = vst.msk [vmem:[%s3666_s10 + $0x38] sm:$0xff] %vm48_vm0, %v2103_v51 }

// kernel: seq2seq_forward.4
= control target key start
LH: loop header
LB: loop body
LE: loop exit
PB: predicated region body
PF: predicated region fallthrough
CT: control target
= control target key end

     0   :  { %v3892_v3 = vmov 0.0   ;;  %vm54_vm0 = vcmask 261120   ;;  %v2687_v49 = vmov 0   ;;  %v44_v50 = vlaneseq  ;;  %s2689_s21 = smov 32   ;;  %s3885_s2 = inlined_call_operand.vmem [shape: f32[32,256], index: 2, kind: input, shape index: {}]   ;;  %s3886_s3 = inlined_call_operand.vmem [shape: f32[64,256], index: 3, kind: input, shape index: {}]   ;;  %s3887_s0 = inlined_call_operand.vmem [shape: f32[96,32], index: 0, kind: input, shape index: {}]   ;;  %s3888_s4 = inlined_call_operand.vmem [shape: f32[1,256], index: 4, kind: input, shape index: {}]   ;;  %s3889_s1 = inlined_call_operand.vmem [shape: f32[96,1], index: 1, kind: input, shape index: {}]   ;;  %s3890_s5 = inlined_call_operand.vmem [shape: f32[96,64], index: 5, kind: output, shape index: {0}]   ;;  %s3891_s6 = inlined_call_operand.vmem [shape: f32[8,32], index: 6, kind: output, shape index: {1}]  }
   0x1   :  { %v35_v0 = vld [vmem:[%s3885_s2 + $0x8] sm:$0xff]  ;;  %v37_v1 = vld [vmem:[%s3885_s2 + $0x18] sm:$0xff]  ;;  %155 = vmatprep.mubr.f32.mxu0 %v3892_v3  ;;  %336 = vmatprep.mubr.f32.mxu1 %v3892_v3  ;;  %v34_v6 = vld [vmem:[%s3885_s2] sm:$0xff]  ;;  %vm3899_vm3 = vcmask 523520   ;;  %vm268_vm4 = vcmask 523264  }
   0x2   :  { %v253_v2 = vld [vmem:[%s3886_s3 + $0x8] sm:$0xff]  ;;  %v2288_v4 = vpack.c.bf16 %v37_v1, %v35_v0  ;;  %v255_v5 = vld [vmem:[%s3886_s3 + $0x18] sm:$0xff]  ;;  %v36_v7 = vld [vmem:[%s3885_s2 + $0x10] sm:$0xff]  ;;  %2492 = vset.pattern.permute.xlu0 %v2687_v49  ;;  %2493 = vset.pattern.permute.xlu1 %v2687_v49  ;;  %v45_v51 = vshrl.u32 %v44_v50, 7 }
   0x3   :  { %v2745_v8 = vpack.c.bf16 %v255_v5, %v253_v2  ;;  %v2290_v9 = vpack.c.bf16 %v36_v7, %v34_v6  ;;  %v252_v10 = vld [vmem:[%s3886_s3] sm:$0xff]  ;;  %v254_v11 = vld [vmem:[%s3886_s3 + $0x10] sm:$0xff]  ;;  %v39_v12 = vld [vmem:[%s3885_s2 + $0x28] sm:$0xff] }
   0x4   :  { %2289 = vmatprep.subr.bf16.mxu0 %v2288_v4  ;;  %v2756_v13 = vpack.c.bf16 %v254_v11, %v252_v10  ;;  %v41_v14 = vld [vmem:[%s3885_s2 + $0x38] sm:$0xff]  ;;  %v257_v15 = vld [vmem:[%s3886_s3 + $0x28] sm:$0xff]  ;;  %v38_v19 = vld [vmem:[%s3885_s2 + $0x20] sm:$0xff]  ;;  %v50_v52 = vsub.s32 1, %v45_v51  ;;  %v46_v55 = vsub.s32 0, %v45_v51 }
   0x5   :  { %v259_v16 = vld [vmem:[%s3886_s3 + $0x38] sm:$0xff]  ;;  %2297 = vmatprep.subr.bf16.mxu1 %v2745_v8  ;;  %2291 = vmatpush1.bf16.msra.mxu0 %v2290_v9  ;;  %v2292_v17 = vpack.c.bf16 %v41_v14, %v39_v12  ;;  %v40_v20 = vld [vmem:[%s3885_s2 + $0x30] sm:$0xff]  ;;  %v256_v21 = vld [vmem:[%s3886_s3 + $0x20] sm:$0xff] }
   0x6   :  { %v2768_v18 = vpack.c.bf16 %v259_v16, %v257_v15  ;;  %2299 = vmatpush1.bf16.msra.mxu1 %v2756_v13  ;;  %v2294_v22 = vpack.c.bf16 %v40_v20, %v38_v19  ;;  %v258_v23 = vld [vmem:[%s3886_s3 + $0x30] sm:$0xff]  ;;  %v261_v24 = vld [vmem:[%s3886_s3 + $0x48] sm:$0xff]  ;;  %v263_v26 = vld [vmem:[%s3886_s3 + $0x58] sm:$0xff] }
   0x7   :  { %2293 = vmatprep.subr.bf16.mxu0 %v2292_v17  ;;  %v2787_v25 = vpack.c.bf16 %v258_v23, %v256_v21  ;;  %v260_v27 = vld [vmem:[%s3886_s3 + $0x40] sm:$0xff]  ;;  %v262_v28 = vld [vmem:[%s3886_s3 + $0x50] sm:$0xff]  ;;  %v2798_v29 = vpack.c.bf16 %v263_v26, %v261_v24  ;;  %v265_v30 = vld [vmem:[%s3886_s3 + $0x68] sm:$0xff] }
   0x8   :  { %2301 = vmatprep.subr.bf16.mxu1 %v2768_v18  ;;  %v267_v31 = vld [vmem:[%s3886_s3 + $0x78] sm:$0xff]  ;;  %v22_v32 = vld [vmem:[%s3887_s0] sm:$0xff]  ;;  %v2810_v33 = vpack.c.bf16 %v262_v28, %v260_v27  ;;  %v266_v36 = vld [vmem:[%s3886_s3 + $0x70] sm:$0xff] }
   0x9   :  { %2295 = vmatpush1.bf16.msra.mxu0 %v2294_v22  ;;  %v2814_v34 = vpack.c.bf16 %v267_v31, %v265_v30  ;;  %v264_v35 = vld [vmem:[%s3886_s3 + $0x60] sm:$0xff]  ;;  %v23_v37 = vld [vmem:[%s3887_s0 + $0x8] sm:$0xff]  ;;  %v24_v39 = vld [vmem:[%s3887_s0 + $0x10] sm:$0xff] }
   0xa   :  { %2303 = vmatpush1.bf16.msra.mxu1 %v2787_v25  ;;  %2345 = vmatprep.subr.bf16.mxu0 %v2745_v8  ;;  %v2829_v38 = vpack.c.bf16 %v266_v36, %v264_v35  ;;  %v25_v40 = vld [vmem:[%s3887_s0 + $0x18] sm:$0xff]  ;;  %v26_v41 = vld [vmem:[%s3887_s0 + $0x20] sm:$0xff]  ;;  %v27_v42 = vld [vmem:[%s3887_s0 + $0x28] sm:$0xff] }
   0xb   :  { %2305 = vmatprep.subr.bf16.mxu1 %v2798_v29  ;;  %v28_v43 = vld [vmem:[%s3887_s0 + $0x30] sm:$0xff]  ;;  %v29_v44 = vld [vmem:[%s3887_s0 + $0x38] sm:$0xff]  ;;  %v30_v45 = vld [vmem:[%s3887_s0 + $0x40] sm:$0xff] }
   0xc   :  { %2241 = vmatmul.mubr.msk.f32.vlgmr.msra.gmra.mrb[0].mxu0 %vm54_vm0, %v22_v32  ;;  %v31_v46 = vld [vmem:[%s3887_s0 + $0x48] sm:$0xff]  ;;  %v32_v47 = vld [vmem:[%s3887_s0 + $0x50] sm:$0xff]  ;;  %v33_v48 = vld [vmem:[%s3887_s0 + $0x58] sm:$0xff]  ;;  %s2688_s0 = smov 64  }
   0xd   :  { %161 = vmatprep.mubr.f32.mxu0 %v3892_v3  ;;  %2347 = vmatpush1.bf16.msra.mxu0 %v2756_v13  ;;  %v42_v53 = vld [vmem:[%s3888_s4] sm:$0x3] }
   0xe   :  { %2307 = vmatpush1.bf16.msra.mxu1 %v2810_v33  ;;  %2349 = vmatprep.subr.bf16.mxu0 %v2768_v18  ;;  %v51_v54 = vrot.slane %v42_v53, %v50_v52  ;;  %v47_v59 = vrot.slane %v42_v53, %v46_v55 }
   0xf   :  { %2309 = vmatprep.subr.bf16.mxu1 %v2814_v34 }
  0x10   :  { %2242 = vmatmul.mubr.msk.f32.gmra.mrb[2].mxu0 %vm54_vm0, %v23_v37 }
  0x11   :  { %167 = vmatprep.mubr.f32.mxu0 %v3892_v3  ;;  %2351 = vmatpush1.bf16.msra.mxu0 %v2787_v25 }
  0x12   :  { %2311 = vmatpush1.bf16.msra.mxu1 %v2829_v38  ;;  %2353 = vmatprep.subr.bf16.mxu0 %v2798_v29 }
  0x13   :  { %2313 = vmatprep.subr.bf16.mxu1 %v2745_v8 }
  0x14   :  { %2243 = vmatmul.mubr.msk.f32.gmra.mrb[4].mxu0 %vm54_vm0, %v24_v39 }
  0x15   :  { %337 = vmatmul.mubr.f32.vlgmr.msra.gmra.mrb[0].mxu1 %v3892_v3  ;;  %173 = vmatprep.mubr.f32.mxu0 %v3892_v3 }
  0x16   :  { %2315 = vmatpush1.bf16.msra.mxu1 %v2756_v13  ;;  %492 = vmatprep.mubr.f32.mxu1 %v3892_v3 }
  0x17   :  { %2317 = vmatprep.subr.bf16.mxu1 %v2768_v18  ;;  %2355 = vmatpush1.bf16.msra.mxu0 %v2810_v33 }
  0x18   :  { %2244 = vmatmul.mubr.msk.f32.gmra.mrb[6].mxu0 %vm54_vm0, %v25_v40  ;;  %2357 = vmatprep.subr.bf16.mxu0 %v2814_v34 }
  0x19   :  { %179 = vmatprep.mubr.f32.mxu0 %v3892_v3 }
  0x1a   :  { %2319 = vmatpush1.bf16.msra.mxu1 %v2787_v25 }
  0x1b   :  { %2321 = vmatprep.subr.bf16.mxu1 %v2798_v29  ;;  %2359 = vmatpush1.bf16.msra.mxu0 %v2829_v38 }
  0x1c   :  { %2245 = vmatmul.mubr.msk.f32.gmra.mrb[8].mxu0 %vm54_vm0, %v26_v41  ;;  %2377 = vmatprep.subr.bf16.mxu0 %v2745_v8 }
  0x1d   :  { %185 = vmatprep.mubr.f32.mxu0 %v3892_v3 }
  0x1e   :  { %2323 = vmatpush1.bf16.msra.mxu1 %v2810_v33 }
  0x1f   :  { %2325 = vmatprep.subr.bf16.mxu1 %v2814_v34 }
  0x20   :  { %2246 = vmatmul.mubr.msk.f32.gmra.mrb[10].mxu0 %vm54_vm0, %v27_v42 }
  0x21   :  { %191 = vmatprep.mubr.f32.mxu0 %v3892_v3 }
  0x22   :  { %2327 = vmatpush1.bf16.msra.mxu1 %v2829_v38 }
  0x23   :  { %2329 = vmatprep.subr.bf16.mxu1 %v2745_v8 }
  0x24   :  { %2247 = vmatmul.mubr.msk.f32.gmra.mrb[12].mxu0 %vm54_vm0, %v28_v43 }
  0x25   :  { %197 = vmatprep.mubr.f32.mxu0 %v3892_v3 }
  0x28   :  { %2248 = vmatmul.mubr.msk.f32.gmra.mrb[14].mxu0 %vm54_vm0, %v29_v44 }
  0x29   :  { %203 = vmatprep.mubr.f32.mxu0 %v3892_v3 }
  0x2c   :  { %2249 = vmatmul.mubr.msk.f32.gmra.mrb[16].mxu0 %vm54_vm0, %v30_v45 }
  0x2d   :  { %209 = vmatprep.mubr.f32.mxu0 %v3892_v3 }
  0x30   :  { %2250 = vmatmul.mubr.msk.f32.gmra.mrb[18].mxu0 %vm54_vm0, %v31_v46 }
  0x31   :  { %215 = vmatprep.mubr.f32.mxu0 %v3892_v3 }
  0x34   :  { %2251 = vmatmul.mubr.msk.f32.gmra.mrb[20].mxu0 %vm54_vm0, %v32_v47 }
  0x35   :  { %221 = vmatprep.mubr.f32.mxu0 %v3892_v3 }
  0x38   :  { %2252 = vmatmul.mubr.msk.f32.gmra.mrb[22].mxu0 %vm54_vm0, %v33_v48 }
  0x39   :  { %822 = vmatprep.mubr.f32.mxu0 %v3892_v3 }
  0xdf   :  { %v157_v56 = vpop.f32.mrb[0].mxu0 }
  0xe0   :  { %v159_v57 = vpop.f32.mrb[1].mxu0  ;;  %v158_v0 = vadd.f32 %v157_v56, %v47_v59 }
  0xe1   :  { %v2906_v58 = vadd.f32 %v159_v57, %v51_v54  ;;  %v343_v57 = vld [vmem:[%s3889_s1] sm:$0xff] }
  0xe3   :  { %v163_v60 = vpop.f32.mrb[2].mxu0 }
  0xe4   :  { %v2908_v61 = vadd.f32 %v163_v60, %v47_v59  ;;  %v165_v62 = vpop.f32.mrb[3].mxu0 }
  0xe5   :  { %v2910_v63 = vadd.f32 %v165_v62, %v51_v54 }
  0xe7   :  { %v169_v1 = vpop.f32.mrb[4].mxu0 }
  0xe8   :  { %v2912_v2 = vadd.f32 %v169_v1, %v47_v59  ;;  %v338_v4 = vpop.f32.mrb[0].mxu1  ;;  %v171_v5 = vpop.f32.mrb[5].mxu0 }
  0xe9   :  { %v351_v6 = vadd.f32 %v338_v4, %v158_v0  ;;  %v2914_v7 = vadd.f32 %v171_v5, %v51_v54  ;;  %v340_v9 = vpop.f32.mrb[1].mxu1 }
  0xeb   :  { %2494 = vtanh.f32 %v351_v6  ;;  %v175_v10 = vpop.f32.mrb[6].mxu0  ;;  %v2253_v60 = vmul.f32 -1.442695, %v351_v6  ;;  %v383_v6 = vld [vmem:[%s3889_s1 + $0x58] sm:$0xff] }
  0xec   :  { %v2916_v11 = vadd.f32 %v175_v10, %v47_v59  ;;  %v177_v12 = vpop.f32.mrb[7].mxu0 }
  0xed   :  { %v2918_v14 = vadd.f32 %v177_v12, %v51_v54 }
  0xef   :  { %v181_v15 = vpop.f32.mrb[8].mxu0 }
  0xf0   :  { %v2920_v16 = vadd.f32 %v181_v15, %v47_v59  ;;  %v183_v17 = vpop.f32.mrb[9].mxu0 }
  0xf1   :  { %v2922_v19 = vadd.f32 %v183_v17, %v51_v54 }
  0xf3   :  { %v187_v20 = vpop.f32.mrb[10].mxu0 }
  0xf4   :  { %v2924_v21 = vadd.f32 %v187_v20, %v47_v59  ;;  %v189_v22 = vpop.f32.mrb[11].mxu0 }
  0xf5   :  { %v2495_v23 = vpop.eup %2494  ;;  %v2926_v24 = vadd.f32 %v189_v22, %v51_v54 }
  0xf6   :  { %361 = vrot.lane.b32.xlu0 %v2495_v23, %s2688_s0 }
  0xf7   :  { %v193_v26 = vpop.f32.mrb[12].mxu0 }
  0xf8   :  { %v2929_v27 = vadd.f32 %v193_v26, %v47_v59  ;;  %v195_v28 = vpop.f32.mrb[13].mxu0 }
  0xf9   :  { %v2931_v30 = vadd.f32 %v195_v28, %v51_v54 }
  0xfb   :  { %v199_v31 = vpop.f32.mrb[14].mxu0 }
  0xfc   :  { %v2933_v32 = vadd.f32 %v199_v31, %v47_v59  ;;  %v201_v35 = vpop.f32.mrb[15].mxu0 }
  0xfd   :  { %v2935_v36 = vadd.f32 %v201_v35, %v51_v54 }
  0xff   :  { %v205_v37 = vpop.f32.mrb[16].mxu0 }
 0x100   :  { %v2937_v39 = vadd.f32 %v205_v37, %v47_v59  ;;  %v207_v40 = vpop.f32.mrb[17].mxu0 }
 0x101   :  { %v2939_v41 = vadd.f32 %v207_v40, %v51_v54 }
 0x103   :  { %v211_v42 = vpop.f32.mrb[18].mxu0 }
 0x104   :  { %v2941_v43 = vadd.f32 %v211_v42, %v47_v59  ;;  %v213_v44 = vpop.f32.mrb[19].mxu0 }
 0x105   :  { %v2943_v45 = vadd.f32 %v213_v44, %v51_v54 }
 0x107   :  { %v217_v46 = vpop.f32.mrb[20].mxu0 }
 0x108   :  { %v2945_v47 = vadd.f32 %v217_v46, %v47_v59  ;;  %v219_v48 = vpop.f32.mrb[21].mxu0 }
 0x109   :  { %v2947_v49 = vadd.f32 %v219_v48, %v51_v54 }
 0x10b   :  { %v223_v50 = vpop.f32.mrb[22].mxu0 }
 0x10c   :  { %v2949_v51 = vadd.f32 %v223_v50, %v47_v59  ;;  %v225_v52 = vpop.f32.mrb[23].mxu0 }
 0x10d   :  { %v226_v53 = vadd.f32 %v225_v52, %v51_v54 }
 0x10f   :  { %v391_v55 = vadd.f32 %v340_v9, %v226_v53 }
 0x111   :  { %2496 = vtanh.f32 %v391_v55  ;;  %v2254_v54 = vmul.f32 -1.442695, %v391_v55 }
 0x112   :  { %2498 = vpow2.f32 %v2253_v60 }
 0x11b   :  { %v2497_v56 = vpop.eup %2496 }
 0x11c   :  { %401 = vrot.lane.b32.xlu0 %v2497_v56, %s2688_s0  ;;  %v2499_v62 = vpop.eup %2498 }
 0x11d   :  { %v355_v0 = vadd.f32 1.0, %v2499_v62 }
 0x11f   :  { %2500 = vrcp.f32 %v355_v0 }
 0x120   :  { %346 = vperm.xlu0 %2492, %v343_v57   ;;  %2502 = vpow2.f32 %v2254_v54 }
 0x129   :  { %v2501_v1 = vpop.eup %2500 }
 0x12a   :  { %v2503_v5 = vpop.eup %2502  ;;  %v359_v17 = vmul.f32 0.0, %v2501_v1 }
 0x12b   :  { %v395_v9 = vadd.f32 1.0, %v2503_v5 }
 0x12d   :  { %2504 = vrcp.f32 %v395_v9 }
 0x137   :  { %v2505_v10 = vpop.eup %2504 }
 0x138   :  { %v399_v26 = vmul.f32 0.0, %v2505_v10 }
 0x168   :  { %v362_v59 = vpop.permute.xlu0 %361 }
 0x169   :  { %v364_v4 = vmul.f32 %v2501_v1, %v362_v59 }
 0x16b   :  { %366 = vrot.lane.b32.xlu1 %v364_v4, %s2689_s21 }
 0x18e   :  { %v402_v12 = vpop.permute.xlu0 %401 }
 0x18f   :  { %v404_v15 = vmul.f32 %v2505_v10, %v402_v12 }
 0x191   :  { %406 = vrot.lane.b32.xlu1 %v404_v15, %s2689_s21 }
 0x195   :  { %386 = vperm.xlu1 %2493, %v383_v6  }
 0x19f   :  { %v347_v40 = vpop.permute.xlu0 %346 }
 0x1a0   :  { %vm349_vm1 = vcmp.gt.f32.partialorder %v347_v40, 0.0 }
 0x1dd   :  { %v367_v20 = vpop.permute.xlu1 %366 }
 0x1de   :  { %v2960_v22 = vadd.f32 %v367_v20, %v359_v17 }
 0x1e0   :  { %2506 = vtanh.f32 %v2960_v22 }
 0x1ea   :  { %v2507_v23 = vpop.eup %2506 }
 0x1eb   :  { %372 = vrot.lane.b32.xlu1 %v2507_v23, %s2688_s0  ;;  %v499_v23 = vld [vmem:[%s3889_s1 + $0x8] sm:$0xff] }
 0x203   :  { %v407_v28 = vpop.permute.xlu1 %406 }
 0x204   :  { %v2964_v31 = vadd.f32 %v407_v28, %v399_v26  ;;  %v540_v26 = vld [vmem:[%s3889_s1 + $0x50] sm:$0xff]  ;;  %v3015_v28 = vsel %vm349_vm1, %v2960_v22, 0.0 }
 0x206   :  { %2508 = vtanh.f32 %v2964_v31 }
 0x210   :  { %v2509_v35 = vpop.eup %2508 }
 0x211   :  { %412 = vrot.lane.b32.xlu0 %v2509_v35, %s2688_s0 }
 0x214   :  { %v2968_v37 = vpop.permute.xlu1 %386 }
 0x215   :  { %vm389_vm2 = vcmp.gt.f32.partialorder %v2968_v37, 0.0 }
 0x216   :  { %v3020_v35 = vsel %vm389_vm2, %v2964_v31, 0.0 }
 0x25d   :  { %v373_v42 = vpop.permute.xlu1 %372 }
 0x25e   :  { %v375_v44 = vmul.f32 %v2501_v1, %v373_v42 }
 0x260   :  { %v2971_v46 = vsel %vm349_vm1, %v375_v44, 0.0 }
 0x261   :  { %378 = vrot.lane.b32.xlu1 %v2971_v46, %s2689_s21 }
 0x283   :  { %v413_v48 = vpop.permute.xlu0 %412 }
 0x284   :  { %v415_v50 = vmul.f32 %v2505_v10, %v413_v48 }
 0x286   :  { %v2978_v52 = vsel %vm389_vm2, %v415_v50, 0.0 }
 0x287   :  { %418 = vrot.lane.b32.xlu0 %v2978_v52, %s2688_s0 }
 0x2d3   :  { %v379_v53 = vpop.permute.xlu1 %378 }
 0x2d4   :  { %381 = vst.msk [vmem:[%s3890_s5] sm:$0xff] %vm54_vm0, %v379_v53 }
 0x2f9   :  { %v419_v55 = vpop.permute.xlu0 %418 }
 0x2fa   :  { %422 = vst.msk [vmem:[%s3890_s5 + $0x58] sm:$0xff] %vm3899_vm3, %v419_v55  ;;  %v424_v56 = vsel %vm54_vm0, %v379_v53, %v419_v55 }
 0x2fb   :  { %2255 = vmatmul.mubr.msk.f32.vlgmr.msra.gmra.mrb[2].mxu1 %vm268_vm4, %v424_v56 }
 0x2fc   :  { %2331 = vmatpush1.bf16.msra.mxu1 %v2756_v13  ;;  %657 = vmatprep.mubr.f32.mxu1 %v3892_v3 }
 0x2fd   :  { %2333 = vmatprep.subr.bf16.mxu1 %v2768_v18 }
 0x300   :  { %2335 = vmatpush1.bf16.msra.mxu1 %v2787_v25 }
 0x301   :  { %2337 = vmatprep.subr.bf16.mxu1 %v2798_v29 }
 0x304   :  { %2339 = vmatpush1.bf16.msra.mxu1 %v2810_v33 }
 0x305   :  { %2341 = vmatprep.subr.bf16.mxu1 %v2814_v34 }
 0x308   :  { %2343 = vmatpush1.bf16.msra.mxu1 %v2829_v38 }
 0x309   :  { %2361 = vmatprep.subr.bf16.mxu1 %v2745_v8 }
 0x3ce   :  { %v494_v57 = vpop.f32.mrb[2].mxu1 }
 0x3cf   :  { %v507_v60 = vadd.f32 %v494_v57, %v2908_v61  ;;  %v496_v62 = vpop.f32.mrb[3].mxu1 }
 0x3d0   :  { %v548_v0 = vadd.f32 %v496_v62, %v2947_v49 }
 0x3d1   :  { %2510 = vtanh.f32 %v507_v60  ;;  %v2256_v4 = vmul.f32 -1.442695, %v507_v60 }
 0x3d2   :  { %2512 = vtanh.f32 %v548_v0  ;;  %v2257_v54 = vmul.f32 -1.442695, %v548_v0 }
 0x3d3   :  { %2514 = vpow2.f32 %v2256_v4 }
 0x3d4   :  { %2516 = vpow2.f32 %v2257_v54 }
 0x3db   :  { %v2511_v1 = vpop.eup %2510 }
 0x3dc   :  { %v2513_v59 = vpop.eup %2512  ;;  %517 = vrot.lane.b32.xlu1 %v2511_v1, %s2688_s0 }
 0x3dd   :  { %558 = vrot.lane.b32.xlu0 %v2513_v59, %s2688_s0  ;;  %v2515_v5 = vpop.eup %2514 }
 0x3de   :  { %v2517_v9 = vpop.eup %2516  ;;  %v511_v10 = vadd.f32 1.0, %v2515_v5 }
 0x3df   :  { %v552_v12 = vadd.f32 1.0, %v2517_v9 }
 0x3e0   :  { %2518 = vrcp.f32 %v511_v10 }
 0x3e1   :  { %2520 = vrcp.f32 %v552_v12 }
 0x3ea   :  { %v2519_v61 = vpop.eup %2518 }
 0x3eb   :  { %v2521_v15 = vpop.eup %2520  ;;  %v515_v42 = vmul.f32 %v2519_v61, %v3015_v28 }
 0x3ec   :  { %v556_v48 = vmul.f32 %v2521_v15, %v3020_v35 }
 0x44e   :  { %v518_v49 = vpop.permute.xlu1 %517 }
 0x44f   :  { %v520_v6 = vmul.f32 %v2519_v61, %v518_v49  ;;  %v559_v17 = vpop.permute.xlu0 %558 }
 0x450   :  { %v561_v20 = vmul.f32 %v2521_v15, %v559_v17 }
 0x451   :  { %522 = vrot.lane.b32.xlu1 %v520_v6, %s2689_s21 }
 0x452   :  { %563 = vrot.lane.b32.xlu0 %v561_v20, %s2689_s21 }
 0x455   :  { %502 = vperm.xlu1 %2493, %v499_v23  }
 0x456   :  { %543 = vperm.xlu0 %2492, %v540_v26  }
 0x4c3   :  { %v523_v44 = vpop.permute.xlu1 %522 }
 0x4c4   :  { %v3024_v50 = vadd.f32 %v523_v44, %v515_v42  ;;  %v564_v53 = vpop.permute.xlu0 %563 }
 0x4c5   :  { %v3026_v55 = vadd.f32 %v564_v53, %v556_v48  ;;  %v3078_v48 = vld [vmem:[%s3889_s1 + $0x10] sm:$0xff]  ;;  %v3083_v53 = vld [vmem:[%s3889_s1 + $0x48] sm:$0xff] }
 0x4c6   :  { %2522 = vtanh.f32 %v3024_v50 }
 0x4c7   :  { %2524 = vtanh.f32 %v3026_v55 }
 0x4d0   :  { %v2523_v22 = vpop.eup %2522 }
 0x4d1   :  { %v2525_v40 = vpop.eup %2524  ;;  %528 = vrot.lane.b32.xlu1 %v2523_v22, %s2688_s0 }
 0x4d2   :  { %569 = vrot.lane.b32.xlu0 %v2525_v40, %s2688_s0 }
 0x4d4   :  { %v3032_v31 = vpop.permute.xlu1 %502 }
 0x4d5   :  { %v3034_v37 = vpop.permute.xlu0 %543  ;;  %vm505_vm5 = vcmp.gt.f32.partialorder %v3032_v31, 0.0 }
 0x4d6   :  { %vm546_vm6 = vcmp.gt.f32.partialorder %v3034_v37, 0.0  ;;  %v3091_v22 = vsel %vm505_vm5, %v3024_v50, %v3015_v28 }
 0x4d7   :  { %v3097_v40 = vsel %vm546_vm6, %v3026_v55, %v3020_v35 }
 0x543   :  { %v529_v56 = vpop.permute.xlu1 %528 }
 0x544   :  { %v3036_v57 = vmul.f32 %v2519_v61, %v529_v56  ;;  %v570_v60 = vpop.permute.xlu0 %569 }
 0x545   :  { %v3039_v62 = vmul.f32 %v2521_v15, %v570_v60 }
 0x546   :  { %v3046_v0 = vsel %vm505_vm5, %v3036_v57, %v2971_v46 }
 0x547   :  { %582 = vrot.lane.b32.xlu1 %v3046_v0, %s2689_s21  ;;  %v3054_v1 = vsel %vm546_vm6, %v3039_v62, %v2978_v52 }
 0x548   :  { %586 = vrot.lane.b32.xlu0 %v3054_v1, %s2688_s0 }
 0x5b9   :  { %v583_v59 = vpop.permute.xlu1 %582 }
 0x5ba   :  { %v587_v4 = vpop.permute.xlu0 %586 }
 0x5bb   :  { %v589_v54 = vsel %vm54_vm0, %v583_v59, %v587_v4 }
 0x5bc   :  { %2258 = vmatmul.mubr.msk.f32.vlgmr.msra.gmra.mrb[4].mxu1 %vm268_vm4, %v589_v54 }
 0x5bd   :  { %2363 = vmatpush1.bf16.msra.mxu1 %v2756_v13  ;;  %987 = vmatprep.mubr.f32.mxu1 %v3892_v3 }
 0x5be   :  { %2365 = vmatprep.subr.bf16.mxu1 %v2768_v18 }
 0x5c1   :  { %2367 = vmatpush1.bf16.msra.mxu1 %v2787_v25 }
 0x5c2   :  { %2369 = vmatprep.subr.bf16.mxu1 %v2798_v29 }
 0x5c5   :  { %2371 = vmatpush1.bf16.msra.mxu1 %v2810_v33 }
 0x5c6   :  { %2373 = vmatprep.subr.bf16.mxu1 %v2814_v34 }
 0x5c9   :  { %2375 = vmatpush1.bf16.msra.mxu1 %v2829_v38 }
 0x5ca   :  { %2393 = vmatprep.subr.bf16.mxu1 %v2745_v8 }
 0x68f   :  { %v659_v46 = vpop.f32.mrb[4].mxu1 }
 0x690   :  { %v672_v52 = vadd.f32 %v659_v46, %v2912_v2  ;;  %v661_v5 = vpop.f32.mrb[5].mxu1 }
 0x691   :  { %v713_v9 = vadd.f32 %v661_v5, %v2943_v45 }
 0x692   :  { %2526 = vtanh.f32 %v672_v52  ;;  %v2259_v61 = vmul.f32 -1.442695, %v672_v52 }
 0x693   :  { %2528 = vtanh.f32 %v713_v9  ;;  %v2260_v49 = vmul.f32 -1.442695, %v713_v9 }
 0x694   :  { %2530 = vpow2.f32 %v2259_v61 }
 0x695   :  { %2532 = vpow2.f32 %v2260_v49 }
 0x69c   :  { %v2527_v10 = vpop.eup %2526 }
 0x69d   :  { %v2529_v12 = vpop.eup %2528  ;;  %682 = vrot.lane.b32.xlu1 %v2527_v10, %s2688_s0 }
 0x69e   :  { %723 = vrot.lane.b32.xlu0 %v2529_v12, %s2688_s0  ;;  %v2531_v15 = vpop.eup %2530 }
 0x69f   :  { %v2533_v6 = vpop.eup %2532  ;;  %v676_v17 = vadd.f32 1.0, %v2531_v15 }
 0x6a0   :  { %v717_v20 = vadd.f32 1.0, %v2533_v6 }
 0x6a1   :  { %2534 = vrcp.f32 %v676_v17 }
 0x6a2   :  { %2536 = vrcp.f32 %v717_v20 }
 0x6ab   :  { %v2535_v2 = vpop.eup %2534 }
 0x6ac   :  { %v2537_v23 = vpop.eup %2536  ;;  %v680_v56 = vmul.f32 %v2535_v2, %v3091_v22 }
 0x6ad   :  { %v721_v59 = vmul.f32 %v2537_v23, %v3097_v40 }
 0x70f   :  { %v683_v45 = vpop.permute.xlu1 %682 }
 0x710   :  { %v685_v26 = vmul.f32 %v2535_v2, %v683_v45  ;;  %v724_v42 = vpop.permute.xlu0 %723 }
 0x711   :  { %v726_v44 = vmul.f32 %v2537_v23, %v724_v42 }
 0x712   :  { %687 = vrot.lane.b32.xlu1 %v685_v26, %s2689_s21 }
 0x713   :  { %728 = vrot.lane.b32.xlu0 %v726_v44, %s2689_s21 }
 0x716   :  { %667 = vperm.xlu1 %2493, %v3078_v48  }
 0x717   :  { %708 = vperm.xlu0 %2492, %v3083_v53  }
 0x784   :  { %v688_v60 = vpop.permute.xlu1 %687 }
 0x785   :  { %v3101_v4 = vadd.f32 %v688_v60, %v680_v56  ;;  %v729_v54 = vpop.permute.xlu0 %728 }
 0x786   :  { %v3103_v46 = vadd.f32 %v729_v54, %v721_v59 }
 0x787   :  { %2538 = vtanh.f32 %v3101_v4 }
 0x788   :  { %2540 = vtanh.f32 %v3103_v46 }
 0x791   :  { %v2539_v28 = vpop.eup %2538 }
 0x792   :  { %v2541_v50 = vpop.eup %2540  ;;  %693 = vrot.lane.b32.xlu1 %v2539_v28, %s2688_s0 }
 0x793   :  { %734 = vrot.lane.b32.xlu0 %v2541_v50, %s2688_s0 }
 0x795   :  { %v3109_v35 = vpop.permute.xlu1 %667 }
 0x796   :  { %v3111_v55 = vpop.permute.xlu0 %708  ;;  %vm670_vm7 = vcmp.gt.f32.partialorder %v3109_v35, 0.0 }
 0x797   :  { %vm711_vm8 = vcmp.gt.f32.partialorder %v3111_v55, 0.0 }
 0x804   :  { %v694_v52 = vpop.permute.xlu1 %693 }
 0x805   :  { %v3113_v5 = vmul.f32 %v2535_v2, %v694_v52  ;;  %v735_v9 = vpop.permute.xlu0 %734  ;;  %v3155_v52 = vld [vmem:[%s3889_s1 + $0x18] sm:$0xff] }
 0x806   :  { %v3116_v10 = vmul.f32 %v2537_v23, %v735_v9  ;;  %v3160_v9 = vld [vmem:[%s3889_s1 + $0x40] sm:$0xff] }
 0x807   :  { %v3123_v12 = vsel %vm670_vm7, %v3113_v5, %v3046_v0 }
 0x808   :  { %747 = vrot.lane.b32.xlu1 %v3123_v12, %s2689_s21  ;;  %v3131_v61 = vsel %vm711_vm8, %v3116_v10, %v3054_v1 }
 0x809   :  { %751 = vrot.lane.b32.xlu0 %v3131_v61, %s2688_s0 }
 0x87a   :  { %v748_v49 = vpop.permute.xlu1 %747 }
 0x87b   :  { %v752_v15 = vpop.permute.xlu0 %751 }
 0x87c   :  { %v754_v6 = vsel %vm54_vm0, %v748_v49, %v752_v15  ;;  %v3168_v49 = vsel %vm670_vm7, %v3101_v4, %v3091_v22  ;;  %v3174_v15 = vsel %vm711_vm8, %v3103_v46, %v3097_v40 }
 0x87d   :  { %2261 = vmatmul.mubr.msk.f32.vlgmr.msra.gmra.mrb[24].mxu0 %vm268_vm4, %v754_v6 }
 0x87e   :  { %2379 = vmatpush1.bf16.msra.mxu0 %v2756_v13  ;;  %1152 = vmatprep.mubr.f32.mxu0 %v3892_v3 }
 0x87f   :  { %2381 = vmatprep.subr.bf16.mxu0 %v2768_v18 }
 0x882   :  { %2383 = vmatpush1.bf16.msra.mxu0 %v2787_v25 }
 0x883   :  { %2385 = vmatprep.subr.bf16.mxu0 %v2798_v29 }
 0x886   :  { %2387 = vmatpush1.bf16.msra.mxu0 %v2810_v33 }
 0x887   :  { %2389 = vmatprep.subr.bf16.mxu0 %v2814_v34 }
 0x88a   :  { %2391 = vmatpush1.bf16.msra.mxu0 %v2829_v38 }
 0x88b   :  { %2409 = vmatprep.subr.bf16.mxu0 %v2745_v8 }
 0x950   :  { %v824_v0 = vpop.f32.mrb[24].mxu0 }
 0x951   :  { %v837_v1 = vadd.f32 %v824_v0, %v2916_v11  ;;  %v826_v17 = vpop.f32.mrb[25].mxu0 }
 0x952   :  { %v878_v20 = vadd.f32 %v826_v17, %v2939_v41 }
 0x953   :  { %2542 = vtanh.f32 %v837_v1  ;;  %v2262_v23 = vmul.f32 -1.442695, %v837_v1 }
 0x954   :  { %2544 = vtanh.f32 %v878_v20  ;;  %v2263_v26 = vmul.f32 -1.442695, %v878_v20 }
 0x955   :  { %2546 = vpow2.f32 %v2262_v23 }
 0x956   :  { %2548 = vpow2.f32 %v2263_v26 }
 0x95d   :  { %v2543_v2 = vpop.eup %2542 }
 0x95e   :  { %v2545_v45 = vpop.eup %2544  ;;  %847 = vrot.lane.b32.xlu1 %v2543_v2, %s2688_s0 }
 0x95f   :  { %888 = vrot.lane.b32.xlu0 %v2545_v45, %s2688_s0  ;;  %v2547_v42 = vpop.eup %2546 }
 0x960   :  { %v2549_v44 = vpop.eup %2548  ;;  %v841_v56 = vadd.f32 1.0, %v2547_v42 }
 0x961   :  { %v882_v60 = vadd.f32 1.0, %v2549_v44 }
 0x962   :  { %2550 = vrcp.f32 %v841_v56 }
 0x963   :  { %2552 = vrcp.f32 %v882_v60 }
 0x96c   :  { %v2551_v11 = vpop.eup %2550 }
 0x96d   :  { %v2553_v59 = vpop.eup %2552  ;;  %v845_v6 = vmul.f32 %v2551_v11, %v3168_v49 }
 0x96e   :  { %v886_v1 = vmul.f32 %v2553_v59, %v3174_v15 }
 0x9d0   :  { %v848_v41 = vpop.permute.xlu1 %847 }
 0x9d1   :  { %v850_v54 = vmul.f32 %v2551_v11, %v848_v41  ;;  %v889_v28 = vpop.permute.xlu0 %888 }
 0x9d2   :  { %v891_v50 = vmul.f32 %v2553_v59, %v889_v28 }
 0x9d3   :  { %852 = vrot.lane.b32.xlu1 %v850_v54, %s2689_s21 }
 0x9d4   :  { %893 = vrot.lane.b32.xlu0 %v891_v50, %s2689_s21 }
 0x9d7   :  { %832 = vperm.xlu1 %2493, %v3155_v52  }
 0x9d8   :  { %873 = vperm.xlu0 %2492, %v3160_v9  }
 0xa45   :  { %v853_v0 = vpop.permute.xlu1 %852 }
 0xa46   :  { %v3178_v17 = vadd.f32 %v853_v0, %v845_v6  ;;  %v894_v20 = vpop.permute.xlu0 %893 }
 0xa47   :  { %v3180_v2 = vadd.f32 %v894_v20, %v886_v1 }
 0xa48   :  { %2554 = vtanh.f32 %v3178_v17 }
 0xa49   :  { %2556 = vtanh.f32 %v3180_v2 }
 0xa52   :  { %v2555_v22 = vpop.eup %2554 }
 0xa53   :  { %v2557_v4 = vpop.eup %2556  ;;  %858 = vrot.lane.b32.xlu1 %v2555_v22, %s2688_s0 }
 0xa54   :  { %899 = vrot.lane.b32.xlu0 %v2557_v4, %s2688_s0 }
 0xa56   :  { %v3186_v40 = vpop.permute.xlu1 %832 }
 0xa57   :  { %v3188_v46 = vpop.permute.xlu0 %873  ;;  %vm835_vm9 = vcmp.gt.f32.partialorder %v3186_v40, 0.0 }
 0xa58   :  { %vm876_vm10 = vcmp.gt.f32.partialorder %v3188_v46, 0.0 }
 0xac5   :  { %v859_v45 = vpop.permute.xlu1 %858 }
 0xac6   :  { %v3190_v23 = vmul.f32 %v2551_v11, %v859_v45  ;;  %v900_v26 = vpop.permute.xlu0 %899 }
 0xac7   :  { %v3193_v42 = vmul.f32 %v2553_v59, %v900_v26 }
 0xac8   :  { %v3200_v44 = vsel %vm835_vm9, %v3190_v23, %v3123_v12  ;;  %v862_v31 = vsel %vm835_vm9, %v3190_v23, 0.0 }
 0xac9   :  { %912 = vrot.lane.b32.xlu1 %v3200_v44, %s2689_s21  ;;  %v3208_v56 = vsel %vm876_vm10, %v3193_v42, %v3131_v61  ;;  %v903_v37 = vsel %vm876_vm10, %v3193_v42, 0.0 }
 0xaca   :  { %916 = vrot.lane.b32.xlu0 %v3208_v56, %s2688_s0 }
 0xb3b   :  { %v913_v60 = vpop.permute.xlu1 %912 }
 0xb3c   :  { %v917_v11 = vpop.permute.xlu0 %916 }
 0xb3d   :  { %v919_v41 = vsel %vm54_vm0, %v913_v60, %v917_v11 }
 0xb3e   :  { %2264 = vmatmul.mubr.msk.f32.vlgmr.msra.gmra.mrb[6].mxu1 %vm268_vm4, %v919_v41  ;;  %v3232_v41 = vld [vmem:[%s3889_s1 + $0x20] sm:$0xff] }
 0xb3f   :  { %2395 = vmatpush1.bf16.msra.mxu1 %v2756_v13  ;;  %1317 = vmatprep.mubr.f32.mxu1 %v3892_v3 }
 0xb40   :  { %2397 = vmatprep.subr.bf16.mxu1 %v2768_v18 }
 0xb43   :  { %2399 = vmatpush1.bf16.msra.mxu1 %v2787_v25 }
 0xb44   :  { %2401 = vmatprep.subr.bf16.mxu1 %v2798_v29 }
 0xb47   :  { %2403 = vmatpush1.bf16.msra.mxu1 %v2810_v33 }
 0xb48   :  { %2405 = vmatprep.subr.bf16.mxu1 %v2814_v34 }
 0xb4b   :  { %2407 = vmatpush1.bf16.msra.mxu1 %v2829_v38 }
 0xb4c   :  { %2425 = vmatprep.subr.bf16.mxu1 %v2745_v8 }
 0xc11   :  { %v989_v12 = vpop.f32.mrb[6].mxu1 }
 0xc12   :  { %v1002_v61 = vadd.f32 %v989_v12, %v2920_v16  ;;  %v991_v59 = vpop.f32.mrb[7].mxu1  ;;  %v3237_v12 = vld [vmem:[%s3889_s1 + $0x38] sm:$0xff] }
 0xc13   :  { %v1043_v54 = vadd.f32 %v991_v59, %v2935_v36 }
 0xc14   :  { %2558 = vtanh.f32 %v1002_v61  ;;  %v2265_v6 = vmul.f32 -1.442695, %v1002_v61  ;;  %v3245_v61 = vsel %vm835_vm9, %v3178_v17, %v3168_v49 }
 0xc15   :  { %2560 = vtanh.f32 %v1043_v54  ;;  %v2266_v0 = vmul.f32 -1.442695, %v1043_v54  ;;  %v3252_v54 = vsel %vm876_vm10, %v3180_v2, %v3174_v15 }
 0xc16   :  { %2562 = vpow2.f32 %v2265_v6 }
 0xc17   :  { %2564 = vpow2.f32 %v2266_v0 }
 0xc1e   :  { %v2559_v28 = vpop.eup %2558 }
 0xc1f   :  { %v2561_v50 = vpop.eup %2560  ;;  %1012 = vrot.lane.b32.xlu1 %v2559_v28, %s2688_s0 }
 0xc20   :  { %1053 = vrot.lane.b32.xlu0 %v2561_v50, %s2688_s0  ;;  %v2563_v1 = vpop.eup %2562 }
 0xc21   :  { %v2565_v20 = vpop.eup %2564  ;;  %v1006_v22 = vadd.f32 1.0, %v2563_v1 }
 0xc22   :  { %v1047_v4 = vadd.f32 1.0, %v2565_v20 }
 0xc23   :  { %2566 = vrcp.f32 %v1006_v22 }
 0xc24   :  { %2568 = vrcp.f32 %v1047_v4 }
 0xc2d   :  { %v2567_v16 = vpop.eup %2566 }
 0xc2e   :  { %v2569_v45 = vpop.eup %2568  ;;  %v1010_v59 = vmul.f32 %v2567_v16, %v3245_v61 }
 0xc2f   :  { %v1051_v50 = vmul.f32 %v2569_v45, %v3252_v54 }
 0xc91   :  { %v1013_v36 = vpop.permute.xlu1 %1012 }
 0xc92   :  { %v1015_v26 = vmul.f32 %v2567_v16, %v1013_v36  ;;  %v1054_v60 = vpop.permute.xlu0 %1053 }
 0xc93   :  { %v1056_v11 = vmul.f32 %v2569_v45, %v1054_v60 }
 0xc94   :  { %1017 = vrot.lane.b32.xlu1 %v1015_v26, %s2689_s21 }
 0xc95   :  { %1058 = vrot.lane.b32.xlu0 %v1056_v11, %s2689_s21 }
 0xc98   :  { %997 = vperm.xlu1 %2493, %v3232_v41  }
 0xc99   :  { %1038 = vperm.xlu0 %2492, %v3237_v12  }
 0xd06   :  { %v1018_v28 = vpop.permute.xlu1 %1017 }
 0xd07   :  { %v3255_v6 = vadd.f32 %v1018_v28, %v1010_v59  ;;  %v1059_v0 = vpop.permute.xlu0 %1058 }
 0xd08   :  { %v3257_v1 = vadd.f32 %v1059_v0, %v1051_v50 }
 0xd09   :  { %2570 = vtanh.f32 %v3255_v6 }
 0xd0a   :  { %2572 = vtanh.f32 %v3257_v1 }
 0xd13   :  { %v2571_v49 = vpop.eup %2570 }
 0xd14   :  { %v2573_v17 = vpop.eup %2572  ;;  %1023 = vrot.lane.b32.xlu1 %v2571_v49, %s2688_s0 }
 0xd15   :  { %1064 = vrot.lane.b32.xlu0 %v2573_v17, %s2688_s0 }
 0xd17   :  { %v3263_v15 = vpop.permute.xlu1 %997 }
 0xd18   :  { %3906 = vst [vmem:[#allocation3_spill] sm:$0xff] %v3263_v15  ;;  %v3265_v2 = vpop.permute.xlu0 %1038  ;;  %vm1000_vm11 = vcmp.gt.f32.partialorder %v3263_v15, 0.0 }
 0xd19   :  { %3907 = vst [vmem:[#allocation4_spill] sm:$0xff] %v3265_v2  ;;  %vm1041_vm12 = vcmp.gt.f32.partialorder %v3265_v2, 0.0 }
 0xd86   :  { %v1024_v20 = vpop.permute.xlu1 %1023 }
 0xd87   :  { %v3267_v22 = vmul.f32 %v2567_v16, %v1024_v20  ;;  %v1065_v4 = vpop.permute.xlu0 %1064 }
 0xd88   :  { %v3270_v36 = vmul.f32 %v2569_v45, %v1065_v4 }
 0xd89   :  { %v3277_v26 = vsel %vm1000_vm11, %v3267_v22, %v3200_v44 }
 0xd8a   :  { %3908 = vst [vmem:[#allocation5_spill] sm:$0xff] %v3270_v36  ;;  %1077 = vrot.lane.b32.xlu1 %v3277_v26, %s2689_s21  ;;  %v3285_v16 = vsel %vm1041_vm12, %v3270_v36, %v3208_v56 }
 0xd8b   :  { %1081 = vrot.lane.b32.xlu0 %v3285_v16, %s2688_s0 }
 0xd91   :  { %v3913_v35 = vld [vmem:[#allocation5_spill] sm:$0xff] }
 0xdfc   :  { %v1078_v45 = vpop.permute.xlu1 %1077 }
 0xdfd   :  { %v1082_v60 = vpop.permute.xlu0 %1081 }
 0xdfe   :  { %v1084_v11 = vsel %vm54_vm0, %v1078_v45, %v1082_v60 }
 0xdff   :  { %2267 = vmatmul.mubr.msk.f32.vlgmr.msra.gmra.mrb[26].mxu0 %vm268_vm4, %v1084_v11 }
 0xe00   :  { %2411 = vmatpush1.bf16.msra.mxu0 %v2756_v13  ;;  %1482 = vmatprep.mubr.f32.mxu0 %v3892_v3 }
 0xe01   :  { %2413 = vmatprep.subr.bf16.mxu0 %v2768_v18 }
 0xe04   :  { %2415 = vmatpush1.bf16.msra.mxu0 %v2787_v25 }
 0xe05   :  { %2417 = vmatprep.subr.bf16.mxu0 %v2798_v29 }
 0xe08   :  { %2419 = vmatpush1.bf16.msra.mxu0 %v2810_v33 }
 0xe09   :  { %2421 = vmatprep.subr.bf16.mxu0 %v2814_v34 }
 0xe0c   :  { %2423 = vmatpush1.bf16.msra.mxu0 %v2829_v38 }
 0xe0d   :  { %2441 = vmatprep.subr.bf16.mxu0 %v2745_v8 }
 0xed2   :  { %v1154_v44 = vpop.f32.mrb[26].mxu0 }
 0xed3   :  { %v1167_v56 = vadd.f32 %v1154_v44, %v2924_v21  ;;  %v1156_v59 = vpop.f32.mrb[27].mxu0 }
 0xed4   :  { %v1208_v28 = vadd.f32 %v1156_v59, %v2931_v30 }
 0xed5   :  { %2574 = vtanh.f32 %v1167_v56  ;;  %v2268_v49 = vmul.f32 -1.442695, %v1167_v56  ;;  %v3309_v56 = vld [vmem:[%s3889_s1 + $0x28] sm:$0xff] }
 0xed6   :  { %2576 = vtanh.f32 %v1208_v28  ;;  %v2269_v17 = vmul.f32 -1.442695, %v1208_v28  ;;  %v3314_v28 = vld [vmem:[%s3889_s1 + $0x30] sm:$0xff] }
 0xed7   :  { %2578 = vpow2.f32 %v2268_v49 }
 0xed8   :  { %2580 = vpow2.f32 %v2269_v17 }
 0xedf   :  { %v2575_v50 = vpop.eup %2574 }
 0xee0   :  { %v2577_v0 = vpop.eup %2576  ;;  %1177 = vrot.lane.b32.xlu1 %v2575_v50, %s2688_s0  ;;  %v3322_v50 = vsel %vm1000_vm11, %v3255_v6, %v3245_v61 }
 0xee1   :  { %1218 = vrot.lane.b32.xlu0 %v2577_v0, %s2688_s0  ;;  %v2579_v20 = vpop.eup %2578 }
 0xee2   :  { %v2581_v4 = vpop.eup %2580  ;;  %v1171_v45 = vadd.f32 1.0, %v2579_v20 }
 0xee3   :  { %v1212_v60 = vadd.f32 1.0, %v2581_v4 }
 0xee4   :  { %2582 = vrcp.f32 %v1171_v45 }
 0xee5   :  { %2584 = vrcp.f32 %v1212_v60 }
 0xeee   :  { %v2583_v21 = vpop.eup %2582 }
 0xeef   :  { %v2585_v11 = vpop.eup %2584  ;;  %v1175_v0 = vmul.f32 %v2583_v21, %v3322_v50 }
 0xf52   :  { %v1178_v30 = vpop.permute.xlu1 %1177 }
 0xf53   :  { %v1180_v44 = vmul.f32 %v2583_v21, %v1178_v30  ;;  %v1219_v59 = vpop.permute.xlu0 %1218 }
 0xf54   :  { %v1221_v3 = vmul.f32 %v2585_v11, %v1219_v59 }
 0xf55   :  { %1182 = vrot.lane.b32.xlu1 %v1180_v44, %s2689_s21 }
 0xf56   :  { %1223 = vrot.lane.b32.xlu0 %v1221_v3, %s2689_s21  ;;  %v3328_v3 = vsel %vm1041_vm12, %v3257_v1, %v3252_v54 }
 0xf57   :  { %v1216_v17 = vmul.f32 %v2585_v11, %v3328_v3 }
 0xf59   :  { %1162 = vperm.xlu1 %2493, %v3309_v56  }
 0xf5a   :  { %1203 = vperm.xlu0 %2492, %v3314_v28  }
 0xfc7   :  { %v1183_v49 = vpop.permute.xlu1 %1182 }
 0xfc8   :  { %v3332_v20 = vadd.f32 %v1183_v49, %v1175_v0  ;;  %v1224_v4 = vpop.permute.xlu0 %1223 }
 0xfc9   :  { %v3334_v45 = vadd.f32 %v1224_v4, %v1216_v17 }
 0xfca   :  { %2586 = vtanh.f32 %v3332_v20 }
 0xfcb   :  { %2588 = vtanh.f32 %v3334_v45 }
 0xfd4   :  { %v2587_v61 = vpop.eup %2586 }
 0xfd5   :  { %v2589_v6 = vpop.eup %2588  ;;  %1188 = vrot.lane.b32.xlu1 %v2587_v61, %s2688_s0 }
 0xfd6   :  { %1229 = vrot.lane.b32.xlu0 %v2589_v6, %s2688_s0 }
 0xfd8   :  { %v3340_v54 = vpop.permute.xlu1 %1162 }
 0xfd9   :  { %v3342_v1 = vpop.permute.xlu0 %1203  ;;  %vm1165_vm13 = vcmp.gt.f32.partialorder %v3340_v54, 0.0 }
 0xfda   :  { %vm1206_vm14 = vcmp.gt.f32.partialorder %v3342_v1, 0.0 }
0x1047   :  { %v1189_v60 = vpop.permute.xlu1 %1188 }
0x1048   :  { %v3344_v30 = vmul.f32 %v2583_v21, %v1189_v60  ;;  %v1230_v44 = vpop.permute.xlu0 %1229 }
0x1049   :  { %v3347_v59 = vmul.f32 %v2585_v11, %v1230_v44 }
0x104a   :  { %3909 = vst [vmem:[#allocation6_spill] sm:$0xff] %v3344_v30  ;;  %v3354_v0 = vsel %vm1165_vm13, %v3344_v30, %v3277_v26  ;;  %v3911_v26 = vmov 0.0  }
0x104b   :  { %3910 = vst [vmem:[#allocation7_spill] sm:$0xff] %v3347_v59  ;;  %1242 = vrot.lane.b32.xlu1 %v3354_v0, %s2689_s21  ;;  %v3362_v21 = vsel %vm1206_vm14, %v3347_v59, %v3285_v16 }
0x104c   :  { %1246 = vrot.lane.b32.xlu0 %v3362_v21, %s2688_s0 }
0x1052   :  { %v3916_v46 = vld [vmem:[#allocation7_spill] sm:$0xff] }
0x1053   :  { %v1233_v23 = vsel %vm1206_vm14, %v3916_v46, 0.0 }
0x10bd   :  { %v1243_v11 = vpop.permute.xlu1 %1242 }
0x10be   :  { %v1247_v49 = vpop.permute.xlu0 %1246 }
0x10bf   :  { %v1249_v17 = vsel %vm54_vm0, %v1243_v11, %v1247_v49 }
0x10c0   :  { %2270 = vmatmul.mubr.msk.f32.vlgmr.msra.gmra.mrb[8].mxu1 %vm268_vm4, %v1249_v17 }
0x10c1   :  { %2427 = vmatpush1.bf16.msra.mxu1 %v2756_v13  ;;  %1647 = vmatprep.mubr.f32.mxu1 %v3911_v26 }
0x10c2   :  { %2429 = vmatprep.subr.bf16.mxu1 %v2768_v18 }
0x10c5   :  { %2431 = vmatpush1.bf16.msra.mxu1 %v2787_v25 }
0x10c6   :  { %2433 = vmatprep.subr.bf16.mxu1 %v2798_v29 }
0x10c9   :  { %2435 = vmatpush1.bf16.msra.mxu1 %v2810_v33 }
0x10ca   :  { %2437 = vmatprep.subr.bf16.mxu1 %v2814_v34 }
0x10cd   :  { %2439 = vmatpush1.bf16.msra.mxu1 %v2829_v38 }
0x10ce   :  { %2457 = vmatprep.subr.bf16.mxu1 %v2745_v8 }
0x1193   :  { %v1319_v16 = vpop.f32.mrb[8].mxu1 }
0x1194   :  { %v1332_v4 = vadd.f32 %v1319_v16, %v2929_v27  ;;  %v1321_v61 = vpop.f32.mrb[9].mxu1 }
0x1195   :  { %v1373_v6 = vadd.f32 %v1321_v61, %v2926_v24 }
0x1196   :  { %2590 = vtanh.f32 %v1332_v4  ;;  %v2271_v11 = vmul.f32 -1.442695, %v1332_v4 }
0x1197   :  { %2592 = vtanh.f32 %v1373_v6  ;;  %v2272_v49 = vmul.f32 -1.442695, %v1373_v6 }
0x1198   :  { %2594 = vpow2.f32 %v2271_v11 }
0x1199   :  { %2596 = vpow2.f32 %v2272_v49 }
0x11a0   :  { %v2591_v60 = vpop.eup %2590 }
0x11a1   :  { %v2593_v44 = vpop.eup %2592  ;;  %1342 = vrot.lane.b32.xlu1 %v2591_v60, %s2688_s0 }
0x11a2   :  { %1383 = vrot.lane.b32.xlu0 %v2593_v44, %s2688_s0  ;;  %v2595_v17 = vpop.eup %2594 }
0x11a3   :  { %v2597_v59 = vpop.eup %2596  ;;  %v1336_v30 = vadd.f32 1.0, %v2595_v17 }
0x11a4   :  { %v1377_v2 = vadd.f32 1.0, %v2597_v59 }
0x11a5   :  { %2598 = vrcp.f32 %v1336_v30  ;;  %v3389_v30 = vsel %vm1165_vm13, %v3332_v20, %v3322_v50 }
0x11a6   :  { %2600 = vrcp.f32 %v1377_v2  ;;  %v3395_v2 = vsel %vm1206_vm14, %v3334_v45, %v3328_v3 }
0x11af   :  { %v2599_v27 = vpop.eup %2598 }
0x11b0   :  { %v2601_v16 = vpop.eup %2600 }
0x1213   :  { %v1343_v24 = vpop.permute.xlu1 %1342 }
0x1214   :  { %v1345_v61 = vmul.f32 %v2599_v27, %v1343_v24  ;;  %v1384_v36 = vpop.permute.xlu0 %1383 }
0x1215   :  { %v1386_v15 = vmul.f32 %v2601_v16, %v1384_v36  ;;  %v1340_v36 = vmul.f32 %v2599_v27, %v3389_v30 }
0x1216   :  { %1347 = vrot.lane.b32.xlu1 %v1345_v61, %s2689_s21 }
0x1217   :  { %1388 = vrot.lane.b32.xlu0 %v1386_v15, %s2689_s21  ;;  %v1381_v15 = vmul.f32 %v2601_v16, %v3395_v2 }
0x121a   :  { %1327 = vperm.xlu1 %2493, %v3314_v28  }
0x121b   :  { %1368 = vperm.xlu0 %2492, %v3309_v56  }
0x1288   :  { %v1348_v59 = vpop.permute.xlu1 %1347 }
0x1289   :  { %v3399_v28 = vadd.f32 %v1348_v59, %v1340_v36  ;;  %v1389_v56 = vpop.permute.xlu0 %1388 }
0x128a   :  { %v3401_v4 = vadd.f32 %v1389_v56, %v1381_v15 }
0x128b   :  { %2602 = vtanh.f32 %v3399_v28 }
0x128c   :  { %2604 = vtanh.f32 %v3401_v4 }
0x1295   :  { %v2603_v50 = vpop.eup %2602 }
0x1296   :  { %v2605_v20 = vpop.eup %2604  ;;  %1353 = vrot.lane.b32.xlu1 %v2603_v50, %s2688_s0 }
0x1297   :  { %1394 = vrot.lane.b32.xlu0 %v2605_v20, %s2688_s0 }
0x1299   :  { %v3407_v3 = vpop.permute.xlu1 %1327 }
0x129a   :  { %v3409_v45 = vpop.permute.xlu0 %1368  ;;  %vm1330_vm15 = vcmp.gt.f32.partialorder %v3407_v3, 0.0 }
0x129b   :  { %vm1371_vm1 = vcmp.gt.f32.partialorder %v3409_v45, 0.0 }
0x1308   :  { %v1354_v6 = vpop.permute.xlu1 %1353 }
0x1309   :  { %v3411_v60 = vmul.f32 %v2599_v27, %v1354_v6  ;;  %v1395_v44 = vpop.permute.xlu0 %1394 }
0x130a   :  { %v3414_v11 = vmul.f32 %v2601_v16, %v1395_v44 }
0x130b   :  { %v3421_v49 = vsel %vm1330_vm15, %v3411_v60, %v3354_v0  ;;  %v1357_v42 = vsel %vm1330_vm15, %v3411_v60, 0.0 }
0x130c   :  { %1407 = vrot.lane.b32.xlu1 %v3421_v49, %s2689_s21  ;;  %v3429_v17 = vsel %vm1371_vm1, %v3414_v11, %v3362_v21 }
0x130d   :  { %1411 = vrot.lane.b32.xlu0 %v3429_v17, %s2688_s0 }
0x137e   :  { %v1408_v27 = vpop.permute.xlu1 %1407 }
0x137f   :  { %v1412_v24 = vpop.permute.xlu0 %1411 }
0x1380   :  { %v1414_v16 = vsel %vm54_vm0, %v1408_v27, %v1412_v24 }
0x1381   :  { %2273 = vmatmul.mubr.msk.f32.vlgmr.msra.gmra.mrb[28].mxu0 %vm268_vm4, %v1414_v16 }
0x1382   :  { %2443 = vmatpush1.bf16.msra.mxu0 %v2756_v13  ;;  %1812 = vmatprep.mubr.f32.mxu0 %v3911_v26 }
0x1383   :  { %2445 = vmatprep.subr.bf16.mxu0 %v2768_v18 }
0x1386   :  { %2447 = vmatpush1.bf16.msra.mxu0 %v2787_v25 }
0x1387   :  { %2449 = vmatprep.subr.bf16.mxu0 %v2798_v29 }
0x138a   :  { %2451 = vmatpush1.bf16.msra.mxu0 %v2810_v33 }
0x138b   :  { %2453 = vmatprep.subr.bf16.mxu0 %v2814_v34 }
0x138e   :  { %2455 = vmatpush1.bf16.msra.mxu0 %v2829_v38 }
0x138f   :  { %2473 = vmatprep.subr.bf16.mxu0 %v2745_v8 }
0x1454   :  { %v1484_v0 = vpop.f32.mrb[28].mxu0 }
0x1455   :  { %v1497_v21 = vadd.f32 %v1484_v0, %v2933_v32  ;;  %v1486_v61 = vpop.f32.mrb[29].mxu0 }
0x1456   :  { %v1538_v36 = vadd.f32 %v1486_v61, %v2922_v19  ;;  %v3462_v61 = vsel %vm1371_vm1, %v3401_v4, %v3395_v2 }
0x1457   :  { %2606 = vtanh.f32 %v1497_v21  ;;  %v2274_v56 = vmul.f32 -1.442695, %v1497_v21  ;;  %v3456_v21 = vsel %vm1330_vm15, %v3399_v28, %v3389_v30 }
0x1458   :  { %2608 = vtanh.f32 %v1538_v36  ;;  %v2275_v50 = vmul.f32 -1.442695, %v1538_v36 }
0x1459   :  { %2610 = vpow2.f32 %v2274_v56 }
0x145a   :  { %2612 = vpow2.f32 %v2275_v50 }
0x1461   :  { %v2607_v59 = vpop.eup %2606 }
0x1462   :  { %v2609_v15 = vpop.eup %2608  ;;  %1507 = vrot.lane.b32.xlu1 %v2607_v59, %s2688_s0 }
0x1463   :  { %1548 = vrot.lane.b32.xlu0 %v2609_v15, %s2688_s0  ;;  %v2611_v20 = vpop.eup %2610 }
0x1464   :  { %v2613_v8 = vpop.eup %2612  ;;  %v1501_v6 = vadd.f32 1.0, %v2611_v20 }
0x1465   :  { %v1542_v44 = vadd.f32 1.0, %v2613_v8 }
0x1466   :  { %2614 = vrcp.f32 %v1501_v6 }
0x1467   :  { %2616 = vrcp.f32 %v1542_v44 }
0x1470   :  { %v2615_v32 = vpop.eup %2614 }
0x1471   :  { %v2617_v27 = vpop.eup %2616  ;;  %v1505_v36 = vmul.f32 %v2615_v32, %v3456_v21 }
0x1472   :  { %v1546_v15 = vmul.f32 %v2617_v27, %v3462_v61 }
0x14d4   :  { %v1508_v19 = vpop.permute.xlu1 %1507 }
0x14d5   :  { %v1510_v24 = vmul.f32 %v2615_v32, %v1508_v19  ;;  %v1549_v16 = vpop.permute.xlu0 %1548 }
0x14d6   :  { %v1551_v0 = vmul.f32 %v2617_v27, %v1549_v16 }
0x14d7   :  { %1512 = vrot.lane.b32.xlu1 %v1510_v24, %s2689_s21 }
0x14d8   :  { %1553 = vrot.lane.b32.xlu0 %v1551_v0, %s2689_s21 }
0x14db   :  { %1492 = vperm.xlu1 %2493, %v3237_v12  }
0x14dc   :  { %1533 = vperm.xlu0 %2492, %v3232_v41  }
0x1549   :  { %v1513_v59 = vpop.permute.xlu1 %1512 }
0x154a   :  { %v3466_v12 = vadd.f32 %v1513_v59, %v1505_v36  ;;  %v1554_v41 = vpop.permute.xlu0 %1553 }
0x154b   :  { %v3468_v56 = vadd.f32 %v1554_v41, %v1546_v15 }
0x154c   :  { %2618 = vtanh.f32 %v3466_v12 }
0x154d   :  { %2620 = vtanh.f32 %v3468_v56 }
0x1556   :  { %v2619_v30 = vpop.eup %2618 }
0x1557   :  { %v2621_v28 = vpop.eup %2620  ;;  %1518 = vrot.lane.b32.xlu1 %v2619_v30, %s2688_s0 }
0x1558   :  { %1559 = vrot.lane.b32.xlu0 %v2621_v28, %s2688_s0 }
0x155a   :  { %v3474_v2 = vpop.permute.xlu1 %1492 }
0x155b   :  { %v3476_v4 = vpop.permute.xlu0 %1533  ;;  %vm3901_vm2 = vcmp.gt.f32.partialorder %v3474_v2, 0.0 }
0x155c   :  { %vm3900_vm3 = vcmp.gt.f32.partialorder %v3476_v4, 0.0 }
0x15c9   :  { %v1519_v50 = vpop.permute.xlu1 %1518 }
0x15ca   :  { %v3478_v20 = vmul.f32 %v2615_v32, %v1519_v50  ;;  %v1560_v8 = vpop.permute.xlu0 %1559 }
0x15cb   :  { %v3481_v6 = vmul.f32 %v2617_v27, %v1560_v8 }
0x15cc   :  { %v3488_v44 = vsel %vm3901_vm2, %v3478_v20, %v3421_v49 }
0x15cd   :  { %1572 = vrot.lane.b32.xlu1 %v3488_v44, %s2689_s21  ;;  %v3496_v32 = vsel %vm3900_vm3, %v3481_v6, %v3429_v17 }
0x15ce   :  { %1576 = vrot.lane.b32.xlu0 %v3496_v32, %s2688_s0 }
0x163f   :  { %v1573_v19 = vpop.permute.xlu1 %1572 }
0x1640   :  { %v1577_v27 = vpop.permute.xlu0 %1576 }
0x1641   :  { %v1579_v24 = vsel %vm54_vm0, %v1573_v19, %v1577_v27 }
0x1642   :  { %2276 = vmatmul.mubr.msk.f32.vlgmr.msra.gmra.mrb[10].mxu1 %vm268_vm4, %v1579_v24 }
0x1643   :  { %2459 = vmatpush1.bf16.msra.mxu1 %v2756_v13  ;;  %1977 = vmatprep.mubr.f32.mxu1 %v3911_v26 }
0x1644   :  { %2461 = vmatprep.subr.bf16.mxu1 %v2768_v18 }
0x1647   :  { %2463 = vmatpush1.bf16.msra.mxu1 %v2787_v25 }
0x1648   :  { %2465 = vmatprep.subr.bf16.mxu1 %v2798_v29 }
0x164b   :  { %2467 = vmatpush1.bf16.msra.mxu1 %v2810_v33 }
0x164c   :  { %2469 = vmatprep.subr.bf16.mxu1 %v2814_v34 }
0x164f   :  { %2471 = vmatpush1.bf16.msra.mxu1 %v2829_v38 }
0x1715   :  { %v1649_v49 = vpop.f32.mrb[10].mxu1 }
0x1716   :  { %v1662_v17 = vadd.f32 %v1649_v49, %v2937_v39  ;;  %v1651_v16 = vpop.f32.mrb[11].mxu1 }
0x1717   :  { %v1703_v0 = vadd.f32 %v1651_v16, %v2918_v14  ;;  %v3528_v16 = vsel %vm3900_vm3, %v3468_v56, %v3462_v61 }
0x1718   :  { %2622 = vtanh.f32 %v1662_v17  ;;  %v2277_v15 = vmul.f32 -1.442695, %v1662_v17  ;;  %v3522_v17 = vsel %vm3901_vm2, %v3466_v12, %v3456_v21 }
0x1719   :  { %2624 = vtanh.f32 %v1703_v0  ;;  %v2278_v41 = vmul.f32 -1.442695, %v1703_v0 }
0x171a   :  { %2626 = vpow2.f32 %v2277_v15 }
0x171b   :  { %2628 = vpow2.f32 %v2278_v41 }
0x1722   :  { %v2623_v36 = vpop.eup %2622 }
0x1723   :  { %v2625_v59 = vpop.eup %2624  ;;  %1672 = vrot.lane.b32.xlu1 %v2623_v36, %s2688_s0 }
0x1724   :  { %1713 = vrot.lane.b32.xlu0 %v2625_v59, %s2688_s0  ;;  %v2627_v30 = vpop.eup %2626 }
0x1725   :  { %v2629_v28 = vpop.eup %2628  ;;  %v1666_v50 = vadd.f32 1.0, %v2627_v30 }
0x1726   :  { %v1707_v8 = vadd.f32 1.0, %v2629_v28 }
0x1727   :  { %2630 = vrcp.f32 %v1666_v50 }
0x1728   :  { %2632 = vrcp.f32 %v1707_v8 }
0x1731   :  { %v2631_v39 = vpop.eup %2630 }
0x1732   :  { %v2633_v19 = vpop.eup %2632  ;;  %v1670_v0 = vmul.f32 %v2631_v39, %v3522_v17 }
0x1733   :  { %v1711_v59 = vmul.f32 %v2633_v19, %v3528_v16 }
0x1795   :  { %v1673_v14 = vpop.permute.xlu1 %1672 }
0x1796   :  { %v1675_v27 = vmul.f32 %v2631_v39, %v1673_v14  ;;  %v1714_v24 = vpop.permute.xlu0 %1713 }
0x1797   :  { %v1716_v49 = vmul.f32 %v2633_v19, %v1714_v24 }
0x1798   :  { %1677 = vrot.lane.b32.xlu1 %v1675_v27, %s2689_s21 }
0x1799   :  { %1718 = vrot.lane.b32.xlu0 %v1716_v49, %s2689_s21 }
0x179c   :  { %1657 = vperm.xlu1 %2493, %v3160_v9  }
0x179d   :  { %1698 = vperm.xlu0 %2492, %v3155_v52  }
0x180a   :  { %v1678_v36 = vpop.permute.xlu1 %1677 }
0x180b   :  { %v3532_v9 = vadd.f32 %v1678_v36, %v1670_v0  ;;  %v1719_v52 = vpop.permute.xlu0 %1718 }
0x180c   :  { %v3534_v15 = vadd.f32 %v1719_v52, %v1711_v59 }
0x180d   :  { %2634 = vtanh.f32 %v3532_v9 }
0x180e   :  { %2636 = vtanh.f32 %v3534_v15 }
0x1817   :  { %v2635_v21 = vpop.eup %2634 }
0x1818   :  { %v2637_v12 = vpop.eup %2636  ;;  %1683 = vrot.lane.b32.xlu1 %v2635_v21, %s2688_s0 }
0x1819   :  { %1724 = vrot.lane.b32.xlu0 %v2637_v12, %s2688_s0 }
0x181b   :  { %v3540_v61 = vpop.permute.xlu1 %1657 }
0x181c   :  { %v3542_v56 = vpop.permute.xlu0 %1698  ;;  %vm3903_vm3 = vcmp.gt.f32.partialorder %v3540_v61, 0.0 }
0x181d   :  { %vm3902_vm2 = vcmp.gt.f32.partialorder %v3542_v56, 0.0  ;;  %v3588_v21 = vsel %vm3903_vm3, %v3532_v9, %v3522_v17 }
0x181e   :  { %v3594_v12 = vsel %vm3902_vm2, %v3534_v15, %v3528_v16 }
0x188a   :  { %v1684_v41 = vpop.permute.xlu1 %1683 }
0x188b   :  { %v3544_v30 = vmul.f32 %v2631_v39, %v1684_v41  ;;  %v1725_v28 = vpop.permute.xlu0 %1724 }
0x188c   :  { %v3547_v50 = vmul.f32 %v2633_v19, %v1725_v28 }
0x188d   :  { %v3554_v8 = vsel %vm3903_vm3, %v3544_v30, %v3488_v44 }
0x188e   :  { %1737 = vrot.lane.b32.xlu1 %v3554_v8, %s2689_s21  ;;  %v3562_v39 = vsel %vm3902_vm2, %v3547_v50, %v3496_v32 }
0x188f   :  { %1741 = vrot.lane.b32.xlu0 %v3562_v39, %s2688_s0 }
0x1900   :  { %v1738_v14 = vpop.permute.xlu1 %1737 }
0x1901   :  { %v1742_v19 = vpop.permute.xlu0 %1741 }
0x1902   :  { %v1744_v27 = vsel %vm54_vm0, %v1738_v14, %v1742_v19 }
0x1903   :  { %2279 = vmatmul.mubr.msk.f32.vlgmr.msra.gmra.mrb[30].mxu0 %vm268_vm4, %v1744_v27 }
0x1904   :  { %2475 = vmatpush1.bf16.msra.mxu0 %v2756_v13  ;;  %2142 = vmatprep.mubr.f32.mxu0 %v3911_v26 }
0x1905   :  { %2477 = vmatprep.subr.bf16.mxu0 %v2768_v18 }
0x1908   :  { %2479 = vmatpush1.bf16.msra.mxu0 %v2787_v25 }
0x1909   :  { %2481 = vmatprep.subr.bf16.mxu0 %v2798_v29 }
0x190c   :  { %2483 = vmatpush1.bf16.msra.mxu0 %v2810_v33 }
0x190d   :  { %2485 = vmatprep.subr.bf16.mxu0 %v2814_v34 }
0x1910   :  { %2487 = vmatpush1.bf16.msra.mxu0 %v2829_v38 }
0x19d6   :  { %v1814_v44 = vpop.f32.mrb[30].mxu0 }
0x19d7   :  { %v1827_v32 = vadd.f32 %v1814_v44, %v2941_v43  ;;  %v1816_v24 = vpop.f32.mrb[31].mxu0 }
0x19d8   :  { %v1868_v13 = vadd.f32 %v1816_v24, %v2914_v7 }
0x19d9   :  { %2638 = vtanh.f32 %v1827_v32  ;;  %v2280_v25 = vmul.f32 -1.442695, %v1827_v32 }
0x19da   :  { %2640 = vtanh.f32 %v1868_v13  ;;  %v2281_v29 = vmul.f32 -1.442695, %v1868_v13 }
0x19db   :  { %2642 = vpow2.f32 %v2280_v25 }
0x19dc   :  { %2644 = vpow2.f32 %v2281_v29 }
0x19e3   :  { %v2639_v26 = vpop.eup %2638 }
0x19e4   :  { %v2641_v18 = vpop.eup %2640  ;;  %1837 = vrot.lane.b32.xlu1 %v2639_v26, %s2688_s0 }
0x19e5   :  { %1878 = vrot.lane.b32.xlu0 %v2641_v18, %s2688_s0  ;;  %v2643_v33 = vpop.eup %2642 }
0x19e6   :  { %v2645_v34 = vpop.eup %2644  ;;  %v1831_v38 = vadd.f32 1.0, %v2643_v33 }
0x19e7   :  { %v1872_v49 = vadd.f32 1.0, %v2645_v34 }
0x19e8   :  { %2646 = vrcp.f32 %v1831_v38 }
0x19e9   :  { %2648 = vrcp.f32 %v1872_v49 }
0x19f2   :  { %v2647_v43 = vpop.eup %2646 }
0x19f3   :  { %v2649_v0 = vpop.eup %2648  ;;  %v1835_v41 = vmul.f32 %v2647_v43, %v3588_v21 }
0x19f4   :  { %v1876_v14 = vmul.f32 %v2649_v0, %v3594_v12 }
0x1a56   :  { %v1838_v7 = vpop.permute.xlu1 %1837 }
0x1a57   :  { %v1840_v36 = vmul.f32 %v2647_v43, %v1838_v7  ;;  %v1879_v59 = vpop.permute.xlu0 %1878 }
0x1a58   :  { %v1881_v52 = vmul.f32 %v2649_v0, %v1879_v59 }
0x1a59   :  { %1842 = vrot.lane.b32.xlu1 %v1840_v36, %s2689_s21 }
0x1a5a   :  { %1883 = vrot.lane.b32.xlu0 %v1881_v52, %s2689_s21 }
0x1a5d   :  { %1822 = vperm.xlu1 %2493, %v3083_v53  }
0x1a5e   :  { %1863 = vperm.xlu0 %2492, %v3078_v48  }
0x1acb   :  { %v1843_v28 = vpop.permute.xlu1 %1842 }
0x1acc   :  { %v1845_v53 = vadd.f32 %v1843_v28, %v1835_v41  ;;  %v1884_v19 = vpop.permute.xlu0 %1883 }
0x1acd   :  { %v1886_v48 = vadd.f32 %v1884_v19, %v1876_v14 }
0x1ace   :  { %2650 = vtanh.f32 %v1845_v53 }
0x1acf   :  { %2652 = vtanh.f32 %v1886_v48 }
0x1ad8   :  { %v2651_v27 = vpop.eup %2650 }
0x1ad9   :  { %v2653_v44 = vpop.eup %2652  ;;  %1848 = vrot.lane.b32.xlu1 %v2651_v27, %s2688_s0  ;;  %v1984_v27 = vld [vmem:[%s3889_s1 + $0x50] sm:$0xff] }
0x1ada   :  { %1889 = vrot.lane.b32.xlu0 %v2653_v44, %s2688_s0  ;;  %v2025_v44 = vld [vmem:[%s3889_s1 + $0x8] sm:$0xff] }
0x1adc   :  { %v3600_v17 = vpop.permute.xlu1 %1822 }
0x1add   :  { %v3602_v16 = vpop.permute.xlu0 %1863  ;;  %vm3905_vm2 = vcmp.gt.f32.partialorder %v3600_v17, 0.0 }
0x1ade   :  { %vm3904_vm3 = vcmp.gt.f32.partialorder %v3602_v16, 0.0  ;;  %vm3922_vm9 = vcmp.gt.f32.partialorder %v3602_v16, 0.0 }
0x1b4b   :  { %v1849_v9 = vpop.permute.xlu1 %1848 }
0x1b4c   :  { %v3604_v15 = vmul.f32 %v2647_v43, %v1849_v9  ;;  %v1890_v32 = vpop.permute.xlu0 %1889  ;;  %v3643_v9 = vsel %vm3905_vm2, %v1845_v53, %v3588_v21 }
0x1b4d   :  { %v3607_v24 = vmul.f32 %v2649_v0, %v1890_v32  ;;  %v3648_v32 = vsel %vm3904_vm3, %v1886_v48, %v3594_v12 }
0x1b4e   :  { %v3614_v13 = vsel %vm3905_vm2, %v3604_v15, %v3554_v8 }
0x1b4f   :  { %1902 = vrot.lane.b32.xlu1 %v3614_v13, %s2689_s21  ;;  %v3622_v26 = vsel %vm3904_vm3, %v3607_v24, %v3562_v39 }
0x1b50   :  { %1906 = vrot.lane.b32.xlu0 %v3622_v26, %s2688_s0 }
0x1bc1   :  { %v1903_v18 = vpop.permute.xlu1 %1902 }
0x1bc2   :  { %v1907_v25 = vpop.permute.xlu0 %1906 }
0x1bc3   :  { %v1909_v29 = vsel %vm54_vm0, %v1903_v18, %v1907_v25 }
0x1bc4   :  { %2282 = vmatmul.mubr.msk.f32.vlgmr.msra.gmra.mrb[12].mxu1 %vm268_vm4, %v1909_v29 }
0x1c97   :  { %v1979_v8 = vpop.f32.mrb[12].mxu1 }
0x1c98   :  { %v1992_v33 = vadd.f32 %v1979_v8, %v2945_v47  ;;  %v1981_v34 = vpop.f32.mrb[13].mxu1 }
0x1c99   :  { %v2033_v38 = vadd.f32 %v1981_v34, %v2910_v63 }
0x1c9a   :  { %2654 = vtanh.f32 %v1992_v33  ;;  %v2283_v43 = vmul.f32 -1.442695, %v1992_v33 }
0x1c9b   :  { %2656 = vtanh.f32 %v2033_v38  ;;  %v2284_v7 = vmul.f32 -1.442695, %v2033_v38 }
0x1c9c   :  { %2658 = vpow2.f32 %v2283_v43 }
0x1c9d   :  { %2660 = vpow2.f32 %v2284_v7 }
0x1ca4   :  { %v2655_v49 = vpop.eup %2654 }
0x1ca5   :  { %v2657_v39 = vpop.eup %2656  ;;  %2002 = vrot.lane.b32.xlu1 %v2655_v49, %s2688_s0 }
0x1ca6   :  { %2043 = vrot.lane.b32.xlu0 %v2657_v39, %s2688_s0  ;;  %v2659_v0 = vpop.eup %2658 }
0x1ca7   :  { %v2661_v36 = vpop.eup %2660  ;;  %v1996_v59 = vadd.f32 1.0, %v2659_v0 }
0x1ca8   :  { %v2037_v52 = vadd.f32 1.0, %v2661_v36 }
0x1ca9   :  { %2662 = vrcp.f32 %v1996_v59 }
0x1caa   :  { %2664 = vrcp.f32 %v2037_v52 }
0x1cb3   :  { %v2663_v47 = vpop.eup %2662 }
0x1cb4   :  { %v2665_v41 = vpop.eup %2664  ;;  %v2000_v18 = vmul.f32 %v2663_v47, %v3643_v9 }
0x1cb5   :  { %v2041_v29 = vmul.f32 %v2665_v41, %v3648_v32 }
0x1d17   :  { %v2003_v63 = vpop.permute.xlu1 %2002 }
0x1d18   :  { %v2005_v28 = vmul.f32 %v2663_v47, %v2003_v63  ;;  %v2044_v14 = vpop.permute.xlu0 %2043 }
0x1d19   :  { %v2046_v19 = vmul.f32 %v2665_v41, %v2044_v14 }
0x1d1a   :  { %2007 = vrot.lane.b32.xlu1 %v2005_v28, %s2689_s21 }
0x1d1b   :  { %2048 = vrot.lane.b32.xlu0 %v2046_v19, %s2689_s21 }
0x1d1e   :  { %1987 = vperm.xlu1 %2493, %v1984_v27  }
0x1d1f   :  { %2028 = vperm.xlu0 %2492, %v2025_v44  }
0x1d8c   :  { %v2008_v25 = vpop.permute.xlu1 %2007 }
0x1d8d   :  { %v2010_v8 = vadd.f32 %v2008_v25, %v2000_v18  ;;  %v2049_v33 = vpop.permute.xlu0 %2048 }
0x1d8e   :  { %v2051_v34 = vadd.f32 %v2049_v33, %v2041_v29 }
0x1d8f   :  { %2666 = vtanh.f32 %v2010_v8 }
0x1d90   :  { %2668 = vtanh.f32 %v2051_v34 }
0x1d99   :  { %v2667_v38 = vpop.eup %2666 }
0x1d9a   :  { %v2669_v49 = vpop.eup %2668  ;;  %2013 = vrot.lane.b32.xlu1 %v2667_v38, %s2688_s0 }
0x1d9b   :  { %2054 = vrot.lane.b32.xlu0 %v2669_v49, %s2688_s0 }
0x1d9d   :  { %v3654_v21 = vpop.permute.xlu1 %1987 }
0x1d9e   :  { %v3656_v12 = vpop.permute.xlu0 %2028  ;;  %vm1990_vm3 = vcmp.gt.f32.partialorder %v3654_v21, 0.0 }
0x1d9f   :  { %vm2031_vm2 = vcmp.gt.f32.partialorder %v3656_v12, 0.0 }
0x1e0c   :  { %v2014_v53 = vpop.permute.xlu1 %2013 }
0x1e0d   :  { %v3658_v48 = vmul.f32 %v2663_v47, %v2014_v53  ;;  %v2055_v39 = vpop.permute.xlu0 %2054  ;;  %v2149_v53 = vld [vmem:[%s3889_s1 + $0x58] sm:$0xff] }
0x1e0e   :  { %v3661_v43 = vmul.f32 %v2665_v41, %v2055_v39  ;;  %v2189_v39 = vld [vmem:[%s3889_s1] sm:$0xff] }
0x1e0f   :  { %v3668_v7 = vsel %vm1990_vm3, %v3658_v48, %v3614_v13 }
0x1e10   :  { %2067 = vrot.lane.b32.xlu1 %v3668_v7, %s2689_s21  ;;  %v2064_v0 = vsel %vm2031_vm2, %v3661_v43, %v3622_v26 }
0x1e11   :  { %2071 = vrot.lane.b32.xlu0 %v2064_v0, %s2688_s0  ;;  %v2024_v0 = vsel %vm1990_vm3, %v2010_v8, %v3643_v9  ;;  %v532_v9 = vsel %vm505_vm5, %v3036_v57, 0.0  ;;  %v697_v8 = vsel %vm670_vm7, %v3113_v5, 0.0  ;;  %v1068_v5 = vsel %vm1041_vm12, %v3913_v35, 0.0 }
0x1e12   :  { %vm3918_vm5 = vcmp.gt.f32.partialorder %v3476_v4, 0.0  ;;  %vm3920_vm7 = vcmp.gt.f32.partialorder %v3542_v56, 0.0  ;;  %v2058_v4 = vsel %vm2031_vm2, %v3661_v43, 0.0 }
0x1e13   :  { %v1563_v1 = vsel %vm3918_vm5, %v3481_v6, 0.0  ;;  %v1728_v45 = vsel %vm3920_vm7, %v3547_v50, 0.0 }
0x1e82   :  { %v2068_v36 = vpop.permute.xlu1 %2067 }
0x1e83   :  { %v2072_v59 = vpop.permute.xlu0 %2071 }
0x1e84   :  { %v2074_v52 = vsel %vm54_vm0, %v2068_v36, %v2072_v59  ;;  %v2065_v36 = vsel %vm2031_vm2, %v2051_v34, %v3648_v32  ;;  %v573_v32 = vsel %vm546_vm6, %v3039_v62, 0.0  ;;  %v738_v34 = vsel %vm711_vm8, %v3116_v10, 0.0  ;;  %v3915_v10 = vld [vmem:[#allocation6_spill] sm:$0xff] }
0x1e85   :  { %2285 = vmatmul.mubr.msk.f32.vlgmr.msra.gmra.mrb[32].mxu0 %vm268_vm4, %v2074_v52  ;;  %v1027_v62 = vsel %vm1000_vm11, %v3267_v22, 0.0  ;;  %v1192_v40 = vsel %vm1165_vm13, %v3915_v10, 0.0  ;;  %v1398_v22 = vsel %vm1371_vm1, %v3414_v11, 0.0  ;;  %vm3917_vm4 = vcmp.gt.f32.partialorder %v3474_v2, 0.0 }
0x1e86   :  { %v1522_v54 = vsel %vm3917_vm4, %v3478_v20, 0.0  ;;  %vm3919_vm6 = vcmp.gt.f32.partialorder %v3540_v61, 0.0  ;;  %vm3921_vm8 = vcmp.gt.f32.partialorder %v3600_v17, 0.0  ;;  %v1893_v11 = vsel %vm3922_vm9, %v3607_v24, 0.0 }
0x1e87   :  { %v1687_v3 = vsel %vm3919_vm6, %v3544_v30, 0.0  ;;  %v1852_v60 = vsel %vm3921_vm8, %v3604_v15, 0.0  ;;  %v2017_v2 = vsel %vm1990_vm3, %v3658_v48, 0.0  ;;  %vm3923_vm3 = vcmask 523520  }
0x1e88   :  { %vm3924_vm12 = vmmov %vm3923_vm3 }
0x1e89   :  { %vm3925_vm13 = vmmov %vm3923_vm3 }
0x1e8a   :  { %vm3926_vm14 = vmmov %vm3923_vm3 }
0x1e8b   :  { %vm3927_vm15 = vmmov %vm3923_vm3 }
0x1e8c   :  { %vm3928_vm1 = vmmov %vm3923_vm3 }
0x1e8d   :  { %vm3929_vm2 = vmmov %vm3928_vm1 }
0x1e8e   :  { %vm3930_vm4 = vmmov %vm3928_vm1 }
0x1e8f   :  { %vm3931_vm5 = vmmov %vm3928_vm1 }
0x1e90   :  { %vm3932_vm6 = vmmov %vm3928_vm1 }
0x1e91   :  { %vm3933_vm7 = vmmov %vm3928_vm1 }
0x1f58   :  { %v2144_v47 = vpop.f32.mrb[32].mxu0 }
0x1f59   :  { %v2157_v13 = vadd.f32 %v2144_v47, %v2949_v51  ;;  %v2146_v63 = vpop.f32.mrb[33].mxu0 }
0x1f5a   :  { %v2197_v41 = vadd.f32 %v2146_v63, %v2906_v58 }
0x1f5b   :  { %2670 = vtanh.f32 %v2157_v13  ;;  %v2286_v26 = vmul.f32 -1.442695, %v2157_v13 }
0x1f5c   :  { %2672 = vtanh.f32 %v2197_v41  ;;  %v2287_v19 = vmul.f32 -1.442695, %v2197_v41 }
0x1f5d   :  { %2674 = vpow2.f32 %v2286_v26 }
0x1f5e   :  { %2676 = vpow2.f32 %v2287_v19 }
0x1f65   :  { %v2671_v28 = vpop.eup %2670 }
0x1f66   :  { %v2673_v14 = vpop.eup %2672  ;;  %2167 = vrot.lane.b32.xlu1 %v2671_v28, %s2688_s0 }
0x1f67   :  { %2207 = vrot.lane.b32.xlu0 %v2673_v14, %s2688_s0  ;;  %v2675_v27 = vpop.eup %2674 }
0x1f68   :  { %v2677_v44 = vpop.eup %2676  ;;  %v2161_v18 = vadd.f32 1.0, %v2675_v27 }
0x1f69   :  { %v2201_v25 = vadd.f32 1.0, %v2677_v44 }
0x1f6a   :  { %2678 = vrcp.f32 %v2161_v18 }
0x1f6b   :  { %2680 = vrcp.f32 %v2201_v25 }
0x1f74   :  { %v3683_v51 = vpop.eup %2678 }
0x1f75   :  { %v3685_v29 = vpop.eup %2680  ;;  %v2165_v59 = vmul.f32 %v3683_v51, %v2024_v0 }
0x1f76   :  { %v2205_v47 = vmul.f32 %v3685_v29, %v2065_v36 }
0x1fd8   :  { %v2168_v58 = vpop.permute.xlu1 %2167 }
0x1fd9   :  { %v2170_v33 = vmul.f32 %v3683_v51, %v2168_v58  ;;  %v2208_v38 = vpop.permute.xlu0 %2207 }
0x1fda   :  { %v2210_v49 = vmul.f32 %v3685_v29, %v2208_v38 }
0x1fdb   :  { %2172 = vrot.lane.b32.xlu1 %v2170_v33, %s2689_s21 }
0x1fdc   :  { %2212 = vrot.lane.b32.xlu0 %v2210_v49, %s2689_s21 }
0x1fdf   :  { %2152 = vperm.xlu1 %2493, %v2149_v53  }
0x1fe0   :  { %2192 = vperm.xlu0 %2492, %v2189_v39  }
0x204d   :  { %v2173_v52 = vpop.permute.xlu1 %2172 }
0x204e   :  { %v2175_v13 = vadd.f32 %v2173_v52, %v2165_v59  ;;  %v2213_v63 = vpop.permute.xlu0 %2212 }
0x204f   :  { %v2215_v41 = vadd.f32 %v2213_v63, %v2205_v47 }
0x2050   :  { %2682 = vtanh.f32 %v2175_v13 }
0x2051   :  { %2684 = vtanh.f32 %v2215_v41 }
0x205a   :  { %v2683_v28 = vpop.eup %2682 }
0x205b   :  { %v2685_v14 = vpop.eup %2684  ;;  %2178 = vrot.lane.b32.xlu1 %v2683_v28, %s2688_s0 }
0x205c   :  { %2218 = vrot.lane.b32.xlu0 %v2685_v14, %s2688_s0 }
0x205e   :  { %v2153_v20 = vpop.permute.xlu1 %2152 }
0x205f   :  { %534 = vrot.lane.b32.xlu1 %v532_v9, %s2689_s21  ;;  %v2193_v6 = vpop.permute.xlu0 %2192  ;;  %vm2155_vm10 = vcmp.gt.f32.partialorder %v2153_v20, 0.0 }
0x2060   :  { %575 = vrot.lane.b32.xlu0 %v573_v32, %s2688_s0  ;;  %vm2195_vm11 = vcmp.gt.f32.partialorder %v2193_v6, 0.0 }
0x2063   :  { %699 = vrot.lane.b32.xlu1 %v697_v8, %s2689_s21 }
0x2064   :  { %740 = vrot.lane.b32.xlu0 %v738_v34, %s2688_s0 }
0x2067   :  { %864 = vrot.lane.b32.xlu1 %v862_v31, %s2689_s21 }
0x2068   :  { %905 = vrot.lane.b32.xlu0 %v903_v37, %s2688_s0 }
0x206b   :  { %1029 = vrot.lane.b32.xlu1 %v1027_v62, %s2689_s21 }
0x206c   :  { %1070 = vrot.lane.b32.xlu0 %v1068_v5, %s2688_s0 }
0x206f   :  { %1194 = vrot.lane.b32.xlu1 %v1192_v40, %s2689_s21 }
0x2070   :  { %1235 = vrot.lane.b32.xlu0 %v1233_v23, %s2688_s0 }
0x2073   :  { %1359 = vrot.lane.b32.xlu1 %v1357_v42, %s2689_s21 }
0x2074   :  { %1400 = vrot.lane.b32.xlu0 %v1398_v22, %s2688_s0 }
0x2077   :  { %1524 = vrot.lane.b32.xlu1 %v1522_v54, %s2689_s21 }
0x2078   :  { %1565 = vrot.lane.b32.xlu0 %v1563_v1, %s2688_s0 }
0x207b   :  { %1689 = vrot.lane.b32.xlu1 %v1687_v3, %s2689_s21 }
0x207c   :  { %1730 = vrot.lane.b32.xlu0 %v1728_v45, %s2688_s0 }
0x207f   :  { %1854 = vrot.lane.b32.xlu1 %v1852_v60, %s2689_s21 }
0x2080   :  { %1895 = vrot.lane.b32.xlu0 %v1893_v11, %s2688_s0 }
0x2083   :  { %2019 = vrot.lane.b32.xlu1 %v2017_v2, %s2689_s21 }
0x2084   :  { %2060 = vrot.lane.b32.xlu0 %v2058_v4, %s2688_s0 }
0x20cd   :  { %v2179_v61 = vpop.permute.xlu1 %2178 }
0x20ce   :  { %v2181_v56 = vmul.f32 %v3683_v51, %v2179_v61  ;;  %v2219_v30 = vpop.permute.xlu0 %2218 }
0x20cf   :  { %v2221_v50 = vmul.f32 %v3685_v29, %v2219_v30 }
0x20d0   :  { %v2182_v17 = vsel %vm2155_vm10, %v2181_v56, 0.0  ;;  %v2188_v21 = vsel %vm2155_vm10, %v2181_v56, %v3668_v7 }
0x20d1   :  { %v2222_v16 = vsel %vm2195_vm11, %v2221_v50, 0.0  ;;  %2184 = vrot.lane.b32.xlu1 %v2182_v17, %s2689_s21  ;;  %v535_v15 = vpop.permute.xlu1 %534 }
0x20d2   :  { %537 = vst.msk [vmem:[%s3890_s5 + $0x8] sm:$0xff] %vm54_vm0, %v535_v15  ;;  %2224 = vrot.lane.b32.xlu0 %v2222_v16, %s2688_s0  ;;  %v576_v24 = vpop.permute.xlu0 %575 }
0x20d3   :  { %578 = vst.msk [vmem:[%s3890_s5 + $0x50] sm:$0xff] %vm3923_vm3, %v576_v24 }
0x20d5   :  { %2229 = vrot.lane.b32.xlu1 %v2188_v21, %s2689_s21  ;;  %v700_v12 = vpop.permute.xlu1 %699 }
0x20d6   :  { %702 = vst.msk [vmem:[%s3890_s5 + $0x10] sm:$0xff] %vm54_vm0, %v700_v12  ;;  %v741_v48 = vpop.permute.xlu0 %740 }
0x20d7   :  { %743 = vst.msk [vmem:[%s3890_s5 + $0x48] sm:$0xff] %vm3924_vm12, %v741_v48 }
0x20d9   :  { %v865_v43 = vpop.permute.xlu1 %864 }
0x20da   :  { %867 = vst.msk [vmem:[%s3890_s5 + $0x18] sm:$0xff] %vm54_vm0, %v865_v43  ;;  %v906_v7 = vpop.permute.xlu0 %905 }
0x20db   :  { %908 = vst.msk [vmem:[%s3890_s5 + $0x40] sm:$0xff] %vm3925_vm13, %v906_v7 }
0x20dd   :  { %v1030_v26 = vpop.permute.xlu1 %1029 }
0x20de   :  { %1032 = vst.msk [vmem:[%s3890_s5 + $0x20] sm:$0xff] %vm54_vm0, %v1030_v26  ;;  %v1071_v19 = vpop.permute.xlu0 %1070 }
0x20df   :  { %1073 = vst.msk [vmem:[%s3890_s5 + $0x38] sm:$0xff] %vm3926_vm14, %v1071_v19 }
0x20e1   :  { %v1195_v27 = vpop.permute.xlu1 %1194 }
0x20e2   :  { %1197 = vst.msk [vmem:[%s3890_s5 + $0x28] sm:$0xff] %vm54_vm0, %v1195_v27  ;;  %v1236_v44 = vpop.permute.xlu0 %1235 }
0x20e3   :  { %1238 = vst.msk [vmem:[%s3890_s5 + $0x30] sm:$0xff] %vm3927_vm15, %v1236_v44 }
0x20e5   :  { %v1360_v18 = vpop.permute.xlu1 %1359 }
0x20e6   :  { %1362 = vst.msk [vmem:[%s3890_s5 + $0x30] sm:$0xff] %vm54_vm0, %v1360_v18  ;;  %v1401_v25 = vpop.permute.xlu0 %1400 }
0x20e7   :  { %1403 = vst.msk [vmem:[%s3890_s5 + $0x28] sm:$0xff] %vm3928_vm1, %v1401_v25 }
0x20e9   :  { %v1525_v51 = vpop.permute.xlu1 %1524 }
0x20ea   :  { %1527 = vst.msk [vmem:[%s3890_s5 + $0x38] sm:$0xff] %vm54_vm0, %v1525_v51  ;;  %v1566_v58 = vpop.permute.xlu0 %1565 }
0x20eb   :  { %1568 = vst.msk [vmem:[%s3890_s5 + $0x20] sm:$0xff] %vm3929_vm2, %v1566_v58 }
0x20ed   :  { %v1690_v29 = vpop.permute.xlu1 %1689 }
0x20ee   :  { %1692 = vst.msk [vmem:[%s3890_s5 + $0x40] sm:$0xff] %vm54_vm0, %v1690_v29  ;;  %v1731_v33 = vpop.permute.xlu0 %1730 }
0x20ef   :  { %1733 = vst.msk [vmem:[%s3890_s5 + $0x18] sm:$0xff] %vm3930_vm4, %v1731_v33 }
0x20f1   :  { %v1855_v38 = vpop.permute.xlu1 %1854 }
0x20f2   :  { %1857 = vst.msk [vmem:[%s3890_s5 + $0x48] sm:$0xff] %vm54_vm0, %v1855_v38  ;;  %v1896_v49 = vpop.permute.xlu0 %1895 }
0x20f3   :  { %1898 = vst.msk [vmem:[%s3890_s5 + $0x10] sm:$0xff] %vm3931_vm5, %v1896_v49 }
0x20f5   :  { %v2020_v53 = vpop.permute.xlu1 %2019 }
0x20f6   :  { %2022 = vst.msk [vmem:[%s3890_s5 + $0x50] sm:$0xff] %vm54_vm0, %v2020_v53  ;;  %v2061_v39 = vpop.permute.xlu0 %2060 }
0x20f7   :  { %2063 = vst.msk [vmem:[%s3890_s5 + $0x8] sm:$0xff] %vm3932_vm6, %v2061_v39 }
0x2143   :  { %v2185_v0 = vpop.permute.xlu1 %2184 }
0x2144   :  { %2187 = vst.msk [vmem:[%s3890_s5 + $0x58] sm:$0xff] %vm54_vm0, %v2185_v0  ;;  %v2225_v36 = vpop.permute.xlu0 %2224 }
0x2145   :  { %2227 = vst.msk [vmem:[%s3890_s5] sm:$0xff] %vm3933_vm7, %v2225_v36 }
0x2147   :  { %v2230_v59 = vpop.permute.xlu1 %2229 }
0x2148   :  { %2232 = vst.msk [vmem:[%s3891_s6] sm:$0xff] %vm54_vm0, %v2230_v59 }

// kernel: seq2seq_forward.5
= control target key start
LH: loop header
LB: loop body
LE: loop exit
PB: predicated region body
PF: predicated region fallthrough
CT: control target
= control target key end

     0   :  { %v3932_v3 = vmov 0.0   ;;  %vm62_vm0 = vcmask 523264   ;;  %v2703_v61 = vmov 0   ;;  %v52_v62 = vlaneseq  ;;  %s2705_s13 = smov 32   ;;  %s3925_s2 = inlined_call_operand.vmem [shape: f32[64,256], index: 2, kind: input, shape index: {}]   ;;  %s3926_s3 = inlined_call_operand.vmem [shape: f32[64,256], index: 3, kind: input, shape index: {}]   ;;  %s3927_s0 = inlined_call_operand.vmem [shape: f32[96,64], index: 0, kind: input, shape index: {}]   ;;  %s3928_s4 = inlined_call_operand.vmem [shape: f32[1,256], index: 4, kind: input, shape index: {}]   ;;  %s3929_s1 = inlined_call_operand.vmem [shape: f32[96,1], index: 1, kind: input, shape index: {}]   ;;  %s3930_s5 = inlined_call_operand.vmem [shape: f32[96,64], index: 5, kind: output, shape index: {0}]   ;;  %s3931_s6 = inlined_call_operand.vmem [shape: f32[8,32], index: 6, kind: output, shape index: {1}]  }
   0x1   :  { %v35_v0 = vld [vmem:[%s3925_s2 + $0x8] sm:$0xff]  ;;  %v37_v1 = vld [vmem:[%s3925_s2 + $0x18] sm:$0xff]  ;;  %v34_v2 = vld [vmem:[%s3925_s2] sm:$0xff]  ;;  %163 = vmatprep.mubr.f32.mxu0 %v3932_v3  ;;  %343 = vmatprep.mubr.f32.mxu1 %v3932_v3  ;;  %vm388_vm3 = vcmask 261120   ;;  %vm3939_vm4 = vcmask 523520  }
   0x2   :  { %v2296_v4 = vpack.c.bf16 %v37_v1, %v35_v0  ;;  %v36_v5 = vld [vmem:[%s3925_s2 + $0x10] sm:$0xff]  ;;  %v261_v6 = vld [vmem:[%s3926_s3 + $0x8] sm:$0xff]  ;;  %v263_v7 = vld [vmem:[%s3926_s3 + $0x18] sm:$0xff]  ;;  %2508 = vset.pattern.permute.xlu0 %v2703_v61  ;;  %2509 = vset.pattern.permute.xlu1 %v2703_v61  ;;  %v53_v63 = vshrl.u32 %v52_v62, 7 }
   0x3   :  { %v2298_v8 = vpack.c.bf16 %v36_v5, %v34_v2  ;;  %v2761_v9 = vpack.c.bf16 %v263_v7, %v261_v6  ;;  %v260_v10 = vld [vmem:[%s3926_s3] sm:$0xff]  ;;  %v262_v11 = vld [vmem:[%s3926_s3 + $0x10] sm:$0xff]  ;;  %v39_v12 = vld [vmem:[%s3925_s2 + $0x28] sm:$0xff] }
   0x4   :  { %2297 = vmatprep.subr.bf16.mxu0 %v2296_v4  ;;  %v2772_v13 = vpack.c.bf16 %v262_v11, %v260_v10  ;;  %v41_v14 = vld [vmem:[%s3925_s2 + $0x38] sm:$0xff]  ;;  %v38_v15 = vld [vmem:[%s3925_s2 + $0x20] sm:$0xff]  ;;  %v40_v16 = vld [vmem:[%s3925_s2 + $0x30] sm:$0xff]  ;;  %v54_v0 = vsub.s32 0, %v53_v63  ;;  %v58_v2 = vsub.s32 1, %v53_v63 }
   0x5   :  { %2299 = vmatpush1.bf16.msra.mxu0 %v2298_v8  ;;  %2313 = vmatprep.subr.bf16.mxu1 %v2761_v9  ;;  %v2300_v17 = vpack.c.bf16 %v41_v14, %v39_v12  ;;  %v2302_v18 = vpack.c.bf16 %v40_v16, %v38_v15  ;;  %v265_v19 = vld [vmem:[%s3926_s3 + $0x28] sm:$0xff]  ;;  %v267_v20 = vld [vmem:[%s3926_s3 + $0x38] sm:$0xff]  ;;  %v264_v21 = vld [vmem:[%s3926_s3 + $0x20] sm:$0xff] }
   0x6   :  { %2315 = vmatpush1.bf16.msra.mxu1 %v2772_v13  ;;  %v2794_v22 = vpack.c.bf16 %v267_v20, %v265_v19  ;;  %v266_v23 = vld [vmem:[%s3926_s3 + $0x30] sm:$0xff]  ;;  %v43_v24 = vld [vmem:[%s3925_s2 + $0x48] sm:$0xff]  ;;  %v45_v25 = vld [vmem:[%s3925_s2 + $0x58] sm:$0xff] }
   0x7   :  { %2301 = vmatprep.subr.bf16.mxu0 %v2300_v17  ;;  %v2805_v26 = vpack.c.bf16 %v266_v23, %v264_v21  ;;  %v2304_v27 = vpack.c.bf16 %v45_v25, %v43_v24  ;;  %v42_v28 = vld [vmem:[%s3925_s2 + $0x40] sm:$0xff]  ;;  %v44_v29 = vld [vmem:[%s3925_s2 + $0x50] sm:$0xff]  ;;  %v269_v30 = vld [vmem:[%s3926_s3 + $0x48] sm:$0xff] }
   0x8   :  { %2317 = vmatprep.subr.bf16.mxu1 %v2794_v22  ;;  %v271_v31 = vld [vmem:[%s3926_s3 + $0x58] sm:$0xff]  ;;  %v268_v32 = vld [vmem:[%s3926_s3 + $0x40] sm:$0xff]  ;;  %v270_v33 = vld [vmem:[%s3926_s3 + $0x50] sm:$0xff]  ;;  %v2306_v34 = vpack.c.bf16 %v44_v29, %v42_v28 }
   0x9   :  { %2303 = vmatpush1.bf16.msra.mxu0 %v2302_v18  ;;  %v2826_v35 = vpack.c.bf16 %v271_v31, %v269_v30  ;;  %v47_v36 = vld [vmem:[%s3925_s2 + $0x68] sm:$0xff]  ;;  %v49_v37 = vld [vmem:[%s3925_s2 + $0x78] sm:$0xff]  ;;  %v46_v38 = vld [vmem:[%s3925_s2 + $0x60] sm:$0xff]  ;;  %v2838_v39 = vpack.c.bf16 %v270_v33, %v268_v32 }
   0xa   :  { %2319 = vmatpush1.bf16.msra.mxu1 %v2805_v26  ;;  %2305 = vmatprep.subr.bf16.mxu0 %v2304_v27  ;;  %v2308_v40 = vpack.c.bf16 %v49_v37, %v47_v36  ;;  %v48_v41 = vld [vmem:[%s3925_s2 + $0x70] sm:$0xff]  ;;  %v273_v42 = vld [vmem:[%s3926_s3 + $0x68] sm:$0xff]  ;;  %v275_v43 = vld [vmem:[%s3926_s3 + $0x78] sm:$0xff] }
   0xb   :  { %2321 = vmatprep.subr.bf16.mxu1 %v2826_v35  ;;  %v2850_v44 = vpack.c.bf16 %v275_v43, %v273_v42  ;;  %v272_v45 = vld [vmem:[%s3926_s3 + $0x60] sm:$0xff]  ;;  %v274_v46 = vld [vmem:[%s3926_s3 + $0x70] sm:$0xff]  ;;  %v2310_v47 = vpack.c.bf16 %v48_v41, %v46_v38  ;;  %v23_v50 = vld [vmem:[%s3927_s0 + $0x8] sm:$0xff] }
   0xc   :  { %v2859_v48 = vpack.c.bf16 %v274_v46, %v272_v45  ;;  %v22_v49 = vld [vmem:[%s3927_s0] sm:$0xff]  ;;  %v24_v51 = vld [vmem:[%s3927_s0 + $0x10] sm:$0xff]  ;;  %v25_v52 = vld [vmem:[%s3927_s0 + $0x18] sm:$0xff] }
   0xd   :  { %2307 = vmatpush1.bf16.msra.mxu0 %v2306_v34  ;;  %v26_v53 = vld [vmem:[%s3927_s0 + $0x20] sm:$0xff]  ;;  %v27_v54 = vld [vmem:[%s3927_s0 + $0x28] sm:$0xff]  ;;  %v28_v55 = vld [vmem:[%s3927_s0 + $0x30] sm:$0xff] }
   0xe   :  { %2323 = vmatpush1.bf16.msra.mxu1 %v2838_v39  ;;  %2309 = vmatprep.subr.bf16.mxu0 %v2308_v40  ;;  %v29_v56 = vld [vmem:[%s3927_s0 + $0x38] sm:$0xff]  ;;  %v30_v57 = vld [vmem:[%s3927_s0 + $0x40] sm:$0xff]  ;;  %v31_v58 = vld [vmem:[%s3927_s0 + $0x48] sm:$0xff] }
   0xf   :  { %2325 = vmatprep.subr.bf16.mxu1 %v2850_v44  ;;  %v32_v59 = vld [vmem:[%s3927_s0 + $0x50] sm:$0xff]  ;;  %v33_v60 = vld [vmem:[%s3927_s0 + $0x58] sm:$0xff]  ;;  %v50_v1 = vld [vmem:[%s3928_s4] sm:$0x3]  ;;  %s2704_s0 = smov 64  }
  0x10   :  { %v55_v4 = vrot.slane %v50_v1, %v54_v0  ;;  %v59_v5 = vrot.slane %v50_v1, %v58_v2 }
  0x11   :  { %2311 = vmatpush1.bf16.msra.mxu0 %v2310_v47 }
  0x12   :  { %2327 = vmatpush1.bf16.msra.mxu1 %v2859_v48  ;;  %2361 = vmatprep.subr.bf16.mxu0 %v2761_v9 }
  0x13   :  { %2329 = vmatprep.subr.bf16.mxu1 %v2761_v9 }
  0x14   :  { %2249 = vmatmul.mubr.msk.f32.vlgmr.msra.gmra.mrb[0].mxu0 %vm62_vm0, %v22_v49 }
  0x15   :  { %344 = vmatmul.mubr.f32.vlgmr.msra.gmra.mrb[0].mxu1 %v3932_v3  ;;  %169 = vmatprep.mubr.f32.mxu0 %v3932_v3 }
  0x16   :  { %2331 = vmatpush1.bf16.msra.mxu1 %v2772_v13  ;;  %500 = vmatprep.mubr.f32.mxu1 %v3932_v3 }
  0x17   :  { %2333 = vmatprep.subr.bf16.mxu1 %v2794_v22  ;;  %2363 = vmatpush1.bf16.msra.mxu0 %v2772_v13 }
  0x18   :  { %2250 = vmatmul.mubr.msk.f32.gmra.mrb[2].mxu0 %vm62_vm0, %v23_v50  ;;  %2365 = vmatprep.subr.bf16.mxu0 %v2794_v22 }
  0x19   :  { %175 = vmatprep.mubr.f32.mxu0 %v3932_v3 }
  0x1a   :  { %2335 = vmatpush1.bf16.msra.mxu1 %v2805_v26 }
  0x1b   :  { %2337 = vmatprep.subr.bf16.mxu1 %v2826_v35  ;;  %2367 = vmatpush1.bf16.msra.mxu0 %v2805_v26 }
  0x1c   :  { %2251 = vmatmul.mubr.msk.f32.gmra.mrb[4].mxu0 %vm62_vm0, %v24_v51  ;;  %2369 = vmatprep.subr.bf16.mxu0 %v2826_v35 }
  0x1d   :  { %181 = vmatprep.mubr.f32.mxu0 %v3932_v3 }
  0x1e   :  { %2339 = vmatpush1.bf16.msra.mxu1 %v2838_v39 }
  0x1f   :  { %2341 = vmatprep.subr.bf16.mxu1 %v2850_v44  ;;  %2371 = vmatpush1.bf16.msra.mxu0 %v2838_v39 }
  0x20   :  { %2252 = vmatmul.mubr.msk.f32.gmra.mrb[6].mxu0 %vm62_vm0, %v25_v52  ;;  %2373 = vmatprep.subr.bf16.mxu0 %v2850_v44 }
  0x21   :  { %187 = vmatprep.mubr.f32.mxu0 %v3932_v3 }
  0x22   :  { %2343 = vmatpush1.bf16.msra.mxu1 %v2859_v48 }
  0x23   :  { %2345 = vmatprep.subr.bf16.mxu1 %v2761_v9  ;;  %2375 = vmatpush1.bf16.msra.mxu0 %v2859_v48 }
  0x24   :  { %2253 = vmatmul.mubr.msk.f32.gmra.mrb[8].mxu0 %vm62_vm0, %v26_v53  ;;  %2393 = vmatprep.subr.bf16.mxu0 %v2761_v9 }
  0x25   :  { %193 = vmatprep.mubr.f32.mxu0 %v3932_v3 }
  0x28   :  { %2254 = vmatmul.mubr.msk.f32.gmra.mrb[10].mxu0 %vm62_vm0, %v27_v54 }
  0x29   :  { %199 = vmatprep.mubr.f32.mxu0 %v3932_v3 }
  0x2c   :  { %2255 = vmatmul.mubr.msk.f32.gmra.mrb[12].mxu0 %vm62_vm0, %v28_v55 }
  0x2d   :  { %205 = vmatprep.mubr.f32.mxu0 %v3932_v3 }
  0x30   :  { %2256 = vmatmul.mubr.msk.f32.gmra.mrb[14].mxu0 %vm62_vm0, %v29_v56 }
  0x31   :  { %211 = vmatprep.mubr.f32.mxu0 %v3932_v3 }
  0x34   :  { %2257 = vmatmul.mubr.msk.f32.gmra.mrb[16].mxu0 %vm62_vm0, %v30_v57 }
  0x35   :  { %217 = vmatprep.mubr.f32.mxu0 %v3932_v3 }
  0x38   :  { %2258 = vmatmul.mubr.msk.f32.gmra.mrb[18].mxu0 %vm62_vm0, %v31_v58 }
  0x39   :  { %223 = vmatprep.mubr.f32.mxu0 %v3932_v3 }
  0x3c   :  { %2259 = vmatmul.mubr.msk.f32.gmra.mrb[20].mxu0 %vm62_vm0, %v32_v59 }
  0x3d   :  { %229 = vmatprep.mubr.f32.mxu0 %v3932_v3 }
  0x40   :  { %2260 = vmatmul.mubr.msk.f32.gmra.mrb[22].mxu0 %vm62_vm0, %v33_v60 }
  0x41   :  { %830 = vmatprep.mubr.f32.mxu0 %v3932_v3 }
  0xe7   :  { %v165_v6 = vpop.f32.mrb[0].mxu0 }
  0xe8   :  { %v166_v7 = vadd.f32 %v165_v6, %v55_v4  ;;  %v167_v8 = vpop.f32.mrb[1].mxu0  ;;  %v345_v10 = vpop.f32.mrb[0].mxu1 }
  0xe9   :  { %v2946_v11 = vadd.f32 %v167_v8, %v59_v5  ;;  %v347_v12 = vpop.f32.mrb[1].mxu1 }
  0xea   :  { %v358_v14 = vadd.f32 %v345_v10, %v166_v7  ;;  %v350_v7 = vld [vmem:[%s3929_s1] sm:$0xff] }
  0xeb   :  { %v171_v15 = vpop.f32.mrb[2].mxu0 }
  0xec   :  { %2510 = vtanh.f32 %v358_v14  ;;  %v2948_v16 = vadd.f32 %v171_v15, %v55_v4  ;;  %v173_v17 = vpop.f32.mrb[3].mxu0  ;;  %v2261_v8 = vmul.f32 -1.442695, %v358_v14  ;;  %v391_v14 = vld [vmem:[%s3929_s1 + $0x58] sm:$0xff] }
  0xed   :  { %v2950_v18 = vadd.f32 %v173_v17, %v59_v5 }
  0xef   :  { %v177_v19 = vpop.f32.mrb[4].mxu0 }
  0xf0   :  { %v2952_v20 = vadd.f32 %v177_v19, %v55_v4  ;;  %v179_v21 = vpop.f32.mrb[5].mxu0 }
  0xf1   :  { %v2954_v23 = vadd.f32 %v179_v21, %v59_v5 }
  0xf3   :  { %v183_v24 = vpop.f32.mrb[6].mxu0 }
  0xf4   :  { %v2956_v25 = vadd.f32 %v183_v24, %v55_v4  ;;  %v185_v27 = vpop.f32.mrb[7].mxu0 }
  0xf5   :  { %v2958_v28 = vadd.f32 %v185_v27, %v59_v5 }
  0xf6   :  { %v2511_v29 = vpop.eup %2510 }
  0xf7   :  { %v189_v30 = vpop.f32.mrb[8].mxu0  ;;  %368 = vrot.lane.b32.xlu0 %v2511_v29, %s2704_s0 }
  0xf8   :  { %v2961_v31 = vadd.f32 %v189_v30, %v55_v4  ;;  %v191_v32 = vpop.f32.mrb[9].mxu0 }
  0xf9   :  { %v2963_v33 = vadd.f32 %v191_v32, %v59_v5 }
  0xfb   :  { %v195_v34 = vpop.f32.mrb[10].mxu0 }
  0xfc   :  { %v2965_v36 = vadd.f32 %v195_v34, %v55_v4  ;;  %v197_v37 = vpop.f32.mrb[11].mxu0 }
  0xfd   :  { %v2967_v38 = vadd.f32 %v197_v37, %v59_v5 }
  0xff   :  { %v201_v40 = vpop.f32.mrb[12].mxu0 }
 0x100   :  { %v2969_v41 = vadd.f32 %v201_v40, %v55_v4  ;;  %v203_v42 = vpop.f32.mrb[13].mxu0 }
 0x101   :  { %v2971_v43 = vadd.f32 %v203_v42, %v59_v5 }
 0x103   :  { %v207_v45 = vpop.f32.mrb[14].mxu0 }
 0x104   :  { %v2973_v46 = vadd.f32 %v207_v45, %v55_v4  ;;  %v209_v47 = vpop.f32.mrb[15].mxu0 }
 0x105   :  { %v2975_v49 = vadd.f32 %v209_v47, %v59_v5 }
 0x107   :  { %v213_v50 = vpop.f32.mrb[16].mxu0 }
 0x108   :  { %v2977_v51 = vadd.f32 %v213_v50, %v55_v4  ;;  %v215_v52 = vpop.f32.mrb[17].mxu0 }
 0x109   :  { %v2979_v53 = vadd.f32 %v215_v52, %v59_v5 }
 0x10b   :  { %v219_v54 = vpop.f32.mrb[18].mxu0 }
 0x10c   :  { %v2981_v55 = vadd.f32 %v219_v54, %v55_v4  ;;  %v221_v56 = vpop.f32.mrb[19].mxu0 }
 0x10d   :  { %v2983_v57 = vadd.f32 %v221_v56, %v59_v5 }
 0x10f   :  { %v225_v58 = vpop.f32.mrb[20].mxu0 }
 0x110   :  { %v2985_v59 = vadd.f32 %v225_v58, %v55_v4  ;;  %v227_v60 = vpop.f32.mrb[21].mxu0 }
 0x111   :  { %v2987_v61 = vadd.f32 %v227_v60, %v59_v5 }
 0x113   :  { %v231_v62 = vpop.f32.mrb[22].mxu0 }
 0x114   :  { %v2989_v63 = vadd.f32 %v231_v62, %v55_v4  ;;  %v233_v0 = vpop.f32.mrb[23].mxu0 }
 0x115   :  { %v234_v1 = vadd.f32 %v233_v0, %v59_v5 }
 0x117   :  { %v399_v2 = vadd.f32 %v347_v12, %v234_v1 }
 0x119   :  { %2512 = vtanh.f32 %v399_v2  ;;  %v2262_v5 = vmul.f32 -1.442695, %v399_v2 }
 0x11a   :  { %2514 = vpow2.f32 %v2261_v8 }
 0x123   :  { %v2513_v6 = vpop.eup %2512 }
 0x124   :  { %409 = vrot.lane.b32.xlu0 %v2513_v6, %s2704_s0  ;;  %v2515_v10 = vpop.eup %2514 }
 0x125   :  { %v362_v15 = vadd.f32 1.0, %v2515_v10 }
 0x127   :  { %2516 = vrcp.f32 %v362_v15 }
 0x128   :  { %353 = vperm.xlu0 %2508, %v350_v7   ;;  %2518 = vpow2.f32 %v2262_v5 }
 0x131   :  { %v2517_v17 = vpop.eup %2516 }
 0x132   :  { %v2519_v12 = vpop.eup %2518  ;;  %v366_v30 = vmul.f32 0.0, %v2517_v17 }
 0x133   :  { %v403_v21 = vadd.f32 1.0, %v2519_v12 }
 0x135   :  { %2520 = vrcp.f32 %v403_v21 }
 0x13f   :  { %v2521_v24 = vpop.eup %2520 }
 0x140   :  { %v407_v40 = vmul.f32 0.0, %v2521_v24 }
 0x169   :  { %v369_v4 = vpop.permute.xlu0 %368 }
 0x16a   :  { %v371_v19 = vmul.f32 %v2517_v17, %v369_v4 }
 0x16c   :  { %373 = vrot.lane.b32.xlu1 %v371_v19, %s2705_s13 }
 0x196   :  { %v410_v27 = vpop.permute.xlu0 %409 }
 0x197   :  { %v412_v29 = vmul.f32 %v2521_v24, %v410_v27 }
 0x199   :  { %414 = vrot.lane.b32.xlu1 %v412_v29, %s2705_s13 }
 0x19d   :  { %394 = vperm.xlu1 %2509, %v391_v14  }
 0x1a7   :  { %v354_v52 = vpop.permute.xlu0 %353 }
 0x1a8   :  { %vm356_vm1 = vcmp.gt.f32.partialorder %v354_v52, 0.0 }
 0x1de   :  { %v374_v32 = vpop.permute.xlu1 %373 }
 0x1df   :  { %v3000_v34 = vadd.f32 %v374_v32, %v366_v30 }
 0x1e1   :  { %2522 = vtanh.f32 %v3000_v34 }
 0x1eb   :  { %v2523_v37 = vpop.eup %2522 }
 0x1ec   :  { %379 = vrot.lane.b32.xlu1 %v2523_v37, %s2704_s0  ;;  %v507_v37 = vld [vmem:[%s3929_s1 + $0x8] sm:$0xff] }
 0x20b   :  { %v415_v42 = vpop.permute.xlu1 %414 }
 0x20c   :  { %v3004_v45 = vadd.f32 %v415_v42, %v407_v40  ;;  %v548_v40 = vld [vmem:[%s3929_s1 + $0x50] sm:$0xff]  ;;  %v3055_v42 = vsel %vm356_vm1, %v3000_v34, 0.0 }
 0x20e   :  { %2524 = vtanh.f32 %v3004_v45 }
 0x218   :  { %v2525_v47 = vpop.eup %2524 }
 0x219   :  { %420 = vrot.lane.b32.xlu0 %v2525_v47, %s2704_s0 }
 0x21c   :  { %v3008_v50 = vpop.permute.xlu1 %394 }
 0x21d   :  { %vm397_vm2 = vcmp.gt.f32.partialorder %v3008_v50, 0.0 }
 0x21e   :  { %v3060_v47 = vsel %vm397_vm2, %v3004_v45, 0.0 }
 0x25e   :  { %v380_v54 = vpop.permute.xlu1 %379 }
 0x25f   :  { %v382_v56 = vmul.f32 %v2517_v17, %v380_v54 }
 0x261   :  { %v3011_v58 = vsel %vm356_vm1, %v382_v56, 0.0 }
 0x262   :  { %385 = vrot.lane.b32.xlu1 %v3011_v58, %s2705_s13 }
 0x28b   :  { %v421_v60 = vpop.permute.xlu0 %420 }
 0x28c   :  { %v423_v62 = vmul.f32 %v2521_v24, %v421_v60 }
 0x28e   :  { %v3018_v0 = vsel %vm397_vm2, %v423_v62, 0.0 }
 0x28f   :  { %426 = vrot.lane.b32.xlu0 %v3018_v0, %s2704_s0 }
 0x2d4   :  { %v386_v1 = vpop.permute.xlu1 %385 }
 0x2d5   :  { %389 = vst.msk [vmem:[%s3930_s5] sm:$0xff] %vm388_vm3, %v386_v1 }
 0x301   :  { %v427_v2 = vpop.permute.xlu0 %426 }
 0x302   :  { %430 = vst.msk [vmem:[%s3930_s5 + $0x58] sm:$0xff] %vm3939_vm4, %v427_v2  ;;  %v432_v6 = vsel %vm388_vm3, %v386_v1, %v427_v2 }
 0x303   :  { %2263 = vmatmul.mubr.msk.f32.vlgmr.msra.gmra.mrb[2].mxu1 %vm62_vm0, %v432_v6 }
 0x304   :  { %2347 = vmatpush1.bf16.msra.mxu1 %v2772_v13  ;;  %665 = vmatprep.mubr.f32.mxu1 %v3932_v3 }
 0x305   :  { %2349 = vmatprep.subr.bf16.mxu1 %v2794_v22 }
 0x308   :  { %2351 = vmatpush1.bf16.msra.mxu1 %v2805_v26 }
 0x309   :  { %2353 = vmatprep.subr.bf16.mxu1 %v2826_v35 }
 0x30c   :  { %2355 = vmatpush1.bf16.msra.mxu1 %v2838_v39 }
 0x30d   :  { %2357 = vmatprep.subr.bf16.mxu1 %v2850_v44 }
 0x310   :  { %2359 = vmatpush1.bf16.msra.mxu1 %v2859_v48 }
 0x311   :  { %2377 = vmatprep.subr.bf16.mxu1 %v2761_v9 }
 0x3d6   :  { %v502_v7 = vpop.f32.mrb[2].mxu1 }
 0x3d7   :  { %v515_v8 = vadd.f32 %v502_v7, %v2948_v16  ;;  %v504_v10 = vpop.f32.mrb[3].mxu1 }
 0x3d8   :  { %v556_v15 = vadd.f32 %v504_v10, %v2987_v61 }
 0x3d9   :  { %2526 = vtanh.f32 %v515_v8  ;;  %v2264_v19 = vmul.f32 -1.442695, %v515_v8 }
 0x3da   :  { %2528 = vtanh.f32 %v556_v15  ;;  %v2265_v5 = vmul.f32 -1.442695, %v556_v15 }
 0x3db   :  { %2530 = vpow2.f32 %v2264_v19 }
 0x3dc   :  { %2532 = vpow2.f32 %v2265_v5 }
 0x3e3   :  { %v2527_v17 = vpop.eup %2526 }
 0x3e4   :  { %v2529_v4 = vpop.eup %2528  ;;  %525 = vrot.lane.b32.xlu1 %v2527_v17, %s2704_s0 }
 0x3e5   :  { %566 = vrot.lane.b32.xlu0 %v2529_v4, %s2704_s0  ;;  %v2531_v12 = vpop.eup %2530 }
 0x3e6   :  { %v2533_v21 = vpop.eup %2532  ;;  %v519_v24 = vadd.f32 1.0, %v2531_v12 }
 0x3e7   :  { %v560_v27 = vadd.f32 1.0, %v2533_v21 }
 0x3e8   :  { %2534 = vrcp.f32 %v519_v24 }
 0x3e9   :  { %2536 = vrcp.f32 %v560_v27 }
 0x3f2   :  { %v2535_v16 = vpop.eup %2534 }
 0x3f3   :  { %v2537_v29 = vpop.eup %2536  ;;  %v523_v54 = vmul.f32 %v2535_v16, %v3055_v42 }
 0x3f4   :  { %v564_v60 = vmul.f32 %v2537_v29, %v3060_v47 }
 0x456   :  { %v526_v61 = vpop.permute.xlu1 %525 }
 0x457   :  { %v528_v14 = vmul.f32 %v2535_v16, %v526_v61  ;;  %v567_v30 = vpop.permute.xlu0 %566 }
 0x458   :  { %v569_v32 = vmul.f32 %v2537_v29, %v567_v30 }
 0x459   :  { %530 = vrot.lane.b32.xlu1 %v528_v14, %s2705_s13 }
 0x45a   :  { %571 = vrot.lane.b32.xlu0 %v569_v32, %s2705_s13 }
 0x45d   :  { %510 = vperm.xlu1 %2509, %v507_v37  }
 0x45e   :  { %551 = vperm.xlu0 %2508, %v548_v40  }
 0x4cb   :  { %v531_v56 = vpop.permute.xlu1 %530 }
 0x4cc   :  { %v3064_v62 = vadd.f32 %v531_v56, %v523_v54  ;;  %v572_v1 = vpop.permute.xlu0 %571 }
 0x4cd   :  { %v3066_v2 = vadd.f32 %v572_v1, %v564_v60  ;;  %v3118_v60 = vld [vmem:[%s3929_s1 + $0x10] sm:$0xff]  ;;  %v3123_v1 = vld [vmem:[%s3929_s1 + $0x48] sm:$0xff] }
 0x4ce   :  { %2538 = vtanh.f32 %v3064_v62 }
 0x4cf   :  { %2540 = vtanh.f32 %v3066_v2 }
 0x4d8   :  { %v2539_v34 = vpop.eup %2538 }
 0x4d9   :  { %v2541_v52 = vpop.eup %2540  ;;  %536 = vrot.lane.b32.xlu1 %v2539_v34, %s2704_s0 }
 0x4da   :  { %577 = vrot.lane.b32.xlu0 %v2541_v52, %s2704_s0 }
 0x4dc   :  { %v3072_v45 = vpop.permute.xlu1 %510 }
 0x4dd   :  { %v3074_v50 = vpop.permute.xlu0 %551  ;;  %vm513_vm5 = vcmp.gt.f32.partialorder %v3072_v45, 0.0 }
 0x4de   :  { %vm554_vm6 = vcmp.gt.f32.partialorder %v3074_v50, 0.0  ;;  %v3131_v34 = vsel %vm513_vm5, %v3064_v62, %v3055_v42 }
 0x4df   :  { %v3137_v52 = vsel %vm554_vm6, %v3066_v2, %v3060_v47 }
 0x54b   :  { %v537_v6 = vpop.permute.xlu1 %536 }
 0x54c   :  { %v3076_v7 = vmul.f32 %v2535_v16, %v537_v6  ;;  %v578_v8 = vpop.permute.xlu0 %577 }
 0x54d   :  { %v3079_v10 = vmul.f32 %v2537_v29, %v578_v8 }
 0x54e   :  { %v3086_v15 = vsel %vm513_vm5, %v3076_v7, %v3011_v58 }
 0x54f   :  { %590 = vrot.lane.b32.xlu1 %v3086_v15, %s2705_s13  ;;  %v3094_v17 = vsel %vm554_vm6, %v3079_v10, %v3018_v0 }
 0x550   :  { %594 = vrot.lane.b32.xlu0 %v3094_v17, %s2704_s0 }
 0x5c1   :  { %v591_v4 = vpop.permute.xlu1 %590 }
 0x5c2   :  { %v595_v19 = vpop.permute.xlu0 %594 }
 0x5c3   :  { %v597_v5 = vsel %vm388_vm3, %v591_v4, %v595_v19 }
 0x5c4   :  { %2266 = vmatmul.mubr.msk.f32.vlgmr.msra.gmra.mrb[4].mxu1 %vm62_vm0, %v597_v5 }
 0x5c5   :  { %2379 = vmatpush1.bf16.msra.mxu1 %v2772_v13  ;;  %995 = vmatprep.mubr.f32.mxu1 %v3932_v3 }
 0x5c6   :  { %2381 = vmatprep.subr.bf16.mxu1 %v2794_v22 }
 0x5c9   :  { %2383 = vmatpush1.bf16.msra.mxu1 %v2805_v26 }
 0x5ca   :  { %2385 = vmatprep.subr.bf16.mxu1 %v2826_v35 }
 0x5cd   :  { %2387 = vmatpush1.bf16.msra.mxu1 %v2838_v39 }
 0x5ce   :  { %2389 = vmatprep.subr.bf16.mxu1 %v2850_v44 }
 0x5d1   :  { %2391 = vmatpush1.bf16.msra.mxu1 %v2859_v48 }
 0x5d2   :  { %2409 = vmatprep.subr.bf16.mxu1 %v2761_v9 }
 0x697   :  { %v667_v58 = vpop.f32.mrb[4].mxu1 }
 0x698   :  { %v680_v0 = vadd.f32 %v667_v58, %v2952_v20  ;;  %v669_v12 = vpop.f32.mrb[5].mxu1 }
 0x699   :  { %v721_v21 = vadd.f32 %v669_v12, %v2983_v57 }
 0x69a   :  { %2542 = vtanh.f32 %v680_v0  ;;  %v2267_v16 = vmul.f32 -1.442695, %v680_v0 }
 0x69b   :  { %2544 = vtanh.f32 %v721_v21  ;;  %v2268_v61 = vmul.f32 -1.442695, %v721_v21 }
 0x69c   :  { %2546 = vpow2.f32 %v2267_v16 }
 0x69d   :  { %2548 = vpow2.f32 %v2268_v61 }
 0x6a4   :  { %v2543_v24 = vpop.eup %2542 }
 0x6a5   :  { %v2545_v27 = vpop.eup %2544  ;;  %690 = vrot.lane.b32.xlu1 %v2543_v24, %s2704_s0 }
 0x6a6   :  { %731 = vrot.lane.b32.xlu0 %v2545_v27, %s2704_s0  ;;  %v2547_v29 = vpop.eup %2546 }
 0x6a7   :  { %v2549_v14 = vpop.eup %2548  ;;  %v684_v30 = vadd.f32 1.0, %v2547_v29 }
 0x6a8   :  { %v725_v32 = vadd.f32 1.0, %v2549_v14 }
 0x6a9   :  { %2550 = vrcp.f32 %v684_v30 }
 0x6aa   :  { %2552 = vrcp.f32 %v725_v32 }
 0x6b3   :  { %v2551_v20 = vpop.eup %2550 }
 0x6b4   :  { %v2553_v37 = vpop.eup %2552  ;;  %v688_v6 = vmul.f32 %v2551_v20, %v3131_v34 }
 0x6b5   :  { %v729_v4 = vmul.f32 %v2553_v37, %v3137_v52 }
 0x717   :  { %v691_v57 = vpop.permute.xlu1 %690 }
 0x718   :  { %v693_v40 = vmul.f32 %v2551_v20, %v691_v57  ;;  %v732_v54 = vpop.permute.xlu0 %731 }
 0x719   :  { %v734_v56 = vmul.f32 %v2553_v37, %v732_v54 }
 0x71a   :  { %695 = vrot.lane.b32.xlu1 %v693_v40, %s2705_s13 }
 0x71b   :  { %736 = vrot.lane.b32.xlu0 %v734_v56, %s2705_s13 }
 0x71e   :  { %675 = vperm.xlu1 %2509, %v3118_v60  }
 0x71f   :  { %716 = vperm.xlu0 %2508, %v3123_v1  }
 0x78c   :  { %v696_v8 = vpop.permute.xlu1 %695 }
 0x78d   :  { %v3141_v19 = vadd.f32 %v696_v8, %v688_v6  ;;  %v737_v5 = vpop.permute.xlu0 %736 }
 0x78e   :  { %v3143_v58 = vadd.f32 %v737_v5, %v729_v4 }
 0x78f   :  { %2554 = vtanh.f32 %v3141_v19 }
 0x790   :  { %2556 = vtanh.f32 %v3143_v58 }
 0x799   :  { %v2555_v42 = vpop.eup %2554 }
 0x79a   :  { %v2557_v62 = vpop.eup %2556  ;;  %701 = vrot.lane.b32.xlu1 %v2555_v42, %s2704_s0 }
 0x79b   :  { %742 = vrot.lane.b32.xlu0 %v2557_v62, %s2704_s0 }
 0x79d   :  { %v3149_v47 = vpop.permute.xlu1 %675 }
 0x79e   :  { %v3151_v2 = vpop.permute.xlu0 %716  ;;  %vm678_vm7 = vcmp.gt.f32.partialorder %v3149_v47, 0.0 }
 0x79f   :  { %vm719_vm8 = vcmp.gt.f32.partialorder %v3151_v2, 0.0 }
 0x80c   :  { %v702_v0 = vpop.permute.xlu1 %701 }
 0x80d   :  { %v3153_v12 = vmul.f32 %v2551_v20, %v702_v0  ;;  %v743_v21 = vpop.permute.xlu0 %742  ;;  %v3195_v0 = vld [vmem:[%s3929_s1 + $0x18] sm:$0xff] }
 0x80e   :  { %v3156_v24 = vmul.f32 %v2553_v37, %v743_v21  ;;  %v3200_v21 = vld [vmem:[%s3929_s1 + $0x40] sm:$0xff] }
 0x80f   :  { %v3163_v27 = vsel %vm678_vm7, %v3153_v12, %v3086_v15 }
 0x810   :  { %755 = vrot.lane.b32.xlu1 %v3163_v27, %s2705_s13  ;;  %v3171_v16 = vsel %vm719_vm8, %v3156_v24, %v3094_v17 }
 0x811   :  { %759 = vrot.lane.b32.xlu0 %v3171_v16, %s2704_s0 }
 0x882   :  { %v756_v61 = vpop.permute.xlu1 %755 }
 0x883   :  { %v760_v29 = vpop.permute.xlu0 %759 }
 0x884   :  { %v762_v14 = vsel %vm388_vm3, %v756_v61, %v760_v29  ;;  %v3208_v61 = vsel %vm678_vm7, %v3141_v19, %v3131_v34  ;;  %v3214_v29 = vsel %vm719_vm8, %v3143_v58, %v3137_v52 }
 0x885   :  { %2269 = vmatmul.mubr.msk.f32.vlgmr.msra.gmra.mrb[24].mxu0 %vm62_vm0, %v762_v14 }
 0x886   :  { %2395 = vmatpush1.bf16.msra.mxu0 %v2772_v13  ;;  %1160 = vmatprep.mubr.f32.mxu0 %v3932_v3 }
 0x887   :  { %2397 = vmatprep.subr.bf16.mxu0 %v2794_v22 }
 0x88a   :  { %2399 = vmatpush1.bf16.msra.mxu0 %v2805_v26 }
 0x88b   :  { %2401 = vmatprep.subr.bf16.mxu0 %v2826_v35 }
 0x88e   :  { %2403 = vmatpush1.bf16.msra.mxu0 %v2838_v39 }
 0x88f   :  { %2405 = vmatprep.subr.bf16.mxu0 %v2850_v44 }
 0x892   :  { %2407 = vmatpush1.bf16.msra.mxu0 %v2859_v48 }
 0x893   :  { %2425 = vmatprep.subr.bf16.mxu0 %v2761_v9 }
 0x958   :  { %v832_v15 = vpop.f32.mrb[24].mxu0 }
 0x959   :  { %v845_v17 = vadd.f32 %v832_v15, %v2956_v25  ;;  %v834_v30 = vpop.f32.mrb[25].mxu0 }
 0x95a   :  { %v886_v32 = vadd.f32 %v834_v30, %v2979_v53 }
 0x95b   :  { %2558 = vtanh.f32 %v845_v17  ;;  %v2270_v37 = vmul.f32 -1.442695, %v845_v17 }
 0x95c   :  { %2560 = vtanh.f32 %v886_v32  ;;  %v2271_v40 = vmul.f32 -1.442695, %v886_v32 }
 0x95d   :  { %2562 = vpow2.f32 %v2270_v37 }
 0x95e   :  { %2564 = vpow2.f32 %v2271_v40 }
 0x965   :  { %v2559_v20 = vpop.eup %2558 }
 0x966   :  { %v2561_v57 = vpop.eup %2560  ;;  %855 = vrot.lane.b32.xlu1 %v2559_v20, %s2704_s0 }
 0x967   :  { %896 = vrot.lane.b32.xlu0 %v2561_v57, %s2704_s0  ;;  %v2563_v54 = vpop.eup %2562 }
 0x968   :  { %v2565_v56 = vpop.eup %2564  ;;  %v849_v6 = vadd.f32 1.0, %v2563_v54 }
 0x969   :  { %v890_v8 = vadd.f32 1.0, %v2565_v56 }
 0x96a   :  { %2566 = vrcp.f32 %v849_v6 }
 0x96b   :  { %2568 = vrcp.f32 %v890_v8 }
 0x974   :  { %v2567_v25 = vpop.eup %2566 }
 0x975   :  { %v2569_v4 = vpop.eup %2568  ;;  %v853_v14 = vmul.f32 %v2567_v25, %v3208_v61 }
 0x976   :  { %v894_v17 = vmul.f32 %v2569_v4, %v3214_v29 }
 0x9d8   :  { %v856_v53 = vpop.permute.xlu1 %855 }
 0x9d9   :  { %v858_v5 = vmul.f32 %v2567_v25, %v856_v53  ;;  %v897_v42 = vpop.permute.xlu0 %896 }
 0x9da   :  { %v899_v62 = vmul.f32 %v2569_v4, %v897_v42 }
 0x9db   :  { %860 = vrot.lane.b32.xlu1 %v858_v5, %s2705_s13 }
 0x9dc   :  { %901 = vrot.lane.b32.xlu0 %v899_v62, %s2705_s13 }
 0x9df   :  { %840 = vperm.xlu1 %2509, %v3195_v0  }
 0x9e0   :  { %881 = vperm.xlu0 %2508, %v3200_v21  }
 0xa4d   :  { %v861_v15 = vpop.permute.xlu1 %860 }
 0xa4e   :  { %v3218_v30 = vadd.f32 %v861_v15, %v853_v14  ;;  %v902_v32 = vpop.permute.xlu0 %901 }
 0xa4f   :  { %v3220_v20 = vadd.f32 %v902_v32, %v894_v17 }
 0xa50   :  { %2570 = vtanh.f32 %v3218_v30 }
 0xa51   :  { %2572 = vtanh.f32 %v3220_v20 }
 0xa5a   :  { %v2571_v34 = vpop.eup %2570 }
 0xa5b   :  { %v2573_v19 = vpop.eup %2572  ;;  %866 = vrot.lane.b32.xlu1 %v2571_v34, %s2704_s0 }
 0xa5c   :  { %907 = vrot.lane.b32.xlu0 %v2573_v19, %s2704_s0 }
 0xa5e   :  { %v3226_v52 = vpop.permute.xlu1 %840 }
 0xa5f   :  { %v3228_v58 = vpop.permute.xlu0 %881  ;;  %vm843_vm9 = vcmp.gt.f32.partialorder %v3226_v52, 0.0 }
 0xa60   :  { %vm884_vm10 = vcmp.gt.f32.partialorder %v3228_v58, 0.0 }
 0xacd   :  { %v867_v57 = vpop.permute.xlu1 %866 }
 0xace   :  { %v3230_v37 = vmul.f32 %v2567_v25, %v867_v57  ;;  %v908_v40 = vpop.permute.xlu0 %907 }
 0xacf   :  { %v3233_v54 = vmul.f32 %v2569_v4, %v908_v40 }
 0xad0   :  { %v3240_v56 = vsel %vm843_vm9, %v3230_v37, %v3163_v27  ;;  %v870_v45 = vsel %vm843_vm9, %v3230_v37, 0.0 }
 0xad1   :  { %920 = vrot.lane.b32.xlu1 %v3240_v56, %s2705_s13  ;;  %v3248_v6 = vsel %vm884_vm10, %v3233_v54, %v3171_v16  ;;  %v911_v50 = vsel %vm884_vm10, %v3233_v54, 0.0 }
 0xad2   :  { %924 = vrot.lane.b32.xlu0 %v3248_v6, %s2704_s0 }
 0xb43   :  { %v921_v8 = vpop.permute.xlu1 %920 }
 0xb44   :  { %v925_v25 = vpop.permute.xlu0 %924 }
 0xb45   :  { %v927_v53 = vsel %vm388_vm3, %v921_v8, %v925_v25 }
 0xb46   :  { %2272 = vmatmul.mubr.msk.f32.vlgmr.msra.gmra.mrb[6].mxu1 %vm62_vm0, %v927_v53  ;;  %v3272_v53 = vld [vmem:[%s3929_s1 + $0x20] sm:$0xff] }
 0xb47   :  { %2411 = vmatpush1.bf16.msra.mxu1 %v2772_v13  ;;  %1325 = vmatprep.mubr.f32.mxu1 %v3932_v3 }
 0xb48   :  { %2413 = vmatprep.subr.bf16.mxu1 %v2794_v22 }
 0xb4b   :  { %2415 = vmatpush1.bf16.msra.mxu1 %v2805_v26 }
 0xb4c   :  { %2417 = vmatprep.subr.bf16.mxu1 %v2826_v35 }
 0xb4f   :  { %2419 = vmatpush1.bf16.msra.mxu1 %v2838_v39 }
 0xb50   :  { %2421 = vmatprep.subr.bf16.mxu1 %v2850_v44 }
 0xb53   :  { %2423 = vmatpush1.bf16.msra.mxu1 %v2859_v48 }
 0xb54   :  { %2441 = vmatprep.subr.bf16.mxu1 %v2761_v9 }
 0xc19   :  { %v997_v27 = vpop.f32.mrb[6].mxu1 }
 0xc1a   :  { %v1010_v16 = vadd.f32 %v997_v27, %v2961_v31  ;;  %v999_v4 = vpop.f32.mrb[7].mxu1  ;;  %v3277_v27 = vld [vmem:[%s3929_s1 + $0x38] sm:$0xff] }
 0xc1b   :  { %v1051_v5 = vadd.f32 %v999_v4, %v2975_v49 }
 0xc1c   :  { %2574 = vtanh.f32 %v1010_v16  ;;  %v2273_v14 = vmul.f32 -1.442695, %v1010_v16  ;;  %v3285_v16 = vsel %vm843_vm9, %v3218_v30, %v3208_v61 }
 0xc1d   :  { %2576 = vtanh.f32 %v1051_v5  ;;  %v2274_v15 = vmul.f32 -1.442695, %v1051_v5  ;;  %v3292_v5 = vsel %vm884_vm10, %v3220_v20, %v3214_v29 }
 0xc1e   :  { %2578 = vpow2.f32 %v2273_v14 }
 0xc1f   :  { %2580 = vpow2.f32 %v2274_v15 }
 0xc26   :  { %v2575_v42 = vpop.eup %2574 }
 0xc27   :  { %v2577_v62 = vpop.eup %2576  ;;  %1020 = vrot.lane.b32.xlu1 %v2575_v42, %s2704_s0 }
 0xc28   :  { %1061 = vrot.lane.b32.xlu0 %v2577_v62, %s2704_s0  ;;  %v2579_v17 = vpop.eup %2578 }
 0xc29   :  { %v2581_v32 = vpop.eup %2580  ;;  %v1014_v34 = vadd.f32 1.0, %v2579_v17 }
 0xc2a   :  { %v1055_v19 = vadd.f32 1.0, %v2581_v32 }
 0xc2b   :  { %2582 = vrcp.f32 %v1014_v34 }
 0xc2c   :  { %2584 = vrcp.f32 %v1055_v19 }
 0xc35   :  { %v2583_v31 = vpop.eup %2582 }
 0xc36   :  { %v2585_v57 = vpop.eup %2584  ;;  %v1018_v4 = vmul.f32 %v2583_v31, %v3285_v16 }
 0xc37   :  { %v1059_v62 = vmul.f32 %v2585_v57, %v3292_v5 }
 0xc99   :  { %v1021_v49 = vpop.permute.xlu1 %1020 }
 0xc9a   :  { %v1023_v40 = vmul.f32 %v2583_v31, %v1021_v49  ;;  %v1062_v8 = vpop.permute.xlu0 %1061 }
 0xc9b   :  { %v1064_v25 = vmul.f32 %v2585_v57, %v1062_v8 }
 0xc9c   :  { %1025 = vrot.lane.b32.xlu1 %v1023_v40, %s2705_s13 }
 0xc9d   :  { %1066 = vrot.lane.b32.xlu0 %v1064_v25, %s2705_s13 }
 0xca0   :  { %1005 = vperm.xlu1 %2509, %v3272_v53  }
 0xca1   :  { %1046 = vperm.xlu0 %2508, %v3277_v27  }
 0xd0e   :  { %v1026_v42 = vpop.permute.xlu1 %1025 }
 0xd0f   :  { %v3295_v14 = vadd.f32 %v1026_v42, %v1018_v4  ;;  %v1067_v15 = vpop.permute.xlu0 %1066 }
 0xd10   :  { %v3297_v17 = vadd.f32 %v1067_v15, %v1059_v62 }
 0xd11   :  { %2586 = vtanh.f32 %v3295_v14 }
 0xd12   :  { %2588 = vtanh.f32 %v3297_v17 }
 0xd1b   :  { %v2587_v61 = vpop.eup %2586 }
 0xd1c   :  { %v2589_v30 = vpop.eup %2588  ;;  %1031 = vrot.lane.b32.xlu1 %v2587_v61, %s2704_s0 }
 0xd1d   :  { %1072 = vrot.lane.b32.xlu0 %v2589_v30, %s2704_s0 }
 0xd1f   :  { %v3303_v29 = vpop.permute.xlu1 %1005 }
 0xd20   :  { %3946 = vst [vmem:[#allocation3_spill] sm:$0xff] %v3303_v29  ;;  %v3305_v20 = vpop.permute.xlu0 %1046  ;;  %vm1008_vm11 = vcmp.gt.f32.partialorder %v3303_v29, 0.0 }
 0xd21   :  { %3947 = vst [vmem:[#allocation4_spill] sm:$0xff] %v3305_v20  ;;  %vm1049_vm12 = vcmp.gt.f32.partialorder %v3305_v20, 0.0 }
 0xd8e   :  { %v1032_v32 = vpop.permute.xlu1 %1031 }
 0xd8f   :  { %v3307_v34 = vmul.f32 %v2583_v31, %v1032_v32  ;;  %v1073_v19 = vpop.permute.xlu0 %1072 }
 0xd90   :  { %v3310_v49 = vmul.f32 %v2585_v57, %v1073_v19 }
 0xd91   :  { %v3317_v40 = vsel %vm1008_vm11, %v3307_v34, %v3240_v56 }
 0xd92   :  { %3948 = vst [vmem:[#allocation5_spill] sm:$0xff] %v3310_v49  ;;  %1085 = vrot.lane.b32.xlu1 %v3317_v40, %s2705_s13  ;;  %v3325_v31 = vsel %vm1049_vm12, %v3310_v49, %v3248_v6 }
 0xd93   :  { %1089 = vrot.lane.b32.xlu0 %v3325_v31, %s2704_s0 }
 0xd99   :  { %v3953_v47 = vld [vmem:[#allocation5_spill] sm:$0xff] }
 0xe04   :  { %v1086_v57 = vpop.permute.xlu1 %1085 }
 0xe05   :  { %v1090_v8 = vpop.permute.xlu0 %1089 }
 0xe06   :  { %v1092_v25 = vsel %vm388_vm3, %v1086_v57, %v1090_v8 }
 0xe07   :  { %2275 = vmatmul.mubr.msk.f32.vlgmr.msra.gmra.mrb[26].mxu0 %vm62_vm0, %v1092_v25 }
 0xe08   :  { %2427 = vmatpush1.bf16.msra.mxu0 %v2772_v13  ;;  %1490 = vmatprep.mubr.f32.mxu0 %v3932_v3 }
 0xe09   :  { %2429 = vmatprep.subr.bf16.mxu0 %v2794_v22 }
 0xe0c   :  { %2431 = vmatpush1.bf16.msra.mxu0 %v2805_v26 }
 0xe0d   :  { %2433 = vmatprep.subr.bf16.mxu0 %v2826_v35 }
 0xe10   :  { %2435 = vmatpush1.bf16.msra.mxu0 %v2838_v39 }
 0xe11   :  { %2437 = vmatprep.subr.bf16.mxu0 %v2850_v44 }
 0xe14   :  { %2439 = vmatpush1.bf16.msra.mxu0 %v2859_v48 }
 0xe15   :  { %2457 = vmatprep.subr.bf16.mxu0 %v2761_v9 }
 0xeda   :  { %v1162_v56 = vpop.f32.mrb[26].mxu0 }
 0xedb   :  { %v1175_v6 = vadd.f32 %v1162_v56, %v2965_v36  ;;  %v1164_v4 = vpop.f32.mrb[27].mxu0 }
 0xedc   :  { %v1216_v42 = vadd.f32 %v1164_v4, %v2971_v43 }
 0xedd   :  { %2590 = vtanh.f32 %v1175_v6  ;;  %v2276_v61 = vmul.f32 -1.442695, %v1175_v6  ;;  %v3349_v6 = vld [vmem:[%s3929_s1 + $0x28] sm:$0xff] }
 0xede   :  { %2592 = vtanh.f32 %v1216_v42  ;;  %v2277_v30 = vmul.f32 -1.442695, %v1216_v42  ;;  %v3354_v42 = vld [vmem:[%s3929_s1 + $0x30] sm:$0xff] }
 0xedf   :  { %2594 = vpow2.f32 %v2276_v61 }
 0xee0   :  { %2596 = vpow2.f32 %v2277_v30 }
 0xee7   :  { %v2591_v62 = vpop.eup %2590 }
 0xee8   :  { %v2593_v15 = vpop.eup %2592  ;;  %1185 = vrot.lane.b32.xlu1 %v2591_v62, %s2704_s0  ;;  %v3362_v62 = vsel %vm1008_vm11, %v3295_v14, %v3285_v16 }
 0xee9   :  { %1226 = vrot.lane.b32.xlu0 %v2593_v15, %s2704_s0  ;;  %v2595_v32 = vpop.eup %2594 }
 0xeea   :  { %v2597_v19 = vpop.eup %2596  ;;  %v1179_v57 = vadd.f32 1.0, %v2595_v32 }
 0xeeb   :  { %v1220_v8 = vadd.f32 1.0, %v2597_v19 }
 0xeec   :  { %2598 = vrcp.f32 %v1179_v57 }
 0xeed   :  { %2600 = vrcp.f32 %v1220_v8 }
 0xef6   :  { %v2599_v36 = vpop.eup %2598 }
 0xef7   :  { %v2601_v25 = vpop.eup %2600  ;;  %v1183_v15 = vmul.f32 %v2599_v36, %v3362_v62 }
 0xf5a   :  { %v1186_v43 = vpop.permute.xlu1 %1185 }
 0xf5b   :  { %v1188_v56 = vmul.f32 %v2599_v36, %v1186_v43  ;;  %v1227_v4 = vpop.permute.xlu0 %1226 }
 0xf5c   :  { %v1229_v3 = vmul.f32 %v2601_v25, %v1227_v4 }
 0xf5d   :  { %1190 = vrot.lane.b32.xlu1 %v1188_v56, %s2705_s13 }
 0xf5e   :  { %1231 = vrot.lane.b32.xlu0 %v1229_v3, %s2705_s13  ;;  %v3368_v3 = vsel %vm1049_vm12, %v3297_v17, %v3292_v5 }
 0xf5f   :  { %v1224_v30 = vmul.f32 %v2601_v25, %v3368_v3 }
 0xf61   :  { %1170 = vperm.xlu1 %2509, %v3349_v6  }
 0xf62   :  { %1211 = vperm.xlu0 %2508, %v3354_v42  }
 0xfcf   :  { %v1191_v61 = vpop.permute.xlu1 %1190 }
 0xfd0   :  { %v3372_v32 = vadd.f32 %v1191_v61, %v1183_v15  ;;  %v1232_v19 = vpop.permute.xlu0 %1231 }
 0xfd1   :  { %v3374_v57 = vadd.f32 %v1232_v19, %v1224_v30 }
 0xfd2   :  { %2602 = vtanh.f32 %v3372_v32 }
 0xfd3   :  { %2604 = vtanh.f32 %v3374_v57 }
 0xfdc   :  { %v2603_v16 = vpop.eup %2602 }
 0xfdd   :  { %v2605_v14 = vpop.eup %2604  ;;  %1196 = vrot.lane.b32.xlu1 %v2603_v16, %s2704_s0 }
 0xfde   :  { %1237 = vrot.lane.b32.xlu0 %v2605_v14, %s2704_s0 }
 0xfe0   :  { %v3380_v5 = vpop.permute.xlu1 %1170 }
 0xfe1   :  { %v3382_v17 = vpop.permute.xlu0 %1211  ;;  %vm1173_vm13 = vcmp.gt.f32.partialorder %v3380_v5, 0.0 }
 0xfe2   :  { %vm1214_vm14 = vcmp.gt.f32.partialorder %v3382_v17, 0.0 }
0x104f   :  { %v1197_v8 = vpop.permute.xlu1 %1196 }
0x1050   :  { %v3384_v43 = vmul.f32 %v2599_v36, %v1197_v8  ;;  %v1238_v56 = vpop.permute.xlu0 %1237 }
0x1051   :  { %v3387_v4 = vmul.f32 %v2601_v25, %v1238_v56 }
0x1052   :  { %3949 = vst [vmem:[#allocation6_spill] sm:$0xff] %v3384_v43  ;;  %v3394_v15 = vsel %vm1173_vm13, %v3384_v43, %v3317_v40  ;;  %v3951_v40 = vmov 0.0  }
0x1053   :  { %3950 = vst [vmem:[#allocation7_spill] sm:$0xff] %v3387_v4  ;;  %1250 = vrot.lane.b32.xlu1 %v3394_v15, %s2705_s13  ;;  %v3402_v36 = vsel %vm1214_vm14, %v3387_v4, %v3325_v31 }
0x1054   :  { %1254 = vrot.lane.b32.xlu0 %v3402_v36, %s2704_s0 }
0x105a   :  { %v3956_v58 = vld [vmem:[#allocation7_spill] sm:$0xff] }
0x105b   :  { %v1241_v37 = vsel %vm1214_vm14, %v3956_v58, 0.0 }
0x10c5   :  { %v1251_v25 = vpop.permute.xlu1 %1250 }
0x10c6   :  { %v1255_v61 = vpop.permute.xlu0 %1254 }
0x10c7   :  { %v1257_v30 = vsel %vm388_vm3, %v1251_v25, %v1255_v61 }
0x10c8   :  { %2278 = vmatmul.mubr.msk.f32.vlgmr.msra.gmra.mrb[8].mxu1 %vm62_vm0, %v1257_v30 }
0x10c9   :  { %2443 = vmatpush1.bf16.msra.mxu1 %v2772_v13  ;;  %1655 = vmatprep.mubr.f32.mxu1 %v3951_v40 }
0x10ca   :  { %2445 = vmatprep.subr.bf16.mxu1 %v2794_v22 }
0x10cd   :  { %2447 = vmatpush1.bf16.msra.mxu1 %v2805_v26 }
0x10ce   :  { %2449 = vmatprep.subr.bf16.mxu1 %v2826_v35 }
0x10d1   :  { %2451 = vmatpush1.bf16.msra.mxu1 %v2838_v39 }
0x10d2   :  { %2453 = vmatprep.subr.bf16.mxu1 %v2850_v44 }
0x10d5   :  { %2455 = vmatpush1.bf16.msra.mxu1 %v2859_v48 }
0x10d6   :  { %2473 = vmatprep.subr.bf16.mxu1 %v2761_v9 }
0x119b   :  { %v1327_v31 = vpop.f32.mrb[8].mxu1 }
0x119c   :  { %v1340_v19 = vadd.f32 %v1327_v31, %v2969_v41  ;;  %v1329_v16 = vpop.f32.mrb[9].mxu1 }
0x119d   :  { %v1381_v14 = vadd.f32 %v1329_v16, %v2967_v38 }
0x119e   :  { %2606 = vtanh.f32 %v1340_v19  ;;  %v2279_v25 = vmul.f32 -1.442695, %v1340_v19 }
0x119f   :  { %2608 = vtanh.f32 %v1381_v14  ;;  %v2280_v61 = vmul.f32 -1.442695, %v1381_v14 }
0x11a0   :  { %2610 = vpow2.f32 %v2279_v25 }
0x11a1   :  { %2612 = vpow2.f32 %v2280_v61 }
0x11a8   :  { %v2607_v8 = vpop.eup %2606 }
0x11a9   :  { %v2609_v56 = vpop.eup %2608  ;;  %1350 = vrot.lane.b32.xlu1 %v2607_v8, %s2704_s0 }
0x11aa   :  { %1391 = vrot.lane.b32.xlu0 %v2609_v56, %s2704_s0  ;;  %v2611_v30 = vpop.eup %2610 }
0x11ab   :  { %v2613_v4 = vpop.eup %2612  ;;  %v1344_v43 = vadd.f32 1.0, %v2611_v30 }
0x11ac   :  { %v1385_v20 = vadd.f32 1.0, %v2613_v4 }
0x11ad   :  { %2614 = vrcp.f32 %v1344_v43  ;;  %v3429_v43 = vsel %vm1173_vm13, %v3372_v32, %v3362_v62 }
0x11ae   :  { %2616 = vrcp.f32 %v1385_v20  ;;  %v3435_v20 = vsel %vm1214_vm14, %v3374_v57, %v3368_v3 }
0x11b7   :  { %v2615_v41 = vpop.eup %2614 }
0x11b8   :  { %v2617_v31 = vpop.eup %2616 }
0x121b   :  { %v1351_v38 = vpop.permute.xlu1 %1350 }
0x121c   :  { %v1353_v16 = vmul.f32 %v2615_v41, %v1351_v38  ;;  %v1392_v49 = vpop.permute.xlu0 %1391 }
0x121d   :  { %v1394_v29 = vmul.f32 %v2617_v31, %v1392_v49  ;;  %v1348_v49 = vmul.f32 %v2615_v41, %v3429_v43 }
0x121e   :  { %1355 = vrot.lane.b32.xlu1 %v1353_v16, %s2705_s13 }
0x121f   :  { %1396 = vrot.lane.b32.xlu0 %v1394_v29, %s2705_s13  ;;  %v1389_v29 = vmul.f32 %v2617_v31, %v3435_v20 }
0x1222   :  { %1335 = vperm.xlu1 %2509, %v3354_v42  }
0x1223   :  { %1376 = vperm.xlu0 %2508, %v3349_v6  }
0x1290   :  { %v1356_v4 = vpop.permute.xlu1 %1355 }
0x1291   :  { %v3439_v42 = vadd.f32 %v1356_v4, %v1348_v49  ;;  %v1397_v6 = vpop.permute.xlu0 %1396 }
0x1292   :  { %v3441_v19 = vadd.f32 %v1397_v6, %v1389_v29 }
0x1293   :  { %2618 = vtanh.f32 %v3439_v42 }
0x1294   :  { %2620 = vtanh.f32 %v3441_v19 }
0x129d   :  { %v2619_v62 = vpop.eup %2618 }
0x129e   :  { %v2621_v32 = vpop.eup %2620  ;;  %1361 = vrot.lane.b32.xlu1 %v2619_v62, %s2704_s0 }
0x129f   :  { %1402 = vrot.lane.b32.xlu0 %v2621_v32, %s2704_s0 }
0x12a1   :  { %v3447_v3 = vpop.permute.xlu1 %1335 }
0x12a2   :  { %v3449_v57 = vpop.permute.xlu0 %1376  ;;  %vm1338_vm15 = vcmp.gt.f32.partialorder %v3447_v3, 0.0 }
0x12a3   :  { %vm1379_vm1 = vcmp.gt.f32.partialorder %v3449_v57, 0.0 }
0x1310   :  { %v1362_v14 = vpop.permute.xlu1 %1361 }
0x1311   :  { %v3451_v8 = vmul.f32 %v2615_v41, %v1362_v14  ;;  %v1403_v56 = vpop.permute.xlu0 %1402 }
0x1312   :  { %v3454_v25 = vmul.f32 %v2617_v31, %v1403_v56 }
0x1313   :  { %v3461_v61 = vsel %vm1338_vm15, %v3451_v8, %v3394_v15  ;;  %v1365_v54 = vsel %vm1338_vm15, %v3451_v8, 0.0 }
0x1314   :  { %1415 = vrot.lane.b32.xlu1 %v3461_v61, %s2705_s13  ;;  %v3469_v30 = vsel %vm1379_vm1, %v3454_v25, %v3402_v36 }
0x1315   :  { %1419 = vrot.lane.b32.xlu0 %v3469_v30, %s2704_s0 }
0x1386   :  { %v1416_v41 = vpop.permute.xlu1 %1415 }
0x1387   :  { %v1420_v38 = vpop.permute.xlu0 %1419 }
0x1388   :  { %v1422_v31 = vsel %vm388_vm3, %v1416_v41, %v1420_v38 }
0x1389   :  { %2281 = vmatmul.mubr.msk.f32.vlgmr.msra.gmra.mrb[28].mxu0 %vm62_vm0, %v1422_v31 }
0x138a   :  { %2459 = vmatpush1.bf16.msra.mxu0 %v2772_v13  ;;  %1820 = vmatprep.mubr.f32.mxu0 %v3951_v40 }
0x138b   :  { %2461 = vmatprep.subr.bf16.mxu0 %v2794_v22 }
0x138e   :  { %2463 = vmatpush1.bf16.msra.mxu0 %v2805_v26 }
0x138f   :  { %2465 = vmatprep.subr.bf16.mxu0 %v2826_v35 }
0x1392   :  { %2467 = vmatpush1.bf16.msra.mxu0 %v2838_v39 }
0x1393   :  { %2469 = vmatprep.subr.bf16.mxu0 %v2850_v44 }
0x1396   :  { %2471 = vmatpush1.bf16.msra.mxu0 %v2859_v48 }
0x1397   :  { %2489 = vmatprep.subr.bf16.mxu0 %v2761_v9 }
0x145c   :  { %v1492_v15 = vpop.f32.mrb[28].mxu0 }
0x145d   :  { %v1505_v36 = vadd.f32 %v1492_v15, %v2973_v46  ;;  %v1494_v16 = vpop.f32.mrb[29].mxu0 }
0x145e   :  { %v1546_v49 = vadd.f32 %v1494_v16, %v2963_v33  ;;  %v3502_v16 = vsel %vm1379_vm1, %v3441_v19, %v3435_v20 }
0x145f   :  { %2622 = vtanh.f32 %v1505_v36  ;;  %v2282_v6 = vmul.f32 -1.442695, %v1505_v36  ;;  %v3496_v36 = vsel %vm1338_vm15, %v3439_v42, %v3429_v43 }
0x1460   :  { %2624 = vtanh.f32 %v1546_v49  ;;  %v2283_v62 = vmul.f32 -1.442695, %v1546_v49 }
0x1461   :  { %2626 = vpow2.f32 %v2282_v6 }
0x1462   :  { %2628 = vpow2.f32 %v2283_v62 }
0x1469   :  { %v2623_v4 = vpop.eup %2622 }
0x146a   :  { %v2625_v29 = vpop.eup %2624  ;;  %1515 = vrot.lane.b32.xlu1 %v2623_v4, %s2704_s0 }
0x146b   :  { %1556 = vrot.lane.b32.xlu0 %v2625_v29, %s2704_s0  ;;  %v2627_v32 = vpop.eup %2626 }
0x146c   :  { %v2629_v9 = vpop.eup %2628  ;;  %v1509_v14 = vadd.f32 1.0, %v2627_v32 }
0x146d   :  { %v1550_v56 = vadd.f32 1.0, %v2629_v9 }
0x146e   :  { %2630 = vrcp.f32 %v1509_v14 }
0x146f   :  { %2632 = vrcp.f32 %v1550_v56 }
0x1478   :  { %v2631_v46 = vpop.eup %2630 }
0x1479   :  { %v2633_v41 = vpop.eup %2632  ;;  %v1513_v49 = vmul.f32 %v2631_v46, %v3496_v36 }
0x147a   :  { %v1554_v29 = vmul.f32 %v2633_v41, %v3502_v16 }
0x14dc   :  { %v1516_v33 = vpop.permute.xlu1 %1515 }
0x14dd   :  { %v1518_v38 = vmul.f32 %v2631_v46, %v1516_v33  ;;  %v1557_v31 = vpop.permute.xlu0 %1556 }
0x14de   :  { %v1559_v15 = vmul.f32 %v2633_v41, %v1557_v31 }
0x14df   :  { %1520 = vrot.lane.b32.xlu1 %v1518_v38, %s2705_s13 }
0x14e0   :  { %1561 = vrot.lane.b32.xlu0 %v1559_v15, %s2705_s13 }
0x14e3   :  { %1500 = vperm.xlu1 %2509, %v3277_v27  }
0x14e4   :  { %1541 = vperm.xlu0 %2508, %v3272_v53  }
0x1551   :  { %v1521_v4 = vpop.permute.xlu1 %1520 }
0x1552   :  { %v3506_v27 = vadd.f32 %v1521_v4, %v1513_v49  ;;  %v1562_v53 = vpop.permute.xlu0 %1561 }
0x1553   :  { %v3508_v6 = vadd.f32 %v1562_v53, %v1554_v29 }
0x1554   :  { %2634 = vtanh.f32 %v3506_v27 }
0x1555   :  { %2636 = vtanh.f32 %v3508_v6 }
0x155e   :  { %v2635_v43 = vpop.eup %2634 }
0x155f   :  { %v2637_v42 = vpop.eup %2636  ;;  %1526 = vrot.lane.b32.xlu1 %v2635_v43, %s2704_s0 }
0x1560   :  { %1567 = vrot.lane.b32.xlu0 %v2637_v42, %s2704_s0 }
0x1562   :  { %v3514_v20 = vpop.permute.xlu1 %1500 }
0x1563   :  { %v3516_v19 = vpop.permute.xlu0 %1541  ;;  %vm3941_vm2 = vcmp.gt.f32.partialorder %v3514_v20, 0.0 }
0x1564   :  { %vm3940_vm4 = vcmp.gt.f32.partialorder %v3516_v19, 0.0 }
0x15d1   :  { %v1527_v62 = vpop.permute.xlu1 %1526 }
0x15d2   :  { %v3518_v32 = vmul.f32 %v2631_v46, %v1527_v62  ;;  %v1568_v9 = vpop.permute.xlu0 %1567 }
0x15d3   :  { %v3521_v14 = vmul.f32 %v2633_v41, %v1568_v9 }
0x15d4   :  { %v3528_v56 = vsel %vm3941_vm2, %v3518_v32, %v3461_v61 }
0x15d5   :  { %1580 = vrot.lane.b32.xlu1 %v3528_v56, %s2705_s13  ;;  %v3536_v46 = vsel %vm3940_vm4, %v3521_v14, %v3469_v30 }
0x15d6   :  { %1584 = vrot.lane.b32.xlu0 %v3536_v46, %s2704_s0 }
0x1647   :  { %v1581_v33 = vpop.permute.xlu1 %1580 }
0x1648   :  { %v1585_v41 = vpop.permute.xlu0 %1584 }
0x1649   :  { %v1587_v38 = vsel %vm388_vm3, %v1581_v33, %v1585_v41 }
0x164a   :  { %2284 = vmatmul.mubr.msk.f32.vlgmr.msra.gmra.mrb[10].mxu1 %vm62_vm0, %v1587_v38 }
0x164b   :  { %2475 = vmatpush1.bf16.msra.mxu1 %v2772_v13  ;;  %1985 = vmatprep.mubr.f32.mxu1 %v3951_v40 }
0x164c   :  { %2477 = vmatprep.subr.bf16.mxu1 %v2794_v22 }
0x164f   :  { %2479 = vmatpush1.bf16.msra.mxu1 %v2805_v26 }
0x1650   :  { %2481 = vmatprep.subr.bf16.mxu1 %v2826_v35 }
0x1653   :  { %2483 = vmatpush1.bf16.msra.mxu1 %v2838_v39 }
0x1654   :  { %2485 = vmatprep.subr.bf16.mxu1 %v2850_v44 }
0x1657   :  { %2487 = vmatpush1.bf16.msra.mxu1 %v2859_v48 }
0x171d   :  { %v1657_v61 = vpop.f32.mrb[10].mxu1 }
0x171e   :  { %v1670_v30 = vadd.f32 %v1657_v61, %v2977_v51  ;;  %v1659_v31 = vpop.f32.mrb[11].mxu1 }
0x171f   :  { %v1711_v15 = vadd.f32 %v1659_v31, %v2958_v28  ;;  %v3568_v31 = vsel %vm3940_vm4, %v3508_v6, %v3502_v16 }
0x1720   :  { %2638 = vtanh.f32 %v1670_v30  ;;  %v2285_v29 = vmul.f32 -1.442695, %v1670_v30  ;;  %v3562_v30 = vsel %vm3941_vm2, %v3506_v27, %v3496_v36 }
0x1721   :  { %2640 = vtanh.f32 %v1711_v15  ;;  %v2286_v53 = vmul.f32 -1.442695, %v1711_v15 }
0x1722   :  { %2642 = vpow2.f32 %v2285_v29 }
0x1723   :  { %2644 = vpow2.f32 %v2286_v53 }
0x172a   :  { %v2639_v49 = vpop.eup %2638 }
0x172b   :  { %v2641_v4 = vpop.eup %2640  ;;  %1680 = vrot.lane.b32.xlu1 %v2639_v49, %s2704_s0 }
0x172c   :  { %1721 = vrot.lane.b32.xlu0 %v2641_v4, %s2704_s0  ;;  %v2643_v43 = vpop.eup %2642 }
0x172d   :  { %v2645_v42 = vpop.eup %2644  ;;  %v1674_v62 = vadd.f32 1.0, %v2643_v43 }
0x172e   :  { %v1715_v9 = vadd.f32 1.0, %v2645_v42 }
0x172f   :  { %2646 = vrcp.f32 %v1674_v62 }
0x1730   :  { %2648 = vrcp.f32 %v1715_v9 }
0x1739   :  { %v2647_v51 = vpop.eup %2646 }
0x173a   :  { %v2649_v33 = vpop.eup %2648  ;;  %v1678_v15 = vmul.f32 %v2647_v51, %v3562_v30 }
0x173b   :  { %v1719_v4 = vmul.f32 %v2649_v33, %v3568_v31 }
0x179d   :  { %v1681_v28 = vpop.permute.xlu1 %1680 }
0x179e   :  { %v1683_v41 = vmul.f32 %v2647_v51, %v1681_v28  ;;  %v1722_v38 = vpop.permute.xlu0 %1721 }
0x179f   :  { %v1724_v61 = vmul.f32 %v2649_v33, %v1722_v38 }
0x17a0   :  { %1685 = vrot.lane.b32.xlu1 %v1683_v41, %s2705_s13 }
0x17a1   :  { %1726 = vrot.lane.b32.xlu0 %v1724_v61, %s2705_s13 }
0x17a4   :  { %1665 = vperm.xlu1 %2509, %v3200_v21  }
0x17a5   :  { %1706 = vperm.xlu0 %2508, %v3195_v0  }
0x1812   :  { %v1686_v49 = vpop.permute.xlu1 %1685 }
0x1813   :  { %v3572_v21 = vadd.f32 %v1686_v49, %v1678_v15  ;;  %v1727_v0 = vpop.permute.xlu0 %1726 }
0x1814   :  { %v3574_v29 = vadd.f32 %v1727_v0, %v1719_v4 }
0x1815   :  { %2650 = vtanh.f32 %v3572_v21 }
0x1816   :  { %2652 = vtanh.f32 %v3574_v29 }
0x181f   :  { %v2651_v36 = vpop.eup %2650 }
0x1820   :  { %v2653_v27 = vpop.eup %2652  ;;  %1691 = vrot.lane.b32.xlu1 %v2651_v36, %s2704_s0 }
0x1821   :  { %1732 = vrot.lane.b32.xlu0 %v2653_v27, %s2704_s0 }
0x1823   :  { %v3580_v16 = vpop.permute.xlu1 %1665 }
0x1824   :  { %v3582_v6 = vpop.permute.xlu0 %1706  ;;  %vm3943_vm4 = vcmp.gt.f32.partialorder %v3580_v16, 0.0 }
0x1825   :  { %vm3942_vm2 = vcmp.gt.f32.partialorder %v3582_v6, 0.0  ;;  %v3628_v36 = vsel %vm3943_vm4, %v3572_v21, %v3562_v30 }
0x1826   :  { %v3634_v27 = vsel %vm3942_vm2, %v3574_v29, %v3568_v31 }
0x1892   :  { %v1692_v53 = vpop.permute.xlu1 %1691 }
0x1893   :  { %v3584_v43 = vmul.f32 %v2647_v51, %v1692_v53  ;;  %v1733_v42 = vpop.permute.xlu0 %1732 }
0x1894   :  { %v3587_v62 = vmul.f32 %v2649_v33, %v1733_v42 }
0x1895   :  { %v3594_v9 = vsel %vm3943_vm4, %v3584_v43, %v3528_v56 }
0x1896   :  { %1745 = vrot.lane.b32.xlu1 %v3594_v9, %s2705_s13  ;;  %v3602_v51 = vsel %vm3942_vm2, %v3587_v62, %v3536_v46 }
0x1897   :  { %1749 = vrot.lane.b32.xlu0 %v3602_v51, %s2704_s0 }
0x1908   :  { %v1746_v28 = vpop.permute.xlu1 %1745 }
0x1909   :  { %v1750_v33 = vpop.permute.xlu0 %1749 }
0x190a   :  { %v1752_v41 = vsel %vm388_vm3, %v1746_v28, %v1750_v33 }
0x190b   :  { %2287 = vmatmul.mubr.msk.f32.vlgmr.msra.gmra.mrb[30].mxu0 %vm62_vm0, %v1752_v41 }
0x190c   :  { %2491 = vmatpush1.bf16.msra.mxu0 %v2772_v13  ;;  %2150 = vmatprep.mubr.f32.mxu0 %v3951_v40 }
0x190d   :  { %2493 = vmatprep.subr.bf16.mxu0 %v2794_v22 }
0x1910   :  { %2495 = vmatpush1.bf16.msra.mxu0 %v2805_v26 }
0x1911   :  { %2497 = vmatprep.subr.bf16.mxu0 %v2826_v35 }
0x1914   :  { %2499 = vmatpush1.bf16.msra.mxu0 %v2838_v39 }
0x1915   :  { %2501 = vmatprep.subr.bf16.mxu0 %v2850_v44 }
0x1918   :  { %2503 = vmatpush1.bf16.msra.mxu0 %v2859_v48 }
0x19de   :  { %v1822_v56 = vpop.f32.mrb[30].mxu0 }
0x19df   :  { %v1835_v46 = vadd.f32 %v1822_v56, %v2981_v55  ;;  %v1824_v38 = vpop.f32.mrb[31].mxu0 }
0x19e0   :  { %v1876_v13 = vadd.f32 %v1824_v38, %v2954_v23 }
0x19e1   :  { %2654 = vtanh.f32 %v1835_v46  ;;  %v2288_v26 = vmul.f32 -1.442695, %v1835_v46 }
0x19e2   :  { %2656 = vtanh.f32 %v1876_v13  ;;  %v2289_v35 = vmul.f32 -1.442695, %v1876_v13 }
0x19e3   :  { %2658 = vpow2.f32 %v2288_v26 }
0x19e4   :  { %2660 = vpow2.f32 %v2289_v35 }
0x19eb   :  { %v2655_v40 = vpop.eup %2654 }
0x19ec   :  { %v2657_v22 = vpop.eup %2656  ;;  %1845 = vrot.lane.b32.xlu1 %v2655_v40, %s2704_s0 }
0x19ed   :  { %1886 = vrot.lane.b32.xlu0 %v2657_v22, %s2704_s0  ;;  %v2659_v39 = vpop.eup %2658 }
0x19ee   :  { %v2661_v44 = vpop.eup %2660  ;;  %v1839_v48 = vadd.f32 1.0, %v2659_v39 }
0x19ef   :  { %v1880_v61 = vadd.f32 1.0, %v2661_v44 }
0x19f0   :  { %2662 = vrcp.f32 %v1839_v48 }
0x19f1   :  { %2664 = vrcp.f32 %v1880_v61 }
0x19fa   :  { %v2663_v55 = vpop.eup %2662 }
0x19fb   :  { %v2665_v15 = vpop.eup %2664  ;;  %v1843_v53 = vmul.f32 %v2663_v55, %v3628_v36 }
0x19fc   :  { %v1884_v28 = vmul.f32 %v2665_v15, %v3634_v27 }
0x1a5e   :  { %v1846_v23 = vpop.permute.xlu1 %1845 }
0x1a5f   :  { %v1848_v49 = vmul.f32 %v2663_v55, %v1846_v23  ;;  %v1887_v4 = vpop.permute.xlu0 %1886 }
0x1a60   :  { %v1889_v0 = vmul.f32 %v2665_v15, %v1887_v4 }
0x1a61   :  { %1850 = vrot.lane.b32.xlu1 %v1848_v49, %s2705_s13 }
0x1a62   :  { %1891 = vrot.lane.b32.xlu0 %v1889_v0, %s2705_s13 }
0x1a65   :  { %1830 = vperm.xlu1 %2509, %v3123_v1  }
0x1a66   :  { %1871 = vperm.xlu0 %2508, %v3118_v60  }
0x1ad3   :  { %v1851_v42 = vpop.permute.xlu1 %1850 }
0x1ad4   :  { %v1853_v1 = vadd.f32 %v1851_v42, %v1843_v53  ;;  %v1892_v33 = vpop.permute.xlu0 %1891 }
0x1ad5   :  { %v1894_v60 = vadd.f32 %v1892_v33, %v1884_v28 }
0x1ad6   :  { %2666 = vtanh.f32 %v1853_v1 }
0x1ad7   :  { %2668 = vtanh.f32 %v1894_v60 }
0x1ae0   :  { %v2667_v41 = vpop.eup %2666 }
0x1ae1   :  { %v2669_v56 = vpop.eup %2668  ;;  %1856 = vrot.lane.b32.xlu1 %v2667_v41, %s2704_s0  ;;  %v1992_v41 = vld [vmem:[%s3929_s1 + $0x50] sm:$0xff] }
0x1ae2   :  { %1897 = vrot.lane.b32.xlu0 %v2669_v56, %s2704_s0  ;;  %v2033_v56 = vld [vmem:[%s3929_s1 + $0x8] sm:$0xff] }
0x1ae4   :  { %v3640_v30 = vpop.permute.xlu1 %1830 }
0x1ae5   :  { %v3642_v31 = vpop.permute.xlu0 %1871  ;;  %vm3945_vm2 = vcmp.gt.f32.partialorder %v3640_v30, 0.0 }
0x1ae6   :  { %vm3944_vm4 = vcmp.gt.f32.partialorder %v3642_v31, 0.0  ;;  %vm3962_vm9 = vcmp.gt.f32.partialorder %v3642_v31, 0.0 }
0x1b53   :  { %v1857_v21 = vpop.permute.xlu1 %1856 }
0x1b54   :  { %v3644_v29 = vmul.f32 %v2663_v55, %v1857_v21  ;;  %v1898_v46 = vpop.permute.xlu0 %1897  ;;  %v3683_v21 = vsel %vm3945_vm2, %v1853_v1, %v3628_v36 }
0x1b55   :  { %v3647_v38 = vmul.f32 %v2665_v15, %v1898_v46  ;;  %v3688_v46 = vsel %vm3944_vm4, %v1894_v60, %v3634_v27 }
0x1b56   :  { %v3654_v13 = vsel %vm3945_vm2, %v3644_v29, %v3594_v9 }
0x1b57   :  { %1910 = vrot.lane.b32.xlu1 %v3654_v13, %s2705_s13  ;;  %v3662_v40 = vsel %vm3944_vm4, %v3647_v38, %v3602_v51 }
0x1b58   :  { %1914 = vrot.lane.b32.xlu0 %v3662_v40, %s2704_s0 }
0x1bc9   :  { %v1911_v22 = vpop.permute.xlu1 %1910 }
0x1bca   :  { %v1915_v26 = vpop.permute.xlu0 %1914 }
0x1bcb   :  { %v1917_v35 = vsel %vm388_vm3, %v1911_v22, %v1915_v26 }
0x1bcc   :  { %2290 = vmatmul.mubr.msk.f32.vlgmr.msra.gmra.mrb[12].mxu1 %vm62_vm0, %v1917_v35 }
0x1c9f   :  { %v1987_v9 = vpop.f32.mrb[12].mxu1 }
0x1ca0   :  { %v2000_v39 = vadd.f32 %v1987_v9, %v2985_v59  ;;  %v1989_v44 = vpop.f32.mrb[13].mxu1 }
0x1ca1   :  { %v2041_v48 = vadd.f32 %v1989_v44, %v2950_v18 }
0x1ca2   :  { %2670 = vtanh.f32 %v2000_v39  ;;  %v2291_v55 = vmul.f32 -1.442695, %v2000_v39 }
0x1ca3   :  { %2672 = vtanh.f32 %v2041_v48  ;;  %v2292_v23 = vmul.f32 -1.442695, %v2041_v48 }
0x1ca4   :  { %2674 = vpow2.f32 %v2291_v55 }
0x1ca5   :  { %2676 = vpow2.f32 %v2292_v23 }
0x1cac   :  { %v2671_v61 = vpop.eup %2670 }
0x1cad   :  { %v2673_v51 = vpop.eup %2672  ;;  %2010 = vrot.lane.b32.xlu1 %v2671_v61, %s2704_s0 }
0x1cae   :  { %2051 = vrot.lane.b32.xlu0 %v2673_v51, %s2704_s0  ;;  %v2675_v15 = vpop.eup %2674 }
0x1caf   :  { %v2677_v49 = vpop.eup %2676  ;;  %v2004_v4 = vadd.f32 1.0, %v2675_v15 }
0x1cb0   :  { %v2045_v0 = vadd.f32 1.0, %v2677_v49 }
0x1cb1   :  { %2678 = vrcp.f32 %v2004_v4 }
0x1cb2   :  { %2680 = vrcp.f32 %v2045_v0 }
0x1cbb   :  { %v2679_v59 = vpop.eup %2678 }
0x1cbc   :  { %v2681_v53 = vpop.eup %2680  ;;  %v2008_v22 = vmul.f32 %v2679_v59, %v3683_v21 }
0x1cbd   :  { %v2049_v35 = vmul.f32 %v2681_v53, %v3688_v46 }
0x1d1f   :  { %v2011_v18 = vpop.permute.xlu1 %2010 }
0x1d20   :  { %v2013_v42 = vmul.f32 %v2679_v59, %v2011_v18  ;;  %v2052_v28 = vpop.permute.xlu0 %2051 }
0x1d21   :  { %v2054_v33 = vmul.f32 %v2681_v53, %v2052_v28 }
0x1d22   :  { %2015 = vrot.lane.b32.xlu1 %v2013_v42, %s2705_s13 }
0x1d23   :  { %2056 = vrot.lane.b32.xlu0 %v2054_v33, %s2705_s13 }
0x1d26   :  { %1995 = vperm.xlu1 %2509, %v1992_v41  }
0x1d27   :  { %2036 = vperm.xlu0 %2508, %v2033_v56  }
0x1d94   :  { %v2016_v26 = vpop.permute.xlu1 %2015 }
0x1d95   :  { %v2018_v9 = vadd.f32 %v2016_v26, %v2008_v22  ;;  %v2057_v39 = vpop.permute.xlu0 %2056 }
0x1d96   :  { %v2059_v44 = vadd.f32 %v2057_v39, %v2049_v35 }
0x1d97   :  { %2682 = vtanh.f32 %v2018_v9 }
0x1d98   :  { %2684 = vtanh.f32 %v2059_v44 }
0x1da1   :  { %v2683_v48 = vpop.eup %2682 }
0x1da2   :  { %v2685_v61 = vpop.eup %2684  ;;  %2021 = vrot.lane.b32.xlu1 %v2683_v48, %s2704_s0 }
0x1da3   :  { %2062 = vrot.lane.b32.xlu0 %v2685_v61, %s2704_s0 }
0x1da5   :  { %v3694_v36 = vpop.permute.xlu1 %1995 }
0x1da6   :  { %v3696_v27 = vpop.permute.xlu0 %2036  ;;  %vm1998_vm4 = vcmp.gt.f32.partialorder %v3694_v36, 0.0 }
0x1da7   :  { %vm2039_vm2 = vcmp.gt.f32.partialorder %v3696_v27, 0.0 }
0x1e14   :  { %v2022_v1 = vpop.permute.xlu1 %2021 }
0x1e15   :  { %v3698_v60 = vmul.f32 %v2679_v59, %v2022_v1  ;;  %v2063_v51 = vpop.permute.xlu0 %2062  ;;  %v2157_v1 = vld [vmem:[%s3929_s1 + $0x58] sm:$0xff] }
0x1e16   :  { %v3701_v55 = vmul.f32 %v2681_v53, %v2063_v51  ;;  %v2197_v51 = vld [vmem:[%s3929_s1] sm:$0xff] }
0x1e17   :  { %v3708_v23 = vsel %vm1998_vm4, %v3698_v60, %v3654_v13 }
0x1e18   :  { %2075 = vrot.lane.b32.xlu1 %v3708_v23, %s2705_s13  ;;  %v2072_v15 = vsel %vm2039_vm2, %v3701_v55, %v3662_v40 }
0x1e19   :  { %2079 = vrot.lane.b32.xlu0 %v2072_v15, %s2704_s0  ;;  %v2032_v15 = vsel %vm1998_vm4, %v2018_v9, %v3683_v21  ;;  %v540_v21 = vsel %vm513_vm5, %v3076_v7, 0.0  ;;  %v705_v9 = vsel %vm678_vm7, %v3153_v12, 0.0  ;;  %v1076_v12 = vsel %vm1049_vm12, %v3953_v47, 0.0 }
0x1e1a   :  { %vm3958_vm5 = vcmp.gt.f32.partialorder %v3516_v19, 0.0  ;;  %vm3960_vm7 = vcmp.gt.f32.partialorder %v3582_v6, 0.0  ;;  %v2066_v19 = vsel %vm2039_vm2, %v3701_v55, 0.0 }
0x1e1b   :  { %v1571_v17 = vsel %vm3958_vm5, %v3521_v14, 0.0  ;;  %v1736_v57 = vsel %vm3960_vm7, %v3587_v62, 0.0 }
0x1e8a   :  { %v2076_v49 = vpop.permute.xlu1 %2075 }
0x1e8b   :  { %v2080_v4 = vpop.permute.xlu0 %2079 }
0x1e8c   :  { %v2082_v0 = vsel %vm388_vm3, %v2076_v49, %v2080_v4  ;;  %v2073_v49 = vsel %vm2039_vm2, %v2059_v44, %v3688_v46  ;;  %v581_v46 = vsel %vm554_vm6, %v3079_v10, 0.0  ;;  %v746_v44 = vsel %vm719_vm8, %v3156_v24, 0.0  ;;  %v3955_v24 = vld [vmem:[#allocation6_spill] sm:$0xff] }
0x1e8d   :  { %2293 = vmatmul.mubr.msk.f32.vlgmr.msra.gmra.mrb[32].mxu0 %vm62_vm0, %v2082_v0  ;;  %v1035_v10 = vsel %vm1008_vm11, %v3307_v34, 0.0  ;;  %v1200_v52 = vsel %vm1173_vm13, %v3955_v24, 0.0  ;;  %v1406_v34 = vsel %vm1379_vm1, %v3454_v25, 0.0  ;;  %vm3957_vm0 = vcmp.gt.f32.partialorder %v3514_v20, 0.0 }
0x1e8e   :  { %v1530_v5 = vsel %vm3957_vm0, %v3518_v32, 0.0  ;;  %vm3959_vm6 = vcmp.gt.f32.partialorder %v3580_v16, 0.0  ;;  %vm3961_vm8 = vcmp.gt.f32.partialorder %v3640_v30, 0.0  ;;  %v1901_v25 = vsel %vm3962_vm9, %v3647_v38, 0.0 }
0x1e8f   :  { %v1695_v3 = vsel %vm3959_vm6, %v3584_v43, 0.0  ;;  %v1860_v8 = vsel %vm3961_vm8, %v3644_v29, 0.0  ;;  %v2025_v20 = vsel %vm1998_vm4, %v3698_v60, 0.0  ;;  %vm3963_vm4 = vcmask 523520  }
0x1e90   :  { %vm3964_vm12 = vmmov %vm3963_vm4 }
0x1e91   :  { %vm3965_vm13 = vmmov %vm3963_vm4 }
0x1e92   :  { %vm3966_vm14 = vmmov %vm3963_vm4 }
0x1e93   :  { %vm3967_vm15 = vmmov %vm3963_vm4 }
0x1e94   :  { %vm3968_vm1 = vmmov %vm3963_vm4 }
0x1e95   :  { %vm3969_vm2 = vmmov %vm3968_vm1 }
0x1e96   :  { %vm3970_vm0 = vmmov %vm3968_vm1 }
0x1e97   :  { %vm3971_vm5 = vmmov %vm3970_vm0 }
0x1e98   :  { %vm3972_vm6 = vmmov %vm3970_vm0 }
0x1e99   :  { %vm3973_vm7 = vmmov %vm3970_vm0 }
0x1f60   :  { %v2152_v59 = vpop.f32.mrb[32].mxu0 }
0x1f61   :  { %v2165_v13 = vadd.f32 %v2152_v59, %v2989_v63  ;;  %v2154_v18 = vpop.f32.mrb[33].mxu0 }
0x1f62   :  { %v2205_v53 = vadd.f32 %v2154_v18, %v2946_v11 }
0x1f63   :  { %2686 = vtanh.f32 %v2165_v13  ;;  %v2294_v40 = vmul.f32 -1.442695, %v2165_v13 }
0x1f64   :  { %2688 = vtanh.f32 %v2205_v53  ;;  %v2295_v33 = vmul.f32 -1.442695, %v2205_v53 }
0x1f65   :  { %2690 = vpow2.f32 %v2294_v40 }
0x1f66   :  { %2692 = vpow2.f32 %v2295_v33 }
0x1f6d   :  { %v2687_v42 = vpop.eup %2686 }
0x1f6e   :  { %v2689_v28 = vpop.eup %2688  ;;  %2175 = vrot.lane.b32.xlu1 %v2687_v42, %s2704_s0 }
0x1f6f   :  { %2215 = vrot.lane.b32.xlu0 %v2689_v28, %s2704_s0  ;;  %v2691_v41 = vpop.eup %2690 }
0x1f70   :  { %v2693_v56 = vpop.eup %2692  ;;  %v2169_v22 = vadd.f32 1.0, %v2691_v41 }
0x1f71   :  { %v2209_v26 = vadd.f32 1.0, %v2693_v56 }
0x1f72   :  { %2694 = vrcp.f32 %v2169_v22 }
0x1f73   :  { %2696 = vrcp.f32 %v2209_v26 }
0x1f7c   :  { %v3723_v63 = vpop.eup %2694 }
0x1f7d   :  { %v3725_v35 = vpop.eup %2696  ;;  %v2173_v4 = vmul.f32 %v3723_v63, %v2032_v15 }
0x1f7e   :  { %v2213_v59 = vmul.f32 %v3725_v35, %v2073_v49 }
0x1fe0   :  { %v2176_v11 = vpop.permute.xlu1 %2175 }
0x1fe1   :  { %v2178_v39 = vmul.f32 %v3723_v63, %v2176_v11  ;;  %v2216_v48 = vpop.permute.xlu0 %2215 }
0x1fe2   :  { %v2218_v61 = vmul.f32 %v3725_v35, %v2216_v48 }
0x1fe3   :  { %2180 = vrot.lane.b32.xlu1 %v2178_v39, %s2705_s13 }
0x1fe4   :  { %2220 = vrot.lane.b32.xlu0 %v2218_v61, %s2705_s13 }
0x1fe7   :  { %2160 = vperm.xlu1 %2509, %v2157_v1  }
0x1fe8   :  { %2200 = vperm.xlu0 %2508, %v2197_v51  }
0x2055   :  { %v2181_v0 = vpop.permute.xlu1 %2180 }
0x2056   :  { %v2183_v13 = vadd.f32 %v2181_v0, %v2173_v4  ;;  %v2221_v18 = vpop.permute.xlu0 %2220 }
0x2057   :  { %v2223_v53 = vadd.f32 %v2221_v18, %v2213_v59 }
0x2058   :  { %2698 = vtanh.f32 %v2183_v13 }
0x2059   :  { %2700 = vtanh.f32 %v2223_v53 }
0x2062   :  { %v2699_v42 = vpop.eup %2698 }
0x2063   :  { %v2701_v28 = vpop.eup %2700  ;;  %2186 = vrot.lane.b32.xlu1 %v2699_v42, %s2704_s0 }
0x2064   :  { %2226 = vrot.lane.b32.xlu0 %v2701_v28, %s2704_s0 }
0x2066   :  { %v2161_v32 = vpop.permute.xlu1 %2160 }
0x2067   :  { %542 = vrot.lane.b32.xlu1 %v540_v21, %s2705_s13  ;;  %v2201_v14 = vpop.permute.xlu0 %2200  ;;  %vm2163_vm10 = vcmp.gt.f32.partialorder %v2161_v32, 0.0 }
0x2068   :  { %583 = vrot.lane.b32.xlu0 %v581_v46, %s2704_s0  ;;  %vm2203_vm11 = vcmp.gt.f32.partialorder %v2201_v14, 0.0 }
0x206b   :  { %707 = vrot.lane.b32.xlu1 %v705_v9, %s2705_s13 }
0x206c   :  { %748 = vrot.lane.b32.xlu0 %v746_v44, %s2704_s0 }
0x206f   :  { %872 = vrot.lane.b32.xlu1 %v870_v45, %s2705_s13 }
0x2070   :  { %913 = vrot.lane.b32.xlu0 %v911_v50, %s2704_s0 }
0x2073   :  { %1037 = vrot.lane.b32.xlu1 %v1035_v10, %s2705_s13 }
0x2074   :  { %1078 = vrot.lane.b32.xlu0 %v1076_v12, %s2704_s0 }
0x2077   :  { %1202 = vrot.lane.b32.xlu1 %v1200_v52, %s2705_s13 }
0x2078   :  { %1243 = vrot.lane.b32.xlu0 %v1241_v37, %s2704_s0 }
0x207b   :  { %1367 = vrot.lane.b32.xlu1 %v1365_v54, %s2705_s13 }
0x207c   :  { %1408 = vrot.lane.b32.xlu0 %v1406_v34, %s2704_s0 }
0x207f   :  { %1532 = vrot.lane.b32.xlu1 %v1530_v5, %s2705_s13 }
0x2080   :  { %1573 = vrot.lane.b32.xlu0 %v1571_v17, %s2704_s0 }
0x2083   :  { %1697 = vrot.lane.b32.xlu1 %v1695_v3, %s2705_s13 }
0x2084   :  { %1738 = vrot.lane.b32.xlu0 %v1736_v57, %s2704_s0 }
0x2087   :  { %1862 = vrot.lane.b32.xlu1 %v1860_v8, %s2705_s13 }
0x2088   :  { %1903 = vrot.lane.b32.xlu0 %v1901_v25, %s2704_s0 }
0x208b   :  { %2027 = vrot.lane.b32.xlu1 %v2025_v20, %s2705_s13 }
0x208c   :  { %2068 = vrot.lane.b32.xlu0 %v2066_v19, %s2704_s0 }
0x20d5   :  { %v2187_v16 = vpop.permute.xlu1 %2186 }
0x20d6   :  { %v2189_v6 = vmul.f32 %v3723_v63, %v2187_v16  ;;  %v2227_v43 = vpop.permute.xlu0 %2226 }
0x20d7   :  { %v2229_v62 = vmul.f32 %v3725_v35, %v2227_v43 }
0x20d8   :  { %v2190_v30 = vsel %vm2163_vm10, %v2189_v6, 0.0  ;;  %v2196_v36 = vsel %vm2163_vm10, %v2189_v6, %v3708_v23 }
0x20d9   :  { %v2230_v31 = vsel %vm2203_vm11, %v2229_v62, 0.0  ;;  %2192 = vrot.lane.b32.xlu1 %v2190_v30, %s2705_s13  ;;  %v543_v29 = vpop.permute.xlu1 %542 }
0x20da   :  { %545 = vst.msk [vmem:[%s3930_s5 + $0x8] sm:$0xff] %vm388_vm3, %v543_v29  ;;  %2232 = vrot.lane.b32.xlu0 %v2230_v31, %s2704_s0  ;;  %v584_v38 = vpop.permute.xlu0 %583 }
0x20db   :  { %586 = vst.msk [vmem:[%s3930_s5 + $0x50] sm:$0xff] %vm3963_vm4, %v584_v38 }
0x20dd   :  { %2237 = vrot.lane.b32.xlu1 %v2196_v36, %s2705_s13  ;;  %v708_v27 = vpop.permute.xlu1 %707 }
0x20de   :  { %710 = vst.msk [vmem:[%s3930_s5 + $0x10] sm:$0xff] %vm388_vm3, %v708_v27  ;;  %v749_v60 = vpop.permute.xlu0 %748 }
0x20df   :  { %751 = vst.msk [vmem:[%s3930_s5 + $0x48] sm:$0xff] %vm3964_vm12, %v749_v60 }
0x20e1   :  { %v873_v55 = vpop.permute.xlu1 %872 }
0x20e2   :  { %875 = vst.msk [vmem:[%s3930_s5 + $0x18] sm:$0xff] %vm388_vm3, %v873_v55  ;;  %v914_v23 = vpop.permute.xlu0 %913 }
0x20e3   :  { %916 = vst.msk [vmem:[%s3930_s5 + $0x40] sm:$0xff] %vm3965_vm13, %v914_v23 }
0x20e5   :  { %v1038_v40 = vpop.permute.xlu1 %1037 }
0x20e6   :  { %1040 = vst.msk [vmem:[%s3930_s5 + $0x20] sm:$0xff] %vm388_vm3, %v1038_v40  ;;  %v1079_v33 = vpop.permute.xlu0 %1078 }
0x20e7   :  { %1081 = vst.msk [vmem:[%s3930_s5 + $0x38] sm:$0xff] %vm3966_vm14, %v1079_v33 }
0x20e9   :  { %v1203_v41 = vpop.permute.xlu1 %1202 }
0x20ea   :  { %1205 = vst.msk [vmem:[%s3930_s5 + $0x28] sm:$0xff] %vm388_vm3, %v1203_v41  ;;  %v1244_v56 = vpop.permute.xlu0 %1243 }
0x20eb   :  { %1246 = vst.msk [vmem:[%s3930_s5 + $0x30] sm:$0xff] %vm3967_vm15, %v1244_v56 }
0x20ed   :  { %v1368_v22 = vpop.permute.xlu1 %1367 }
0x20ee   :  { %1370 = vst.msk [vmem:[%s3930_s5 + $0x30] sm:$0xff] %vm388_vm3, %v1368_v22  ;;  %v1409_v26 = vpop.permute.xlu0 %1408 }
0x20ef   :  { %1411 = vst.msk [vmem:[%s3930_s5 + $0x28] sm:$0xff] %vm3968_vm1, %v1409_v26 }
0x20f1   :  { %v1533_v63 = vpop.permute.xlu1 %1532 }
0x20f2   :  { %1535 = vst.msk [vmem:[%s3930_s5 + $0x38] sm:$0xff] %vm388_vm3, %v1533_v63  ;;  %v1574_v11 = vpop.permute.xlu0 %1573 }
0x20f3   :  { %1576 = vst.msk [vmem:[%s3930_s5 + $0x20] sm:$0xff] %vm3969_vm2, %v1574_v11 }
0x20f5   :  { %v1698_v35 = vpop.permute.xlu1 %1697 }
0x20f6   :  { %1700 = vst.msk [vmem:[%s3930_s5 + $0x40] sm:$0xff] %vm388_vm3, %v1698_v35  ;;  %v1739_v39 = vpop.permute.xlu0 %1738 }
0x20f7   :  { %1741 = vst.msk [vmem:[%s3930_s5 + $0x18] sm:$0xff] %vm3970_vm0, %v1739_v39 }
0x20f9   :  { %v1863_v48 = vpop.permute.xlu1 %1862 }
0x20fa   :  { %1865 = vst.msk [vmem:[%s3930_s5 + $0x48] sm:$0xff] %vm388_vm3, %v1863_v48  ;;  %v1904_v61 = vpop.permute.xlu0 %1903 }
0x20fb   :  { %1906 = vst.msk [vmem:[%s3930_s5 + $0x10] sm:$0xff] %vm3971_vm5, %v1904_v61 }
0x20fd   :  { %v2028_v1 = vpop.permute.xlu1 %2027 }
0x20fe   :  { %2030 = vst.msk [vmem:[%s3930_s5 + $0x50] sm:$0xff] %vm388_vm3, %v2028_v1  ;;  %v2069_v51 = vpop.permute.xlu0 %2068 }
0x20ff   :  { %2071 = vst.msk [vmem:[%s3930_s5 + $0x8] sm:$0xff] %vm3972_vm6, %v2069_v51 }
0x214b   :  { %v2193_v15 = vpop.permute.xlu1 %2192 }
0x214c   :  { %2195 = vst.msk [vmem:[%s3930_s5 + $0x58] sm:$0xff] %vm388_vm3, %v2193_v15  ;;  %v2233_v49 = vpop.permute.xlu0 %2232 }
0x214d   :  { %2235 = vst.msk [vmem:[%s3930_s5] sm:$0xff] %vm3973_vm7, %v2233_v49 }
0x214f   :  { %v2238_v4 = vpop.permute.xlu1 %2237 }
0x2150   :  { %2240 = vst.msk [vmem:[%s3931_s6] sm:$0xff] %vm388_vm3, %v2238_v4 }

// kernel: seq2seq_forward.7
= control target key start
LH: loop header
LB: loop body
LE: loop exit
PB: predicated region body
PF: predicated region fallthrough
CT: control target
= control target key end

     0   :  { %vm119_vm0 = vcmask 523264   ;;  %v2741_v56 = vmov 0.0|0.0   ;;  %vm2742_vm1 = vmmov 0   ;;  %v2743_v57 = vmov 0.0   ;;  %s3369_s4 = inlined_call_operand.vmem [shape: f32[64,32], index: 4, kind: input, shape index: {}]   ;;  %s3370_s1 = inlined_call_operand.vmem [shape: f32[8,12,64], index: 1, kind: input, shape index: {}]   ;;  %s3371_s0 = inlined_call_operand.vmem [shape: f32[8,8,32], index: 0, kind: input, shape index: {}]   ;;  %s3372_s2 = inlined_call_operand.vmem [shape: f32[8,1,12], index: 2, kind: input, shape index: {}]   ;;  %s3373_s3 = inlined_call_operand.vmem [shape: f32[8,8,1], index: 3, kind: input, shape index: {}]   ;;  %s3374_s6 = inlined_call_operand.vmem [shape: f32[64,32], index: 6, kind: input, shape index: {}]   ;;  %s3375_s5 = inlined_call_operand.vmem [shape: f32[32,32], index: 5, kind: input, shape index: {}]   ;;  %s3376_s8 = inlined_call_operand.vmem [shape: f32[32,40], index: 8, kind: input, shape index: {}]   ;;  %s3377_s7 = inlined_call_operand.vmem [shape: f32[1,32], index: 7, kind: input, shape index: {}]   ;;  %s3378_s9 = inlined_call_operand.vmem [shape: f32[1,40], index: 9, kind: input, shape index: {}]   ;;  %s3379_s10 = inlined_call_operand.vmem [shape: f32[8,8,40], index: 10, kind: output, shape index: {}]  }
   0x1   :  { %v99_v0 = vld [vmem:[%s3369_s4] sm:$0xff]  ;;  %v100_v1 = vld [vmem:[%s3369_s4 + $0x8] sm:$0xff]  ;;  %v101_v2 = vld [vmem:[%s3369_s4 + $0x10] sm:$0xff]  ;;  %2566 = vmatprep.subr.bf16.mxu1 %v2741_v56  ;;  %2374 = vmatprep.mubr.msk.f32.mxu1 %vm2742_vm1, %v2743_v57  ;;  %vm294_vm2 = vcmask 261120   ;;  %vm982_vm5 = vcmask 97280   ;;  %vm1122_vm13 = vcmask 1043456  }
   0x2   :  { %v2550_v3 = vpack.c.bf16 %v100_v1, %v99_v0  ;;  %v102_v4 = vld [vmem:[%s3369_s4 + $0x18] sm:$0xff]  ;;  %v103_v6 = vld [vmem:[%s3369_s4 + $0x20] sm:$0xff]  ;;  %v104_v7 = vld [vmem:[%s3369_s4 + $0x28] sm:$0xff]  ;;  %vm2745_vm14 = vmmov 1  }
   0x3   :  { %v2554_v5 = vpack.c.bf16 %v102_v4, %v101_v2  ;;  %v2822_v8 = vld [vmem:[%s3370_s1] sm:$0xff]  ;;  %v2827_v9 = vld [vmem:[%s3370_s1 + $0x8] sm:$0xf]  ;;  %v2834_v11 = vld [vmem:[%s3370_s1 + $0x10] sm:$0xff]  ;;  %v2558_v17 = vpack.c.bf16 %v104_v7, %v103_v6 }
   0x4   :  { %2551 = vmatprep.subr.bf16.mxu0 %v2550_v3  ;;  %v91_v10 = vcombine.high %v2822_v8, %v2822_v8  ;;  %v2839_v12 = vld [vmem:[%s3370_s1 + $0x18] sm:$0xf]  ;;  %v2599_v13 = vpack.c.bf16 %v2827_v9, %v2822_v8  ;;  %v2848_v15 = vld [vmem:[%s3370_s1 + $0x20] sm:$0xff]  ;;  %v2853_v16 = vld [vmem:[%s3370_s1 + $0x28] sm:$0xf]  ;;  %v92_v38 = vcombine.high %v2834_v11, %v2834_v11  ;;  %v108_v39 = vcombine.low %v2827_v9, %v2834_v11 }
   0x5   :  { %2553 = vmatpush3.bf16.msra.mxu0 %v2550_v3  ;;  %v2603_v14 = vpack.c.bf16 %v2839_v12, %v2834_v11  ;;  %v105_v18 = vld [vmem:[%s3369_s4 + $0x30] sm:$0xff]  ;;  %v2607_v21 = vpack.c.bf16 %v2853_v16, %v2848_v15  ;;  %v2869_v22 = vld [vmem:[%s3370_s1 + $0x38] sm:$0xf]  ;;  %v2879_v25 = vld [vmem:[%s3370_s1 + $0x40] sm:$0xff]  ;;  %v93_v40 = vcombine.high %v2848_v15, %v2848_v15 }
   0x6   :  { %2555 = vmatprep.subr.bf16.mxu0 %v2554_v5  ;;  %v107_v19 = vcombine.low %v2822_v8, %v91_v10  ;;  %v2862_v20 = vld [vmem:[%s3370_s1 + $0x30] sm:$0xff]  ;;  %v106_v23 = vld [vmem:[%s3369_s4 + $0x38] sm:$0xff]  ;;  %v2884_v26 = vld [vmem:[%s3370_s1 + $0x48] sm:$0xf]  ;;  %v109_v41 = vcombine.low %v92_v38, %v2839_v12  ;;  %v95_v45 = vcombine.high %v2879_v25, %v2879_v25 }
   0x7   :  { %v2611_v24 = vpack.c.bf16 %v2869_v22, %v2862_v20  ;;  %v2890_v27 = vld [vmem:[%s3370_s1 + $0x50] sm:$0xff]  ;;  %v2615_v28 = vpack.c.bf16 %v2884_v26, %v2879_v25  ;;  %v2897_v29 = vld [vmem:[%s3370_s1 + $0x58] sm:$0xf]  ;;  %v2904_v31 = vld [vmem:[%s3370_s1 + $0x60] sm:$0xff]  ;;  %v2562_v33 = vpack.c.bf16 %v106_v23, %v105_v18  ;;  %v110_v42 = vcombine.low %v2848_v15, %v93_v40 }
   0x8   :  { %2352 = vmatprep.mubr.msk.f32.mxu0 %vm119_vm0, %v107_v19  ;;  %v2619_v30 = vpack.c.bf16 %v2897_v29, %v2890_v27  ;;  %v2909_v32 = vld [vmem:[%s3370_s1 + $0x68] sm:$0xf]  ;;  %v2914_v34 = vld [vmem:[%s3370_s1 + $0x70] sm:$0xff]  ;;  %v2921_v36 = vld [vmem:[%s3370_s1 + $0x78] sm:$0xf]  ;;  %v94_v43 = vcombine.high %v2862_v20, %v2862_v20  ;;  %v111_v44 = vcombine.low %v2853_v16, %v2862_v20  ;;  %v113_v47 = vcombine.low %v2879_v25, %v95_v45 }
   0x9   :  { %2557 = vmatpush3.bf16.msra.mxu0 %v2554_v5  ;;  %v2623_v35 = vpack.c.bf16 %v2909_v32, %v2904_v31  ;;  %v2627_v37 = vpack.c.bf16 %v2921_v36, %v2914_v34  ;;  %v96_v48 = vcombine.high %v2890_v27, %v2890_v27  ;;  %v114_v49 = vcombine.low %v2884_v26, %v2890_v27  ;;  %vm2973_vm3 = vmpackc.low %vm294_vm2, %vm294_vm2  ;;  %v2178_v2 = vld [vmem:[%s3372_s2] ss:$0 sm:$0xff]  ;;  %v73_v8 = vld [vmem:[%s3373_s3 + $0x30] sm:$0xff] }
   0xa   :  { %2559 = vmatprep.subr.bf16.mxu0 %v2558_v17  ;;  %v112_v46 = vcombine.low %v94_v43, %v2869_v22  ;;  %v97_v50 = vcombine.high %v2904_v31, %v2904_v31  ;;  %v98_v53 = vcombine.high %v2914_v34, %v2914_v34  ;;  %v117_v54 = vcombine.low %v2909_v32, %v2914_v34  ;;  %vm3143_vm15 = vmpackc.low %vm1122_vm13, %vm2745_vm14  ;;  %v67_v11 = vld [vmem:[%s3373_s3] sm:$0xff]  ;;  %v1725_v15 = vld [vmem:[%s3374_s6 + $0x8] sm:$0xff] }
   0xb   :  { %v115_v51 = vcombine.low %v96_v48, %v2897_v29  ;;  %vm966_vm4 = vcmp.gt.f32.partialorder %v2178_v2, 0.0  ;;  %v2183_v2 = vld [vmem:[%s3372_s2 + $0x5] ss:$0 sm:$0xff]  ;;  %v1727_v25 = vld [vmem:[%s3374_s6 + $0x18] sm:$0xff]  ;;  %v1730_v34 = vld [vmem:[%s3374_s6 + $0x30] sm:$0xff] }
   0xc   :  { %v116_v52 = vcombine.low %v2904_v31, %v97_v50  ;;  %v118_v55 = vcombine.low %v98_v53, %v2921_v36  ;;  %v2997_v53 = vld [vmem:[%s3371_s0 + $0x8] sm:$0xff]  ;;  %vm971_vm11 = vcmp.gt.f32.partialorder %v2183_v2, 0.0  ;;  %v1728_v29 = vld [vmem:[%s3374_s6 + $0x20] sm:$0xff]  ;;  %v1731_v36 = vld [vmem:[%s3374_s6 + $0x38] sm:$0xff] }
   0xd   :  { %2561 = vmatpush3.bf16.msra.mxu0 %v2558_v17 }
   0xe   :  { %2563 = vmatprep.subr.bf16.mxu0 %v2562_v33 }
  0x11   :  { %2565 = vmatpush3.bf16.msra.mxu0 %v2562_v33 }
  0x12   :  { %2582 = vmatprep.subr.bf16.mxu0 %v2741_v56 }
  0x14   :  { %2353 = vmatmul.mubr.msk.f32.vlgmr.msra.gmra.mrb[0].mxu0 %vm119_vm0, %v108_v39  ;;  %v2983_v39 = vld [vmem:[%s3371_s0] sm:$0xff] }
  0x15   :  { %2355 = vmatprep.mubr.msk.f32.mxu0 %vm119_vm0, %v109_v41 }
  0x18   :  { %2356 = vmatmul.mubr.msk.f32.gmra.mrb[2].mxu0 %vm119_vm0, %v110_v42 }
  0x19   :  { %2358 = vmatprep.mubr.msk.f32.mxu0 %vm119_vm0, %v111_v44 }
  0x1c   :  { %2359 = vmatmul.mubr.msk.f32.gmra.mrb[4].mxu0 %vm119_vm0, %v112_v46 }
  0x1d   :  { %2361 = vmatprep.mubr.msk.f32.mxu0 %vm119_vm0, %v113_v47 }
  0x20   :  { %2362 = vmatmul.mubr.msk.f32.gmra.mrb[6].mxu0 %vm119_vm0, %v114_v49 }
  0x21   :  { %2364 = vmatprep.mubr.msk.f32.mxu0 %vm119_vm0, %v115_v51 }
  0x24   :  { %2365 = vmatmul.mubr.msk.f32.gmra.mrb[8].mxu0 %vm119_vm0, %v116_v52 }
  0x25   :  { %2367 = vmatprep.mubr.msk.f32.mxu0 %vm119_vm0, %v117_v54 }
  0x28   :  { %2368 = vmatmul.mubr.msk.f32.gmra.mrb[10].mxu0 %vm119_vm0, %v118_v55 }
  0x29   :  { %2402 = vmatprep.mubr.msk.f32.mxu0 %vm2742_vm1, %v2743_v57 }
  0xe7   :  { %v2354_v58 = vpop.f32.mrb[0].mxu0 }
  0xe8   :  { %v210_v59 = vpop.f32.mrb[1].mxu0  ;;  %v282_v61 = vcombine.high %v2354_v58, %v2354_v58 }
  0xe9   :  { %v281_v60 = vcombine.high %v210_v59, %v210_v59 }
  0xeb   :  { %v293_v62 = vcombine.low %v210_v59, %v281_v60  ;;  %v2357_v63 = vpop.f32.mrb[2].mxu0 }
  0xec   :  { %v284_v0 = vcombine.high %v2357_v63, %v2357_v63  ;;  %v220_v1 = vpop.f32.mrb[3].mxu0 }
  0xed   :  { %v2567_v3 = vpack.c.bf16 %v2354_v58, %v293_v62  ;;  %v283_v4 = vcombine.high %v220_v1, %v220_v1  ;;  %v372_v5 = vcombine.low %v282_v61, %v220_v1  ;;  %v3007_v62 = vld [vmem:[%s3371_s0 + $0x20] sm:$0xff]  ;;  %v3031_v1 = vld [vmem:[%s3371_s0 + $0x30] sm:$0xff] }
  0xee   :  { %v450_v6 = vcombine.low %v2357_v63, %v284_v0  ;;  %v3019_v0 = vld [vmem:[%s3371_s0 + $0x10] sm:$0xff] }
  0xef   :  { %v2571_v7 = vpack.c.bf16 %v283_v4, %v372_v5  ;;  %2569 = vmatpush3.bf16.xpose.msk.msra.mxu1 %vm2973_vm3, %v2567_v3  ;;  %v2360_v10 = vpop.f32.mrb[4].mxu0  ;;  %v3041_v3 = vld [vmem:[%s3371_s0 + $0x18] sm:$0xff]  ;;  %v3055_v4 = vld [vmem:[%s3371_s0 + $0x28] sm:$0xff] }
  0xf0   :  { %v230_v17 = vpop.f32.mrb[5].mxu0  ;;  %2570 = vmatprep.subr.bf16.mxu1 %v2741_v56  ;;  %v286_v18 = vcombine.high %v2360_v10, %v2360_v10  ;;  %v3067_v5 = vld [vmem:[%s3371_s0 + $0x38] sm:$0xff] }
  0xf1   :  { %v285_v19 = vcombine.high %v230_v17, %v230_v17  ;;  %v2575_v23 = vpack.c.bf16 %v230_v17, %v450_v6 }
  0xf3   :  { %v528_v33 = vcombine.low %v285_v19, %v2360_v10  ;;  %v2363_v38 = vpop.f32.mrb[6].mxu0  ;;  %v2182_v19 = vld [vmem:[%s3372_s2 + $0x4] ss:$0 sm:$0xff] }
  0xf4   :  { %v240_v40 = vpop.f32.mrb[7].mxu0  ;;  %v288_v42 = vcombine.high %v2363_v38, %v2363_v38  ;;  %vm970_vm7 = vcmp.gt.f32.partialorder %v2182_v19, 0.0  ;;  %v2185_v19 = vld [vmem:[%s3372_s2 + $0x7] ss:$0 sm:$0xff] }
  0xf5   :  { %v2579_v41 = vpack.c.bf16 %v286_v18, %v528_v33  ;;  %v287_v43 = vcombine.high %v240_v40, %v240_v40  ;;  %v2179_v18 = vld [vmem:[%s3372_s2 + $0x1] ss:$0 sm:$0xff]  ;;  %vm973_vm12 = vcmp.gt.f32.partialorder %v2185_v19, 0.0 }
  0xf6   :  { %2375 = vmatmul.mubr.msk.f32.vlgmr.msra.gmra.mrb[0].mxu1 %vm294_vm2, %v2983_v39  ;;  %vm967_vm6 = vcmp.gt.f32.partialorder %v2179_v18, 0.0 }
  0xf7   :  { %v606_v44 = vcombine.low %v240_v40, %v287_v43  ;;  %2573 = vmatpush3.bf16.xpose.msk.msra.mxu1 %vm2973_vm3, %v2571_v7  ;;  %v2366_v45 = vpop.f32.mrb[8].mxu0  ;;  %2381 = vmatprep.mubr.msk.f32.mxu1 %vm2742_vm1, %v2743_v57 }
  0xf8   :  { %v290_v46 = vcombine.high %v2366_v45, %v2366_v45  ;;  %v250_v47 = vpop.f32.mrb[9].mxu0  ;;  %2574 = vmatprep.subr.bf16.mxu1 %v2741_v56 }
  0xf9   :  { %v2583_v48 = vpack.c.bf16 %v2363_v38, %v606_v44  ;;  %v289_v49 = vcombine.high %v250_v47, %v250_v47  ;;  %v684_v50 = vcombine.low %v288_v42, %v250_v47 }
  0xfa   :  { %v762_v51 = vcombine.low %v2366_v45, %v290_v46  ;;  %v2184_v46 = vld [vmem:[%s3372_s2 + $0x6] ss:$0 sm:$0xff] }
  0xfb   :  { %2585 = vmatpush3.bf16.xpose.msk.msra.mxu0 %vm2973_vm3, %v2583_v48  ;;  %v2587_v52 = vpack.c.bf16 %v289_v49, %v684_v50  ;;  %v2369_v54 = vpop.f32.mrb[10].mxu0  ;;  %vm972_vm9 = vcmp.gt.f32.partialorder %v2184_v46, 0.0 }
  0xfc   :  { %v260_v55 = vpop.f32.mrb[11].mxu0  ;;  %2590 = vmatprep.subr.bf16.mxu0 %v2741_v56  ;;  %v292_v58 = vcombine.high %v2369_v54, %v2369_v54 }
  0xfd   :  { %v291_v59 = vcombine.high %v260_v55, %v260_v55  ;;  %v2591_v60 = vpack.c.bf16 %v260_v55, %v762_v51  ;;  %v2181_v51 = vld [vmem:[%s3372_s2 + $0x3] ss:$0 sm:$0xff] }
  0xfe   :  { %2382 = vmatmul.mubr.msk.f32.vlgmr.msra.gmra.mrb[2].mxu1 %vm294_vm2, %v2997_v53  ;;  %vm969_vm10 = vcmp.gt.f32.partialorder %v2181_v51, 0.0 }
  0xff   :  { %2577 = vmatpush3.bf16.xpose.msk.msra.mxu1 %vm2973_vm3, %v2575_v23  ;;  %v840_v61 = vcombine.low %v291_v59, %v2369_v54  ;;  %2388 = vmatprep.mubr.msk.f32.mxu1 %vm2742_vm1, %v2743_v57 }
 0x100   :  { %2578 = vmatprep.subr.bf16.mxu1 %v2741_v56 }
 0x101   :  { %v2595_v63 = vpack.c.bf16 %v292_v58, %v840_v61 }
 0x102   :  { %2403 = vmatmul.mubr.msk.f32.vlgmr.msra.gmra.mrb[12].mxu0 %vm294_vm2, %v3007_v62 }
 0x103   :  { %2593 = vmatpush3.bf16.xpose.msk.msra.mxu0 %vm2973_vm3, %v2591_v60  ;;  %2416 = vmatprep.mubr.msk.f32.mxu0 %vm2742_vm1, %v2743_v57 }
 0x104   :  { %2598 = vmatprep.subr.bf16.mxu0 %v2741_v56 }
 0x106   :  { %2389 = vmatmul.mubr.msk.f32.vlgmr.msra.gmra.mrb[4].mxu1 %vm294_vm2, %v3019_v0 }
 0x107   :  { %2581 = vmatpush3.bf16.xpose.msk.msra.mxu1 %vm2973_vm3, %v2579_v41  ;;  %2395 = vmatprep.mubr.msk.f32.mxu1 %vm2742_vm1, %v2743_v57  ;;  %v2180_v41 = vld [vmem:[%s3372_s2 + $0x2] ss:$0 sm:$0xff] }
 0x108   :  { %2586 = vmatprep.subr.bf16.mxu1 %v2741_v56  ;;  %vm968_vm8 = vcmp.gt.f32.partialorder %v2180_v41, 0.0 }
 0x10a   :  { %2417 = vmatmul.mubr.msk.f32.vlgmr.msra.gmra.mrb[14].mxu0 %vm294_vm2, %v3031_v1 }
 0x10b   :  { %2430 = vmatprep.mubr.msk.f32.mxu0 %vm2742_vm1, %v2743_v57  ;;  %2601 = vmatpush3.bf16.msk.msra.mxu0 %vm3143_vm15, %v2599_v13 }
 0x10c   :  { %2606 = vmatprep.subr.bf16.mxu0 %v2741_v56 }
 0x10e   :  { %2396 = vmatmul.mubr.msk.f32.vlgmr.msra.gmra.mrb[6].mxu1 %vm294_vm2, %v3041_v3 }
 0x10f   :  { %2589 = vmatpush3.bf16.xpose.msk.msra.mxu1 %vm2973_vm3, %v2587_v52  ;;  %2409 = vmatprep.mubr.msk.f32.mxu1 %vm2742_vm1, %v2743_v57 }
 0x110   :  { %2594 = vmatprep.subr.bf16.mxu1 %v2741_v56 }
 0x116   :  { %2410 = vmatmul.mubr.msk.f32.vlgmr.msra.gmra.mrb[8].mxu1 %vm294_vm2, %v3055_v4 }
 0x117   :  { %2597 = vmatpush3.bf16.xpose.msk.msra.mxu1 %vm2973_vm3, %v2595_v63  ;;  %2423 = vmatprep.mubr.msk.f32.mxu1 %vm2742_vm1, %v2743_v57 }
 0x118   :  { %2602 = vmatprep.subr.bf16.mxu1 %v2741_v56 }
 0x11e   :  { %2424 = vmatmul.mubr.msk.f32.vlgmr.msra.gmra.mrb[10].mxu1 %vm294_vm2, %v3067_v5 }
 0x11f   :  { %2437 = vmatprep.mubr.msk.f32.mxu1 %vm2742_vm1, %v2743_v57  ;;  %2605 = vmatpush3.bf16.msk.msra.mxu1 %vm3143_vm15, %v2603_v14 }
 0x120   :  { %2610 = vmatprep.subr.bf16.mxu1 %v2741_v56 }
 0x1c9   :  { %v368_v6 = vpop.f32.mrb[0].mxu1 }
 0x1ca   :  { %v974_v7 = vsel %vm966_vm4, %v368_v6, -1e+30  ;;  %v2376_v10 = vpop.f32.mrb[1].mxu1 }
 0x1cb   :  { %v983_v17 = vsel %vm982_vm5, %v974_v7, -inf }
 0x1cc   :  { %984 = vmax.xlane.f32.xlu0 %v983_v17 }
 0x1d1   :  { %v446_v23 = vpop.f32.mrb[2].mxu1 }
 0x1d2   :  { %v975_v33 = vsel %vm967_vm6, %v446_v23, -1e+30  ;;  %v2383_v38 = vpop.f32.mrb[3].mxu1 }
 0x1d3   :  { %v986_v40 = vsel %vm982_vm5, %v975_v33, -inf }
 0x1d4   :  { %987 = vmax.xlane.f32.xlu0 %v986_v40 }
 0x1d5   :  { %v680_v42 = vpop.f32.mrb[12].mxu0 }
 0x1d6   :  { %v978_v43 = vsel %vm970_vm7, %v680_v42, -1e+30  ;;  %v2404_v44 = vpop.f32.mrb[13].mxu0  ;;  %v2744_v42 = vmov 0  }
 0x1d7   :  { %v995_v45 = vsel %vm982_vm5, %v978_v43, -inf  ;;  %2680 = vset.pattern.permute.xlu1 %v2744_v42  ;;  %2679 = vset.pattern.permute.xlu0 %v2744_v42  ;;  %v69_v42 = vld [vmem:[%s3373_s3 + $0x10] sm:$0xff] }
 0x1d8   :  { %996 = vmax.xlane.f32.xlu0 %v995_v45 }
 0x1d9   :  { %v524_v47 = vpop.f32.mrb[4].mxu1 }
 0x1da   :  { %v976_v48 = vsel %vm968_vm8, %v524_v47, -1e+30  ;;  %v2390_v49 = vpop.f32.mrb[5].mxu1 }
 0x1db   :  { %v989_v50 = vsel %vm982_vm5, %v976_v48, -inf }
 0x1dc   :  { %990 = vmax.xlane.f32.xlu1 %v989_v50 }
 0x1dd   :  { %v836_v52 = vpop.f32.mrb[14].mxu0 }
 0x1de   :  { %v980_v54 = vsel %vm972_vm9, %v836_v52, -1e+30  ;;  %v2418_v55 = vpop.f32.mrb[15].mxu0 }
 0x1df   :  { %v1001_v58 = vsel %vm982_vm5, %v980_v54, -inf }
 0x1e0   :  { %1002 = vmax.xlane.f32.xlu0 %v1001_v58 }
 0x1e1   :  { %v602_v59 = vpop.f32.mrb[6].mxu1 }
 0x1e2   :  { %v3096_v60 = vsel %vm969_vm10, %v602_v59, -1e+30  ;;  %v2397_v61 = vpop.f32.mrb[7].mxu1 }
 0x1e3   :  { %v992_v63 = vsel %vm982_vm5, %v3096_v60, -inf }
 0x1e4   :  { %993 = vmax.xlane.f32.xlu1 %v992_v63 }
 0x1e9   :  { %v758_v6 = vpop.f32.mrb[8].mxu1 }
 0x1ea   :  { %v3103_v10 = vsel %vm971_vm11, %v758_v6, -1e+30  ;;  %v2411_v17 = vpop.f32.mrb[9].mxu1 }
 0x1eb   :  { %v998_v18 = vsel %vm982_vm5, %v3103_v10, -inf }
 0x1ec   :  { %999 = vmax.xlane.f32.xlu1 %v998_v18 }
 0x1f1   :  { %v914_v23 = vpop.f32.mrb[10].mxu1 }
 0x1f2   :  { %v3110_v38 = vsel %vm973_vm12, %v914_v23, -1e+30  ;;  %v2425_v40 = vpop.f32.mrb[11].mxu1 }
 0x1f3   :  { %v1004_v41 = vsel %vm982_vm5, %v3110_v38, -inf }
 0x1f4   :  { %1005 = vmax.xlane.f32.xlu1 %v1004_v41  ;;  %v68_v41 = vld [vmem:[%s3373_s3 + $0x8] sm:$0xff] }
 0x259   :  { %v985_v44 = vpop.xlane.xlu0 %984 }
 0x25a   :  { %v1007_v45 = vsub.f32 %v974_v7, %v985_v44  ;;  %v70_v44 = vld [vmem:[%s3373_s3 + $0x18] sm:$0xff] }
 0x25c   :  { %v1015_v46 = vmul.f32 1.442695, %v1007_v45  ;;  %v1722_v45 = vld [vmem:[%s3375_s5 + $0x10] sm:$0xff] }
 0x25e   :  { %2693 = vpow2.f32 %v1015_v46  ;;  %v71_v46 = vld [vmem:[%s3373_s3 + $0x20] sm:$0xff] }
 0x261   :  { %v988_v47 = vpop.xlane.xlu0 %987 }
 0x262   :  { %v1008_v49 = vsub.f32 %v975_v33, %v988_v47  ;;  %v72_v47 = vld [vmem:[%s3373_s3 + $0x28] sm:$0xff] }
 0x264   :  { %v1017_v50 = vmul.f32 1.442695, %v1008_v49 }
 0x265   :  { %v997_v51 = vpop.xlane.xlu0 %996 }
 0x266   :  { %2695 = vpow2.f32 %v1017_v50  ;;  %v1011_v52 = vsub.f32 %v978_v43, %v997_v51 }
 0x268   :  { %v3114_v55 = vpop.eup %2693  ;;  %v1023_v58 = vmul.f32 1.442695, %v1011_v52 }
 0x269   :  { %v991_v59 = vpop.xlane.xlu1 %990  ;;  %v1031_v61 = vsel %vm982_vm5, %v3114_v55, 0.0 }
 0x26a   :  { %2697 = vpow2.f32 %v1023_v58  ;;  %v1009_v63 = vsub.f32 %v976_v48, %v991_v59  ;;  %1032 = vadd.xlane.f32.xlu0 %v1031_v61 }
 0x26c   :  { %v1019_v2 = vmul.f32 1.442695, %v1009_v63 }
 0x26d   :  { %v1003_v7 = vpop.xlane.xlu0 %1002 }
 0x26e   :  { %2699 = vpow2.f32 %v1019_v2  ;;  %v1013_v6 = vsub.f32 %v980_v54, %v1003_v7  ;;  %v74_v2 = vld [vmem:[%s3373_s3 + $0x38] sm:$0xff] }
 0x270   :  { %v3118_v17 = vpop.eup %2695  ;;  %v1027_v33 = vmul.f32 1.442695, %v1013_v6 }
 0x271   :  { %v1034_v43 = vsel %vm982_vm5, %v3118_v17, 0.0  ;;  %v994_v9 = vpop.xlane.xlu1 %993 }
 0x272   :  { %2701 = vpow2.f32 %v1027_v33  ;;  %1035 = vadd.xlane.f32.xlu1 %v1034_v43  ;;  %v1010_v12 = vsub.f32 %v3096_v60, %v994_v9 }
 0x274   :  { %v3122_v18 = vpop.eup %2697  ;;  %v1021_v14 = vmul.f32 1.442695, %v1010_v12 }
 0x275   :  { %v1043_v19 = vsel %vm982_vm5, %v3122_v18, 0.0 }
 0x276   :  { %1044 = vadd.xlane.f32.xlu0 %v1043_v19  ;;  %2703 = vpow2.f32 %v1021_v14 }
 0x278   :  { %v3126_v48 = vpop.eup %2699 }
 0x279   :  { %v1037_v23 = vsel %vm982_vm5, %v3126_v48, 0.0  ;;  %v1000_v13 = vpop.xlane.xlu1 %999 }
 0x27a   :  { %1038 = vadd.xlane.f32.xlu0 %v1037_v23  ;;  %v1012_v49 = vsub.f32 %v3103_v10, %v1000_v13 }
 0x27c   :  { %v3130_v54 = vpop.eup %2701  ;;  %v1025_v51 = vmul.f32 1.442695, %v1012_v49 }
 0x27d   :  { %v1049_v40 = vsel %vm982_vm5, %v3130_v54, 0.0 }
 0x27e   :  { %1050 = vadd.xlane.f32.xlu0 %v1049_v40  ;;  %2705 = vpow2.f32 %v1025_v51 }
 0x280   :  { %v3174_v59 = vpop.eup %2703 }
 0x281   :  { %v1006_v50 = vpop.xlane.xlu1 %1005  ;;  %v1040_v61 = vsel %vm982_vm5, %v3174_v59, 0.0 }
 0x282   :  { %v1014_v52 = vsub.f32 %v3110_v38, %v1006_v50  ;;  %v1726_v50 = vld [vmem:[%s3374_s6 + $0x10] sm:$0xff] }
 0x283   :  { %1078 = vperm.xlu1 %2680, %v68_v41  }
 0x284   :  { %v1029_v58 = vmul.f32 1.442695, %v1014_v52 }
 0x286   :  { %2707 = vpow2.f32 %v1029_v58 }
 0x287   :  { %1083 = vperm.xlu1 %2680, %v69_v42  }
 0x288   :  { %v3178_v63 = vpop.eup %2705 }
 0x289   :  { %v1046_v60 = vsel %vm982_vm5, %v3178_v63, 0.0 }
 0x28b   :  { %1088 = vperm.xlu1 %2680, %v70_v44  }
 0x28f   :  { %1093 = vperm.xlu1 %2680, %v71_v46  }
 0x290   :  { %v3182_v10 = vpop.eup %2707 }
 0x291   :  { %v1052_v38 = vsel %vm982_vm5, %v3182_v10, 0.0 }
 0x293   :  { %1098 = vperm.xlu1 %2680, %v72_v47  }
 0x294   :  { %1073 = vperm.xlu0 %2679, %v67_v11  }
 0x297   :  { %1103 = vperm.xlu1 %2680, %v73_v8  }
 0x2bb   :  { %1041 = vadd.xlane.f32.xlu1 %v1040_v61 }
 0x2bf   :  { %1047 = vadd.xlane.f32.xlu1 %v1046_v60 }
 0x2c3   :  { %1053 = vadd.xlane.f32.xlu1 %v1052_v38 }
 0x2d4   :  { %1108 = vperm.xlu1 %2680, %v74_v2   ;;  %v1723_v2 = vld [vmem:[%s3375_s5 + $0x18] sm:$0xff] }
 0x2f7   :  { %v1033_v7 = vpop.xlane.xlu0 %1032 }
 0x2ff   :  { %v1036_v6 = vpop.xlane.xlu1 %1035 }
 0x300   :  { %2709 = vrcp.f32 %v1036_v6 }
 0x301   :  { %2711 = vrcp.f32 %v1033_v7  ;;  %v2650_v7 = vpack.c.bf16 %v1723_v2, %v1722_v45 }
 0x303   :  { %v1045_v33 = vpop.xlane.xlu0 %1044  ;;  %v1079_v43 = vpop.permute.xlu1 %1078 }
 0x307   :  { %v1039_v19 = vpop.xlane.xlu0 %1038  ;;  %v1084_v23 = vpop.permute.xlu1 %1083 }
 0x308   :  { %2713 = vrcp.f32 %v1039_v19 }
 0x309   :  { %2715 = vrcp.f32 %v1045_v33 }
 0x30a   :  { %v2710_v40 = vpop.eup %2709 }
 0x30b   :  { %v1064_v41 = vmul.f32 %v2710_v40, %v3118_v17  ;;  %v1089_v42 = vpop.permute.xlu1 %1088  ;;  %v1051_v44 = vpop.xlane.xlu0 %1050 }
 0x30c   :  { %v2712_v47 = vpop.eup %2711  ;;  %2717 = vrcp.f32 %v1051_v44 }
 0x30d   :  { %v1112_v46 = vmul.f32 %v1079_v43, %v1064_v41  ;;  %v1063_v8 = vmul.f32 %v2712_v47, %v3114_v55 }
 0x30f   :  { %2438 = vmatmul.mubr.msk.f32.vlgmr.msra.gmra.mrb[12].mxu1 %vm982_vm5, %v1112_v46  ;;  %v1094_v11 = vpop.permute.xlu1 %1093 }
 0x310   :  { %2613 = vmatpush3.bf16.msk.msra.mxu1 %vm3143_vm15, %v2611_v24  ;;  %2451 = vmatprep.mubr.msk.f32.mxu1 %vm2742_vm1, %v2743_v57 }
 0x311   :  { %2618 = vmatprep.subr.bf16.mxu1 %v2741_v56 }
 0x312   :  { %v2714_v17 = vpop.eup %2713 }
 0x313   :  { %v1074_v9 = vpop.permute.xlu0 %1073  ;;  %v1065_v12 = vmul.f32 %v2714_v17, %v3126_v48  ;;  %v2716_v14 = vpop.eup %2715  ;;  %v1724_v48 = vld [vmem:[%s3374_s6] sm:$0xff] }
 0x314   :  { %v1111_v13 = vmul.f32 %v1074_v9, %v1063_v8  ;;  %v1099_v20 = vpop.permute.xlu1 %1098  ;;  %v1067_v24 = vmul.f32 %v2716_v14, %v3122_v18  ;;  %v2630_v18 = vpack.c.bf16 %v1725_v15, %v1724_v48  ;;  %v1989_v14 = vld [vmem:[%s3376_s8] sm:$0xff] }
 0x315   :  { %v1113_v22 = vmul.f32 %v1084_v23, %v1065_v12 }
 0x316   :  { %2431 = vmatmul.mubr.msk.f32.vlgmr.msra.gmra.mrb[16].mxu0 %vm982_vm5, %v1111_v13  ;;  %v2718_v55 = vpop.eup %2717  ;;  %v1115_v16 = vmul.f32 %v1094_v11, %v1067_v24 }
 0x317   :  { %2609 = vmatpush3.bf16.msk.msra.mxu0 %vm3143_vm15, %v2607_v21  ;;  %2444 = vmatprep.mubr.msk.f32.mxu0 %vm2742_vm1, %v2743_v57  ;;  %v1069_v21 = vmul.f32 %v2718_v55, %v3130_v54 }
 0x318   :  { %2614 = vmatprep.subr.bf16.mxu0 %v2741_v56  ;;  %v1104_v49 = vpop.permute.xlu1 %1103 }
 0x319   :  { %v1117_v26 = vmul.f32 %v1104_v49, %v1069_v21 }
 0x31a   :  { %2445 = vmatmul.mubr.msk.f32.vlgmr.msra.gmra.mrb[18].mxu0 %vm982_vm5, %v1113_v22 }
 0x31b   :  { %2617 = vmatpush3.bf16.msk.msra.mxu0 %vm3143_vm15, %v2615_v28  ;;  %2458 = vmatprep.mubr.msk.f32.mxu0 %vm2742_vm1, %v2743_v57  ;;  %v2634_v28 = vpack.c.bf16 %v1727_v25, %v1726_v50 }
 0x31c   :  { %2622 = vmatprep.subr.bf16.mxu0 %v2741_v56 }
 0x31e   :  { %2459 = vmatmul.mubr.msk.f32.vlgmr.msra.gmra.mrb[20].mxu0 %vm982_vm5, %v1115_v16 }
 0x31f   :  { %2625 = vmatpush3.bf16.msk.msra.mxu0 %vm3143_vm15, %v2623_v35  ;;  %2472 = vmatprep.mubr.msk.f32.mxu0 %vm2742_vm1, %v2743_v57 }
 0x320   :  { %2631 = vmatprep.subr.bf16.mxu0 %v2630_v18 }
 0x322   :  { %2473 = vmatmul.mubr.msk.f32.vlgmr.msra.gmra.mrb[22].mxu0 %vm982_vm5, %v1117_v26 }
 0x323   :  { %2633 = vmatpush3.bf16.msra.mxu0 %v2630_v18 }
 0x324   :  { %2635 = vmatprep.subr.bf16.mxu0 %v2634_v28 }
 0x327   :  { %2637 = vmatpush3.bf16.msra.mxu0 %v2634_v28 }
 0x348   :  { %v1042_v54 = vpop.xlane.xlu1 %1041 }
 0x349   :  { %2719 = vrcp.f32 %v1042_v54 }
 0x34c   :  { %v1048_v51 = vpop.xlane.xlu1 %1047 }
 0x34d   :  { %2721 = vrcp.f32 %v1048_v51  ;;  %v2218_v51 = vld [vmem:[%s3377_s7] ss:$0 sm:$0xff] }
 0x350   :  { %v1054_v52 = vpop.xlane.xlu1 %1053 }
 0x351   :  { %2723 = vrcp.f32 %v1054_v52 }
 0x353   :  { %v2720_v31 = vpop.eup %2719 }
 0x354   :  { %v1066_v32 = vmul.f32 %v2720_v31, %v3174_v59 }
 0x356   :  { %v1114_v35 = vmul.f32 %v1089_v42, %v1066_v32 }
 0x357   :  { %v2722_v58 = vpop.eup %2721 }
 0x358   :  { %v1068_v61 = vmul.f32 %v2722_v58, %v3178_v63  ;;  %2452 = vmatmul.mubr.msk.f32.vlgmr.msra.gmra.mrb[14].mxu1 %vm982_vm5, %v1114_v35  ;;  %v1109_v63 = vpop.permute.xlu1 %1108 }
 0x359   :  { %2621 = vmatpush3.bf16.msk.msra.mxu1 %vm3143_vm15, %v2619_v30  ;;  %2465 = vmatprep.mubr.msk.f32.mxu1 %vm2742_vm1, %v2743_v57  ;;  %v1729_v30 = vld [vmem:[%s3374_s6 + $0x28] sm:$0xff] }
 0x35a   :  { %2626 = vmatprep.subr.bf16.mxu1 %v2741_v56  ;;  %v1116_v60 = vmul.f32 %v1099_v20, %v1068_v61  ;;  %v2638_v56 = vpack.c.bf16 %v1729_v30, %v1728_v29  ;;  %v1990_v20 = vld [vmem:[%s3376_s8 + $0x8] sm:$0xff] }
 0x35b   :  { %v2724_v38 = vpop.eup %2723  ;;  %v2654_v22 = vpack.c.bf16 %v1990_v20, %v1989_v14 }
 0x35c   :  { %v1070_v59 = vmul.f32 %v2724_v38, %v3182_v10  ;;  %2466 = vmatmul.mubr.msk.f32.vlgmr.msra.gmra.mrb[16].mxu1 %vm982_vm5, %v1116_v60  ;;  %2639 = vmatprep.subr.bf16.mxu0 %v2638_v56 }
 0x35d   :  { %2629 = vmatpush3.bf16.msk.msra.mxu1 %vm3143_vm15, %v2627_v37  ;;  %2479 = vmatprep.mubr.msk.f32.mxu1 %vm2742_vm1, %v2743_v57  ;;  %v2642_v37 = vpack.c.bf16 %v1731_v36, %v1730_v34  ;;  %v1720_v57 = vld [vmem:[%s3375_s5] sm:$0xff] }
 0x35e   :  { %v1118_v27 = vmul.f32 %v1109_v63, %v1070_v59  ;;  %2641 = vmatpush3.bf16.msra.mxu0 %v2638_v56 }
 0x35f   :  { %2643 = vmatprep.subr.bf16.mxu0 %v2642_v37 }
 0x360   :  { %2480 = vmatmul.mubr.msk.f32.vlgmr.msra.gmra.mrb[18].mxu1 %vm982_vm5, %v1118_v27 }
 0x361   :  { %2521 = vmatprep.mubr.msk.f32.mxu1 %vm294_vm2, %v3019_v0  ;;  %v1721_v0 = vld [vmem:[%s3375_s5 + $0x8] sm:$0xff] }
 0x362   :  { %2645 = vmatpush3.bf16.msra.mxu0 %v2642_v37  ;;  %v2646_v10 = vpack.c.bf16 %v1721_v0, %v1720_v57  ;;  %v2219_v0 = vld [vmem:[%s3378_s9] ss:$0 sm:$0xff] }
 0x364   :  { %2662 = vmatprep.subr.bf16.mxu1 %v2646_v10  ;;  %2647 = vmatprep.subr.bf16.mxu0 %v2646_v10 }
 0x365   :  { %2664 = vmatpush3.bf16.msra.mxu1 %v2646_v10 }
 0x366   :  { %2663 = vmatprep.subr.bf16.mxu1 %v2650_v7 }
 0x369   :  { %2665 = vmatpush3.bf16.msra.mxu1 %v2650_v7 }
 0x36a   :  { %2655 = vmatprep.subr.bf16.mxu1 %v2654_v22 }
 0x36c   :  { %2522 = vmatmul.mubr.msk.f32.vlgmr.msra.gmra.mrb[20].mxu1 %vm294_vm2, %v3041_v3 }
 0x36d   :  { %2524 = vmatprep.mubr.msk.f32.mxu1 %vm294_vm2, %v3007_v62  ;;  %2657 = vmatpush3.bf16.msra.mxu1 %v2654_v22 }
 0x370   :  { %2525 = vmatmul.mubr.msk.f32.gmra.mrb[22].mxu1 %vm294_vm2, %v3055_v4 }
 0x371   :  { %2527 = vmatprep.mubr.msk.f32.mxu1 %vm294_vm2, %v3031_v1 }
 0x374   :  { %2528 = vmatmul.mubr.msk.f32.gmra.mrb[24].mxu1 %vm294_vm2, %v3067_v5 }
 0x3e2   :  { %v1266_v6 = vpop.f32.mrb[12].mxu1 }
 0x3e3   :  { %v2439_v33 = vpop.f32.mrb[13].mxu1 }
 0x3e9   :  { %v1191_v43 = vpop.f32.mrb[16].mxu0 }
 0x3ea   :  { %v2432_v19 = vpop.f32.mrb[17].mxu0  ;;  %2498 = vmatprep.mubr.msk.f32.mxu0 %vm119_vm0, %v1191_v43 }
 0x3eb   :  { %2499 = vmatmul.mubr.msk.f32.vlgmr.msra.gmra.mrb[24].mxu0 %vm119_vm0, %v1266_v6 }
 0x3ec   :  { %2649 = vmatpush3.bf16.msra.mxu0 %v2646_v10 }
 0x3ed   :  { %v1341_v3 = vpop.f32.mrb[18].mxu0  ;;  %2651 = vmatprep.subr.bf16.mxu0 %v2650_v7 }
 0x3ee   :  { %v2446_v62 = vpop.f32.mrb[19].mxu0  ;;  %2501 = vmatprep.mubr.msk.f32.mxu0 %vm119_vm0, %v1341_v3 }
 0x3f0   :  { %2653 = vmatpush3.bf16.msra.mxu0 %v2650_v7 }
 0x3f1   :  { %v1491_v4 = vpop.f32.mrb[20].mxu0 }
 0x3f2   :  { %v2460_v1 = vpop.f32.mrb[21].mxu0 }
 0x3f5   :  { %v1641_v23 = vpop.f32.mrb[22].mxu0 }
 0x3f6   :  { %v2474_v40 = vpop.f32.mrb[23].mxu0 }
 0x42b   :  { %v1416_v5 = vpop.f32.mrb[14].mxu1 }
 0x42c   :  { %v2453_v41 = vpop.f32.mrb[15].mxu1  ;;  %2502 = vmatmul.mubr.msk.f32.gmra.mrb[26].mxu0 %vm119_vm0, %v1416_v5 }
 0x42d   :  { %2504 = vmatprep.mubr.msk.f32.mxu0 %vm119_vm0, %v1491_v4 }
 0x42f   :  { %v1566_v42 = vpop.f32.mrb[16].mxu1 }
 0x430   :  { %v2467_v44 = vpop.f32.mrb[17].mxu1  ;;  %2505 = vmatmul.mubr.msk.f32.gmra.mrb[28].mxu0 %vm119_vm0, %v1566_v42 }
 0x431   :  { %2507 = vmatprep.mubr.msk.f32.mxu0 %vm119_vm0, %v1641_v23 }
 0x433   :  { %v1716_v46 = vpop.f32.mrb[18].mxu1 }
 0x434   :  { %v2481_v47 = vpop.f32.mrb[19].mxu1  ;;  %2508 = vmatmul.mubr.msk.f32.gmra.mrb[30].mxu0 %vm119_vm0, %v1716_v46  ;;  %vm2129_vm0 = vcmask 326656  }
 0x435   :  { %2518 = vmatprep.mubr.msk.f32.mxu0 %vm294_vm2, %v2983_v39  ;;  %v1991_v39 = vld [vmem:[%s3376_s8 + $0x10] sm:$0xff] }
 0x438   :  { %2519 = vmatmul.mubr.msk.f32.vlgmr.msra.gmra.mrb[24].mxu0 %vm294_vm2, %v2997_v53  ;;  %v1992_v53 = vld [vmem:[%s3376_s8 + $0x18] sm:$0xff] }
 0x439   :  { %v2658_v24 = vpack.c.bf16 %v1992_v53, %v1991_v39 }
 0x43b   :  { %2659 = vmatprep.subr.bf16.mxu1 %v2658_v24 }
 0x43c   :  { %2661 = vmatpush3.bf16.msra.mxu1 %v2658_v24 }
 0x43f   :  { %v2523_v11 = vpop.f32.mrb[20].mxu1 }
 0x440   :  { %v1937_v17 = vpop.f32.mrb[21].mxu1 }
 0x443   :  { %v2526_v8 = vpop.f32.mrb[22].mxu1 }
 0x444   :  { %v1947_v9 = vpop.f32.mrb[23].mxu1 }
 0x447   :  { %v2529_v12 = vpop.f32.mrb[24].mxu1 }
 0x448   :  { %v1957_v13 = vpop.f32.mrb[25].mxu1 }
 0x4ff   :  { %v2503_v55 = vpop.f32.mrb[26].mxu0 }
 0x500   :  { %v1943_v48 = vadd.f32 %v2523_v11, %v2503_v55  ;;  %v1832_v15 = vpop.f32.mrb[27].mxu0 }
 0x501   :  { %v1938_v16 = vadd.f32 %v1937_v17, %v1832_v15 }
 0x502   :  { %v1976_v61 = vadd.f32 %v2218_v51, %v1943_v48 }
 0x503   :  { %v2506_v21 = vpop.f32.mrb[28].mxu0  ;;  %v1975_v35 = vadd.f32 %v2218_v51, %v1938_v16 }
 0x504   :  { %v1953_v18 = vadd.f32 %v2526_v8, %v2506_v21  ;;  %v1842_v49 = vpop.f32.mrb[29].mxu0 }
 0x505   :  { %v1948_v50 = vadd.f32 %v1947_v9, %v1842_v49 }
 0x506   :  { %v1978_v38 = vadd.f32 %v2218_v51, %v1953_v18 }
 0x507   :  { %v2509_v25 = vpop.f32.mrb[30].mxu0  ;;  %v1977_v60 = vadd.f32 %v2218_v51, %v1948_v50 }
 0x508   :  { %v1963_v26 = vadd.f32 %v2529_v12, %v2509_v25  ;;  %v1852_v28 = vpop.f32.mrb[31].mxu0 }
 0x509   :  { %v1958_v54 = vadd.f32 %v1957_v13, %v1852_v28 }
 0x50a   :  { %v1980_v63 = vadd.f32 %v2218_v51, %v1963_v26 }
 0x50b   :  { %v2520_v52 = vpop.f32.mrb[24].mxu0  ;;  %v1979_v59 = vadd.f32 %v2218_v51, %v1958_v54 }
 0x50c   :  { %v1974_v31 = vadd.f32 %v2520_v52, %v2218_v51  ;;  %v1927_v32 = vpop.f32.mrb[25].mxu0 }
 0x50d   :  { %v1973_v58 = vadd.f32 %v2218_v51, %v1927_v32 }
 0x50f   :  { %2725 = vtanh.f32 %v1973_v58 }
 0x510   :  { %2727 = vtanh.f32 %v1974_v31 }
 0x511   :  { %2729 = vtanh.f32 %v1975_v35 }
 0x512   :  { %2731 = vtanh.f32 %v1976_v61 }
 0x513   :  { %2733 = vtanh.f32 %v1977_v60 }
 0x514   :  { %2735 = vtanh.f32 %v1978_v38 }
 0x515   :  { %2737 = vtanh.f32 %v1979_v59 }
 0x516   :  { %2739 = vtanh.f32 %v1980_v63 }
 0x519   :  { %v2726_v27 = vpop.eup %2725 }
 0x51a   :  { %v2728_v29 = vpop.eup %2727  ;;  %2538 = vmatprep.mubr.msk.f32.mxu1 %vm294_vm2, %v2726_v27 }
 0x51b   :  { %v2730_v30 = vpop.eup %2729  ;;  %2539 = vmatmul.mubr.msk.f32.vlgmr.msra.gmra.mrb[26].mxu1 %vm294_vm2, %v2728_v29 }
 0x51c   :  { %2541 = vmatprep.mubr.msk.f32.mxu1 %vm294_vm2, %v2730_v30  ;;  %v2732_v56 = vpop.eup %2731 }
 0x51d   :  { %v2734_v34 = vpop.eup %2733 }
 0x51e   :  { %v2736_v36 = vpop.eup %2735 }
 0x51f   :  { %2542 = vmatmul.mubr.msk.f32.gmra.mrb[28].mxu1 %vm294_vm2, %v2732_v56  ;;  %v2738_v37 = vpop.eup %2737 }
 0x520   :  { %2544 = vmatprep.mubr.msk.f32.mxu1 %vm294_vm2, %v2734_v34  ;;  %v2740_v57 = vpop.eup %2739 }
 0x523   :  { %2545 = vmatmul.mubr.msk.f32.gmra.mrb[30].mxu1 %vm294_vm2, %v2736_v36 }
 0x524   :  { %2547 = vmatprep.mubr.msk.f32.mxu1 %vm294_vm2, %v2738_v37 }
 0x527   :  { %2548 = vmatmul.mubr.msk.f32.gmra.mrb[32].mxu1 %vm294_vm2, %v2740_v57 }
 0x5ee   :  { %v2540_v45 = vpop.f32.mrb[26].mxu1 }
 0x5ef   :  { %v2096_v10 = vadd.f32 %v2540_v45, %v2219_v0  ;;  %v2090_v2 = vpop.f32.mrb[27].mxu1 }
 0x5f0   :  { %v2091_v7 = vadd.f32 %v2219_v0, %v2090_v2 }
 0x5f1   :  { %2131 = vst.msk [vmem:[%s3379_s10 + $0x8] sm:$0xff] %vm2129_vm0, %v2096_v10 }
 0x5f2   :  { %2130 = vst.msk [vmem:[%s3379_s10] sm:$0xff] %vm2129_vm0, %v2091_v7  ;;  %v2543_v6 = vpop.f32.mrb[28].mxu1 }
 0x5f3   :  { %v2106_v33 = vadd.f32 %v2543_v6, %v2219_v0  ;;  %v2100_v43 = vpop.f32.mrb[29].mxu1 }
 0x5f4   :  { %v2101_v19 = vadd.f32 %v2219_v0, %v2100_v43 }
 0x5f5   :  { %2133 = vst.msk [vmem:[%s3379_s10 + $0x18] sm:$0xff] %vm2129_vm0, %v2106_v33 }
 0x5f6   :  { %2132 = vst.msk [vmem:[%s3379_s10 + $0x10] sm:$0xff] %vm2129_vm0, %v2101_v19  ;;  %v2546_v3 = vpop.f32.mrb[30].mxu1 }
 0x5f7   :  { %v2116_v62 = vadd.f32 %v2546_v3, %v2219_v0  ;;  %v2110_v4 = vpop.f32.mrb[31].mxu1 }
 0x5f8   :  { %v2111_v1 = vadd.f32 %v2219_v0, %v2110_v4 }
 0x5f9   :  { %2135 = vst.msk [vmem:[%s3379_s10 + $0x28] sm:$0xff] %vm2129_vm0, %v2116_v62 }
 0x5fa   :  { %2134 = vst.msk [vmem:[%s3379_s10 + $0x20] sm:$0xff] %vm2129_vm0, %v2111_v1  ;;  %v2549_v23 = vpop.f32.mrb[32].mxu1 }
 0x5fb   :  { %v2126_v40 = vadd.f32 %v2549_v23, %v2219_v0  ;;  %v2120_v5 = vpop.f32.mrb[33].mxu1 }
 0x5fc   :  { %v2121_v41 = vadd.f32 %v2219_v0, %v2120_v5 }
 0x5fd   :  { %2137 = vst.msk [vmem:[%s3379_s10 + $0x38] sm:$0xff] %vm2129_vm0, %v2126_v40 }
 0x5fe   :  { %2136 = vst.msk [vmem:[%s3379_s10 + $0x30] sm:$0xff] %vm2129_vm0, %v2121_v41 }

</bundles_post_ra>
